<compile_context>
chip_gen: v7x
topology: tpu7x:2x2x1
jax: 0.10.0
libtpu: 0.0.40
codegen_flags: <defaults>
</compile_context>

<pallas_src>
import functools

import jax
import jax.numpy as jnp
from jax.experimental import pallas as pl
from jax.experimental.pallas import tpu as pltpu


# ------------------------------ small helpers -------------------------------

def _round_up(x, m):
    return ((x + m - 1) // m) * m


def _pick_tk(K):
    """Largest K-tile <= 1024 that is a multiple of 128 and divides K."""
    if K <= 1024:
        return K
    for tk in range(1024, 127, -128):
        if K % tk == 0:
            return tk
    return K  # fallback: no K blocking


# ----------------------------- Pallas kernels ------------------------------

def _mm_bn_kernel(x_ref, w_ref, s_ref, b_ref, o_ref, acc_ref, *, relu):
    @pl.when(pl.program_id(2) == 0)
    def _():
        acc_ref[...] = jnp.zeros_like(acc_ref)

    acc_ref[...] += jnp.dot(x_ref[...], w_ref[...],
                            preferred_element_type=jnp.float32)

    @pl.when(pl.program_id(2) == pl.num_programs(2) - 1)
    def _():
        y = acc_ref[...] * s_ref[...] + b_ref[...]
        if relu:
            y = jnp.maximum(y, 0.0)
        o_ref[...] = y.astype(o_ref.dtype)


def _mm_bn_res_kernel(x_ref, w_ref, s_ref, b_ref, r_ref, o_ref, acc_ref):
    @pl.when(pl.program_id(2) == 0)
    def _():
        acc_ref[...] = jnp.zeros_like(acc_ref)

    acc_ref[...] += jnp.dot(x_ref[...], w_ref[...],
                            preferred_element_type=jnp.float32)

    @pl.when(pl.program_id(2) == pl.num_programs(2) - 1)
    def _():
        y = (acc_ref[...] * s_ref[...] + b_ref[...]
             + r_ref[...].astype(jnp.float32))
        o_ref[...] = jnp.maximum(y, 0.0).astype(o_ref.dtype)


def fused_conv_matmul(x2d, w2d, scale, bias, *, relu=True, residual=None,
                      out_dtype=jnp.bfloat16):
    """(M, K) @ (K, Cout) with fused folded-BN, optional residual add + ReLU.

    Tiled grid: (M/TM, Cout/TN, K/TK); K is an accumulated reduction axis.
    """
    M, K = x2d.shape
    Cout = w2d.shape[1]
    assert Cout % 128 == 0, Cout
    assert K % 128 == 0, K

    tn = 256 if Cout % 256 == 0 else 128
    tk = _pick_tk(K)
    nk = K // tk

    tm = min(512, _round_up(M, 8))
    Mp = _round_up(M, tm)

    x2d = x2d.astype(jnp.bfloat16)
    w2d = w2d.astype(jnp.bfloat16)
    if Mp != M:
        x2d = jnp.pad(x2d, ((0, Mp - M), (0, 0)))
    s2 = scale.reshape(1, Cout).astype(jnp.float32)
    b2 = bias.reshape(1, Cout).astype(jnp.float32)

    in_specs = [
        pl.BlockSpec((tm, tk), lambda i, j, k: (i, k)),
        pl.BlockSpec((tk, tn), lambda i, j, k: (k, j)),
        pl.BlockSpec((1, tn), lambda i, j, k: (0, j)),
        pl.BlockSpec((1, tn), lambda i, j, k: (0, j)),
    ]
    args = [x2d, w2d, s2, b2]
    if residual is not None:
        r = residual.astype(jnp.bfloat16)
        if Mp != M:
            r = jnp.pad(r, ((0, Mp - M), (0, 0)))
        in_specs.append(pl.BlockSpec((tm, tn), lambda i, j, k: (i, j)))
        args.append(r)
        kernel = _mm_bn_res_kernel
    else:
        kernel = functools.partial(_mm_bn_kernel, relu=relu)

    out = pl.pallas_call(
        kernel,
        out_shape=jax.ShapeDtypeStruct((Mp, Cout), out_dtype),
        grid=(Mp // tm, Cout // tn, nk),
        in_specs=in_specs,
        out_specs=pl.BlockSpec((tm, tn), lambda i, j, k: (i, j)),
        scratch_shapes=[pltpu.VMEM((tm, tn), jnp.float32)],
        compiler_params=pltpu.CompilerParams(
            dimension_semantics=("parallel", "parallel", "arbitrary"),
            vmem_limit_bytes=64 * 1024 * 1024),
    )(*args)

    if Mp != M:
        out = out[:M]
    return out


# ------------------------------ plain-JAX glue ------------------------------

def im2col_3x3(x, stride):
    """x: (N, H, W, C) NHWC, pad=1, kernel 3x3 -> ((N*Ho*Wo, 9*C), (N,Ho,Wo))."""
    N, H, W, C = x.shape
    Ho = (H + 2 - 3) // stride + 1
    Wo = (W + 2 - 3) // stride + 1
    xp = jnp.pad(x, ((0, 0), (1, 1), (1, 1), (0, 0)))
    cols = []
    for i in range(3):
        for j in range(3):
            cols.append(
                xp[:, i:i + (Ho - 1) * stride + 1:stride,
                      j:j + (Wo - 1) * stride + 1:stride, :])
    patches = jnp.concatenate(cols, axis=-1)  # (N, Ho, Wo, 9*C), (kh,kw,Cin) order
    return patches.reshape(N * Ho * Wo, 9 * C), (N, Ho, Wo)


# ------------------------- deterministic parameters -------------------------

def _he_conv(key, kh, kw, cin, cout):
    fan_in = kh * kw * cin
    w = jax.random.normal(key, (kh, kw, cin, cout), jnp.float32)
    w = (w * jnp.sqrt(2.0 / fan_in)).reshape(kh * kw * cin, cout)
    return w.astype(jnp.bfloat16)  # stored bf16: MXU inputs, half the HBM bytes


def _bn_fold(key, c, eps=1e-5):
    k1, k2, k3, k4 = jax.random.split(key, 4)
    gamma = 1.0 + 0.1 * jax.random.normal(k1, (c,), jnp.float32)
    beta = 0.1 * jax.random.normal(k2, (c,), jnp.float32)
    mean = 0.1 * jax.random.normal(k3, (c,), jnp.float32)
    var = 1.0 + 0.1 * jnp.abs(jax.random.normal(k4, (c,), jnp.float32))
    scale = gamma * jax.lax.rsqrt(var + eps)
    bias = beta - mean * scale
    return scale, bias


def make_bottleneck_params(key, cin, width, downsample):
    ks = jax.random.split(key, 8)
    cout = 4 * width
    p = {
        "w1": _he_conv(ks[0], 1, 1, cin, width),
        "w2": _he_conv(ks[1], 3, 3, width, width),
        "w3": _he_conv(ks[2], 1, 1, width, cout),
    }
    p["s1"], p["b1"] = _bn_fold(ks[3], width)
    p["s2"], p["b2"] = _bn_fold(ks[4], width)
    p["s3"], p["b3"] = _bn_fold(ks[5], cout)
    if downsample:
        p["wd"] = _he_conv(ks[6], 1, 1, cin, cout)
        p["sd"], p["bd"] = _bn_fold(ks[7], cout)
    return p


def make_params(key):
    """ResNet50 layer2 (4 bottlenecks, width 128) + layer3 (6, width 256)."""
    keys = jax.random.split(key, 10)
    layer2 = [make_bottleneck_params(keys[0], 256, 128, True)]
    layer2 += [make_bottleneck_params(keys[i], 512, 128, False) for i in range(1, 4)]
    layer3 = [make_bottleneck_params(keys[4], 512, 256, True)]
    layer3 += [make_bottleneck_params(keys[i], 1024, 256, False) for i in range(5, 10)]
    return {"layer2": layer2, "layer3": layer3}


# --------------------------------- forward ----------------------------------

def bottleneck_forward(x, p, stride):
    """x: (N, H, W, Cin) NHWC bf16 -> (N, Ho, Wo, 4*width) bf16."""
    N, H, W, C = x.shape

    # conv1 1x1 + bn1 + relu
    out = fused_conv_matmul(x.reshape(N * H * W, C), p["w1"], p["s1"], p["b1"])
    width = p["w1"].shape[1]
    out = out.reshape(N, H, W, width)

    # conv2 3x3 (stride) + bn2 + relu
    patches, (N, Ho, Wo) = im2col_3x3(out, stride)
    out = fused_conv_matmul(patches, p["w2"], p["s2"], p["b2"])  # (N*Ho*Wo, width)

    # identity branch
    if "wd" in p:
        xs = x[:, ::stride, ::stride, :].reshape(N * Ho * Wo, C)
        identity = fused_conv_matmul(xs, p["wd"], p["sd"], p["bd"], relu=False)
    else:
        identity = x.reshape(N * H * W, C)

    # conv3 1x1 + bn3 + residual add + relu (all fused in one kernel)
    out = fused_conv_matmul(out, p["w3"], p["s3"], p["b3"], residual=identity)
    return out.reshape(N, Ho, Wo, -1)


def resnet50_part2(x_nchw, params):
    """Input (N, 256, H, W) NCHW -> output (N, 1024, H//4, W//4) NCHW f32."""
    x = jnp.transpose(x_nchw, (0, 2, 3, 1)).astype(jnp.bfloat16)  # NCHW -> NHWC
    for i, p in enumerate(params["layer2"]):
        x = bottleneck_forward(x, p, stride=2 if i == 0 else 1)
    for i, p in enumerate(params["layer3"]):
        x = bottleneck_forward(x, p, stride=2 if i == 0 else 1)
    return jnp.transpose(x, (0, 3, 1, 2)).astype(jnp.float32)  # NHWC -> NCHW


# ----------------------------------- main ------------------------------------

if __name__ == "__main__":
    key = jax.random.PRNGKey(0)
    kx, kp = jax.random.split(key)

    # Small shapes consistent with the module: layer2 requires 256 input
    # channels (architectural); batch=2 and spatial=8 keep it small.
    x = jax.random.normal(kx, (2, 256, 8, 8), jnp.float32)  # NCHW, like PyTorch
    params = make_params(kp)

    fwd = jax.jit(lambda inp: resnet50_part2(inp, params))
    out = fwd(x)
    jax.block_until_ready(out)

    assert out.shape == (2, 1024, 2, 2), out.shape
    assert out.dtype == jnp.float32
    print("KERNEL_OK")
</pallas_src>

<mosaic_0001>
module attributes {stable_mosaic.version = 11 : i64} {
  func.func @_mm_bn_kernel(%arg0: i32, %arg1: i32, %arg2: i32, %arg3: memref<128x256xbf16, #tpu.memory_space<vmem>>, %arg4: memref<256x128xbf16, #tpu.memory_space<vmem>>, %arg5: memref<1x128xf32, #tpu.memory_space<vmem>>, %arg6: memref<1x128xf32, #tpu.memory_space<vmem>>, %arg7: memref<128x128xbf16, #tpu.memory_space<vmem>>, %arg8: memref<128x128xf32, #tpu.memory_space<vmem>>) attributes {dimension_semantics = [#tpu.dimension_semantics<parallel>, #tpu.dimension_semantics<parallel>, #tpu.dimension_semantics<arbitrary>], iteration_bounds = array<i64: 1, 1, 1>, scalar_prefetch = 0 : i64, scratch_operands = 1 : i64, tpu.core_type = #tpu.core_type<tc>, window_params = [{transform_indices = @transform_0, window_bounds = array<i64: 128, 256>}, {transform_indices = @transform_1, window_bounds = array<i64: 256, 128>}, {transform_indices = @transform_2, window_bounds = array<i64: 1, 128>}, {transform_indices = @transform_3, window_bounds = array<i64: 1, 128>}, {transform_indices = @transform_4, window_bounds = array<i64: 128, 128>}]} {
    %c0_i32 = arith.constant 0 : i32
    %0 = arith.cmpi eq, %arg2, %c0_i32 : i32
    %1 = arith.extui %0 : i1 to i32
    %c0_i32_0 = arith.constant 0 : i32
    %2 = arith.cmpi ne, %1, %c0_i32_0 : i32
    scf.if %2 {
      %cst_10 = arith.constant 0.000000e+00 : f32
      %12 = vector.broadcast %cst_10 : f32 to vector<128x128xf32>
      %c0_11 = arith.constant 0 : index
      %c0_12 = arith.constant 0 : index
      %13 = vector.load %arg8[%c0_11, %c0_12] : memref<128x128xf32, #tpu.memory_space<vmem>>, vector<128x128xf32>
      tpu.vector_store %arg8[%c0_11, %c0_12], %12 {strides = array<i32>} : memref<128x128xf32, #tpu.memory_space<vmem>>, vector<128x128xf32>,
    } else {
    }
    %c0 = arith.constant 0 : index
    %c0_1 = arith.constant 0 : index
    %3 = vector.load %arg8[%c0, %c0_1] : memref<128x128xf32, #tpu.memory_space<vmem>>, vector<128x128xf32>
    %c0_2 = arith.constant 0 : index
    %c0_3 = arith.constant 0 : index
    %4 = vector.load %arg3[%c0_2, %c0_3] : memref<128x256xbf16, #tpu.memory_space<vmem>>, vector<128x256xbf16>
    %c0_4 = arith.constant 0 : index
    %c0_5 = arith.constant 0 : index
    %5 = vector.load %arg4[%c0_4, %c0_5] : memref<256x128xbf16, #tpu.memory_space<vmem>>, vector<256x128xbf16>
    %cst = arith.constant dense<0.000000e+00> : vector<128x128xf32>
    %6 = tpu.matmul %4, %5, %cst {dimension_numbers = #tpu.dot_dimension_numbers<[1], [0], [0], [1], [0, 0, 1, 1], [], []>} : vector<128x256xbf16>, vector<256x128xbf16>, vector<128x128xf32> -> vector<128x128xf32>
    %7 = arith.addf %3, %6 : vector<128x128xf32>
    %c0_6 = arith.constant 0 : index
    %c0_7 = arith.constant 0 : index
    %8 = vector.load %arg8[%c0_6, %c0_7] : memref<128x128xf32, #tpu.memory_space<vmem>>, vector<128x128xf32>
    tpu.vector_store %arg8[%c0_6, %c0_7], %7 {strides = array<i32>} : memref<128x128xf32, #tpu.memory_space<vmem>>, vector<128x128xf32>,
    %c0_i32_8 = arith.constant 0 : i32
    %9 = arith.cmpi eq, %arg2, %c0_i32_8 : i32
    %10 = arith.extui %9 : i1 to i32
    %c0_i32_9 = arith.constant 0 : i32
    %11 = arith.cmpi ne, %10, %c0_i32_9 : i32
    scf.if %11 {
      %c0_10 = arith.constant 0 : index
      %c0_11 = arith.constant 0 : index
      %12 = vector.load %arg8[%c0_10, %c0_11] : memref<128x128xf32, #tpu.memory_space<vmem>>, vector<128x128xf32>
      %c0_12 = arith.constant 0 : index
      %c0_13 = arith.constant 0 : index
      %13 = vector.load %arg5[%c0_12, %c0_13] : memref<1x128xf32, #tpu.memory_space<vmem>>, vector<1x128xf32>
      %14 = vector.broadcast %13 : vector<1x128xf32> to vector<128x128xf32>
      %15 = arith.mulf %12, %14 : vector<128x128xf32>
      %c0_14 = arith.constant 0 : index
      %c0_15 = arith.constant 0 : index
      %16 = vector.load %arg6[%c0_14, %c0_15] : memref<1x128xf32, #tpu.memory_space<vmem>>, vector<1x128xf32>
      %17 = vector.broadcast %16 : vector<1x128xf32> to vector<128x128xf32>
      %18 = arith.addf %15, %17 : vector<128x128xf32>
      %cst_16 = arith.constant 0.000000e+00 : f32
      %19 = vector.broadcast %cst_16 : f32 to vector<128x128xf32>
      %20 = arith.maximumf %18, %19 : vector<128x128xf32>
      %21 = arith.truncf %20 : vector<128x128xf32> to vector<128x128xbf16>
      %c0_17 = arith.constant 0 : index
      %c0_18 = arith.constant 0 : index
      %22 = vector.load %arg7[%c0_17, %c0_18] : memref<128x128xbf16, #tpu.memory_space<vmem>>, vector<128x128xbf16>
      tpu.vector_store %arg7[%c0_17, %c0_18], %21 {strides = array<i32>} : memref<128x128xbf16, #tpu.memory_space<vmem>>, vector<128x128xbf16>,
    } else {
    }
    return
  }
  func.func @transform_0(%arg0: i32, %arg1: i32, %arg2: i32) -> (i32, i32) {
    %c0_i32 = arith.constant 0 : i32
    return %arg0, %arg2 : i32, i32
  }
  func.func @transform_1(%arg0: i32, %arg1: i32, %arg2: i32) -> (i32, i32) {
    %c0_i32 = arith.constant 0 : i32
    return %arg2, %arg1 : i32, i32
  }
  func.func @transform_2(%arg0: i32, %arg1: i32, %arg2: i32) -> (i32, i32) {
    %c0_i32 = arith.constant 0 : i32
    %c0_i32_0 = arith.constant 0 : i32
    return %c0_i32, %arg1 : i32, i32
  }
  func.func @transform_3(%arg0: i32, %arg1: i32, %arg2: i32) -> (i32, i32) {
    %c0_i32 = arith.constant 0 : i32
    %c0_i32_0 = arith.constant 0 : i32
    return %c0_i32, %arg1 : i32, i32
  }
  func.func @transform_4(%arg0: i32, %arg1: i32, %arg2: i32) -> (i32, i32) {
    %c0_i32 = arith.constant 0 : i32
    return %arg0, %arg1 : i32, i32
  }
}

module attributes {stable_mosaic.version = 11 : i64} {
  func.func @_mm_bn_kernel(%arg0: i32, %arg1: i32, %arg2: i32, %arg3: memref<32x384xbf16, #tpu.memory_space<vmem>>, %arg4: memref<384x128xbf16, #tpu.memory_space<vmem>>, %arg5: memref<1x128xf32, #tpu.memory_space<vmem>>, %arg6: memref<1x128xf32, #tpu.memory_space<vmem>>, %arg7: memref<32x128xbf16, #tpu.memory_space<vmem>>, %arg8: memref<32x128xf32, #tpu.memory_space<vmem>>) attributes {dimension_semantics = [#tpu.dimension_semantics<parallel>, #tpu.dimension_semantics<parallel>, #tpu.dimension_semantics<arbitrary>], iteration_bounds = array<i64: 1, 1, 3>, scalar_prefetch = 0 : i64, scratch_operands = 1 : i64, tpu.core_type = #tpu.core_type<tc>, window_params = [{transform_indices = @transform_0, window_bounds = array<i64: 32, 384>}, {transform_indices = @transform_1, window_bounds = array<i64: 384, 128>}, {transform_indices = @transform_2, window_bounds = array<i64: 1, 128>}, {transform_indices = @transform_3, window_bounds = array<i64: 1, 128>}, {transform_indices = @transform_4, window_bounds = array<i64: 32, 128>}]} {
    %c0_i32 = arith.constant 0 : i32
    %0 = arith.cmpi eq, %arg2, %c0_i32 : i32
    %1 = arith.extui %0 : i1 to i32
    %c0_i32_0 = arith.constant 0 : i32
    %2 = arith.cmpi ne, %1, %c0_i32_0 : i32
    scf.if %2 {
      %cst_9 = arith.constant 0.000000e+00 : f32
      %12 = vector.broadcast %cst_9 : f32 to vector<32x128xf32>
      %c0_10 = arith.constant 0 : index
      %c0_11 = arith.constant 0 : index
      %13 = vector.load %arg8[%c0_10, %c0_11] : memref<32x128xf32, #tpu.memory_space<vmem>>, vector<32x128xf32>
      tpu.vector_store %arg8[%c0_10, %c0_11], %12 {strides = array<i32>} : memref<32x128xf32, #tpu.memory_space<vmem>>, vector<32x128xf32>,
    } else {
    }
    %c0 = arith.constant 0 : index
    %c0_1 = arith.constant 0 : index
    %3 = vector.load %arg8[%c0, %c0_1] : memref<32x128xf32, #tpu.memory_space<vmem>>, vector<32x128xf32>
    %c0_2 = arith.constant 0 : index
    %c0_3 = arith.constant 0 : index
    %4 = vector.load %arg3[%c0_2, %c0_3] : memref<32x384xbf16, #tpu.memory_space<vmem>>, vector<32x384xbf16>
    %c0_4 = arith.constant 0 : index
    %c0_5 = arith.constant 0 : index
    %5 = vector.load %arg4[%c0_4, %c0_5] : memref<384x128xbf16, #tpu.memory_space<vmem>>, vector<384x128xbf16>
    %cst = arith.constant dense<0.000000e+00> : vector<32x128xf32>
    %6 = tpu.matmul %4, %5, %cst {dimension_numbers = #tpu.dot_dimension_numbers<[1], [0], [0], [1], [0, 0, 1, 1], [], []>} : vector<32x384xbf16>, vector<384x128xbf16>, vector<32x128xf32> -> vector<32x128xf32>
    %7 = arith.addf %3, %6 : vector<32x128xf32>
    %c0_6 = arith.constant 0 : index
    %c0_7 = arith.constant 0 : index
    %8 = vector.load %arg8[%c0_6, %c0_7] : memref<32x128xf32, #tpu.memory_space<vmem>>, vector<32x128xf32>
    tpu.vector_store %arg8[%c0_6, %c0_7], %7 {strides = array<i32>} : memref<32x128xf32, #tpu.memory_space<vmem>>, vector<32x128xf32>,
    %c2_i32 = arith.constant 2 : i32
    %9 = arith.cmpi eq, %arg2, %c2_i32 : i32
    %10 = arith.extui %9 : i1 to i32
    %c0_i32_8 = arith.constant 0 : i32
    %11 = arith.cmpi ne, %10, %c0_i32_8 : i32
    scf.if %11 {
      %c0_9 = arith.constant 0 : index
      %c0_10 = arith.constant 0 : index
      %12 = vector.load %arg8[%c0_9, %c0_10] : memref<32x128xf32, #tpu.memory_space<vmem>>, vector<32x128xf32>
      %c0_11 = arith.constant 0 : index
      %c0_12 = arith.constant 0 : index
      %13 = vector.load %arg5[%c0_11, %c0_12] : memref<1x128xf32, #tpu.memory_space<vmem>>, vector<1x128xf32>
      %14 = vector.broadcast %13 : vector<1x128xf32> to vector<32x128xf32>
      %15 = arith.mulf %12, %14 : vector<32x128xf32>
      %c0_13 = arith.constant 0 : index
      %c0_14 = arith.constant 0 : index
      %16 = vector.load %arg6[%c0_13, %c0_14] : memref<1x128xf32, #tpu.memory_space<vmem>>, vector<1x128xf32>
      %17 = vector.broadcast %16 : vector<1x128xf32> to vector<32x128xf32>
      %18 = arith.addf %15, %17 : vector<32x128xf32>
      %cst_15 = arith.constant 0.000000e+00 : f32
      %19 = vector.broadcast %cst_15 : f32 to vector<32x128xf32>
      %20 = arith.maximumf %18, %19 : vector<32x128xf32>
      %21 = arith.truncf %20 : vector<32x128xf32> to vector<32x128xbf16>
      %c0_16 = arith.constant 0 : index
      %c0_17 = arith.constant 0 : index
      %22 = vector.load %arg7[%c0_16, %c0_17] : memref<32x128xbf16, #tpu.memory_space<vmem>>, vector<32x128xbf16>
      tpu.vector_store %arg7[%c0_16, %c0_17], %21 {strides = array<i32>} : memref<32x128xbf16, #tpu.memory_space<vmem>>, vector<32x128xbf16>,
    } else {
    }
    return
  }
  func.func @transform_0(%arg0: i32, %arg1: i32, %arg2: i32) -> (i32, i32) {
    %c0_i32 = arith.constant 0 : i32
    return %arg0, %arg2 : i32, i32
  }
  func.func @transform_1(%arg0: i32, %arg1: i32, %arg2: i32) -> (i32, i32) {
    %c0_i32 = arith.constant 0 : i32
    return %arg2, %arg1 : i32, i32
  }
  func.func @transform_2(%arg0: i32, %arg1: i32, %arg2: i32) -> (i32, i32) {
    %c0_i32 = arith.constant 0 : i32
    %c0_i32_0 = arith.constant 0 : i32
    return %c0_i32, %arg1 : i32, i32
  }
  func.func @transform_3(%arg0: i32, %arg1: i32, %arg2: i32) -> (i32, i32) {
    %c0_i32 = arith.constant 0 : i32
    %c0_i32_0 = arith.constant 0 : i32
    return %c0_i32, %arg1 : i32, i32
  }
  func.func @transform_4(%arg0: i32, %arg1: i32, %arg2: i32) -> (i32, i32) {
    %c0_i32 = arith.constant 0 : i32
    return %arg0, %arg1 : i32, i32
  }
}

module attributes {stable_mosaic.version = 11 : i64} {
  func.func @_mm_bn_kernel(%arg0: i32, %arg1: i32, %arg2: i32, %arg3: memref<32x256xbf16, #tpu.memory_space<vmem>>, %arg4: memref<256x256xbf16, #tpu.memory_space<vmem>>, %arg5: memref<1x256xf32, #tpu.memory_space<vmem>>, %arg6: memref<1x256xf32, #tpu.memory_space<vmem>>, %arg7: memref<32x256xbf16, #tpu.memory_space<vmem>>, %arg8: memref<32x256xf32, #tpu.memory_space<vmem>>) attributes {dimension_semantics = [#tpu.dimension_semantics<parallel>, #tpu.dimension_semantics<parallel>, #tpu.dimension_semantics<arbitrary>], iteration_bounds = array<i64: 1, 2, 1>, scalar_prefetch = 0 : i64, scratch_operands = 1 : i64, tpu.core_type = #tpu.core_type<tc>, window_params = [{transform_indices = @transform_0, window_bounds = array<i64: 32, 256>}, {transform_indices = @transform_1, window_bounds = array<i64: 256, 256>}, {transform_indices = @transform_2, window_bounds = array<i64: 1, 256>}, {transform_indices = @transform_3, window_bounds = array<i64: 1, 256>}, {transform_indices = @transform_4, window_bounds = array<i64: 32, 256>}]} {
    %c0_i32 = arith.constant 0 : i32
    %0 = arith.cmpi eq, %arg2, %c0_i32 : i32
    %1 = arith.extui %0 : i1 to i32
    %c0_i32_0 = arith.constant 0 : i32
    %2 = arith.cmpi ne, %1, %c0_i32_0 : i32
    scf.if %2 {
      %cst_10 = arith.constant 0.000000e+00 : f32
      %12 = vector.broadcast %cst_10 : f32 to vector<32x256xf32>
      %c0_11 = arith.constant 0 : index
      %c0_12 = arith.constant 0 : index
      %13 = vector.load %arg8[%c0_11, %c0_12] : memref<32x256xf32, #tpu.memory_space<vmem>>, vector<32x256xf32>
      tpu.vector_store %arg8[%c0_11, %c0_12], %12 {strides = array<i32>} : memref<32x256xf32, #tpu.memory_space<vmem>>, vector<32x256xf32>,
    } else {
    }
    %c0 = arith.constant 0 : index
    %c0_1 = arith.constant 0 : index
    %3 = vector.load %arg8[%c0, %c0_1] : memref<32x256xf32, #tpu.memory_space<vmem>>, vector<32x256xf32>
    %c0_2 = arith.constant 0 : index
    %c0_3 = arith.constant 0 : index
    %4 = vector.load %arg3[%c0_2, %c0_3] : memref<32x256xbf16, #tpu.memory_space<vmem>>, vector<32x256xbf16>
    %c0_4 = arith.constant 0 : index
    %c0_5 = arith.constant 0 : index
    %5 = vector.load %arg4[%c0_4, %c0_5] : memref<256x256xbf16, #tpu.memory_space<vmem>>, vector<256x256xbf16>
    %cst = arith.constant dense<0.000000e+00> : vector<32x256xf32>
    %6 = tpu.matmul %4, %5, %cst {dimension_numbers = #tpu.dot_dimension_numbers<[1], [0], [0], [1], [0, 0, 1, 1], [], []>} : vector<32x256xbf16>, vector<256x256xbf16>, vector<32x256xf32> -> vector<32x256xf32>
    %7 = arith.addf %3, %6 : vector<32x256xf32>
    %c0_6 = arith.constant 0 : index
    %c0_7 = arith.constant 0 : index
    %8 = vector.load %arg8[%c0_6, %c0_7] : memref<32x256xf32, #tpu.memory_space<vmem>>, vector<32x256xf32>
    tpu.vector_store %arg8[%c0_6, %c0_7], %7 {strides = array<i32>} : memref<32x256xf32, #tpu.memory_space<vmem>>, vector<32x256xf32>,
    %c0_i32_8 = arith.constant 0 : i32
    %9 = arith.cmpi eq, %arg2, %c0_i32_8 : i32
    %10 = arith.extui %9 : i1 to i32
    %c0_i32_9 = arith.constant 0 : i32
    %11 = arith.cmpi ne, %10, %c0_i32_9 : i32
    scf.if %11 {
      %c0_10 = arith.constant 0 : index
      %c0_11 = arith.constant 0 : index
      %12 = vector.load %arg8[%c0_10, %c0_11] : memref<32x256xf32, #tpu.memory_space<vmem>>, vector<32x256xf32>
      %c0_12 = arith.constant 0 : index
      %c0_13 = arith.constant 0 : index
      %13 = vector.load %arg5[%c0_12, %c0_13] : memref<1x256xf32, #tpu.memory_space<vmem>>, vector<1x256xf32>
      %14 = vector.broadcast %13 : vector<1x256xf32> to vector<32x256xf32>
      %15 = arith.mulf %12, %14 : vector<32x256xf32>
      %c0_14 = arith.constant 0 : index
      %c0_15 = arith.constant 0 : index
      %16 = vector.load %arg6[%c0_14, %c0_15] : memref<1x256xf32, #tpu.memory_space<vmem>>, vector<1x256xf32>
      %17 = vector.broadcast %16 : vector<1x256xf32> to vector<32x256xf32>
      %18 = arith.addf %15, %17 : vector<32x256xf32>
      %19 = arith.truncf %18 : vector<32x256xf32> to vector<32x256xbf16>
      %c0_16 = arith.constant 0 : index
      %c0_17 = arith.constant 0 : index
      %20 = vector.load %arg7[%c0_16, %c0_17] : memref<32x256xbf16, #tpu.memory_space<vmem>>, vector<32x256xbf16>
      tpu.vector_store %arg7[%c0_16, %c0_17], %19 {strides = array<i32>} : memref<32x256xbf16, #tpu.memory_space<vmem>>, vector<32x256xbf16>,
    } else {
    }
    return
  }
  func.func @transform_0(%arg0: i32, %arg1: i32, %arg2: i32) -> (i32, i32) {
    %c0_i32 = arith.constant 0 : i32
    return %arg0, %arg2 : i32, i32
  }
  func.func @transform_1(%arg0: i32, %arg1: i32, %arg2: i32) -> (i32, i32) {
    %c0_i32 = arith.constant 0 : i32
    return %arg2, %arg1 : i32, i32
  }
  func.func @transform_2(%arg0: i32, %arg1: i32, %arg2: i32) -> (i32, i32) {
    %c0_i32 = arith.constant 0 : i32
    %c0_i32_0 = arith.constant 0 : i32
    return %c0_i32, %arg1 : i32, i32
  }
  func.func @transform_3(%arg0: i32, %arg1: i32, %arg2: i32) -> (i32, i32) {
    %c0_i32 = arith.constant 0 : i32
    %c0_i32_0 = arith.constant 0 : i32
    return %c0_i32, %arg1 : i32, i32
  }
  func.func @transform_4(%arg0: i32, %arg1: i32, %arg2: i32) -> (i32, i32) {
    %c0_i32 = arith.constant 0 : i32
    return %arg0, %arg1 : i32, i32
  }
}

module attributes {stable_mosaic.version = 11 : i64} {
  func.func @_mm_bn_res_kernel(%arg0: i32, %arg1: i32, %arg2: i32, %arg3: memref<32x128xbf16, #tpu.memory_space<vmem>>, %arg4: memref<128x256xbf16, #tpu.memory_space<vmem>>, %arg5: memref<1x256xf32, #tpu.memory_space<vmem>>, %arg6: memref<1x256xf32, #tpu.memory_space<vmem>>, %arg7: memref<32x256xbf16, #tpu.memory_space<vmem>>, %arg8: memref<32x256xbf16, #tpu.memory_space<vmem>>, %arg9: memref<32x256xf32, #tpu.memory_space<vmem>>) attributes {dimension_semantics = [#tpu.dimension_semantics<parallel>, #tpu.dimension_semantics<parallel>, #tpu.dimension_semantics<arbitrary>], iteration_bounds = array<i64: 1, 2, 1>, scalar_prefetch = 0 : i64, scratch_operands = 1 : i64, tpu.core_type = #tpu.core_type<tc>, window_params = [{transform_indices = @transform_0, window_bounds = array<i64: 32, 128>}, {transform_indices = @transform_1, window_bounds = array<i64: 128, 256>}, {transform_indices = @transform_2, window_bounds = array<i64: 1, 256>}, {transform_indices = @transform_3, window_bounds = array<i64: 1, 256>}, {transform_indices = @transform_4, window_bounds = array<i64: 32, 256>}, {transform_indices = @transform_5, window_bounds = array<i64: 32, 256>}]} {
    %c0_i32 = arith.constant 0 : i32
    %0 = arith.cmpi eq, %arg2, %c0_i32 : i32
    %1 = arith.extui %0 : i1 to i32
    %c0_i32_0 = arith.constant 0 : i32
    %2 = arith.cmpi ne, %1, %c0_i32_0 : i32
    scf.if %2 {
      %cst_10 = arith.constant 0.000000e+00 : f32
      %12 = vector.broadcast %cst_10 : f32 to vector<32x256xf32>
      %c0_11 = arith.constant 0 : index
      %c0_12 = arith.constant 0 : index
      %13 = vector.load %arg9[%c0_11, %c0_12] : memref<32x256xf32, #tpu.memory_space<vmem>>, vector<32x256xf32>
      tpu.vector_store %arg9[%c0_11, %c0_12], %12 {strides = array<i32>} : memref<32x256xf32, #tpu.memory_space<vmem>>, vector<32x256xf32>,
    } else {
    }
    %c0 = arith.constant 0 : index
    %c0_1 = arith.constant 0 : index
    %3 = vector.load %arg9[%c0, %c0_1] : memref<32x256xf32, #tpu.memory_space<vmem>>, vector<32x256xf32>
    %c0_2 = arith.constant 0 : index
    %c0_3 = arith.constant 0 : index
    %4 = vector.load %arg3[%c0_2, %c0_3] : memref<32x128xbf16, #tpu.memory_space<vmem>>, vector<32x128xbf16>
    %c0_4 = arith.constant 0 : index
    %c0_5 = arith.constant 0 : index
    %5 = vector.load %arg4[%c0_4, %c0_5] : memref<128x256xbf16, #tpu.memory_space<vmem>>, vector<128x256xbf16>
    %cst = arith.constant dense<0.000000e+00> : vector<32x256xf32>
    %6 = tpu.matmul %4, %5, %cst {dimension_numbers = #tpu.dot_dimension_numbers<[1], [0], [0], [1], [0, 0, 1, 1], [], []>} : vector<32x128xbf16>, vector<128x256xbf16>, vector<32x256xf32> -> vector<32x256xf32>
    %7 = arith.addf %3, %6 : vector<32x256xf32>
    %c0_6 = arith.constant 0 : index
    %c0_7 = arith.constant 0 : index
    %8 = vector.load %arg9[%c0_6, %c0_7] : memref<32x256xf32, #tpu.memory_space<vmem>>, vector<32x256xf32>
    tpu.vector_store %arg9[%c0_6, %c0_7], %7 {strides = array<i32>} : memref<32x256xf32, #tpu.memory_space<vmem>>, vector<32x256xf32>,
    %c0_i32_8 = arith.constant 0 : i32
    %9 = arith.cmpi eq, %arg2, %c0_i32_8 : i32
    %10 = arith.extui %9 : i1 to i32
    %c0_i32_9 = arith.constant 0 : i32
    %11 = arith.cmpi ne, %10, %c0_i32_9 : i32
    scf.if %11 {
      %c0_10 = arith.constant 0 : index
      %c0_11 = arith.constant 0 : index
      %12 = vector.load %arg9[%c0_10, %c0_11] : memref<32x256xf32, #tpu.memory_space<vmem>>, vector<32x256xf32>
      %c0_12 = arith.constant 0 : index
      %c0_13 = arith.constant 0 : index
      %13 = vector.load %arg5[%c0_12, %c0_13] : memref<1x256xf32, #tpu.memory_space<vmem>>, vector<1x256xf32>
      %14 = vector.broadcast %13 : vector<1x256xf32> to vector<32x256xf32>
      %15 = arith.mulf %12, %14 : vector<32x256xf32>
      %c0_14 = arith.constant 0 : index
      %c0_15 = arith.constant 0 : index
      %16 = vector.load %arg6[%c0_14, %c0_15] : memref<1x256xf32, #tpu.memory_space<vmem>>, vector<1x256xf32>
      %17 = vector.broadcast %16 : vector<1x256xf32> to vector<32x256xf32>
      %18 = arith.addf %15, %17 : vector<32x256xf32>
      %c0_16 = arith.constant 0 : index
      %c0_17 = arith.constant 0 : index
      %19 = vector.load %arg7[%c0_16, %c0_17] : memref<32x256xbf16, #tpu.memory_space<vmem>>, vector<32x256xbf16>
      %20 = arith.extf %19 : vector<32x256xbf16> to vector<32x256xf32>
      %21 = arith.addf %18, %20 : vector<32x256xf32>
      %cst_18 = arith.constant 0.000000e+00 : f32
      %22 = vector.broadcast %cst_18 : f32 to vector<32x256xf32>
      %23 = arith.maximumf %21, %22 : vector<32x256xf32>
      %24 = arith.truncf %23 : vector<32x256xf32> to vector<32x256xbf16>
      %c0_19 = arith.constant 0 : index
      %c0_20 = arith.constant 0 : index
      %25 = vector.load %arg8[%c0_19, %c0_20] : memref<32x256xbf16, #tpu.memory_space<vmem>>, vector<32x256xbf16>
      tpu.vector_store %arg8[%c0_19, %c0_20], %24 {strides = array<i32>} : memref<32x256xbf16, #tpu.memory_space<vmem>>, vector<32x256xbf16>,
    } else {
    }
    return
  }
  func.func @transform_0(%arg0: i32, %arg1: i32, %arg2: i32) -> (i32, i32) {
    %c0_i32 = arith.constant 0 : i32
    return %arg0, %arg2 : i32, i32
  }
  func.func @transform_1(%arg0: i32, %arg1: i32, %arg2: i32) -> (i32, i32) {
    %c0_i32 = arith.constant 0 : i32
    return %arg2, %arg1 : i32, i32
  }
  func.func @transform_2(%arg0: i32, %arg1: i32, %arg2: i32) -> (i32, i32) {
    %c0_i32 = arith.constant 0 : i32
    %c0_i32_0 = arith.constant 0 : i32
    return %c0_i32, %arg1 : i32, i32
  }
  func.func @transform_3(%arg0: i32, %arg1: i32, %arg2: i32) -> (i32, i32) {
    %c0_i32 = arith.constant 0 : i32
    %c0_i32_0 = arith.constant 0 : i32
    return %c0_i32, %arg1 : i32, i32
  }
  func.func @transform_4(%arg0: i32, %arg1: i32, %arg2: i32) -> (i32, i32) {
    %c0_i32 = arith.constant 0 : i32
    return %arg0, %arg1 : i32, i32
  }
  func.func @transform_5(%arg0: i32, %arg1: i32, %arg2: i32) -> (i32, i32) {
    %c0_i32 = arith.constant 0 : i32
    return %arg0, %arg1 : i32, i32
  }
}

module attributes {stable_mosaic.version = 11 : i64} {
  func.func @_mm_bn_kernel(%arg0: i32, %arg1: i32, %arg2: i32, %arg3: memref<32x512xbf16, #tpu.memory_space<vmem>>, %arg4: memref<512x128xbf16, #tpu.memory_space<vmem>>, %arg5: memref<1x128xf32, #tpu.memory_space<vmem>>, %arg6: memref<1x128xf32, #tpu.memory_space<vmem>>, %arg7: memref<32x128xbf16, #tpu.memory_space<vmem>>, %arg8: memref<32x128xf32, #tpu.memory_space<vmem>>) attributes {dimension_semantics = [#tpu.dimension_semantics<parallel>, #tpu.dimension_semantics<parallel>, #tpu.dimension_semantics<arbitrary>], iteration_bounds = array<i64: 1, 1, 1>, scalar_prefetch = 0 : i64, scratch_operands = 1 : i64, tpu.core_type = #tpu.core_type<tc>, window_params = [{transform_indices = @transform_0, window_bounds = array<i64: 32, 512>}, {transform_indices = @transform_1, window_bounds = array<i64: 512, 128>}, {transform_indices = @transform_2, window_bounds = array<i64: 1, 128>}, {transform_indices = @transform_3, window_bounds = array<i64: 1, 128>}, {transform_indices = @transform_4, window_bounds = array<i64: 32, 128>}]} {
    %c0_i32 = arith.constant 0 : i32
    %0 = arith.cmpi eq, %arg2, %c0_i32 : i32
    %1 = arith.extui %0 : i1 to i32
    %c0_i32_0 = arith.constant 0 : i32
    %2 = arith.cmpi ne, %1, %c0_i32_0 : i32
    scf.if %2 {
      %cst_10 = arith.constant 0.000000e+00 : f32
      %12 = vector.broadcast %cst_10 : f32 to vector<32x128xf32>
      %c0_11 = arith.constant 0 : index
      %c0_12 = arith.constant 0 : index
      %13 = vector.load %arg8[%c0_11, %c0_12] : memref<32x128xf32, #tpu.memory_space<vmem>>, vector<32x128xf32>
      tpu.vector_store %arg8[%c0_11, %c0_12], %12 {strides = array<i32>} : memref<32x128xf32, #tpu.memory_space<vmem>>, vector<32x128xf32>,
    } else {
    }
    %c0 = arith.constant 0 : index
    %c0_1 = arith.constant 0 : index
    %3 = vector.load %arg8[%c0, %c0_1] : memref<32x128xf32, #tpu.memory_space<vmem>>, vector<32x128xf32>
    %c0_2 = arith.constant 0 : index
    %c0_3 = arith.constant 0 : index
    %4 = vector.load %arg3[%c0_2, %c0_3] : memref<32x512xbf16, #tpu.memory_space<vmem>>, vector<32x512xbf16>
    %c0_4 = arith.constant 0 : index
    %c0_5 = arith.constant 0 : index
    %5 = vector.load %arg4[%c0_4, %c0_5] : memref<512x128xbf16, #tpu.memory_space<vmem>>, vector<512x128xbf16>
    %cst = arith.constant dense<0.000000e+00> : vector<32x128xf32>
    %6 = tpu.matmul %4, %5, %cst {dimension_numbers = #tpu.dot_dimension_numbers<[1], [0], [0], [1], [0, 0, 1, 1], [], []>} : vector<32x512xbf16>, vector<512x128xbf16>, vector<32x128xf32> -> vector<32x128xf32>
    %7 = arith.addf %3, %6 : vector<32x128xf32>
    %c0_6 = arith.constant 0 : index
    %c0_7 = arith.constant 0 : index
    %8 = vector.load %arg8[%c0_6, %c0_7] : memref<32x128xf32, #tpu.memory_space<vmem>>, vector<32x128xf32>
    tpu.vector_store %arg8[%c0_6, %c0_7], %7 {strides = array<i32>} : memref<32x128xf32, #tpu.memory_space<vmem>>, vector<32x128xf32>,
    %c0_i32_8 = arith.constant 0 : i32
    %9 = arith.cmpi eq, %arg2, %c0_i32_8 : i32
    %10 = arith.extui %9 : i1 to i32
    %c0_i32_9 = arith.constant 0 : i32
    %11 = arith.cmpi ne, %10, %c0_i32_9 : i32
    scf.if %11 {
      %c0_10 = arith.constant 0 : index
      %c0_11 = arith.constant 0 : index
      %12 = vector.load %arg8[%c0_10, %c0_11] : memref<32x128xf32, #tpu.memory_space<vmem>>, vector<32x128xf32>
      %c0_12 = arith.constant 0 : index
      %c0_13 = arith.constant 0 : index
      %13 = vector.load %arg5[%c0_12, %c0_13] : memref<1x128xf32, #tpu.memory_space<vmem>>, vector<1x128xf32>
      %14 = vector.broadcast %13 : vector<1x128xf32> to vector<32x128xf32>
      %15 = arith.mulf %12, %14 : vector<32x128xf32>
      %c0_14 = arith.constant 0 : index
      %c0_15 = arith.constant 0 : index
      %16 = vector.load %arg6[%c0_14, %c0_15] : memref<1x128xf32, #tpu.memory_space<vmem>>, vector<1x128xf32>
      %17 = vector.broadcast %16 : vector<1x128xf32> to vector<32x128xf32>
      %18 = arith.addf %15, %17 : vector<32x128xf32>
      %cst_16 = arith.constant 0.000000e+00 : f32
      %19 = vector.broadcast %cst_16 : f32 to vector<32x128xf32>
      %20 = arith.maximumf %18, %19 : vector<32x128xf32>
      %21 = arith.truncf %20 : vector<32x128xf32> to vector<32x128xbf16>
      %c0_17 = arith.constant 0 : index
      %c0_18 = arith.constant 0 : index
      %22 = vector.load %arg7[%c0_17, %c0_18] : memref<32x128xbf16, #tpu.memory_space<vmem>>, vector<32x128xbf16>
      tpu.vector_store %arg7[%c0_17, %c0_18], %21 {strides = array<i32>} : memref<32x128xbf16, #tpu.memory_space<vmem>>, vector<32x128xbf16>,
    } else {
    }
    return
  }
  func.func @transform_0(%arg0: i32, %arg1: i32, %arg2: i32) -> (i32, i32) {
    %c0_i32 = arith.constant 0 : i32
    return %arg0, %arg2 : i32, i32
  }
  func.func @transform_1(%arg0: i32, %arg1: i32, %arg2: i32) -> (i32, i32) {
    %c0_i32 = arith.constant 0 : i32
    return %arg2, %arg1 : i32, i32
  }
  func.func @transform_2(%arg0: i32, %arg1: i32, %arg2: i32) -> (i32, i32) {
    %c0_i32 = arith.constant 0 : i32
    %c0_i32_0 = arith.constant 0 : i32
    return %c0_i32, %arg1 : i32, i32
  }
  func.func @transform_3(%arg0: i32, %arg1: i32, %arg2: i32) -> (i32, i32) {
    %c0_i32 = arith.constant 0 : i32
    %c0_i32_0 = arith.constant 0 : i32
    return %c0_i32, %arg1 : i32, i32
  }
  func.func @transform_4(%arg0: i32, %arg1: i32, %arg2: i32) -> (i32, i32) {
    %c0_i32 = arith.constant 0 : i32
    return %arg0, %arg1 : i32, i32
  }
}

module attributes {stable_mosaic.version = 11 : i64} {
  func.func @_mm_bn_kernel(%arg0: i32, %arg1: i32, %arg2: i32, %arg3: memref<32x512xbf16, #tpu.memory_space<vmem>>, %arg4: memref<512x256xbf16, #tpu.memory_space<vmem>>, %arg5: memref<1x256xf32, #tpu.memory_space<vmem>>, %arg6: memref<1x256xf32, #tpu.memory_space<vmem>>, %arg7: memref<32x256xbf16, #tpu.memory_space<vmem>>, %arg8: memref<32x256xf32, #tpu.memory_space<vmem>>) attributes {dimension_semantics = [#tpu.dimension_semantics<parallel>, #tpu.dimension_semantics<parallel>, #tpu.dimension_semantics<arbitrary>], iteration_bounds = array<i64: 1, 1, 1>, scalar_prefetch = 0 : i64, scratch_operands = 1 : i64, tpu.core_type = #tpu.core_type<tc>, window_params = [{transform_indices = @transform_0, window_bounds = array<i64: 32, 512>}, {transform_indices = @transform_1, window_bounds = array<i64: 512, 256>}, {transform_indices = @transform_2, window_bounds = array<i64: 1, 256>}, {transform_indices = @transform_3, window_bounds = array<i64: 1, 256>}, {transform_indices = @transform_4, window_bounds = array<i64: 32, 256>}]} {
    %c0_i32 = arith.constant 0 : i32
    %0 = arith.cmpi eq, %arg2, %c0_i32 : i32
    %1 = arith.extui %0 : i1 to i32
    %c0_i32_0 = arith.constant 0 : i32
    %2 = arith.cmpi ne, %1, %c0_i32_0 : i32
    scf.if %2 {
      %cst_10 = arith.constant 0.000000e+00 : f32
      %12 = vector.broadcast %cst_10 : f32 to vector<32x256xf32>
      %c0_11 = arith.constant 0 : index
      %c0_12 = arith.constant 0 : index
      %13 = vector.load %arg8[%c0_11, %c0_12] : memref<32x256xf32, #tpu.memory_space<vmem>>, vector<32x256xf32>
      tpu.vector_store %arg8[%c0_11, %c0_12], %12 {strides = array<i32>} : memref<32x256xf32, #tpu.memory_space<vmem>>, vector<32x256xf32>,
    } else {
    }
    %c0 = arith.constant 0 : index
    %c0_1 = arith.constant 0 : index
    %3 = vector.load %arg8[%c0, %c0_1] : memref<32x256xf32, #tpu.memory_space<vmem>>, vector<32x256xf32>
    %c0_2 = arith.constant 0 : index
    %c0_3 = arith.constant 0 : index
    %4 = vector.load %arg3[%c0_2, %c0_3] : memref<32x512xbf16, #tpu.memory_space<vmem>>, vector<32x512xbf16>
    %c0_4 = arith.constant 0 : index
    %c0_5 = arith.constant 0 : index
    %5 = vector.load %arg4[%c0_4, %c0_5] : memref<512x256xbf16, #tpu.memory_space<vmem>>, vector<512x256xbf16>
    %cst = arith.constant dense<0.000000e+00> : vector<32x256xf32>
    %6 = tpu.matmul %4, %5, %cst {dimension_numbers = #tpu.dot_dimension_numbers<[1], [0], [0], [1], [0, 0, 1, 1], [], []>} : vector<32x512xbf16>, vector<512x256xbf16>, vector<32x256xf32> -> vector<32x256xf32>
    %7 = arith.addf %3, %6 : vector<32x256xf32>
    %c0_6 = arith.constant 0 : index
    %c0_7 = arith.constant 0 : index
    %8 = vector.load %arg8[%c0_6, %c0_7] : memref<32x256xf32, #tpu.memory_space<vmem>>, vector<32x256xf32>
    tpu.vector_store %arg8[%c0_6, %c0_7], %7 {strides = array<i32>} : memref<32x256xf32, #tpu.memory_space<vmem>>, vector<32x256xf32>,
    %c0_i32_8 = arith.constant 0 : i32
    %9 = arith.cmpi eq, %arg2, %c0_i32_8 : i32
    %10 = arith.extui %9 : i1 to i32
    %c0_i32_9 = arith.constant 0 : i32
    %11 = arith.cmpi ne, %10, %c0_i32_9 : i32
    scf.if %11 {
      %c0_10 = arith.constant 0 : index
      %c0_11 = arith.constant 0 : index
      %12 = vector.load %arg8[%c0_10, %c0_11] : memref<32x256xf32, #tpu.memory_space<vmem>>, vector<32x256xf32>
      %c0_12 = arith.constant 0 : index
      %c0_13 = arith.constant 0 : index
      %13 = vector.load %arg5[%c0_12, %c0_13] : memref<1x256xf32, #tpu.memory_space<vmem>>, vector<1x256xf32>
      %14 = vector.broadcast %13 : vector<1x256xf32> to vector<32x256xf32>
      %15 = arith.mulf %12, %14 : vector<32x256xf32>
      %c0_14 = arith.constant 0 : index
      %c0_15 = arith.constant 0 : index
      %16 = vector.load %arg6[%c0_14, %c0_15] : memref<1x256xf32, #tpu.memory_space<vmem>>, vector<1x256xf32>
      %17 = vector.broadcast %16 : vector<1x256xf32> to vector<32x256xf32>
      %18 = arith.addf %15, %17 : vector<32x256xf32>
      %cst_16 = arith.constant 0.000000e+00 : f32
      %19 = vector.broadcast %cst_16 : f32 to vector<32x256xf32>
      %20 = arith.maximumf %18, %19 : vector<32x256xf32>
      %21 = arith.truncf %20 : vector<32x256xf32> to vector<32x256xbf16>
      %c0_17 = arith.constant 0 : index
      %c0_18 = arith.constant 0 : index
      %22 = vector.load %arg7[%c0_17, %c0_18] : memref<32x256xbf16, #tpu.memory_space<vmem>>, vector<32x256xbf16>
      tpu.vector_store %arg7[%c0_17, %c0_18], %21 {strides = array<i32>} : memref<32x256xbf16, #tpu.memory_space<vmem>>, vector<32x256xbf16>,
    } else {
    }
    return
  }
  func.func @transform_0(%arg0: i32, %arg1: i32, %arg2: i32) -> (i32, i32) {
    %c0_i32 = arith.constant 0 : i32
    return %arg0, %arg2 : i32, i32
  }
  func.func @transform_1(%arg0: i32, %arg1: i32, %arg2: i32) -> (i32, i32) {
    %c0_i32 = arith.constant 0 : i32
    return %arg2, %arg1 : i32, i32
  }
  func.func @transform_2(%arg0: i32, %arg1: i32, %arg2: i32) -> (i32, i32) {
    %c0_i32 = arith.constant 0 : i32
    %c0_i32_0 = arith.constant 0 : i32
    return %c0_i32, %arg1 : i32, i32
  }
  func.func @transform_3(%arg0: i32, %arg1: i32, %arg2: i32) -> (i32, i32) {
    %c0_i32 = arith.constant 0 : i32
    %c0_i32_0 = arith.constant 0 : i32
    return %c0_i32, %arg1 : i32, i32
  }
  func.func @transform_4(%arg0: i32, %arg1: i32, %arg2: i32) -> (i32, i32) {
    %c0_i32 = arith.constant 0 : i32
    return %arg0, %arg1 : i32, i32
  }
}

module attributes {stable_mosaic.version = 11 : i64} {
  func.func @_mm_bn_kernel(%arg0: i32, %arg1: i32, %arg2: i32, %arg3: memref<8x768xbf16, #tpu.memory_space<vmem>>, %arg4: memref<768x256xbf16, #tpu.memory_space<vmem>>, %arg5: memref<1x256xf32, #tpu.memory_space<vmem>>, %arg6: memref<1x256xf32, #tpu.memory_space<vmem>>, %arg7: memref<8x256xbf16, #tpu.memory_space<vmem>>, %arg8: memref<8x256xf32, #tpu.memory_space<vmem>>) attributes {dimension_semantics = [#tpu.dimension_semantics<parallel>, #tpu.dimension_semantics<parallel>, #tpu.dimension_semantics<arbitrary>], iteration_bounds = array<i64: 1, 1, 3>, scalar_prefetch = 0 : i64, scratch_operands = 1 : i64, tpu.core_type = #tpu.core_type<tc>, window_params = [{transform_indices = @transform_0, window_bounds = array<i64: 8, 768>}, {transform_indices = @transform_1, window_bounds = array<i64: 768, 256>}, {transform_indices = @transform_2, window_bounds = array<i64: 1, 256>}, {transform_indices = @transform_3, window_bounds = array<i64: 1, 256>}, {transform_indices = @transform_4, window_bounds = array<i64: 8, 256>}]} {
    %c0_i32 = arith.constant 0 : i32
    %0 = arith.cmpi eq, %arg2, %c0_i32 : i32
    %1 = arith.extui %0 : i1 to i32
    %c0_i32_0 = arith.constant 0 : i32
    %2 = arith.cmpi ne, %1, %c0_i32_0 : i32
    scf.if %2 {
      %cst_9 = arith.constant 0.000000e+00 : f32
      %12 = vector.broadcast %cst_9 : f32 to vector<8x256xf32>
      %c0_10 = arith.constant 0 : index
      %c0_11 = arith.constant 0 : index
      %13 = vector.load %arg8[%c0_10, %c0_11] : memref<8x256xf32, #tpu.memory_space<vmem>>, vector<8x256xf32>
      tpu.vector_store %arg8[%c0_10, %c0_11], %12 {strides = array<i32>} : memref<8x256xf32, #tpu.memory_space<vmem>>, vector<8x256xf32>,
    } else {
    }
    %c0 = arith.constant 0 : index
    %c0_1 = arith.constant 0 : index
    %3 = vector.load %arg8[%c0, %c0_1] : memref<8x256xf32, #tpu.memory_space<vmem>>, vector<8x256xf32>
    %c0_2 = arith.constant 0 : index
    %c0_3 = arith.constant 0 : index
    %4 = vector.load %arg3[%c0_2, %c0_3] : memref<8x768xbf16, #tpu.memory_space<vmem>>, vector<8x768xbf16>
    %c0_4 = arith.constant 0 : index
    %c0_5 = arith.constant 0 : index
    %5 = vector.load %arg4[%c0_4, %c0_5] : memref<768x256xbf16, #tpu.memory_space<vmem>>, vector<768x256xbf16>
    %cst = arith.constant dense<0.000000e+00> : vector<8x256xf32>
    %6 = tpu.matmul %4, %5, %cst {dimension_numbers = #tpu.dot_dimension_numbers<[1], [0], [0], [1], [0, 0, 1, 1], [], []>} : vector<8x768xbf16>, vector<768x256xbf16>, vector<8x256xf32> -> vector<8x256xf32>
    %7 = arith.addf %3, %6 : vector<8x256xf32>
    %c0_6 = arith.constant 0 : index
    %c0_7 = arith.constant 0 : index
    %8 = vector.load %arg8[%c0_6, %c0_7] : memref<8x256xf32, #tpu.memory_space<vmem>>, vector<8x256xf32>
    tpu.vector_store %arg8[%c0_6, %c0_7], %7 {strides = array<i32>} : memref<8x256xf32, #tpu.memory_space<vmem>>, vector<8x256xf32>,
    %c2_i32 = arith.constant 2 : i32
    %9 = arith.cmpi eq, %arg2, %c2_i32 : i32
    %10 = arith.extui %9 : i1 to i32
    %c0_i32_8 = arith.constant 0 : i32
    %11 = arith.cmpi ne, %10, %c0_i32_8 : i32
    scf.if %11 {
      %c0_9 = arith.constant 0 : index
      %c0_10 = arith.constant 0 : index
      %12 = vector.load %arg8[%c0_9, %c0_10] : memref<8x256xf32, #tpu.memory_space<vmem>>, vector<8x256xf32>
      %c0_11 = arith.constant 0 : index
      %c0_12 = arith.constant 0 : index
      %13 = vector.load %arg5[%c0_11, %c0_12] : memref<1x256xf32, #tpu.memory_space<vmem>>, vector<1x256xf32>
      %14 = vector.broadcast %13 : vector<1x256xf32> to vector<8x256xf32>
      %15 = arith.mulf %12, %14 : vector<8x256xf32>
      %c0_13 = arith.constant 0 : index
      %c0_14 = arith.constant 0 : index
      %16 = vector.load %arg6[%c0_13, %c0_14] : memref<1x256xf32, #tpu.memory_space<vmem>>, vector<1x256xf32>
      %17 = vector.broadcast %16 : vector<1x256xf32> to vector<8x256xf32>
      %18 = arith.addf %15, %17 : vector<8x256xf32>
      %cst_15 = arith.constant 0.000000e+00 : f32
      %19 = vector.broadcast %cst_15 : f32 to vector<8x256xf32>
      %20 = arith.maximumf %18, %19 : vector<8x256xf32>
      %21 = arith.truncf %20 : vector<8x256xf32> to vector<8x256xbf16>
      %c0_16 = arith.constant 0 : index
      %c0_17 = arith.constant 0 : index
      %22 = vector.load %arg7[%c0_16, %c0_17] : memref<8x256xbf16, #tpu.memory_space<vmem>>, vector<8x256xbf16>
      tpu.vector_store %arg7[%c0_16, %c0_17], %21 {strides = array<i32>} : memref<8x256xbf16, #tpu.memory_space<vmem>>, vector<8x256xbf16>,
    } else {
    }
    return
  }
  func.func @transform_0(%arg0: i32, %arg1: i32, %arg2: i32) -> (i32, i32) {
    %c0_i32 = arith.constant 0 : i32
    return %arg0, %arg2 : i32, i32
  }
  func.func @transform_1(%arg0: i32, %arg1: i32, %arg2: i32) -> (i32, i32) {
    %c0_i32 = arith.constant 0 : i32
    return %arg2, %arg1 : i32, i32
  }
  func.func @transform_2(%arg0: i32, %arg1: i32, %arg2: i32) -> (i32, i32) {
    %c0_i32 = arith.constant 0 : i32
    %c0_i32_0 = arith.constant 0 : i32
    return %c0_i32, %arg1 : i32, i32
  }
  func.func @transform_3(%arg0: i32, %arg1: i32, %arg2: i32) -> (i32, i32) {
    %c0_i32 = arith.constant 0 : i32
    %c0_i32_0 = arith.constant 0 : i32
    return %c0_i32, %arg1 : i32, i32
  }
  func.func @transform_4(%arg0: i32, %arg1: i32, %arg2: i32) -> (i32, i32) {
    %c0_i32 = arith.constant 0 : i32
    return %arg0, %arg1 : i32, i32
  }
}

module attributes {stable_mosaic.version = 11 : i64} {
  func.func @_mm_bn_kernel(%arg0: i32, %arg1: i32, %arg2: i32, %arg3: memref<8x512xbf16, #tpu.memory_space<vmem>>, %arg4: memref<512x256xbf16, #tpu.memory_space<vmem>>, %arg5: memref<1x256xf32, #tpu.memory_space<vmem>>, %arg6: memref<1x256xf32, #tpu.memory_space<vmem>>, %arg7: memref<8x256xbf16, #tpu.memory_space<vmem>>, %arg8: memref<8x256xf32, #tpu.memory_space<vmem>>) attributes {dimension_semantics = [#tpu.dimension_semantics<parallel>, #tpu.dimension_semantics<parallel>, #tpu.dimension_semantics<arbitrary>], iteration_bounds = array<i64: 1, 4, 1>, scalar_prefetch = 0 : i64, scratch_operands = 1 : i64, tpu.core_type = #tpu.core_type<tc>, window_params = [{transform_indices = @transform_0, window_bounds = array<i64: 8, 512>}, {transform_indices = @transform_1, window_bounds = array<i64: 512, 256>}, {transform_indices = @transform_2, window_bounds = array<i64: 1, 256>}, {transform_indices = @transform_3, window_bounds = array<i64: 1, 256>}, {transform_indices = @transform_4, window_bounds = array<i64: 8, 256>}]} {
    %c0_i32 = arith.constant 0 : i32
    %0 = arith.cmpi eq, %arg2, %c0_i32 : i32
    %1 = arith.extui %0 : i1 to i32
    %c0_i32_0 = arith.constant 0 : i32
    %2 = arith.cmpi ne, %1, %c0_i32_0 : i32
    scf.if %2 {
      %cst_10 = arith.constant 0.000000e+00 : f32
      %12 = vector.broadcast %cst_10 : f32 to vector<8x256xf32>
      %c0_11 = arith.constant 0 : index
      %c0_12 = arith.constant 0 : index
      %13 = vector.load %arg8[%c0_11, %c0_12] : memref<8x256xf32, #tpu.memory_space<vmem>>, vector<8x256xf32>
      tpu.vector_store %arg8[%c0_11, %c0_12], %12 {strides = array<i32>} : memref<8x256xf32, #tpu.memory_space<vmem>>, vector<8x256xf32>,
    } else {
    }
    %c0 = arith.constant 0 : index
    %c0_1 = arith.constant 0 : index
    %3 = vector.load %arg8[%c0, %c0_1] : memref<8x256xf32, #tpu.memory_space<vmem>>, vector<8x256xf32>
    %c0_2 = arith.constant 0 : index
    %c0_3 = arith.constant 0 : index
    %4 = vector.load %arg3[%c0_2, %c0_3] : memref<8x512xbf16, #tpu.memory_space<vmem>>, vector<8x512xbf16>
    %c0_4 = arith.constant 0 : index
    %c0_5 = arith.constant 0 : index
    %5 = vector.load %arg4[%c0_4, %c0_5] : memref<512x256xbf16, #tpu.memory_space<vmem>>, vector<512x256xbf16>
    %cst = arith.constant dense<0.000000e+00> : vector<8x256xf32>
    %6 = tpu.matmul %4, %5, %cst {dimension_numbers = #tpu.dot_dimension_numbers<[1], [0], [0], [1], [0, 0, 1, 1], [], []>} : vector<8x512xbf16>, vector<512x256xbf16>, vector<8x256xf32> -> vector<8x256xf32>
    %7 = arith.addf %3, %6 : vector<8x256xf32>
    %c0_6 = arith.constant 0 : index
    %c0_7 = arith.constant 0 : index
    %8 = vector.load %arg8[%c0_6, %c0_7] : memref<8x256xf32, #tpu.memory_space<vmem>>, vector<8x256xf32>
    tpu.vector_store %arg8[%c0_6, %c0_7], %7 {strides = array<i32>} : memref<8x256xf32, #tpu.memory_space<vmem>>, vector<8x256xf32>,
    %c0_i32_8 = arith.constant 0 : i32
    %9 = arith.cmpi eq, %arg2, %c0_i32_8 : i32
    %10 = arith.extui %9 : i1 to i32
    %c0_i32_9 = arith.constant 0 : i32
    %11 = arith.cmpi ne, %10, %c0_i32_9 : i32
    scf.if %11 {
      %c0_10 = arith.constant 0 : index
      %c0_11 = arith.constant 0 : index
      %12 = vector.load %arg8[%c0_10, %c0_11] : memref<8x256xf32, #tpu.memory_space<vmem>>, vector<8x256xf32>
      %c0_12 = arith.constant 0 : index
      %c0_13 = arith.constant 0 : index
      %13 = vector.load %arg5[%c0_12, %c0_13] : memref<1x256xf32, #tpu.memory_space<vmem>>, vector<1x256xf32>
      %14 = vector.broadcast %13 : vector<1x256xf32> to vector<8x256xf32>
      %15 = arith.mulf %12, %14 : vector<8x256xf32>
      %c0_14 = arith.constant 0 : index
      %c0_15 = arith.constant 0 : index
      %16 = vector.load %arg6[%c0_14, %c0_15] : memref<1x256xf32, #tpu.memory_space<vmem>>, vector<1x256xf32>
      %17 = vector.broadcast %16 : vector<1x256xf32> to vector<8x256xf32>
      %18 = arith.addf %15, %17 : vector<8x256xf32>
      %19 = arith.truncf %18 : vector<8x256xf32> to vector<8x256xbf16>
      %c0_16 = arith.constant 0 : index
      %c0_17 = arith.constant 0 : index
      %20 = vector.load %arg7[%c0_16, %c0_17] : memref<8x256xbf16, #tpu.memory_space<vmem>>, vector<8x256xbf16>
      tpu.vector_store %arg7[%c0_16, %c0_17], %19 {strides = array<i32>} : memref<8x256xbf16, #tpu.memory_space<vmem>>, vector<8x256xbf16>,
    } else {
    }
    return
  }
  func.func @transform_0(%arg0: i32, %arg1: i32, %arg2: i32) -> (i32, i32) {
    %c0_i32 = arith.constant 0 : i32
    return %arg0, %arg2 : i32, i32
  }
  func.func @transform_1(%arg0: i32, %arg1: i32, %arg2: i32) -> (i32, i32) {
    %c0_i32 = arith.constant 0 : i32
    return %arg2, %arg1 : i32, i32
  }
  func.func @transform_2(%arg0: i32, %arg1: i32, %arg2: i32) -> (i32, i32) {
    %c0_i32 = arith.constant 0 : i32
    %c0_i32_0 = arith.constant 0 : i32
    return %c0_i32, %arg1 : i32, i32
  }
  func.func @transform_3(%arg0: i32, %arg1: i32, %arg2: i32) -> (i32, i32) {
    %c0_i32 = arith.constant 0 : i32
    %c0_i32_0 = arith.constant 0 : i32
    return %c0_i32, %arg1 : i32, i32
  }
  func.func @transform_4(%arg0: i32, %arg1: i32, %arg2: i32) -> (i32, i32) {
    %c0_i32 = arith.constant 0 : i32
    return %arg0, %arg1 : i32, i32
  }
}

module attributes {stable_mosaic.version = 11 : i64} {
  func.func @_mm_bn_res_kernel(%arg0: i32, %arg1: i32, %arg2: i32, %arg3: memref<8x256xbf16, #tpu.memory_space<vmem>>, %arg4: memref<256x256xbf16, #tpu.memory_space<vmem>>, %arg5: memref<1x256xf32, #tpu.memory_space<vmem>>, %arg6: memref<1x256xf32, #tpu.memory_space<vmem>>, %arg7: memref<8x256xbf16, #tpu.memory_space<vmem>>, %arg8: memref<8x256xbf16, #tpu.memory_space<vmem>>, %arg9: memref<8x256xf32, #tpu.memory_space<vmem>>) attributes {dimension_semantics = [#tpu.dimension_semantics<parallel>, #tpu.dimension_semantics<parallel>, #tpu.dimension_semantics<arbitrary>], iteration_bounds = array<i64: 1, 4, 1>, scalar_prefetch = 0 : i64, scratch_operands = 1 : i64, tpu.core_type = #tpu.core_type<tc>, window_params = [{transform_indices = @transform_0, window_bounds = array<i64: 8, 256>}, {transform_indices = @transform_1, window_bounds = array<i64: 256, 256>}, {transform_indices = @transform_2, window_bounds = array<i64: 1, 256>}, {transform_indices = @transform_3, window_bounds = array<i64: 1, 256>}, {transform_indices = @transform_4, window_bounds = array<i64: 8, 256>}, {transform_indices = @transform_5, window_bounds = array<i64: 8, 256>}]} {
    %c0_i32 = arith.constant 0 : i32
    %0 = arith.cmpi eq, %arg2, %c0_i32 : i32
    %1 = arith.extui %0 : i1 to i32
    %c0_i32_0 = arith.constant 0 : i32
    %2 = arith.cmpi ne, %1, %c0_i32_0 : i32
    scf.if %2 {
      %cst_10 = arith.constant 0.000000e+00 : f32
      %12 = vector.broadcast %cst_10 : f32 to vector<8x256xf32>
      %c0_11 = arith.constant 0 : index
      %c0_12 = arith.constant 0 : index
      %13 = vector.load %arg9[%c0_11, %c0_12] : memref<8x256xf32, #tpu.memory_space<vmem>>, vector<8x256xf32>
      tpu.vector_store %arg9[%c0_11, %c0_12], %12 {strides = array<i32>} : memref<8x256xf32, #tpu.memory_space<vmem>>, vector<8x256xf32>,
    } else {
    }
    %c0 = arith.constant 0 : index
    %c0_1 = arith.constant 0 : index
    %3 = vector.load %arg9[%c0, %c0_1] : memref<8x256xf32, #tpu.memory_space<vmem>>, vector<8x256xf32>
    %c0_2 = arith.constant 0 : index
    %c0_3 = arith.constant 0 : index
    %4 = vector.load %arg3[%c0_2, %c0_3] : memref<8x256xbf16, #tpu.memory_space<vmem>>, vector<8x256xbf16>
    %c0_4 = arith.constant 0 : index
    %c0_5 = arith.constant 0 : index
    %5 = vector.load %arg4[%c0_4, %c0_5] : memref<256x256xbf16, #tpu.memory_space<vmem>>, vector<256x256xbf16>
    %cst = arith.constant dense<0.000000e+00> : vector<8x256xf32>
    %6 = tpu.matmul %4, %5, %cst {dimension_numbers = #tpu.dot_dimension_numbers<[1], [0], [0], [1], [0, 0, 1, 1], [], []>} : vector<8x256xbf16>, vector<256x256xbf16>, vector<8x256xf32> -> vector<8x256xf32>
    %7 = arith.addf %3, %6 : vector<8x256xf32>
    %c0_6 = arith.constant 0 : index
    %c0_7 = arith.constant 0 : index
    %8 = vector.load %arg9[%c0_6, %c0_7] : memref<8x256xf32, #tpu.memory_space<vmem>>, vector<8x256xf32>
    tpu.vector_store %arg9[%c0_6, %c0_7], %7 {strides = array<i32>} : memref<8x256xf32, #tpu.memory_space<vmem>>, vector<8x256xf32>,
    %c0_i32_8 = arith.constant 0 : i32
    %9 = arith.cmpi eq, %arg2, %c0_i32_8 : i32
    %10 = arith.extui %9 : i1 to i32
    %c0_i32_9 = arith.constant 0 : i32
    %11 = arith.cmpi ne, %10, %c0_i32_9 : i32
    scf.if %11 {
      %c0_10 = arith.constant 0 : index
      %c0_11 = arith.constant 0 : index
      %12 = vector.load %arg9[%c0_10, %c0_11] : memref<8x256xf32, #tpu.memory_space<vmem>>, vector<8x256xf32>
      %c0_12 = arith.constant 0 : index
      %c0_13 = arith.constant 0 : index
      %13 = vector.load %arg5[%c0_12, %c0_13] : memref<1x256xf32, #tpu.memory_space<vmem>>, vector<1x256xf32>
      %14 = vector.broadcast %13 : vector<1x256xf32> to vector<8x256xf32>
      %15 = arith.mulf %12, %14 : vector<8x256xf32>
      %c0_14 = arith.constant 0 : index
      %c0_15 = arith.constant 0 : index
      %16 = vector.load %arg6[%c0_14, %c0_15] : memref<1x256xf32, #tpu.memory_space<vmem>>, vector<1x256xf32>
      %17 = vector.broadcast %16 : vector<1x256xf32> to vector<8x256xf32>
      %18 = arith.addf %15, %17 : vector<8x256xf32>
      %c0_16 = arith.constant 0 : index
      %c0_17 = arith.constant 0 : index
      %19 = vector.load %arg7[%c0_16, %c0_17] : memref<8x256xbf16, #tpu.memory_space<vmem>>, vector<8x256xbf16>
      %20 = arith.extf %19 : vector<8x256xbf16> to vector<8x256xf32>
      %21 = arith.addf %18, %20 : vector<8x256xf32>
      %cst_18 = arith.constant 0.000000e+00 : f32
      %22 = vector.broadcast %cst_18 : f32 to vector<8x256xf32>
      %23 = arith.maximumf %21, %22 : vector<8x256xf32>
      %24 = arith.truncf %23 : vector<8x256xf32> to vector<8x256xbf16>
      %c0_19 = arith.constant 0 : index
      %c0_20 = arith.constant 0 : index
      %25 = vector.load %arg8[%c0_19, %c0_20] : memref<8x256xbf16, #tpu.memory_space<vmem>>, vector<8x256xbf16>
      tpu.vector_store %arg8[%c0_19, %c0_20], %24 {strides = array<i32>} : memref<8x256xbf16, #tpu.memory_space<vmem>>, vector<8x256xbf16>,
    } else {
    }
    return
  }
  func.func @transform_0(%arg0: i32, %arg1: i32, %arg2: i32) -> (i32, i32) {
    %c0_i32 = arith.constant 0 : i32
    return %arg0, %arg2 : i32, i32
  }
  func.func @transform_1(%arg0: i32, %arg1: i32, %arg2: i32) -> (i32, i32) {
    %c0_i32 = arith.constant 0 : i32
    return %arg2, %arg1 : i32, i32
  }
  func.func @transform_2(%arg0: i32, %arg1: i32, %arg2: i32) -> (i32, i32) {
    %c0_i32 = arith.constant 0 : i32
    %c0_i32_0 = arith.constant 0 : i32
    return %c0_i32, %arg1 : i32, i32
  }
  func.func @transform_3(%arg0: i32, %arg1: i32, %arg2: i32) -> (i32, i32) {
    %c0_i32 = arith.constant 0 : i32
    %c0_i32_0 = arith.constant 0 : i32
    return %c0_i32, %arg1 : i32, i32
  }
  func.func @transform_4(%arg0: i32, %arg1: i32, %arg2: i32) -> (i32, i32) {
    %c0_i32 = arith.constant 0 : i32
    return %arg0, %arg1 : i32, i32
  }
  func.func @transform_5(%arg0: i32, %arg1: i32, %arg2: i32) -> (i32, i32) {
    %c0_i32 = arith.constant 0 : i32
    return %arg0, %arg1 : i32, i32
  }
}

module attributes {stable_mosaic.version = 11 : i64} {
  func.func @_mm_bn_kernel(%arg0: i32, %arg1: i32, %arg2: i32, %arg3: memref<8x1024xbf16, #tpu.memory_space<vmem>>, %arg4: memref<1024x256xbf16, #tpu.memory_space<vmem>>, %arg5: memref<1x256xf32, #tpu.memory_space<vmem>>, %arg6: memref<1x256xf32, #tpu.memory_space<vmem>>, %arg7: memref<8x256xbf16, #tpu.memory_space<vmem>>, %arg8: memref<8x256xf32, #tpu.memory_space<vmem>>) attributes {dimension_semantics = [#tpu.dimension_semantics<parallel>, #tpu.dimension_semantics<parallel>, #tpu.dimension_semantics<arbitrary>], iteration_bounds = array<i64: 1, 1, 1>, scalar_prefetch = 0 : i64, scratch_operands = 1 : i64, tpu.core_type = #tpu.core_type<tc>, window_params = [{transform_indices = @transform_0, window_bounds = array<i64: 8, 1024>}, {transform_indices = @transform_1, window_bounds = array<i64: 1024, 256>}, {transform_indices = @transform_2, window_bounds = array<i64: 1, 256>}, {transform_indices = @transform_3, window_bounds = array<i64: 1, 256>}, {transform_indices = @transform_4, window_bounds = array<i64: 8, 256>}]} {
    %c0_i32 = arith.constant 0 : i32
    %0 = arith.cmpi eq, %arg2, %c0_i32 : i32
    %1 = arith.extui %0 : i1 to i32
    %c0_i32_0 = arith.constant 0 : i32
    %2 = arith.cmpi ne, %1, %c0_i32_0 : i32
    scf.if %2 {
      %cst_10 = arith.constant 0.000000e+00 : f32
      %12 = vector.broadcast %cst_10 : f32 to vector<8x256xf32>
      %c0_11 = arith.constant 0 : index
      %c0_12 = arith.constant 0 : index
      %13 = vector.load %arg8[%c0_11, %c0_12] : memref<8x256xf32, #tpu.memory_space<vmem>>, vector<8x256xf32>
      tpu.vector_store %arg8[%c0_11, %c0_12], %12 {strides = array<i32>} : memref<8x256xf32, #tpu.memory_space<vmem>>, vector<8x256xf32>,
    } else {
    }
    %c0 = arith.constant 0 : index
    %c0_1 = arith.constant 0 : index
    %3 = vector.load %arg8[%c0, %c0_1] : memref<8x256xf32, #tpu.memory_space<vmem>>, vector<8x256xf32>
    %c0_2 = arith.constant 0 : index
    %c0_3 = arith.constant 0 : index
    %4 = vector.load %arg3[%c0_2, %c0_3] : memref<8x1024xbf16, #tpu.memory_space<vmem>>, vector<8x1024xbf16>
    %c0_4 = arith.constant 0 : index
    %c0_5 = arith.constant 0 : index
    %5 = vector.load %arg4[%c0_4, %c0_5] : memref<1024x256xbf16, #tpu.memory_space<vmem>>, vector<1024x256xbf16>
    %cst = arith.constant dense<0.000000e+00> : vector<8x256xf32>
    %6 = tpu.matmul %4, %5, %cst {dimension_numbers = #tpu.dot_dimension_numbers<[1], [0], [0], [1], [0, 0, 1, 1], [], []>} : vector<8x1024xbf16>, vector<1024x256xbf16>, vector<8x256xf32> -> vector<8x256xf32>
    %7 = arith.addf %3, %6 : vector<8x256xf32>
    %c0_6 = arith.constant 0 : index
    %c0_7 = arith.constant 0 : index
    %8 = vector.load %arg8[%c0_6, %c0_7] : memref<8x256xf32, #tpu.memory_space<vmem>>, vector<8x256xf32>
    tpu.vector_store %arg8[%c0_6, %c0_7], %7 {strides = array<i32>} : memref<8x256xf32, #tpu.memory_space<vmem>>, vector<8x256xf32>,
    %c0_i32_8 = arith.constant 0 : i32
    %9 = arith.cmpi eq, %arg2, %c0_i32_8 : i32
    %10 = arith.extui %9 : i1 to i32
    %c0_i32_9 = arith.constant 0 : i32
    %11 = arith.cmpi ne, %10, %c0_i32_9 : i32
    scf.if %11 {
      %c0_10 = arith.constant 0 : index
      %c0_11 = arith.constant 0 : index
      %12 = vector.load %arg8[%c0_10, %c0_11] : memref<8x256xf32, #tpu.memory_space<vmem>>, vector<8x256xf32>
      %c0_12 = arith.constant 0 : index
      %c0_13 = arith.constant 0 : index
      %13 = vector.load %arg5[%c0_12, %c0_13] : memref<1x256xf32, #tpu.memory_space<vmem>>, vector<1x256xf32>
      %14 = vector.broadcast %13 : vector<1x256xf32> to vector<8x256xf32>
      %15 = arith.mulf %12, %14 : vector<8x256xf32>
      %c0_14 = arith.constant 0 : index
      %c0_15 = arith.constant 0 : index
      %16 = vector.load %arg6[%c0_14, %c0_15] : memref<1x256xf32, #tpu.memory_space<vmem>>, vector<1x256xf32>
      %17 = vector.broadcast %16 : vector<1x256xf32> to vector<8x256xf32>
      %18 = arith.addf %15, %17 : vector<8x256xf32>
      %cst_16 = arith.constant 0.000000e+00 : f32
      %19 = vector.broadcast %cst_16 : f32 to vector<8x256xf32>
      %20 = arith.maximumf %18, %19 : vector<8x256xf32>
      %21 = arith.truncf %20 : vector<8x256xf32> to vector<8x256xbf16>
      %c0_17 = arith.constant 0 : index
      %c0_18 = arith.constant 0 : index
      %22 = vector.load %arg7[%c0_17, %c0_18] : memref<8x256xbf16, #tpu.memory_space<vmem>>, vector<8x256xbf16>
      tpu.vector_store %arg7[%c0_17, %c0_18], %21 {strides = array<i32>} : memref<8x256xbf16, #tpu.memory_space<vmem>>, vector<8x256xbf16>,
    } else {
    }
    return
  }
  func.func @transform_0(%arg0: i32, %arg1: i32, %arg2: i32) -> (i32, i32) {
    %c0_i32 = arith.constant 0 : i32
    return %arg0, %arg2 : i32, i32
  }
  func.func @transform_1(%arg0: i32, %arg1: i32, %arg2: i32) -> (i32, i32) {
    %c0_i32 = arith.constant 0 : i32
    return %arg2, %arg1 : i32, i32
  }
  func.func @transform_2(%arg0: i32, %arg1: i32, %arg2: i32) -> (i32, i32) {
    %c0_i32 = arith.constant 0 : i32
    %c0_i32_0 = arith.constant 0 : i32
    return %c0_i32, %arg1 : i32, i32
  }
  func.func @transform_3(%arg0: i32, %arg1: i32, %arg2: i32) -> (i32, i32) {
    %c0_i32 = arith.constant 0 : i32
    %c0_i32_0 = arith.constant 0 : i32
    return %c0_i32, %arg1 : i32, i32
  }
  func.func @transform_4(%arg0: i32, %arg1: i32, %arg2: i32) -> (i32, i32) {
    %c0_i32 = arith.constant 0 : i32
    return %arg0, %arg1 : i32, i32
  }
}

</mosaic_0001>

<bundles_post_ra>
// kernel: _lambda_.32
= control target key start
LH: loop header
LB: loop body
LE: loop exit
PB: predicated region body
PF: predicated region fallthrough
CT: control target
= control target key end

     0   :  { %9 = vsyncpa [#allocation4], 0  ;;  %s1135_s0 = inlined_call_operand.hbm [shape: bf16[128,256], index: 0, kind: input, shape index: {}]   ;;  %s1136_s1 = inlined_call_operand.hbm [shape: bf16[256,128], index: 1, kind: input, shape index: {}]   ;;  %s1137_s2 = inlined_call_operand.hbm [shape: f32[1,128], index: 2, kind: input, shape index: {}]   ;;  %s1138_s3 = inlined_call_operand.hbm [shape: f32[1,128], index: 3, kind: input, shape index: {}]   ;;  %s1139_s4 = inlined_call_operand.hbm [shape: bf16[128,128], index: 4, kind: output, shape index: {}]  }
   0x1   :  { %10 = vsyncpa [#allocation7], 0 }
   0x2   :  { %11 = vsyncpa [#allocation10], 0 }
   0x3   :  { %12 = vsyncpa [#allocation5], 0  ;;  %s999_s15 = smov [#allocation6]   ;;  %s881_s19 = scalar_lea.hbm %s1136_s1, 2048 }
   0x4   :  { %s30_s16 = sshll.u32 %s999_s15, 4  ;;  %p882_p0 = scmp.ne.s32.totalorder %s1136_s1, %s881_s19  ;;  %s31_s16 = int_to_ptr.vmem [resolvable:$true] %s30_s16 }
   0x5   :  { %p885_p1 = scmp.lt.u32.totalorder %s881_s19, %s1136_s1 }
   0x7   :  { %p887_p2 = pnand %p885_p1, %p882_p0 }
   0x9   :  { %890 = shalt.err (!%p887_p2)
}
   0xa   :  { %s891_s24 = scalar_lea.vmem %s31_s16, 2048  ;;  %p896_p4 = scmp.lt.s32.totalorder %s31_s16, %s31_s16 }
   0xb   :  { %p892_p3 = scmp.ne.s32.totalorder %s31_s16, %s891_s24  ;;  %p897_p5 = scmp.lt.s32.totalorder %s891_s24, %s891_s24 }
   0xd   :  { %p898_p6 = por %p897_p5, %p896_p4 }
   0xf   :  { %p899_p7 = pnand %p898_p6, %p892_p3 }
  0x11   :  { %902 = shalt.err (!%p899_p7)
}
  0x12   :  { %s1000_s25 = smov 64   ;;  %s1001_s26 = smov 4  }
  0x13   :  { %36 = dma.hbm_to_vmem [thread:$0]  %s1136_s1, 2048, %s31_s16, [#allocation7], %s1000_s25, %s1000_s25, %s1001_s26  }
  0x14   :  { %s1002_s29 = smov [#allocation3]   ;;  %s903_s7 = scalar_lea.hbm %s1135_s0, 2048 }
  0x15   :  { %s18_s30 = sshll.u32 %s1002_s29, 4  ;;  %p904_p8 = scmp.ne.s32.totalorder %s1135_s0, %s903_s7  ;;  %s19_s30 = int_to_ptr.vmem [resolvable:$true] %s18_s30 }
  0x16   :  { %p907_p9 = scmp.lt.u32.totalorder %s903_s7, %s1135_s0 }
  0x18   :  { %p909_p10 = pnand %p907_p9, %p904_p8 }
  0x1a   :  { %912 = shalt.err (!%p909_p10)
}
  0x1b   :  { %s913_s12 = scalar_lea.vmem %s19_s30, 2048  ;;  %p918_p12 = scmp.lt.s32.totalorder %s19_s30, %s19_s30 }
  0x1c   :  { %p914_p11 = scmp.ne.s32.totalorder %s19_s30, %s913_s12  ;;  %p919_p13 = scmp.lt.s32.totalorder %s913_s12, %s913_s12 }
  0x1e   :  { %p920_p0 = por %p919_p13, %p918_p12 }
  0x20   :  { %p921_p1 = pnand %p920_p0, %p914_p11 }
  0x22   :  { %924 = shalt.err (!%p921_p1)
}
  0x23   :  { %s1003_s1 = smov 128   ;;  %s1004_s13 = smov 8  }
  0x24   :  { %24 = dma.hbm_to_vmem [thread:$0]  %s1135_s0, 2048, %s19_s30, [#allocation4], %s1003_s1, %s1003_s1, %s1004_s13  }
  0x25   :  { %s1005_s16 = smov [#allocation8]   ;;  %s1006_s18 = smov [#allocation9]  }
  0x26   :  { %s43_s17 = sshll.u32 %s1005_s16, 4  ;;  %s53_s19 = sshll.u32 %s1006_s18, 4  ;;  %s44_s17 = int_to_ptr.vmem [resolvable:$true] %s43_s17  ;;  %s54_s19 = int_to_ptr.vmem [resolvable:$true] %s53_s19 }
  0x27   :  { %s925_s22 = scalar_lea.hbm %s1137_s2, 16 }
  0x28   :  { %p926_p2 = scmp.ne.s32.totalorder %s1137_s2, %s925_s22  ;;  %p929_p3 = scmp.lt.u32.totalorder %s925_s22, %s1137_s2 }
  0x2a   :  { %p931_p4 = pnand %p929_p3, %p926_p2 }
  0x2c   :  { %934 = shalt.err (!%p931_p4)
}
  0x2d   :  { %s935_s0 = scalar_lea.vmem %s44_s17, 16  ;;  %s939_s29 = scalar_lea.vmem %s44_s17, 32 }
  0x2e   :  { %p936_p5 = scmp.ne.s32.totalorder %s44_s17, %s935_s0  ;;  %p940_p6 = scmp.lt.s32.totalorder %s44_s17, %s44_s17 }
  0x2f   :  { %p941_p7 = scmp.lt.s32.totalorder %s939_s29, %s935_s0 }
  0x31   :  { %p942_p8 = por %p941_p7, %p940_p6 }
  0x33   :  { %p943_p9 = pnand %p942_p8, %p936_p5 }
  0x35   :  { %946 = shalt.err (!%p943_p9)
}
  0x36   :  { %46 = dma.hbm_to_vmem [thread:$0]  %s1137_s2, 16, %s44_s17, [#allocation7]  }
  0x37   :  { %s947_s8 = scalar_lea.hbm %s1138_s3, 16 }
  0x38   :  { %p948_p10 = scmp.ne.s32.totalorder %s1138_s3, %s947_s8  ;;  %p951_p11 = scmp.lt.u32.totalorder %s947_s8, %s1138_s3 }
  0x3a   :  { %p953_p12 = pnand %p951_p11, %p948_p10 }
  0x3c   :  { %956 = shalt.err (!%p953_p12)
}
  0x3d   :  { %s957_s1 = scalar_lea.vmem %s54_s19, 16  ;;  %s961_s13 = scalar_lea.vmem %s54_s19, 32 }
  0x3e   :  { %p958_p13 = scmp.ne.s32.totalorder %s54_s19, %s957_s1  ;;  %p962_p0 = scmp.lt.s32.totalorder %s54_s19, %s54_s19 }
  0x3f   :  { %p963_p1 = scmp.lt.s32.totalorder %s961_s13, %s957_s1 }
  0x41   :  { %p964_p2 = por %p963_p1, %p962_p0 }
  0x43   :  { %p965_p3 = pnand %p964_p2, %p958_p13 }
  0x45   :  { %968 = shalt.err (!%p965_p3)
}
  0x46   :  { %56 = dma.hbm_to_vmem [thread:$0]  %s1138_s3, 16, %s54_s19, [#allocation10]  }
  0x47   :  { %991 = dma.done.wait [#allocation4], 2048  }
  0x48   :  { %992 = vsyncadd [#allocation4], 4294965248 }
  0x49   :  { %993 = dma.done.wait [#allocation7], 2064  }
  0x4a   :  { %994 = vsyncadd [#allocation7], 4294965232 }
  0x4b   :  { %995 = dma.done.wait [#allocation10], 16  }
  0x4c   :  { %996 = vsyncadd [#allocation10], 4294967280  ;;  %v841_v0 = vld [vmem:[#allocation6 + $0x40] sm:$0xff]   ;;  %v843_v2 = vld [vmem:[#allocation6 + $0x48] sm:$0xff]   ;;  %s1007_s3 = smov [#allocation11]  }
  0x4d   :  { %v842_v1 = vld [vmem:[#allocation6] sm:$0xff]   ;;  %752 = vmatprep.subr.bf16.mxu0 %v841_v0  ;;  %816 = vmatprep.subr.bf16.mxu1 %v841_v0  ;;  %v844_v3 = vld [vmem:[#allocation6 + $0x8] sm:$0xff]   ;;  %v845_v4 = vld [vmem:[#allocation6 + $0x50] sm:$0xff]   ;;  %s625_s15 = sshll.u32 %s1007_s3, 4  ;;  %s626_s15 = int_to_ptr.vmem [resolvable:$true] %s625_s15 }
  0x4e   :  { %753 = vmatpush3.bf16.msra.mxu0 %v842_v1  ;;  %824 = vmatpush3.bf16.msra.mxu1 %v842_v1  ;;  %v846_v5 = vld [vmem:[#allocation6 + $0x10] sm:$0xff]   ;;  %v847_v6 = vld [vmem:[#allocation6 + $0x58] sm:$0xff]   ;;  %v849_v8 = vld [vmem:[#allocation6 + $0x60] sm:$0xff]   ;;  %s969_s16 = scalar_lea.vmem %s626_s15, 1024  ;;  %p974_p5 = scmp.lt.s32.totalorder %s626_s15, %s626_s15 }
  0x4f   :  { %754 = vmatprep.subr.bf16.mxu0 %v843_v2  ;;  %817 = vmatprep.subr.bf16.mxu1 %v843_v2  ;;  %v848_v7 = vld [vmem:[#allocation6 + $0x18] sm:$0xff]   ;;  %v850_v9 = vld [vmem:[#allocation6 + $0x20] sm:$0xff]   ;;  %v851_v10 = vld [vmem:[#allocation6 + $0x68] sm:$0xff]   ;;  %p970_p4 = scmp.ne.s32.totalorder %s626_s15, %s969_s16  ;;  %p975_p6 = scmp.lt.s32.totalorder %s969_s16, %s969_s16 }
  0x50   :  { %v859_v11 = vld [vmem:[#allocation3 + $0x4] ss:$8 sps:$4 sm:$0xff]   ;;  %v853_v14 = vld [vmem:[#allocation6 + $0x70] sm:$0xff]   ;;  %v855_v16 = vld [vmem:[#allocation6 + $0x78] sm:$0xff]  }
  0x51   :  { %v862_v12 = vld [vmem:[#allocation3 + $0x44] ss:$8 sps:$4 sm:$0xff]   ;;  %362 = vmatprep.mubr.bf16.mxu0 %v859_v11  ;;  %v854_v15 = vld [vmem:[#allocation6 + $0x30] sm:$0xff]   ;;  %v856_v17 = vld [vmem:[#allocation6 + $0x38] sm:$0xff]   ;;  %p976_p7 = por %p975_p6, %p974_p5 }
  0x52   :  { %755 = vmatpush3.bf16.msra.mxu0 %v844_v3  ;;  %825 = vmatpush3.bf16.msra.mxu1 %v844_v3  ;;  %v852_v13 = vld [vmem:[#allocation6 + $0x28] sm:$0xff]   ;;  %v863_v20 = vld [vmem:[#allocation3 + $0x14] ss:$8 sps:$4 sm:$0xff]   ;;  %v867_v22 = vld [vmem:[#allocation3 + $0x10] ss:$8 sps:$4 sm:$0xff]  }
  0x53   :  { %756 = vmatprep.subr.bf16.mxu0 %v845_v4  ;;  %818 = vmatprep.subr.bf16.mxu1 %v845_v4  ;;  %v857_v18 = vld [vmem:[#allocation3] ss:$8 sps:$4 sm:$0xff]   ;;  %v865_v21 = vld [vmem:[#allocation3 + $0x54] ss:$8 sps:$4 sm:$0xff]   ;;  %v868_v23 = vld [vmem:[#allocation3 + $0x50] ss:$8 sps:$4 sm:$0xff]   ;;  %p977_p8 = pnand %p976_p7, %p970_p4 }
  0x54   :  { %394 = vmatprep.mubr.bf16.mxu1 %v862_v12  ;;  %v860_v19 = vld [vmem:[#allocation3 + $0x40] ss:$8 sps:$4 sm:$0xff]   ;;  %v869_v24 = vld [vmem:[#allocation3 + $0x24] ss:$8 sps:$4 sm:$0xff]   ;;  %v875_v28 = vld [vmem:[#allocation3 + $0x34] ss:$8 sps:$4 sm:$0xff]  }
  0x55   :  { %v871_v25 = vld [vmem:[#allocation3 + $0x64] ss:$8 sps:$4 sm:$0xff]   ;;  %v873_v26 = vld [vmem:[#allocation3 + $0x20] ss:$8 sps:$4 sm:$0xff]   ;;  %v877_v29 = vld [vmem:[#allocation3 + $0x74] ss:$8 sps:$4 sm:$0xff]  }
  0x56   :  { %757 = vmatpush3.bf16.msra.mxu0 %v846_v5  ;;  %826 = vmatpush3.bf16.msra.mxu1 %v846_v5  ;;  %v874_v27 = vld [vmem:[#allocation3 + $0x60] ss:$8 sps:$4 sm:$0xff]   ;;  %v879_v30 = vld [vmem:[#allocation3 + $0x30] ss:$8 sps:$4 sm:$0xff]  }
  0x57   :  { %758 = vmatprep.subr.bf16.mxu0 %v847_v6  ;;  %819 = vmatprep.subr.bf16.mxu1 %v847_v6  ;;  %v880_v31 = vld [vmem:[#allocation3 + $0x70] ss:$8 sps:$4 sm:$0xff]   ;;  %v1084_v35 = vld [vmem:[#allocation8] ss:$0 sm:$0xff]  ;;  %v1086_v41 = vld [vmem:[#allocation9] ss:$0 sm:$0xff] }
  0x5a   :  { %759 = vmatpush3.bf16.msra.mxu0 %v848_v7  ;;  %827 = vmatpush3.bf16.msra.mxu1 %v848_v7 }
  0x5b   :  { %760 = vmatprep.subr.bf16.mxu0 %v849_v8  ;;  %820 = vmatprep.subr.bf16.mxu1 %v849_v8 }
  0x5e   :  { %761 = vmatpush3.bf16.msra.mxu0 %v850_v9  ;;  %828 = vmatpush3.bf16.msra.mxu1 %v850_v9 }
  0x5f   :  { %762 = vmatprep.subr.bf16.mxu0 %v851_v10  ;;  %821 = vmatprep.subr.bf16.mxu1 %v851_v10 }
  0x62   :  { %763 = vmatpush3.bf16.msra.mxu0 %v852_v13  ;;  %829 = vmatpush3.bf16.msra.mxu1 %v852_v13 }
  0x63   :  { %764 = vmatprep.subr.bf16.mxu0 %v853_v14  ;;  %822 = vmatprep.subr.bf16.mxu1 %v853_v14 }
  0x66   :  { %765 = vmatpush3.bf16.msra.mxu0 %v854_v15  ;;  %830 = vmatpush3.bf16.msra.mxu1 %v854_v15 }
  0x67   :  { %766 = vmatprep.subr.bf16.mxu0 %v855_v16  ;;  %823 = vmatprep.subr.bf16.mxu1 %v855_v16 }
  0x6a   :  { %767 = vmatpush3.bf16.msra.mxu0 %v856_v17  ;;  %831 = vmatpush3.bf16.msra.mxu1 %v856_v17 }
  0x6d   :  { %363 = vmatmul.mubr.bf16.vlgmr.msra.gmra.mrb[0].mxu0 %v857_v18  ;;  %395 = vmatmul.mubr.bf16.vlgmr.msra.gmra.mrb[0].mxu1 %v860_v19 }
  0x6e   :  { %370 = vmatprep.mubr.bf16.mxu0 %v863_v20  ;;  %402 = vmatprep.mubr.bf16.mxu1 %v865_v21 }
  0x75   :  { %371 = vmatmul.mubr.bf16.gmra.mrb[4].mxu0 %v867_v22  ;;  %403 = vmatmul.mubr.bf16.gmra.mrb[4].mxu1 %v868_v23 }
  0x76   :  { %378 = vmatprep.mubr.bf16.mxu0 %v869_v24  ;;  %410 = vmatprep.mubr.bf16.mxu1 %v871_v25 }
  0x7d   :  { %379 = vmatmul.mubr.bf16.gmra.mrb[8].mxu0 %v873_v26  ;;  %411 = vmatmul.mubr.bf16.gmra.mrb[8].mxu1 %v874_v27 }
  0x7e   :  { %386 = vmatprep.mubr.bf16.mxu0 %v875_v28  ;;  %418 = vmatprep.mubr.bf16.mxu1 %v877_v29 }
  0x85   :  { %387 = vmatmul.mubr.bf16.gmra.mrb[12].mxu0 %v879_v30  ;;  %419 = vmatmul.mubr.bf16.gmra.mrb[12].mxu1 %v880_v31 }
 0x140   :  { %v768_v32 = vpop.f32.mrb[0].mxu0  ;;  %v792_v33 = vpop.f32.mrb[0].mxu1 }
 0x141   :  { %v769_v34 = vpop.f32.mrb[1].mxu0  ;;  %v793_v36 = vpop.f32.mrb[1].mxu1 }
 0x142   :  { %v770_v37 = vadd.f32 %v769_v34, %v768_v32  ;;  %v794_v38 = vadd.f32 %v793_v36, %v792_v33  ;;  %v771_v39 = vpop.f32.mrb[2].mxu0  ;;  %v795_v40 = vpop.f32.mrb[2].mxu1 }
 0x143   :  { %v772_v42 = vpop.f32.mrb[3].mxu0  ;;  %v796_v43 = vpop.f32.mrb[3].mxu1 }
 0x144   :  { %v485_v44 = vmul.f32 %v770_v37, %v1084_v35  ;;  %v493_v45 = vmul.f32 %v794_v38, %v1084_v35  ;;  %v773_v46 = vadd.f32 %v772_v42, %v771_v39  ;;  %v797_v47 = vadd.f32 %v796_v43, %v795_v40 }
 0x146   :  { %v508_v48 = vadd.f32 %v1086_v41, %v485_v44  ;;  %v516_v49 = vadd.f32 %v1086_v41, %v493_v45  ;;  %v486_v50 = vmul.f32 %v773_v46, %v1084_v35  ;;  %v494_v51 = vmul.f32 %v797_v47, %v1084_v35 }
 0x148   :  { %v509_v52 = vadd.f32 %v1086_v41, %v486_v50  ;;  %v517_v53 = vadd.f32 %v1086_v41, %v494_v51  ;;  %v774_v54 = vpop.f32.mrb[4].mxu0  ;;  %v798_v55 = vpop.f32.mrb[4].mxu1  ;;  %v524_v56 = vmax.f32 %v508_v48, 0.0  ;;  %v532_v57 = vmax.f32 %v516_v49, 0.0 }
 0x149   :  { %v775_v58 = vpop.f32.mrb[5].mxu0  ;;  %v799_v59 = vpop.f32.mrb[5].mxu1 }
 0x14a   :  { %v525_v60 = vmax.f32 %v509_v52, 0.0  ;;  %v533_v61 = vmax.f32 %v517_v53, 0.0  ;;  %v776_v62 = vadd.f32 %v775_v58, %v774_v54  ;;  %v800_v63 = vadd.f32 %v799_v59, %v798_v55  ;;  %v777_v0 = vpop.f32.mrb[6].mxu0  ;;  %v801_v1 = vpop.f32.mrb[6].mxu1 }
 0x14b   :  { %v778_v2 = vpop.f32.mrb[7].mxu0  ;;  %v802_v3 = vpop.f32.mrb[7].mxu1 }
 0x14c   :  { %v708_v4 = vpack.c.bf16 %v525_v60, %v524_v56  ;;  %v728_v5 = vpack.c.bf16 %v533_v61, %v532_v57  ;;  %v487_v6 = vmul.f32 %v776_v62, %v1084_v35  ;;  %v495_v7 = vmul.f32 %v800_v63, %v1084_v35 }
 0x14d   :  { %v779_v8 = vadd.f32 %v778_v2, %v777_v0  ;;  %v803_v9 = vadd.f32 %v802_v3, %v801_v1 }
 0x14e   :  { %709 = vst [vmem:[#allocation11] sm:$0xff] %v708_v4   ;;  %748 = vst [vmem:[#allocation11 + $0x20] sm:$0xff] %v728_v5   ;;  %v510_v10 = vadd.f32 %v1086_v41, %v487_v6  ;;  %v518_v11 = vadd.f32 %v1086_v41, %v495_v7 }
 0x14f   :  { %v488_v12 = vmul.f32 %v779_v8, %v1084_v35  ;;  %v496_v13 = vmul.f32 %v803_v9, %v1084_v35 }
 0x150   :  { %v780_v14 = vpop.f32.mrb[8].mxu0  ;;  %v804_v15 = vpop.f32.mrb[8].mxu1  ;;  %v526_v24 = vmax.f32 %v510_v10, 0.0  ;;  %v534_v25 = vmax.f32 %v518_v11, 0.0 }
 0x151   :  { %v511_v16 = vadd.f32 %v1086_v41, %v488_v12  ;;  %v519_v17 = vadd.f32 %v1086_v41, %v496_v13  ;;  %v781_v18 = vpop.f32.mrb[9].mxu0  ;;  %v805_v19 = vpop.f32.mrb[9].mxu1 }
 0x152   :  { %v782_v20 = vadd.f32 %v781_v18, %v780_v14  ;;  %v806_v21 = vadd.f32 %v805_v19, %v804_v15  ;;  %v783_v22 = vpop.f32.mrb[10].mxu0  ;;  %v807_v23 = vpop.f32.mrb[10].mxu1 }
 0x153   :  { %v527_v26 = vmax.f32 %v511_v16, 0.0  ;;  %v535_v27 = vmax.f32 %v519_v17, 0.0  ;;  %v784_v28 = vpop.f32.mrb[11].mxu0  ;;  %v808_v29 = vpop.f32.mrb[11].mxu1 }
 0x154   :  { %v489_v30 = vmul.f32 %v782_v20, %v1084_v35  ;;  %v497_v31 = vmul.f32 %v806_v21, %v1084_v35  ;;  %v785_v32 = vadd.f32 %v784_v28, %v783_v22  ;;  %v809_v33 = vadd.f32 %v808_v29, %v807_v23 }
 0x155   :  { %v713_v34 = vpack.c.bf16 %v527_v26, %v526_v24  ;;  %v733_v36 = vpack.c.bf16 %v535_v27, %v534_v25 }
 0x156   :  { %v512_v37 = vadd.f32 %v1086_v41, %v489_v30  ;;  %v520_v38 = vadd.f32 %v1086_v41, %v497_v31  ;;  %v490_v39 = vmul.f32 %v785_v32, %v1084_v35  ;;  %v498_v40 = vmul.f32 %v809_v33, %v1084_v35 }
 0x157   :  { %745 = vst [vmem:[#allocation11 + $0x8] sm:$0xff] %v713_v34   ;;  %749 = vst [vmem:[#allocation11 + $0x28] sm:$0xff] %v733_v36  }
 0x158   :  { %v513_v42 = vadd.f32 %v1086_v41, %v490_v39  ;;  %v521_v43 = vadd.f32 %v1086_v41, %v498_v40  ;;  %v786_v44 = vpop.f32.mrb[12].mxu0  ;;  %v810_v45 = vpop.f32.mrb[12].mxu1  ;;  %v528_v46 = vmax.f32 %v512_v37, 0.0  ;;  %v536_v47 = vmax.f32 %v520_v38, 0.0 }
 0x159   :  { %v787_v48 = vpop.f32.mrb[13].mxu0  ;;  %v811_v49 = vpop.f32.mrb[13].mxu1 }
 0x15a   :  { %v529_v50 = vmax.f32 %v513_v42, 0.0  ;;  %v537_v51 = vmax.f32 %v521_v43, 0.0  ;;  %v788_v52 = vadd.f32 %v787_v48, %v786_v44  ;;  %v812_v53 = vadd.f32 %v811_v49, %v810_v45  ;;  %v789_v54 = vpop.f32.mrb[14].mxu0  ;;  %v813_v55 = vpop.f32.mrb[14].mxu1 }
 0x15b   :  { %v790_v56 = vpop.f32.mrb[15].mxu0  ;;  %v814_v57 = vpop.f32.mrb[15].mxu1 }
 0x15c   :  { %v718_v58 = vpack.c.bf16 %v529_v50, %v528_v46  ;;  %v738_v59 = vpack.c.bf16 %v537_v51, %v536_v47  ;;  %v491_v60 = vmul.f32 %v788_v52, %v1084_v35  ;;  %v499_v61 = vmul.f32 %v812_v53, %v1084_v35 }
 0x15d   :  { %v791_v62 = vadd.f32 %v790_v56, %v789_v54  ;;  %v815_v63 = vadd.f32 %v814_v57, %v813_v55 }
 0x15e   :  { %746 = vst [vmem:[#allocation11 + $0x10] sm:$0xff] %v718_v58   ;;  %750 = vst [vmem:[#allocation11 + $0x30] sm:$0xff] %v738_v59   ;;  %v514_v0 = vadd.f32 %v1086_v41, %v491_v60  ;;  %v522_v1 = vadd.f32 %v1086_v41, %v499_v61 }
 0x15f   :  { %v492_v2 = vmul.f32 %v791_v62, %v1084_v35  ;;  %v500_v3 = vmul.f32 %v815_v63, %v1084_v35 }
 0x160   :  { %v530_v6 = vmax.f32 %v514_v0, 0.0  ;;  %v538_v7 = vmax.f32 %v522_v1, 0.0 }
 0x161   :  { %v515_v4 = vadd.f32 %v1086_v41, %v492_v2  ;;  %v523_v5 = vadd.f32 %v1086_v41, %v500_v3 }
 0x163   :  { %v531_v8 = vmax.f32 %v515_v4, 0.0  ;;  %v539_v9 = vmax.f32 %v523_v5, 0.0 }
 0x165   :  { %v723_v10 = vpack.c.bf16 %v531_v8, %v530_v6  ;;  %v743_v11 = vpack.c.bf16 %v539_v9, %v538_v7 }
 0x167   :  { %747 = vst [vmem:[#allocation11 + $0x18] sm:$0xff] %v723_v10   ;;  %751 = vst [vmem:[#allocation11 + $0x38] sm:$0xff] %v743_v11  }
 0x168   :  { %980 = shalt.err (!%p977_p8)
}
 0x169   :  { %s981_s19 = scalar_lea.hbm %s1139_s4, 1024 }
 0x16a   :  { %p982_p9 = scmp.ne.s32.totalorder %s1139_s4, %s981_s19  ;;  %p985_p10 = scmp.lt.u32.totalorder %s981_s19, %s1139_s4 }
 0x16c   :  { %p987_p11 = pnand %p985_p10, %p982_p9 }
 0x16e   :  { %990 = shalt.err (!%p987_p11)
}
 0x16f   :  { %631 = dma.vmem_to_hbm [thread:$0]  %s626_s15, 1024, %s1139_s4, [#allocation5], %s1000_s25, %s1000_s25, %s1001_s26  }
 0x170   :  { %997 = dma.done.wait [#allocation5], 1024  }
 0x171   :  { %998 = vsyncadd [#allocation5], 4294966272 }
 0x172   :  { %635 = vsyncpa [#allocation4], 1 }
 0x173   :  { %636 = vsyncpa [#allocation7], 1 }
 0x174   :  { %637 = vsyncpa [#allocation10], 1 }
 0x175   :  { %638 = vsyncpa [#allocation5], 1 }

// kernel: _lambda_.33
= control target key start
LH: loop header
LB: loop body
LE: loop exit
PB: predicated region body
PF: predicated region fallthrough
CT: control target
= control target key end

     0   :  { %s1650_s0 = inlined_call_operand.hbm [shape: bf16[32,1152], index: 0, kind: input, shape index: {}]   ;;  %s1651_s1 = inlined_call_operand.hbm [shape: bf16[1152,128], index: 1, kind: input, shape index: {}]   ;;  %s1652_s2 = inlined_call_operand.hbm [shape: f32[1,128], index: 2, kind: input, shape index: {}]   ;;  %s1653_s3 = inlined_call_operand.hbm [shape: f32[1,128], index: 3, kind: input, shape index: {}]   ;;  %s1654_s4 = inlined_call_operand.hbm [shape: bf16[32,128], index: 4, kind: output, shape index: {}]  }
   0x1   :  { %1659 = sst [smem:[#allocation17_spill]] %s1650_s0 }
   0x2   :  { %1660 = sst [smem:[#allocation18_spill]] %s1652_s2 }
   0x3   :  { %9 = vsyncpa [#allocation4], 0 }
   0x4   :  { %11 = vsyncpa [#allocation4 + $0x1], 0 }
   0x5   :  { %12 = vsyncpa [#allocation7], 0 }
   0x6   :  { %14 = vsyncpa [#allocation7 + $0x1], 0 }
   0x7   :  { %15 = vsyncpa [#allocation10], 0 }
   0x8   :  { %16 = vsyncpa [#allocation5], 0  ;;  %s1363_s15 = smov 0   ;;  %s1365_s16 = smov 0  }
   0x9   :  { %s1367_s17 = smov 0   ;;  %s1369_s18 = smov 0  }
   0xa   :  { %s1371_s19 = smov 0   ;;  %s1373_s20 = smov 0  }
   0xb LB: > { %s1392_s21 = sadd.s32 4294967295, %s1323_s20   ;;  %s50_s22 = sadd.s32 1, %s1311_s17  ;;  %s1323_s20 = sphi %s1373_s20, %s22_s20   ;;  %s1319_s19 = sphi %s1371_s19, %s1678_s19   ;;  %s1315_s18 = sphi %s1369_s18, %s1677_s18   ;;  %s1311_s17 = sphi %s1367_s17, %s1676_s17   ;;  %s1307_s16 = sphi %s1365_s16, %s1675_s16   ;;  %s1303_s15 = sphi %s1363_s15, %s1674_s15  }
   0xc   : > { %p57_p0 = scmp.ne.s32.totalorder %s1311_s17, %s1307_s16  ;;  %p58_p1 = scmp.eq.s32.totalorder %s1323_s20, 0 }
   0xd   : > { %p63_p2 = scmp.ne.s32.totalorder %s1307_s16, %s1303_s15  ;;  %p1655_p3 = scmp.eq.s32.totalorder %s1392_s21, 0 }
   0xe   : > { %p59_p4 = por %p58_p1, %p57_p0  ;;  %p857_p5 = scmp.ge.s32.totalorder %s1323_s20, 1 }
   0xf   : > { %p1403_p6 = por %p1655_p3, %p63_p2  ;;  %p182_p7 = scmp.lt.s32.totalorder %s1323_s20, 4 }
  0x10   : > { %s1325_s25 = smov [#allocation8]   ;;  %p1019_p10 = scmp.lt.s32.totalorder %s1323_s20, 3 }
  0x11   : > { %s1661_s23 = scalar_select %p1403_p6, 1, 0 }
  0x12   : > { %p1408_p8 = pnand %p857_p5, %p182_p7  ;;  %s197_s26 = sshll.u32 %s1325_s25, 4  ;;  %s198_s26 = int_to_ptr.vmem [resolvable:$true] %s197_s26 }
  0x13   : > { %p1421_p12 = pnand %p1019_p10, %p59_p4  ;;  %s1326_s29 = smov [#allocation9]  }
  0x14   : > { %s1662_s24 = scalar_select %p1408_p8, 1, 0 }
  0x15   : > { %p1003_p9 = pneg %p1408_p8  ;;  %s210_s30 = sshll.u32 %s1326_s29, 4  ;;  %s211_s30 = int_to_ptr.vmem [resolvable:$true] %s210_s30 }
  0x16   : > { %s1664_s28 = scalar_select %p1421_p12, 1, 0 }
  0x17   : > { %p1417_p11 = pnand %p1003_p9, %p1655_p3  ;;  %s1665_s2 = sld [smem:[#allocation18_spill]] }
  0x19   : > { %p1117_p0 = pneg %p1417_p11 }
  0x1d   : > { %s1115_s7 = scalar_lea.hbm %s1665_s2, 16 }
  0x1e   : > { %p1116_p13 = scmp.ne.s32.totalorder %s1665_s2, %s1115_s7  ;;  %p1122_p4 = scmp.lt.u32.totalorder %s1115_s7, %s1665_s2 }
  0x20   : > { %p1118_p1 = pnand %p1117_p0, %p1116_p13 }
  0x22   : > { %p1119_p2 = pneg %p1118_p1 }
  0x24   : > { %p1124_p5 = pnand %p1122_p4, %p1119_p2 }
  0x26   : > { %1127 = shalt.err (!%p1124_p5)
}
  0x27   : > { %s1128_s12 = scalar_lea.vmem %s198_s26, 16  ;;  %s1135_s13 = scalar_lea.vmem %s198_s26, 32 }
  0x28   : > { %p1129_p7 = scmp.ne.s32.totalorder %s198_s26, %s1128_s12  ;;  %p1136_p3 = scmp.lt.s32.totalorder %s198_s26, %s198_s26 }
  0x29   : > { %p1137_p6 = scmp.lt.s32.totalorder %s1135_s13, %s1128_s12 }
  0x2a   : > { %p1131_p9 = pnand %p1129_p7, %p1117_p0 }
  0x2b   : > { %p1138_p8 = por %p1137_p6, %p1136_p3 }
  0x2c   : > { %p1132_p10 = pneg %p1131_p9 }
  0x2e   : > { %p1139_p12 = pnand %p1138_p8, %p1132_p10 }
  0x30   : > { %1142 = shalt.err (!%p1139_p12)
}
  0x31   : > { %1006 = dma.hbm_to_vmem [thread:$0]  (!%p1417_p11), %s1665_s2, 16, %s198_s26, [#allocation7]  }
  0x32   : > { %s34_s25 = sadd.s32 1, %s1319_s19  ;;  %s1143_s6 = scalar_lea.hbm %s1653_s3, 16 }
  0x33   : > { %p1144_p3 = scmp.ne.s32.totalorder %s1653_s3, %s1143_s6  ;;  %p1150_p12 = scmp.lt.u32.totalorder %s1143_s6, %s1653_s3 }
  0x35   : > { %p1146_p6 = pnand %p1144_p3, %p1117_p0 }
  0x37   : > { %p1147_p8 = pneg %p1146_p6 }
  0x39   : > { %p1152_p13 = pnand %p1150_p12, %p1147_p8 }
  0x3b   : > { %1155 = shalt.err (!%p1152_p13)
}
  0x3c   : > { %s1156_s26 = scalar_lea.vmem %s211_s30, 16  ;;  %s1163_s11 = scalar_lea.vmem %s211_s30, 32 }
  0x3d   : > { %p1157_p1 = scmp.ne.s32.totalorder %s211_s30, %s1156_s26  ;;  %p1164_p5 = scmp.lt.s32.totalorder %s211_s30, %s211_s30 }
  0x3e   : > { %p1165_p7 = scmp.lt.s32.totalorder %s1163_s11, %s1156_s26 }
  0x3f   : > { %p1159_p2 = pnand %p1157_p1, %p1117_p0 }
  0x40   : > { %p1166_p9 = por %p1165_p7, %p1164_p5 }
  0x41   : > { %p1160_p4 = pneg %p1159_p2 }
  0x43   : > { %p1167_p10 = pnand %p1166_p9, %p1160_p4 }
  0x45   : > { %1170 = shalt.err (!%p1167_p10)
}
  0x46   : > { %1009 = dma.hbm_to_vmem [thread:$0]  (!%p1417_p11), %s1653_s3, 16, %s211_s30, [#allocation10]  }
  0x47   : > { %p35_p0 = scmp.ge.s32.totalorder %s34_s25, 3  ;;  %s1469_s14 = sand.u32 1, %s1311_s17  }
  0x48   : > { %s983_s15 = smul.u32 48, %s1469_s14  ;;  %s1666_s0 = sld [smem:[#allocation17_spill]] }
  0x49   : > { %s1680_s25 = smov (%p35_p0, %s34_s25), 0  ;;  %s908_s27 = smul.u32 192, %s1319_s19 }
  0x4a   : > { %s46_s29 = ssub.s32 %s1319_s19, %s1680_s25  ;;  %s225_s5 = scalar_lea.vmem [#allocation3], %s983_s15 }
  0x4b   : > { %s235_s6 = sshll.u32 %s225_s5, 4  ;;  %p48_p3 = scmp.eq.s32.totalorder %s46_s29, 0  ;;  %s1482_s6 = int_to_ptr.vmem [resolvable:$true] %s235_s6 }
  0x4c   : > { %s222_s10 = scalar_lea.sflag [#allocation4], %s1469_s14  ;;  %p1667_p6 = scmp.ne.s32.totalorder %s1664_s28, 0 }
  0x4d   : > { %s1487_s9 = scalar_select %p48_p3, %s1311_s17, %s50_s22  }
  0x4e   : > { %s1480_s30 = scalar_lea.hbm %s1666_s0, %s908_s27  ;;  %p1173_p8 = pneg %p1667_p6 }
  0x4f   : > { %s1171_s26 = scalar_lea.hbm %s1480_s30, 768  ;;  %s1176_s13 = scalar_lea.hbm %s1666_s0, 2304 }
  0x50   : > { %p1172_p11 = scmp.ne.s32.totalorder %s1480_s30, %s1171_s26  ;;  %p1177_p1 = scmp.lt.u32.totalorder %s1480_s30, %s1666_s0 }
  0x51   : > { %p1178_p2 = scmp.lt.u32.totalorder %s1176_s13, %s1171_s26  ;;  %p1180_p5 = scmp.lt.u32.totalorder %s1171_s26, %s1480_s30 }
  0x52   : > { %p1174_p12 = pnand %p1173_p8, %p1172_p11 }
  0x53   : > { %p1179_p4 = por %p1178_p2, %p1177_p1 }
  0x54   : > { %p1175_p13 = pneg %p1174_p12 }
  0x55   : > { %p1181_p7 = por %p1180_p5, %p1179_p4 }
  0x57   : > { %p1182_p9 = pnand %p1181_p7, %p1175_p13 }
  0x59   : > { %1185 = shalt.err (!%p1182_p9)
}
  0x5a   : > { %s1186_s22 = scalar_lea.vmem %s1482_s6, 768  ;;  %s1327_s29 = smov [#allocation3]  }
  0x5b   : > { %p1187_p10 = scmp.ne.s32.totalorder %s1482_s6, %s1186_s22  ;;  %s1191_s5 = sshll.u32 %s1327_s29, 4  ;;  %s1192_s5 = int_to_ptr.vmem [resolvable:$false] %s1191_s5 }
  0x5c   : > { %s1193_s7 = scalar_lea.vmem %s1192_s5, 1536  ;;  %p1194_p11 = scmp.lt.s32.totalorder %s1482_s6, %s1192_s5 }
  0x5d   : > { %p1189_p0 = pnand %p1187_p10, %p1173_p8  ;;  %p1195_p12 = scmp.lt.s32.totalorder %s1193_s7, %s1186_s22 }
  0x5f   : > { %p1190_p3 = pneg %p1189_p0  ;;  %p1196_p1 = por %p1195_p12, %p1194_p11 }
  0x61   : > { %p1197_p2 = pnand %p1196_p1, %p1190_p3 }
  0x63   : > { %1200 = shalt.err (!%p1197_p2)
}
  0x64   : > { %s1328_s8 = smov 576   ;;  %s1329_s26 = smov 192  }
  0x65   : > { %s1330_s11 = smov 12   ;;  %s245_s12 = sand.u32 1, %s1323_s20  }
  0x66   : > { %1013 = dma.hbm_to_vmem [thread:$0]  (!%p1667_p6), %s1480_s30, 768, %s1482_s6, %s222_s10, %s1328_s8, %s1329_s26, %s1330_s11  }
  0x67   : > { %s984_s13 = smul.u32 192, %s1469_s14  ;;  %s1527_s0 = scalar_lea.sflag [#allocation7], %s245_s12 }
  0x68   : > { %s909_s15 = smul.u32 3072, %s1319_s19  ;;  %s1206_s30 = scalar_lea.hbm %s1651_s1, 9216 }
  0x69   : > { %s249_s5 = scalar_lea.vmem [#allocation6], %s984_s13 }
  0x6a   : > { %s1523_s29 = scalar_lea.hbm %s1651_s1, %s909_s15  ;;  %s257_s7 = sshll.u32 %s249_s5, 4  ;;  %s1525_s7 = int_to_ptr.vmem [resolvable:$true] %s257_s7 }
  0x6b   : > { %s1201_s2 = scalar_lea.hbm %s1523_s29, 3072  ;;  %p1207_p7 = scmp.lt.u32.totalorder %s1523_s29, %s1651_s1 }
  0x6c   : > { %p1202_p13 = scmp.ne.s32.totalorder %s1523_s29, %s1201_s2  ;;  %p1208_p9 = scmp.lt.u32.totalorder %s1206_s30, %s1201_s2 }
  0x6d   : > { %p1210_p0 = scmp.lt.u32.totalorder %s1201_s2, %s1523_s29 }
  0x6e   : > { %p1204_p4 = pnand %p1202_p13, %p1173_p8  ;;  %p1209_p10 = por %p1208_p9, %p1207_p7 }
  0x70   : > { %p1205_p5 = pneg %p1204_p4  ;;  %p1211_p3 = por %p1210_p0, %p1209_p10 }
  0x72   : > { %p1212_p11 = pnand %p1211_p3, %p1205_p5 }
  0x74   : > { %1215 = shalt.err (!%p1212_p11)
}
  0x75   : > { %s1216_s26 = scalar_lea.vmem %s1525_s7, 3072  ;;  %s1331_s11 = smov [#allocation6]  }
  0x76   : > { %p1217_p12 = scmp.ne.s32.totalorder %s1525_s7, %s1216_s26  ;;  %s1221_s12 = sshll.u32 %s1331_s11, 4  ;;  %s1222_s12 = int_to_ptr.vmem [resolvable:$false] %s1221_s12 }
  0x77   : > { %s1223_s13 = scalar_lea.vmem %s1222_s12, 6144  ;;  %p1224_p13 = scmp.lt.s32.totalorder %s1525_s7, %s1222_s12 }
  0x78   : > { %p1219_p1 = pnand %p1217_p12, %p1173_p8  ;;  %p1225_p4 = scmp.lt.s32.totalorder %s1223_s13, %s1216_s26 }
  0x7a   : > { %p1220_p2 = pneg %p1219_p1  ;;  %p1226_p7 = por %p1225_p4, %p1224_p13 }
  0x7c   : > { %p1227_p9 = pnand %p1226_p7, %p1220_p2 }
  0x7e   : > { %1230 = shalt.err (!%p1227_p9)
}
  0x7f   : > { %s1332_s2 = smov 64   ;;  %s1333_s15 = smov 4  }
  0x80   : > { %1016 = dma.hbm_to_vmem [thread:$0]  (!%p1667_p6), %s1523_s29, 3072, %s1525_s7, %s1527_s0, %s1332_s2, %s1332_s2, %s1333_s15  }
  0x81   : > { %p1668_p8 = scmp.ne.s32.totalorder %s1662_s24, 0 }
  0x82   : > { %s271_s27 = sand.u32 (!%p1668_p8), 1, %s1307_s16   ;;  %p1669_p5 = scmp.ne.s32.totalorder (!%p1668_p8), %s1661_s23, 0 }
  0x83   : > { %269 = sbr.rel (%p1668_p8) target bundleno = 463 (0x1cf), region = 36  ;;  %s272_s5 = scalar_lea.sflag (!%p1668_p8), [#allocation4], %s271_s27 }
  0x84   : > { %s985_s22 = smul.u32 (!%p1668_p8), 48, %s271_s27 }
  0x86   : > { %s1556_s14 = scalar_lea.vmem (!%p1668_p8), [#allocation3], %s985_s22 }
  0x8a   : > { %1282 = dma.done.wait (%p1669_p5), %s272_s5, 768  }
  0x8b   : > { %1284 = vsyncadd (%p1669_p5), %s272_s5, 4294966528  ;;  %s280_s6 = sand.u32 1, %s1392_s21   ;;  %s986_s28 = smul.u32 192, %s271_s27 }
  0x8c   : > { %s281_s0 = scalar_lea.sflag [#allocation7], %s280_s6 }
  0x8d   : > { %s1563_s29 = scalar_lea.vmem [#allocation6], %s986_s28 }
  0x8e   : > { %1286 = dma.done.wait (%p1669_p5), %s281_s0, 3072  }
  0x8f   : > { %1288 = vsyncadd (%p1669_p5), %s281_s0, 4294964224  ;;  %p1670_p6 = scmp.eq.s32.totalorder %s1392_s21, 0 }
  0x91   : > { %1290 = dma.done.wait (%p1670_p6), [#allocation7], 16   ;;  %p1671_p10 = pmov %p1670_p6 }
  0x92   : > { %p1672_p0 = pmov %p1670_p6 }
  0x93   : > { %1292 = vsyncadd (%p1671_p10), [#allocation7], 4294967280 }
  0x94   : > { %1294 = dma.done.wait (%p1672_p0), [#allocation10], 16   ;;  %p1673_p3 = pmov %p1672_p0 }
  0x95   : > { %p866_p11 = scmp.ne.s32.totalorder %s1315_s18, 0 }
  0x96   : > { %1296 = vsyncadd (%p1673_p3), [#allocation10], 4294967280  ;;  %v1334_v0 = vmov (!%p866_p11), 0.0  }
  0x97   : > { %325 = sbr.rel (%p866_p11) target bundleno = 158 (0x9e), region = 56  ;;  %326 = vst [vmem:[#allocation2] sm:$0xff] (!%p866_p11), %v1334_v0  ;;  %327 = vst [vmem:[#allocation2 + $0x8] sm:$0xff] (!%p866_p11), %v1334_v0 }
  0x98   : > { %328 = vst [vmem:[#allocation2 + $0x10] sm:$0xff] (!%p866_p11), %v1334_v0  ;;  %329 = vst [vmem:[#allocation2 + $0x18] sm:$0xff] (!%p866_p11), %v1334_v0 }
  0x9e PF: > { %v1083_v1 = vld [vmem:[%s1563_s29 + $0x40] sm:$0xff]   ;;  %v1086_v4 = vld [vmem:[%s1563_s29 + $0x48] sm:$0xff]   ;;  %v1089_v7 = vld [vmem:[%s1563_s29 + $0x50] sm:$0xff]   ;;  %p897_p12 = scmp.ne.s32.totalorder %s1315_s18, 2 }
  0x9f   : > { %v1084_v2 = vld [vmem:[%s1563_s29] sm:$0xff]   ;;  %925 = vmatprep.subr.bf16.mxu0 %v1083_v1  ;;  %v1087_v5 = vld [vmem:[%s1563_s29 + $0x8] sm:$0xff]   ;;  %v1090_v8 = vld [vmem:[%s1563_s29 + $0x10] sm:$0xff]  }
  0xa0   : > { %v1085_v3 = vld [vmem:[%s1563_s29 + $0x80] sm:$0xff]   ;;  %926 = vmatpush3.bf16.msra.mxu0 %v1084_v2  ;;  %v1088_v6 = vld [vmem:[%s1563_s29 + $0x88] sm:$0xff]   ;;  %v1091_v9 = vld [vmem:[%s1563_s29 + $0x90] sm:$0xff]  }
  0xa1   : > { %963 = vmatprep.subr.bf16.mxu1 %v1085_v3  ;;  %927 = vmatprep.subr.bf16.mxu0 %v1086_v4  ;;  %v1092_v10 = vld [vmem:[%s1563_s29 + $0x58] sm:$0xff]   ;;  %v1095_v13 = vld [vmem:[%s1563_s29 + $0x60] sm:$0xff]   ;;  %v1098_v16 = vld [vmem:[%s1563_s29 + $0x68] sm:$0xff]  }
  0xa2   : > { %964 = vmatpush3.bf16.msra.mxu1 %v1085_v3  ;;  %v1093_v11 = vld [vmem:[%s1563_s29 + $0x18] sm:$0xff]   ;;  %v1097_v14 = vld [vmem:[%s1563_s29 + $0xa0] sm:$0xff]   ;;  %v1100_v17 = vld [vmem:[%s1563_s29 + $0xa8] sm:$0xff]  }
  0xa3   : > { %965 = vmatprep.subr.bf16.mxu1 %v1088_v6  ;;  %v1094_v12 = vld [vmem:[%s1563_s29 + $0x98] sm:$0xff]   ;;  %v1096_v15 = vld [vmem:[%s1563_s29 + $0x20] sm:$0xff]   ;;  %v1099_v18 = vld [vmem:[%s1563_s29 + $0x28] sm:$0xff]  }
  0xa4   : > { %928 = vmatpush3.bf16.msra.mxu0 %v1087_v5  ;;  %v1101_v19 = vld [vmem:[%s1563_s29 + $0x70] sm:$0xff]   ;;  %v1104_v22 = vld [vmem:[%s1563_s29 + $0x78] sm:$0xff]   ;;  %v330_v37 = vld [vmem:[#allocation2] sm:$0xff] }
  0xa5   : > { %929 = vmatprep.subr.bf16.mxu0 %v1089_v7  ;;  %v1102_v20 = vld [vmem:[%s1563_s29 + $0x30] sm:$0xff]   ;;  %v1106_v23 = vld [vmem:[%s1563_s29 + $0xb8] sm:$0xff]   ;;  %v331_v42 = vld [vmem:[#allocation2 + $0x8] sm:$0xff] }
  0xa6   : > { %966 = vmatpush3.bf16.msra.mxu1 %v1088_v6  ;;  %v1103_v21 = vld [vmem:[%s1563_s29 + $0xb0] sm:$0xff]   ;;  %v1105_v26 = vld [vmem:[%s1563_s29 + $0x38] sm:$0xff]   ;;  %v898_v61 = vld [vmem:[#allocation8] ss:$0 sm:$0xff] (!%p897_p12) }
  0xa7   : > { %967 = vmatprep.subr.bf16.mxu1 %v1091_v9  ;;  %v1109_v24 = vld [vmem:[%s1556_s14 + $0x4] ss:$12 sps:$4 sm:$0xff]   ;;  %v1110_v25 = vld [vmem:[%s1556_s14 + $0x8] ss:$12 sps:$4 sm:$0xff]   ;;  %v1107_v27 = vld [vmem:[%s1556_s14] ss:$12 sps:$4 sm:$0xff]  }
  0xa8   : > { %930 = vmatpush3.bf16.msra.mxu0 %v1090_v8  ;;  %598 = vmatprep.mubr.bf16.mxu0 %v1109_v24  ;;  %v1112_v28 = vld [vmem:[%s1556_s14 + $0x1c] ss:$12 sps:$4 sm:$0xff]   ;;  %v1111_v29 = vld [vmem:[%s1556_s14 + $0x20] ss:$12 sps:$4 sm:$0xff]   ;;  %v1114_v30 = vld [vmem:[%s1556_s14 + $0x18] ss:$12 sps:$4 sm:$0xff]  }
  0xa9   : > { %931 = vmatprep.subr.bf16.mxu0 %v1092_v10  ;;  %979 = vmatprep.mubr.bf16.mxu1 %v1110_v25  ;;  %v332_v51 = vld [vmem:[#allocation2 + $0x10] sm:$0xff]  ;;  %v333_v55 = vld [vmem:[#allocation2 + $0x18] sm:$0xff]  ;;  %v899_v0 = vld [vmem:[#allocation9] ss:$0 sm:$0xff] (!%p897_p12) }
  0xaa   : > { %968 = vmatpush3.bf16.msra.mxu1 %v1091_v9 }
  0xab   : > { %969 = vmatprep.subr.bf16.mxu1 %v1094_v12 }
  0xac   : > { %932 = vmatpush3.bf16.msra.mxu0 %v1093_v11 }
  0xad   : > { %933 = vmatprep.subr.bf16.mxu0 %v1095_v13 }
  0xae   : > { %970 = vmatpush3.bf16.msra.mxu1 %v1094_v12 }
  0xaf   : > { %971 = vmatprep.subr.bf16.mxu1 %v1097_v14 }
  0xb0   : > { %934 = vmatpush3.bf16.msra.mxu0 %v1096_v15 }
  0xb1   : > { %935 = vmatprep.subr.bf16.mxu0 %v1098_v16 }
  0xb2   : > { %972 = vmatpush3.bf16.msra.mxu1 %v1097_v14 }
  0xb3   : > { %973 = vmatprep.subr.bf16.mxu1 %v1100_v17 }
  0xb4   : > { %936 = vmatpush3.bf16.msra.mxu0 %v1099_v18 }
  0xb5   : > { %937 = vmatprep.subr.bf16.mxu0 %v1101_v19 }
  0xb6   : > { %974 = vmatpush3.bf16.msra.mxu1 %v1100_v17 }
  0xb7   : > { %975 = vmatprep.subr.bf16.mxu1 %v1103_v21 }
  0xb8   : > { %938 = vmatpush3.bf16.msra.mxu0 %v1102_v20 }
  0xb9   : > { %939 = vmatprep.subr.bf16.mxu0 %v1104_v22 }
  0xba   : > { %976 = vmatpush3.bf16.msra.mxu1 %v1103_v21 }
  0xbb   : > { %977 = vmatprep.subr.bf16.mxu1 %v1106_v23 }
  0xbc   : > { %940 = vmatpush3.bf16.msra.mxu0 %v1105_v26 }
  0xbe   : > { %978 = vmatpush3.bf16.msra.mxu1 %v1106_v23 }
  0xbf   : > { %599 = vmatmul.mubr.bf16.vlgmr.msra.gmra.mrb[0].mxu0 %v1107_v27 }
  0xc0   : > { %606 = vmatprep.mubr.bf16.mxu0 %v1112_v28 }
  0xc1   : > { %980 = vmatmul.mubr.bf16.vlgmr.msra.gmra.mrb[0].mxu1 %v1111_v29 }
  0xc7   : > { %607 = vmatmul.mubr.bf16.gmra.mrb[4].mxu0 %v1114_v30 }
 0x192   : > { %v941_v31 = vpop.f32.mrb[0].mxu0 }
 0x193   : > { %v942_v32 = vpop.f32.mrb[1].mxu0 }
 0x194   : > { %v943_v33 = vadd.f32 %v942_v32, %v941_v31  ;;  %v944_v34 = vpop.f32.mrb[2].mxu0  ;;  %v981_v35 = vpop.f32.mrb[0].mxu1 }
 0x195   : > { %v945_v36 = vpop.f32.mrb[3].mxu0  ;;  %v649_v38 = vpop.f32.mrb[1].mxu1 }
 0x196   : > { %v946_v39 = vadd.f32 %v945_v36, %v944_v34  ;;  %v650_v40 = vadd.f32 %v943_v33, %v649_v38  ;;  %v982_v41 = vpop.f32.mrb[2].mxu1 }
 0x197   : > { %v652_v43 = vpop.f32.mrb[3].mxu1 }
 0x198   : > { %v664_v44 = vadd.f32 %v650_v40, %v330_v37  ;;  %v653_v45 = vadd.f32 %v946_v39, %v652_v43 }
 0x19a   : > { %668 = vst [vmem:[#allocation2] sm:$0xff] %v664_v44  ;;  %v665_v46 = vadd.f32 %v653_v45, %v331_v42  ;;  %v947_v47 = vpop.f32.mrb[4].mxu0 }
 0x19b   : > { %v948_v48 = vpop.f32.mrb[5].mxu0 }
 0x19c   : > { %669 = vst [vmem:[#allocation2 + $0x8] sm:$0xff] %v665_v46  ;;  %v949_v49 = vadd.f32 %v948_v48, %v947_v47  ;;  %v950_v50 = vpop.f32.mrb[6].mxu0 }
 0x19d   : > { %v951_v52 = vpop.f32.mrb[7].mxu0 }
 0x19e   : > { %v658_v53 = vadd.f32 %v981_v35, %v949_v49  ;;  %v952_v54 = vadd.f32 %v951_v52, %v950_v50  ;;  %675 = sbr.rel (%p897_p12) target bundleno = 437 (0x1b5), region = 60 }
 0x1a0   : > { %v666_v56 = vadd.f32 %v658_v53, %v332_v51  ;;  %v661_v57 = vadd.f32 %v982_v41, %v952_v54 }
 0x1a1   : > { %v676_v59 = vld [vmem:[#allocation2] sm:$0xff] (!%p897_p12) }
 0x1a2   : > { %670 = vst [vmem:[#allocation2 + $0x10] sm:$0xff] %v666_v56  ;;  %v667_v58 = vadd.f32 %v661_v57, %v333_v55  ;;  %v687_v62 = vmul.f32 (!%p897_p12), %v898_v61, %v676_v59 }
 0x1a3   : > { %v677_v60 = vld [vmem:[#allocation2 + $0x8] sm:$0xff] (!%p897_p12) }
 0x1a4   : > { %671 = vst [vmem:[#allocation2 + $0x18] sm:$0xff] %v667_v58  ;;  %v688_v63 = vmul.f32 (!%p897_p12), %v898_v61, %v677_v60  ;;  %v698_v5 = vadd.f32 (!%p897_p12), %v899_v0, %v687_v62 }
 0x1a6   : > { %v699_v6 = vadd.f32 %v899_v0, %v688_v63  ;;  %v702_v9 = vmax.f32 %v698_v5, 0.0 }
 0x1a8   : > { %v703_v10 = vmax.f32 %v699_v6, 0.0 }
 0x1a9   : > { %v678_v1 = vld [vmem:[#allocation2 + $0x10] sm:$0xff] }
 0x1aa   : > { %v689_v3 = vmul.f32 %v898_v61, %v678_v1  ;;  %v917_v13 = vpack.c.bf16 %v703_v10, %v702_v9 }
 0x1ab   : > { %v679_v2 = vld [vmem:[#allocation2 + $0x18] sm:$0xff] }
 0x1ac   : > { %v690_v4 = vmul.f32 %v898_v61, %v679_v2  ;;  %v700_v7 = vadd.f32 %v899_v0, %v689_v3  ;;  %918 = vst [vmem:[#allocation11] sm:$0xff] %v917_v13  }
 0x1ae   : > { %v701_v8 = vadd.f32 %v899_v0, %v690_v4  ;;  %v704_v11 = vmax.f32 %v700_v7, 0.0 }
 0x1b0   : > { %v705_v12 = vmax.f32 %v701_v8, 0.0 }
 0x1b2   : > { %v922_v14 = vpack.c.bf16 %v705_v12, %v704_v11 }
 0x1b4   : > { %924 = vst [vmem:[#allocation11 + $0x8] sm:$0xff] %v922_v14  }
 0x1b5 PF: > { %p1022_p1 = scmp.eq.s32.totalorder %s1392_s21, 2  ;;  %s1335_s18 = smov [#allocation11]  }
 0x1b6   : > { %s736_s23 = sshll.u32 %s1335_s18, 4  ;;  %s737_s23 = int_to_ptr.vmem [resolvable:$true] %s736_s23 }
 0x1b7   : > { %s1231_s24 = scalar_lea.vmem %s737_s23, 256  ;;  %p1238_p7 = scmp.lt.s32.totalorder %s737_s23, %s737_s23 }
 0x1b8   : > { %p1232_p2 = scmp.ne.s32.totalorder %s737_s23, %s1231_s24  ;;  %p1239_p9 = scmp.lt.s32.totalorder %s1231_s24, %s1231_s24 }
 0x1ba   : > { %p1233_p13 = pnand %p1232_p2, %p1022_p1  ;;  %p1240_p8 = por %p1239_p9, %p1238_p7 }
 0x1bc   : > { %p1234_p4 = pneg %p1233_p13 }
 0x1be   : > { %p1241_p5 = pnand %p1240_p8, %p1234_p4 }
 0x1c0   : > { %1244 = shalt.err (!%p1241_p5)
}
 0x1c1   : > { %s1245_s10 = scalar_lea.hbm %s1654_s4, 256 }
 0x1c2   : > { %p1246_p6 = scmp.ne.s32.totalorder %s1654_s4, %s1245_s10  ;;  %p1251_p3 = scmp.lt.u32.totalorder %s1245_s10, %s1654_s4 }
 0x1c4   : > { %p1247_p10 = pnand %p1246_p6, %p1022_p1 }
 0x1c6   : > { %p1248_p0 = pneg %p1247_p10 }
 0x1c8   : > { %p1253_p11 = pnand %p1251_p3, %p1248_p0 }
 0x1ca   : > { %1256 = shalt.err (!%p1253_p11)
}
 0x1cb   : > { %s1336_s13 = smov 64   ;;  %s1337_s2 = smov 4  }
 0x1cc   : > { %1000 = dma.vmem_to_hbm [thread:$0]  (%p1022_p1), %s737_s23, 256, %s1654_s4, [#allocation5], %s1336_s13, %s1336_s13, %s1337_s2  }
 0x1cd   : > { %1298 = dma.done.wait (%p1022_p1), [#allocation5], 256  }
 0x1ce   : > { %1300 = vsyncadd (%p1022_p1), [#allocation5], 4294967040 }
 0x1cf PF: > { %s22_s20 = sadd.s32 1, %s1323_s20   ;;  %s1674_s15 = smov %s1307_s16 }
 0x1d0   : > { %p19_p12 = scmp.ge.s32.totalorder %s22_s20, 5   ;;  %s1675_s16 = smov %s1311_s17 }
 0x1d1   : > { %s1676_s17 = smov %s1487_s9  ;;  %s1677_s18 = smov %s1319_s19 }
 0x1d2   : > { %s1678_s19 = smov %s1680_s25  ;;  %21 = sbr.rel (!%p19_p12) target bundleno = 11 (0xb), region = 105 }
 0x1d9   :  { %752 = vsyncpa [#allocation4], 1 }
 0x1da   :  { %754 = vsyncpa [#allocation4 + $0x1], 1 }
 0x1db   :  { %755 = vsyncpa [#allocation7], 1 }
 0x1dc   :  { %757 = vsyncpa [#allocation7 + $0x1], 1 }
 0x1dd   :  { %758 = vsyncpa [#allocation10], 1 }
 0x1de   :  { %759 = vsyncpa [#allocation5], 1 }
 0x1df   :  { %761 = vsyncpa [#allocation5 + $0x1], 1 }

// kernel: _lambda_.34
= control target key start
LH: loop header
LB: loop body
LE: loop exit
PB: predicated region body
PF: predicated region fallthrough
CT: control target
= control target key end

     0   :  { %s1736_s0 = inlined_call_operand.hbm [shape: bf16[32,256], index: 0, kind: input, shape index: {}]   ;;  %s1737_s1 = inlined_call_operand.hbm [shape: bf16[256,512], index: 1, kind: input, shape index: {}]   ;;  %s1738_s2 = inlined_call_operand.hbm [shape: f32[1,512], index: 2, kind: input, shape index: {}]   ;;  %s1739_s3 = inlined_call_operand.hbm [shape: f32[1,512], index: 3, kind: input, shape index: {}]   ;;  %s1740_s4 = inlined_call_operand.hbm [shape: bf16[32,512], index: 4, kind: output, shape index: {}]  }
   0x1   :  { %1757 = sst [smem:[#allocation19_spill]] %s1737_s1 }
   0x2   :  { %9 = vsyncpa [#allocation4], 0 }
   0x3   :  { %10 = vsyncpa [#allocation7], 0 }
   0x4   :  { %12 = vsyncpa [#allocation7 + $0x1], 0 }
   0x5   :  { %13 = vsyncpa [#allocation10], 0 }
   0x6   :  { %15 = vsyncpa [#allocation10 + $0x1], 0 }
   0x7   :  { %16 = vsyncpa [#allocation5], 0 }
   0x8   :  { %18 = vsyncpa [#allocation5 + $0x1], 0  ;;  %s1396_s15 = smov 0   ;;  %s1398_s16 = smov 0  }
   0x9   :  { %s1400_s17 = smov 0   ;;  %s1402_s18 = smov 0  }
   0xa   :  { %s1404_s19 = smov 0   ;;  %s1406_s20 = smov 0  }
   0xb LB: > { %1758 = sst [smem:[#allocation16_spill]] %s1346_s17  ;;  %s39_s21 = sadd.s32 1, %s1354_s19  ;;  %s1358_s20 = sphi %s1406_s20, %s24_s20   ;;  %s1354_s19 = sphi %s1404_s19, %s1792_s19   ;;  %s1350_s18 = sphi %s1402_s18, %s1791_s18   ;;  %s1346_s17 = sphi %s1400_s17, %s1787_s17   ;;  %s1342_s16 = sphi %s1398_s16, %s1790_s16   ;;  %s1338_s15 = sphi %s1396_s15, %s1789_s15  }
   0xc   : > { %s80_s22 = sadd.s32 1, %s1346_s17  ;;  %p41_p0 = scmp.ge.s32.totalorder %s39_s21, 2 }
   0xd   : > { %p1741_p1 = scmp.ne.s32.totalorder %s1346_s17, %s1342_s16  ;;  %p88_p2 = scmp.eq.s32.totalorder %s1358_s20, 0 }
   0xe   : > { %s1794_s21 = smov (%p41_p0, %s39_s21), 0  ;;  %p1038_p6 = scmp.lt.s32.totalorder %s1358_s20, 2 }
   0xf   : > { %1759 = sst [smem:[#allocation17_spill]] %s1794_s21  ;;  %p1436_p3 = por %p88_p2, %p1741_p1 }
  0x10   : > { %s76_s24 = ssub.s32 %s1354_s19, %s1794_s21  ;;  %s216_s25 = sand.u32 1, %s1358_s20  }
  0x11   : > { %p78_p5 = scmp.eq.s32.totalorder %s76_s24, 0  ;;  %s1446_s26 = sand.u32 1, %s1346_s17  }
  0x12   : > { %s907_s28 = sshll.u32 %s1446_s26, 8  ;;  %s967_s29 = sshll.u32 %s1354_s19, 7 }
  0x13   : > { %s1449_s27 = scalar_select %p78_p5, %s1346_s17, %s80_s22  }
  0x14   : > { %s1762_s1 = sld [smem:[#allocation19_spill]]  ;;  %s220_s7 = scalar_lea.vmem [#allocation6], %s907_s28 }
  0x15   : > { %1761 = sst [smem:[#allocation18_spill]] %s1449_s27  ;;  %s230_s8 = sshll.u32 %s220_s7, 4  ;;  %s1458_s8 = int_to_ptr.vmem [resolvable:$true] %s230_s8 }
  0x16   : > { %p1462_p7 = pnand %p1038_p6, %p1436_p3  ;;  %s1466_s10 = scalar_lea.sflag [#allocation7], %s216_s25 }
  0x18   : > { %s1763_s9 = scalar_select %p1462_p7, 1, 0 }
  0x19   : > { %p1472_p9 = pneg %p1462_p7 }
  0x1a   : > { %s1456_s6 = scalar_lea.hbm %s1762_s1, %s967_s29  ;;  %s1155_s22 = scalar_lea.hbm %s1762_s1, 8192 }
  0x1b   : > { %s1150_s11 = scalar_lea.hbm %s1456_s6, 4096  ;;  %p1156_p12 = scmp.lt.u32.totalorder %s1456_s6, %s1762_s1 }
  0x1c   : > { %p1151_p8 = scmp.ne.s32.totalorder %s1456_s6, %s1150_s11  ;;  %p1157_p13 = scmp.lt.u32.totalorder %s1155_s22, %s1150_s11 }
  0x1d   : > { %s1764_s12 = scalar_select %p1472_p9, 1, 0 }
  0x1e   : > { %p1153_p10 = pnand %p1472_p9, %p1151_p8  ;;  %p1158_p0 = por %p1157_p13, %p1156_p12 }
  0x1f   : > { %p1159_p2 = scmp.lt.u32.totalorder %s1150_s11, %s1456_s6 }
  0x20   : > { %p1154_p11 = pneg %p1153_p10 }
  0x21   : > { %p1160_p3 = por %p1159_p2, %p1158_p0 }
  0x23   : > { %p1161_p5 = pnand %p1160_p3, %p1154_p11 }
  0x25   : > { %1164 = shalt.err (!%p1161_p5)
}
  0x26   : > { %s1165_s25 = scalar_lea.vmem %s1458_s8, 4096  ;;  %s1360_s28 = smov [#allocation6]  }
  0x27   : > { %p1166_p6 = scmp.ne.s32.totalorder %s1458_s8, %s1165_s25  ;;  %s1170_s29 = sshll.u32 %s1360_s28, 4  ;;  %s1171_s29 = int_to_ptr.vmem [resolvable:$false] %s1170_s29 }
  0x28   : > { %s1172_s30 = scalar_lea.vmem %s1171_s29, 8192  ;;  %p1173_p4 = scmp.lt.s32.totalorder %s1458_s8, %s1171_s29 }
  0x29   : > { %p1168_p8 = pnand %p1166_p6, %p1472_p9  ;;  %p1174_p1 = scmp.lt.s32.totalorder %s1172_s30, %s1165_s25 }
  0x2b   : > { %p1169_p10 = pneg %p1168_p8  ;;  %p1175_p12 = por %p1174_p1, %p1173_p4 }
  0x2d   : > { %p1176_p13 = pnand %p1175_p12, %p1169_p10 }
  0x2f   : > { %1179 = shalt.err (!%p1176_p13)
}
  0x30   : > { %s1361_s5 = smov 256   ;;  %s1742_s7 = smov 128  }
  0x31   : > { %s1743_s11 = smov 8   ;;  %s1499_s13 = sadd.s32 4294967295, %s1358_s20  }
  0x32   : > { %1026 = dma.hbm_to_vmem [thread:$0]  (!%p1462_p7), %s1456_s6, 4096, %s1458_s8, %s1466_s10, %s1361_s5, %s1742_s7, %s1743_s11  }
  0x33   : > { %s903_s14 = sadd.s32 4294967294, %s1358_s20   ;;  %p93_p1 = scmp.ne.s32.totalorder %s1342_s16, %s1338_s15 }
  0x34   : > { %p1746_p4 = scmp.eq.s32.totalorder %s1499_s13, 0  ;;  %p171_p11 = scmp.eq.s32.totalorder %s1499_s13, 1 }
  0x35   : > { %p177_p0 = scmp.eq.s32.totalorder %s903_s14, 1  ;;  %p904_p3 = scmp.ge.s32.totalorder %s1358_s20, 1 }
  0x36   : > { %p1508_p2 = por %p1746_p4, %p93_p1  ;;  %p1766_p5 = scmp.ne.s32.totalorder %s1346_s17, %s1342_s16 }
  0x37   : > { %p1520_p8 = por %p177_p0, %p93_p1  ;;  %p184_p10 = scmp.lt.s32.totalorder %s1358_s20, 3 }
  0x38   : > { %s1765_s22 = scalar_select %p1508_p2, 1, 0 }
  0x39   : > { %p1516_p6 = por %p171_p11, %p1766_p5  ;;  %s1749_s23 = sshll.u32 %s1446_s26, 1 }
  0x3a   : > { %s1768_s8 = scalar_select %p1520_p8, 1, 0 }
  0x3b   : > { %s1767_s6 = scalar_select %p1516_p6, 1, 0 }
  0x3c   : > { %p1526_p12 = pnand %p904_p3, %p184_p10  ;;  %s1364_s25 = smov [#allocation3]  }
  0x3d   : > { %s202_s28 = sshll.u32 %s1364_s25, 4  ;;  %s1744_s29 = sshll.u32 %s1354_s19, 5  ;;  %s1530_s28 = int_to_ptr.vmem [resolvable:$true] %s202_s28 }
  0x3e   : > { %s1769_s24 = scalar_select %p1526_p12, 1, 0 }
  0x3f   : > { %p1019_p13 = pneg %p1526_p12  ;;  %s1540_s14 = scalar_lea.hbm %s1738_s2, %s1744_s29 }
  0x40   : > { %s244_s7 = scalar_lea.vmem [#allocation8], %s1749_s23  ;;  %s1180_s1 = scalar_lea.hbm %s1540_s14, 32 }
  0x41   : > { %s252_s11 = sshll.u32 %s244_s7, 4  ;;  %p1546_p1 = pnand %p1019_p13, %p1746_p4  ;;  %s253_s11 = int_to_ptr.vmem [resolvable:$true] %s252_s11 }
  0x42   : > { %p1181_p11 = scmp.ne.s32.totalorder %s1540_s14, %s1180_s1  ;;  %s1185_s29 = scalar_lea.hbm %s1738_s2, 64 }
  0x43   : > { %s1770_s25 = scalar_select %p1546_p1, 1, 0 }
  0x44   : > { %p1183_p0 = pnand %p1181_p11, %p1472_p9  ;;  %p1186_p5 = scmp.lt.u32.totalorder %s1540_s14, %s1738_s2 }
  0x45   : > { %p1187_p10 = scmp.lt.u32.totalorder %s1185_s29, %s1180_s1  ;;  %p1189_p13 = scmp.lt.u32.totalorder %s1180_s1, %s1540_s14 }
  0x46   : > { %p1184_p3 = pneg %p1183_p0 }
  0x47   : > { %p1188_p8 = por %p1187_p10, %p1186_p5 }
  0x49   : > { %p1190_p4 = por %p1189_p13, %p1188_p8 }
  0x4b   : > { %p1191_p6 = pnand %p1190_p4, %p1184_p3 }
  0x4d   : > { %1194 = shalt.err (!%p1191_p6)
}
  0x4e   : > { %s1195_s7 = scalar_lea.vmem %s253_s11, 32  ;;  %s1365_s23 = smov [#allocation8]  }
  0x4f   : > { %p1196_p2 = scmp.ne.s32.totalorder %s253_s11, %s1195_s7  ;;  %s1200_s17 = sshll.u32 %s1365_s23, 4  ;;  %s1201_s17 = int_to_ptr.vmem [resolvable:$false] %s1200_s17 }
  0x50   : > { %s1202_s30 = scalar_lea.vmem %s1201_s17, 64  ;;  %p1203_p12 = scmp.lt.s32.totalorder %s253_s11, %s1201_s17 }
  0x51   : > { %p1198_p11 = pnand %p1196_p2, %p1472_p9  ;;  %p1204_p1 = scmp.lt.s32.totalorder %s1202_s30, %s1195_s7 }
  0x53   : > { %p1199_p0 = pneg %p1198_p11  ;;  %p1205_p7 = por %p1204_p1, %p1203_p12 }
  0x55   : > { %p1206_p5 = pnand %p1205_p7, %p1199_p0 }
  0x57   : > { %1209 = shalt.err (!%p1206_p5)
}
  0x58   : > { %p1771_p10 = scmp.ne.s32.totalorder %s1763_s9, 0  ;;  %s1210_s27 = scalar_lea.hbm %s1736_s0, 512 }
  0x59   : > { %p1211_p4 = scmp.ne.s32.totalorder %s1736_s0, %s1210_s27  ;;  %p1772_p2 = scmp.ne.s32.totalorder %s1770_s25, 0 }
  0x5a   : > { %1029 = dma.hbm_to_vmem [thread:$0]  (!%p1771_p10), %s1540_s14, 32, %s253_s11, %s1466_s10  }
  0x5b   : > { %p1212_p6 = pneg %p1772_p2  ;;  %p1217_p7 = scmp.lt.u32.totalorder %s1210_s27, %s1736_s0 }
  0x5d   : > { %p1213_p8 = pnand %p1212_p6, %p1211_p4 }
  0x5f   : > { %p1214_p12 = pneg %p1213_p8 }
  0x61   : > { %p1219_p1 = pnand %p1217_p7, %p1214_p12 }
  0x63   : > { %1222 = shalt.err (!%p1219_p1)
}
  0x64   : > { %s1223_s10 = scalar_lea.vmem %s1530_s28, 512  ;;  %p1231_p0 = scmp.lt.s32.totalorder %s1530_s28, %s1530_s28 }
  0x65   : > { %p1224_p3 = scmp.ne.s32.totalorder %s1530_s28, %s1223_s10  ;;  %p1232_p5 = scmp.lt.s32.totalorder %s1223_s10, %s1223_s10 }
  0x67   : > { %p1226_p13 = pnand %p1224_p3, %p1212_p6  ;;  %p1233_p10 = por %p1232_p5, %p1231_p0 }
  0x69   : > { %p1227_p11 = pneg %p1226_p13 }
  0x6b   : > { %p1234_p9 = pnand %p1233_p10, %p1227_p11 }
  0x6d   : > { %1237 = shalt.err (!%p1234_p9)
}
  0x6e   : > { %s1773_s11 = smov 8   ;;  %s1774_s14 = smov 128  }
  0x6f   : > { %1022 = dma.hbm_to_vmem [thread:$0]  (!%p1772_p2), %s1736_s0, 512, %s1530_s28, [#allocation4], %s1774_s14, %s1774_s14, %s1773_s11  }
  0x70   : > { %s1775_s1 = sshll.u32 %s1354_s19, 5  ;;  %s1776_s5 = sshll.u32 %s1446_s26, 1 }
  0x71   : > { %s1597_s29 = scalar_lea.hbm %s1739_s3, %s1775_s1  ;;  %s263_s25 = scalar_lea.vmem [#allocation9], %s1776_s5 }
  0x72   : > { %s271_s17 = sshll.u32 %s263_s25, 4  ;;  %s260_s23 = scalar_lea.sflag [#allocation10], %s1446_s26  ;;  %s272_s17 = int_to_ptr.vmem [resolvable:$true] %s271_s17 }
  0x73   : > { %s1238_s10 = scalar_lea.hbm %s1597_s29, 32  ;;  %p1777_p10 = scmp.ne.s32.totalorder %s1764_s12, 0 }
  0x74   : > { %p1239_p9 = scmp.ne.s32.totalorder %s1597_s29, %s1238_s10  ;;  %s1243_s14 = scalar_lea.hbm %s1739_s3, 64 }
  0x75   : > { %p1244_p6 = scmp.lt.u32.totalorder %s1597_s29, %s1739_s3  ;;  %p1245_p8 = scmp.lt.u32.totalorder %s1243_s14, %s1238_s10 }
  0x76   : > { %p1241_p4 = pnand %p1239_p9, %p1777_p10  ;;  %p1247_p7 = scmp.lt.u32.totalorder %s1238_s10, %s1597_s29 }
  0x77   : > { %p1246_p12 = por %p1245_p8, %p1244_p6 }
  0x78   : > { %p1242_p2 = pneg %p1241_p4 }
  0x79   : > { %p1248_p1 = por %p1247_p7, %p1246_p12 }
  0x7b   : > { %p1249_p3 = pnand %p1248_p1, %p1242_p2 }
  0x7d   : > { %1252 = shalt.err (!%p1249_p3)
}
  0x7e   : > { %s1253_s26 = scalar_lea.vmem %s272_s17, 32  ;;  %s1366_s1 = smov [#allocation9]  }
  0x7f   : > { %p1254_p13 = scmp.ne.s32.totalorder %s272_s17, %s1253_s26  ;;  %s1258_s21 = sshll.u32 %s1366_s1, 4  ;;  %s1259_s21 = int_to_ptr.vmem [resolvable:$false] %s1258_s21 }
  0x80   : > { %s1260_s27 = scalar_lea.vmem %s1259_s21, 64  ;;  %p1261_p5 = scmp.lt.s32.totalorder %s272_s17, %s1259_s21 }
  0x81   : > { %p1256_p11 = pnand %p1254_p13, %p1777_p10  ;;  %p1262_p9 = scmp.lt.s32.totalorder %s1260_s27, %s1253_s26 }
  0x83   : > { %p1257_p0 = pneg %p1256_p11  ;;  %p1263_p4 = por %p1262_p9, %p1261_p5 }
  0x85   : > { %p1264_p6 = pnand %p1263_p4, %p1257_p0 }
  0x87   : > { %1267 = shalt.err (!%p1264_p6)
}
  0x88   : > { %p1778_p8 = scmp.ne.s32.totalorder %s1763_s9, 0  ;;  %p1779_p2 = scmp.ne.s32.totalorder %s1769_s24, 0 }
  0x89   : > { %p1780_p12 = scmp.eq.s32.totalorder (!%p1779_p2), %s1499_s13, 0 }
  0x8a   : > { %1032 = dma.hbm_to_vmem [thread:$0]  (!%p1778_p8), %s1597_s29, 32, %s272_s17, %s260_s23  }
  0x8b   : > { %280 = sbr.rel (%p1779_p2) target bundleno = 457 (0x1c9), region = 36 }
  0x92   : > { %1321 = dma.done.wait (%p1780_p12), [#allocation4], 512   ;;  %p1781_p10 = pmov %p1780_p12 }
  0x93   : > { %s286_s12 = sand.u32 1, %s1499_s13   ;;  %s1627_s5 = sand.u32 1, %s1342_s16  }
  0x94   : > { %1323 = vsyncadd (%p1781_p10), [#allocation4], 4294966784  ;;  %s918_s25 = sshll.u32 %s1627_s5, 8  ;;  %s287_s9 = scalar_lea.sflag [#allocation7], %s286_s12 }
  0x95   : > { %s1630_s10 = scalar_lea.vmem [#allocation6], %s918_s25  ;;  %p1782_p7 = scmp.ne.s32.totalorder %s1765_s22, 0 }
  0x97   : > { %1325 = dma.done.wait (%p1782_p7), %s287_s9, 4128  }
  0x98   : > { %1327 = vsyncadd (%p1782_p7), %s287_s9, 4294963168  ;;  %s919_s24 = sshll.u32 %s1627_s5, 1  ;;  %s305_s17 = scalar_lea.sflag [#allocation10], %s1627_s5 }
  0x99   : > { %s1637_s29 = scalar_lea.vmem [#allocation8], %s919_s24  ;;  %s1640_s13 = scalar_lea.vmem [#allocation9], %s919_s24 }
  0x9a   : > { %1329 = dma.done.wait (%p1782_p7), %s305_s17, 32  }
  0x9b   : > { %1331 = vsyncadd (%p1782_p7), %s305_s17, 4294967264  ;;  %v1096_v0 = vld [vmem:[%s1630_s10 + $0x4] ss:$8 sps:$4 sm:$0xff]   ;;  %v1098_v1 = vld [vmem:[%s1630_s10] ss:$8 sps:$4 sm:$0xff]   ;;  %v669_v36 = vlaneseq  ;;  %s921_s22 = sshll.u32 %s1627_s5, 5 }
  0x9c   : > { %587 = vmatprep.subr.bf16.mxu0 %v1096_v0  ;;  %975 = vmatprep.subr.bf16.mxu1 %v1096_v0  ;;  %v1099_v2 = vld [vmem:[%s1630_s10 + $0x14] ss:$8 sps:$4 sm:$0xff]   ;;  %v1101_v3 = vld [vmem:[%s1630_s10 + $0x10] ss:$8 sps:$4 sm:$0xff]   ;;  %v1102_v4 = vld [vmem:[%s1630_s10 + $0x24] ss:$8 sps:$4 sm:$0xff]  }
  0x9d   : > { %588 = vmatpush1.bf16.msra.mxu0 %v1098_v1  ;;  %991 = vmatpush1.bf16.msra.mxu1 %v1098_v1  ;;  %v1104_v5 = vld [vmem:[%s1630_s10 + $0x20] ss:$8 sps:$4 sm:$0xff]   ;;  %v1105_v6 = vld [vmem:[%s1630_s10 + $0x34] ss:$8 sps:$4 sm:$0xff]   ;;  %v1107_v7 = vld [vmem:[%s1630_s10 + $0x30] ss:$8 sps:$4 sm:$0xff]  }
  0x9e   : > { %589 = vmatprep.subr.bf16.mxu0 %v1099_v2  ;;  %976 = vmatprep.subr.bf16.mxu1 %v1099_v2  ;;  %v1108_v8 = vld [vmem:[%s1630_s10 + $0x44] ss:$8 sps:$4 sm:$0xff]   ;;  %v1110_v9 = vld [vmem:[%s1630_s10 + $0x40] ss:$8 sps:$4 sm:$0xff]   ;;  %v1111_v10 = vld [vmem:[%s1630_s10 + $0x54] ss:$8 sps:$4 sm:$0xff]  }
  0x9f   : > { %v1113_v11 = vld [vmem:[%s1630_s10 + $0x50] ss:$8 sps:$4 sm:$0xff]   ;;  %v1114_v12 = vld [vmem:[%s1630_s10 + $0x64] ss:$8 sps:$4 sm:$0xff]   ;;  %v1116_v14 = vld [vmem:[%s1630_s10 + $0x60] ss:$8 sps:$4 sm:$0xff]  }
  0xa0   : > { %v1146_v13 = vld [vmem:[#allocation3 + $0x4] ss:$8 sps:$4 sm:$0xff]   ;;  %v1149_v15 = vld [vmem:[#allocation3 + $0x14] ss:$8 sps:$4 sm:$0xff]   ;;  %v1119_v17 = vld [vmem:[%s1630_s10 + $0x70] ss:$8 sps:$4 sm:$0xff]  }
  0xa1   : > { %590 = vmatpush1.bf16.msra.mxu0 %v1101_v3  ;;  %992 = vmatpush1.bf16.msra.mxu1 %v1101_v3  ;;  %v1117_v16 = vld [vmem:[%s1630_s10 + $0x74] ss:$8 sps:$4 sm:$0xff]   ;;  %v1120_v18 = vld [vmem:[%s1630_s10 + $0x84] ss:$8 sps:$4 sm:$0xff]   ;;  %v1122_v19 = vld [vmem:[%s1630_s10 + $0x80] ss:$8 sps:$4 sm:$0xff]  }
  0xa2   : > { %591 = vmatprep.subr.bf16.mxu0 %v1102_v4  ;;  %977 = vmatprep.subr.bf16.mxu1 %v1102_v4  ;;  %v1123_v20 = vld [vmem:[%s1630_s10 + $0x94] ss:$8 sps:$4 sm:$0xff]   ;;  %v1125_v21 = vld [vmem:[%s1630_s10 + $0x90] ss:$8 sps:$4 sm:$0xff]   ;;  %v1126_v22 = vld [vmem:[%s1630_s10 + $0xa4] ss:$8 sps:$4 sm:$0xff]  }
  0xa3   : > { %619 = vmatprep.mubr.bf16.mxu0 %v1146_v13  ;;  %629 = vmatprep.mubr.bf16.mxu1 %v1149_v15  ;;  %v1128_v23 = vld [vmem:[%s1630_s10 + $0xa0] ss:$8 sps:$4 sm:$0xff]   ;;  %v1129_v24 = vld [vmem:[%s1630_s10 + $0xb4] ss:$8 sps:$4 sm:$0xff]   ;;  %v1131_v25 = vld [vmem:[%s1630_s10 + $0xb0] ss:$8 sps:$4 sm:$0xff]  }
  0xa4   : > { %v1132_v26 = vld [vmem:[%s1630_s10 + $0xc4] ss:$8 sps:$4 sm:$0xff]   ;;  %v1134_v27 = vld [vmem:[%s1630_s10 + $0xc0] ss:$8 sps:$4 sm:$0xff]   ;;  %v1135_v28 = vld [vmem:[%s1630_s10 + $0xd4] ss:$8 sps:$4 sm:$0xff]  }
  0xa5   : > { %592 = vmatpush1.bf16.msra.mxu0 %v1104_v5  ;;  %993 = vmatpush1.bf16.msra.mxu1 %v1104_v5  ;;  %v1137_v29 = vld [vmem:[%s1630_s10 + $0xd0] ss:$8 sps:$4 sm:$0xff]   ;;  %v1138_v30 = vld [vmem:[%s1630_s10 + $0xe4] ss:$8 sps:$4 sm:$0xff]   ;;  %v1140_v31 = vld [vmem:[%s1630_s10 + $0xe0] ss:$8 sps:$4 sm:$0xff]  }
  0xa6   : > { %593 = vmatprep.subr.bf16.mxu0 %v1105_v6  ;;  %978 = vmatprep.subr.bf16.mxu1 %v1105_v6  ;;  %v1141_v32 = vld [vmem:[%s1630_s10 + $0xf4] ss:$8 sps:$4 sm:$0xff]   ;;  %v1143_v33 = vld [vmem:[%s1630_s10 + $0xf0] ss:$8 sps:$4 sm:$0xff]   ;;  %v1144_v34 = vld [vmem:[#allocation3] ss:$8 sps:$4 sm:$0xff]  }
  0xa7   : > { %v1147_v35 = vld [vmem:[#allocation3 + $0x10] ss:$8 sps:$4 sm:$0xff]   ;;  %v670_v37 = vshrl.u32 %v669_v36, 7  ;;  %v667_v39 = vld [vmem:[%s1637_s29] sm:$0x3]  ;;  %s342_s23 = scalar_lea.vmem [#allocation11], %s921_s22 }
  0xa8   : > { %v687_v41 = vld [vmem:[%s1640_s13] sm:$0x3]  ;;  %s752_s28 = sshll.u32 %s342_s23, 4  ;;  %s974_s11 = sshll.u32 %s1350_s18, 7  ;;  %s1682_s28 = int_to_ptr.vmem [resolvable:$true] %s752_s28 }
  0xa9   : > { %594 = vmatpush1.bf16.msra.mxu0 %v1107_v7  ;;  %994 = vmatpush1.bf16.msra.mxu1 %v1107_v7  ;;  %v671_v38 = vsub.s32 0, %v670_v37  ;;  %v675_v40 = vsub.s32 1, %v670_v37  ;;  %s1687_s30 = scalar_lea.hbm %s1740_s4, %s974_s11  ;;  %s736_s18 = scalar_lea.sflag [#allocation5], %s1627_s5 }
  0xaa   : > { %595 = vmatprep.subr.bf16.mxu0 %v1108_v8  ;;  %979 = vmatprep.subr.bf16.mxu1 %v1108_v8  ;;  %s1268_s26 = scalar_lea.vmem %s1682_s28, 512  ;;  %p1783_p3 = scmp.ne.s32.totalorder %s1767_s6, 0 }
  0xab   : > { %v672_v42 = vrot.slane %v667_v39, %v671_v38  ;;  %v676_v43 = vrot.slane %v667_v39, %v675_v40  ;;  %v692_v44 = vrot.slane %v687_v41, %v671_v38  ;;  %v696_v47 = vrot.slane %v687_v41, %v675_v40  ;;  %p1269_p1 = scmp.ne.s32.totalorder %s1682_s28, %s1268_s26  ;;  %s1367_s1 = smov [#allocation11]  }
  0xac   : > { %s1272_s21 = sshll.u32 %s1367_s1, 4  ;;  %s1273_s21 = int_to_ptr.vmem [resolvable:$false] %s1272_s21 }
  0xad   : > { %596 = vmatpush1.bf16.msra.mxu0 %v1110_v9  ;;  %995 = vmatpush1.bf16.msra.mxu1 %v1110_v9  ;;  %p1270_p13 = pnand %p1269_p1, %p1783_p3  ;;  %s1274_s27 = scalar_lea.vmem %s1273_s21, 1024 }
  0xae   : > { %597 = vmatprep.subr.bf16.mxu0 %v1111_v10  ;;  %980 = vmatprep.subr.bf16.mxu1 %v1111_v10  ;;  %p1275_p0 = scmp.lt.s32.totalorder %s1682_s28, %s1273_s21  ;;  %p1276_p5 = scmp.lt.s32.totalorder %s1274_s27, %s1268_s26 }
  0xaf   : > { %p1271_p11 = pneg %p1270_p13 }
  0xb0   : > { %p1277_p9 = por %p1276_p5, %p1275_p0 }
  0xb1   : > { %598 = vmatpush1.bf16.msra.mxu0 %v1113_v11  ;;  %996 = vmatpush1.bf16.msra.mxu1 %v1113_v11 }
  0xb2   : > { %599 = vmatprep.subr.bf16.mxu0 %v1114_v12  ;;  %981 = vmatprep.subr.bf16.mxu1 %v1114_v12  ;;  %p1278_p4 = pnand %p1277_p9, %p1271_p11 }
  0xb5   : > { %600 = vmatpush1.bf16.msra.mxu0 %v1116_v14  ;;  %997 = vmatpush1.bf16.msra.mxu1 %v1116_v14 }
  0xb6   : > { %601 = vmatprep.subr.bf16.mxu0 %v1117_v16  ;;  %982 = vmatprep.subr.bf16.mxu1 %v1117_v16 }
  0xb9   : > { %602 = vmatpush1.bf16.msra.mxu0 %v1119_v17  ;;  %998 = vmatpush1.bf16.msra.mxu1 %v1119_v17 }
  0xba   : > { %603 = vmatprep.subr.bf16.mxu0 %v1120_v18  ;;  %983 = vmatprep.subr.bf16.mxu1 %v1120_v18 }
  0xbd   : > { %604 = vmatpush1.bf16.msra.mxu0 %v1122_v19  ;;  %999 = vmatpush1.bf16.msra.mxu1 %v1122_v19 }
  0xbe   : > { %605 = vmatprep.subr.bf16.mxu0 %v1123_v20  ;;  %984 = vmatprep.subr.bf16.mxu1 %v1123_v20 }
  0xc1   : > { %606 = vmatpush1.bf16.msra.mxu0 %v1125_v21  ;;  %1000 = vmatpush1.bf16.msra.mxu1 %v1125_v21 }
  0xc2   : > { %607 = vmatprep.subr.bf16.mxu0 %v1126_v22  ;;  %985 = vmatprep.subr.bf16.mxu1 %v1126_v22 }
  0xc5   : > { %608 = vmatpush1.bf16.msra.mxu0 %v1128_v23  ;;  %1001 = vmatpush1.bf16.msra.mxu1 %v1128_v23 }
  0xc6   : > { %609 = vmatprep.subr.bf16.mxu0 %v1129_v24  ;;  %986 = vmatprep.subr.bf16.mxu1 %v1129_v24 }
  0xc9   : > { %610 = vmatpush1.bf16.msra.mxu0 %v1131_v25  ;;  %1002 = vmatpush1.bf16.msra.mxu1 %v1131_v25 }
  0xca   : > { %611 = vmatprep.subr.bf16.mxu0 %v1132_v26  ;;  %987 = vmatprep.subr.bf16.mxu1 %v1132_v26 }
  0xcd   : > { %612 = vmatpush1.bf16.msra.mxu0 %v1134_v27  ;;  %1003 = vmatpush1.bf16.msra.mxu1 %v1134_v27 }
  0xce   : > { %613 = vmatprep.subr.bf16.mxu0 %v1135_v28  ;;  %988 = vmatprep.subr.bf16.mxu1 %v1135_v28 }
  0xd1   : > { %614 = vmatpush1.bf16.msra.mxu0 %v1137_v29  ;;  %1004 = vmatpush1.bf16.msra.mxu1 %v1137_v29 }
  0xd2   : > { %615 = vmatprep.subr.bf16.mxu0 %v1138_v30  ;;  %989 = vmatprep.subr.bf16.mxu1 %v1138_v30 }
  0xd5   : > { %616 = vmatpush1.bf16.msra.mxu0 %v1140_v31  ;;  %1005 = vmatpush1.bf16.msra.mxu1 %v1140_v31 }
  0xd6   : > { %617 = vmatprep.subr.bf16.mxu0 %v1141_v32  ;;  %990 = vmatprep.subr.bf16.mxu1 %v1141_v32 }
  0xd9   : > { %618 = vmatpush1.bf16.msra.mxu0 %v1143_v33  ;;  %1006 = vmatpush1.bf16.msra.mxu1 %v1143_v33 }
  0xdc   : > { %620 = vmatmul.mubr.bf16.vlgmr.msra.gmra.mrb[0].mxu0 %v1144_v34  ;;  %630 = vmatmul.mubr.bf16.vlgmr.msra.gmra.mrb[0].mxu1 %v1147_v35 }
 0x1af   : > { %v621_v45 = vpop.f32.mrb[0].mxu0  ;;  %v631_v46 = vpop.f32.mrb[0].mxu1 }
 0x1b0   : > { %v679_v48 = vmul.f32 %v672_v42, %v621_v45  ;;  %v683_v49 = vmul.f32 %v672_v42, %v631_v46  ;;  %v623_v50 = vpop.f32.mrb[1].mxu0  ;;  %v633_v51 = vpop.f32.mrb[1].mxu1 }
 0x1b1   : > { %v680_v52 = vmul.f32 %v676_v43, %v623_v50  ;;  %v684_v53 = vmul.f32 %v676_v43, %v633_v51  ;;  %v625_v54 = vpop.f32.mrb[2].mxu0  ;;  %v635_v55 = vpop.f32.mrb[2].mxu1 }
 0x1b2   : > { %v699_v56 = vadd.f32 %v692_v44, %v679_v48  ;;  %v703_v57 = vadd.f32 %v692_v44, %v683_v49  ;;  %v681_v58 = vmul.f32 %v672_v42, %v625_v54  ;;  %v685_v59 = vmul.f32 %v672_v42, %v635_v55  ;;  %v627_v60 = vpop.f32.mrb[3].mxu0  ;;  %v637_v61 = vpop.f32.mrb[3].mxu1 }
 0x1b3   : > { %v700_v62 = vadd.f32 %v696_v47, %v680_v52  ;;  %v704_v63 = vadd.f32 %v696_v47, %v684_v53  ;;  %v682_v0 = vmul.f32 %v676_v43, %v627_v60  ;;  %v686_v1 = vmul.f32 %v676_v43, %v637_v61 }
 0x1b4   : > { %v701_v2 = vadd.f32 %v692_v44, %v681_v58  ;;  %v705_v3 = vadd.f32 %v692_v44, %v685_v59 }
 0x1b5   : > { %v970_v4 = vpack.c.bf16 %v700_v62, %v699_v56  ;;  %v972_v5 = vpack.c.bf16 %v704_v63, %v703_v57  ;;  %v702_v6 = vadd.f32 %v696_v47, %v682_v0  ;;  %v706_v7 = vadd.f32 %v696_v47, %v686_v1 }
 0x1b7   : > { %731 = vst [vmem:[%s342_s23] sm:$0xff] %v970_v4  ;;  %733 = vst [vmem:[%s342_s23 + $0x10] sm:$0xff] %v972_v5  ;;  %v971_v8 = vpack.c.bf16 %v702_v6, %v701_v2  ;;  %v973_v9 = vpack.c.bf16 %v706_v7, %v705_v3 }
 0x1b9   : > { %732 = vst [vmem:[%s342_s23 + $0x8] sm:$0xff] %v971_v8  ;;  %734 = vst [vmem:[%s342_s23 + $0x18] sm:$0xff] %v973_v9 }
 0x1ba   : > { %1281 = shalt.err (!%p1278_p4)
}
 0x1bb   : > { %s1282_s12 = scalar_lea.hbm %s1687_s30, 512  ;;  %s1286_s10 = scalar_lea.hbm %s1740_s4, 1024 }
 0x1bc   : > { %p1283_p6 = scmp.ne.s32.totalorder %s1687_s30, %s1282_s12  ;;  %p1287_p12 = scmp.lt.u32.totalorder %s1687_s30, %s1740_s4 }
 0x1bd   : > { %p1288_p10 = scmp.lt.u32.totalorder %s1286_s10, %s1282_s12  ;;  %p1290_p1 = scmp.lt.u32.totalorder %s1282_s12, %s1687_s30 }
 0x1be   : > { %p1284_p8 = pnand %p1283_p6, %p1783_p3 }
 0x1bf   : > { %p1289_p7 = por %p1288_p10, %p1287_p12 }
 0x1c0   : > { %p1285_p2 = pneg %p1284_p8 }
 0x1c1   : > { %p1291_p13 = por %p1290_p1, %p1289_p7 }
 0x1c3   : > { %p1292_p11 = pnand %p1291_p13, %p1285_p2 }
 0x1c5   : > { %1295 = shalt.err (!%p1292_p11)
}
 0x1c6   : > { %s1368_s17 = smov 128   ;;  %s1369_s13 = smov 256  }
 0x1c7   : > { %s1370_s22 = smov 8  }
 0x1c8   : > { %1017 = dma.vmem_to_hbm [thread:$0]  (%p1783_p3), %s1682_s28, 512, %s1687_s30, %s736_s18, %s1368_s17, %s1369_s13, %s1370_s22  }
 0x1c9 PF: > { %s767_s23 = sand.u32 1, %s1338_s15   ;;  %p1784_p0 = scmp.ne.s32.totalorder %s1768_s8, 0 }
 0x1ca   : > { %p1785_p5 = scmp.ge.s32.totalorder %s1358_s20, 2  ;;  %s768_s11 = scalar_lea.sflag [#allocation5], %s767_s23 }
 0x1cc   : > { %p1034_p9 = pnand %p1785_p5, %p1784_p0 }
 0x1ce   : > { %1333 = dma.done.wait (!%p1034_p9), %s768_s11, 512  }
 0x1cf   : > { %1335 = vsyncadd (!%p1034_p9), %s768_s11, 4294966784  ;;  %s24_s20 = sadd.s32 1, %s1358_s20   ;;  %s1786_s14 = sld [smem:[#allocation16_spill]] }
 0x1d0   : > { %p21_p4 = scmp.ge.s32.totalorder %s24_s20, 4   ;;  %s1787_s17 = sld [smem:[#allocation18_spill]] }
 0x1d1   : > { %s1788_s6 = sld [smem:[#allocation17_spill]]  ;;  %s1789_s15 = smov %s1342_s16 }
 0x1d2   : > { %s1791_s18 = smov %s1354_s19  ;;  %23 = sbr.rel (!%p21_p4) target bundleno = 11 (0xb), region = 119 }
 0x1d5   : > { %s1790_s16 = smov %s1786_s14 }
 0x1d7   : > { %s1792_s19 = smov %s1788_s6 }
 0x1d9   :  { %773 = vsyncpa [#allocation4], 1 }
 0x1da   :  { %775 = vsyncpa [#allocation4 + $0x1], 1 }
 0x1db   :  { %776 = vsyncpa [#allocation7], 1 }
 0x1dc   :  { %778 = vsyncpa [#allocation7 + $0x1], 1 }
 0x1dd   :  { %779 = vsyncpa [#allocation10], 1 }
 0x1de   :  { %781 = vsyncpa [#allocation10 + $0x1], 1 }
 0x1df   :  { %782 = vsyncpa [#allocation5], 1 }
 0x1e0   :  { %784 = vsyncpa [#allocation5 + $0x1], 1 }

// kernel: _lambda_.35
= control target key start
LH: loop header
LB: loop body
LE: loop exit
PB: predicated region body
PF: predicated region fallthrough
CT: control target
= control target key end

     0   :  { %s1767_s0 = inlined_call_operand.hbm [shape: bf16[32,128], index: 0, kind: input, shape index: {}]   ;;  %s1768_s1 = inlined_call_operand.hbm [shape: bf16[128,512], index: 1, kind: input, shape index: {}]   ;;  %s1769_s2 = inlined_call_operand.hbm [shape: f32[1,512], index: 2, kind: input, shape index: {}]   ;;  %s1770_s3 = inlined_call_operand.hbm [shape: f32[1,512], index: 3, kind: input, shape index: {}]   ;;  %s1771_s4 = inlined_call_operand.hbm [shape: bf16[32,512], index: 4, kind: input, shape index: {}]   ;;  %s1772_s5 = inlined_call_operand.hbm [shape: bf16[32,512], index: 5, kind: output, shape index: {}]  }
   0x1   :  { %1792 = sst [smem:[#allocation21_spill]] %s1768_s1 }
   0x2   :  { %1793 = sst [smem:[#allocation22_spill]] %s1769_s2 }
   0x3   :  { %1794 = sst [smem:[#allocation23_spill]] %s1770_s3 }
   0x4   :  { %1795 = sst [smem:[#allocation24_spill]] %s1772_s5 }
   0x5   :  { %10 = vsyncpa [#allocation4], 0 }
   0x6   :  { %11 = vsyncpa [#allocation7], 0 }
   0x7   :  { %13 = vsyncpa [#allocation7 + $0x1], 0 }
   0x8   :  { %14 = vsyncpa [#allocation10], 0 }
   0x9   :  { %16 = vsyncpa [#allocation10 + $0x1], 0 }
   0xa   :  { %17 = vsyncpa [#allocation5], 0 }
   0xb   :  { %19 = vsyncpa [#allocation5 + $0x1], 0  ;;  %s1401_s18 = smov 0   ;;  %s1403_s19 = smov 0  }
   0xc   :  { %s1405_s20 = smov 0   ;;  %s1407_s21 = smov 0  }
   0xd   :  { %s1409_s22 = smov 0   ;;  %s1411_s23 = smov 0  }
   0xe LB: > { %1796 = sst [smem:[#allocation17_spill]] %s1342_s20  ;;  %s40_s24 = sadd.s32 1, %s1350_s22  ;;  %s1354_s23 = sphi %s1411_s23, %s25_s23   ;;  %s1350_s22 = sphi %s1409_s22, %s1830_s22   ;;  %s1346_s21 = sphi %s1407_s21, %s1829_s21   ;;  %s1342_s20 = sphi %s1405_s20, %s1828_s20   ;;  %s1338_s19 = sphi %s1403_s19, %s1832_s19   ;;  %s1334_s18 = sphi %s1401_s18, %s1831_s18  }
   0xf   : > { %1797 = sst [smem:[#allocation18_spill]] %s1350_s22  ;;  %s81_s25 = sadd.s32 1, %s1342_s20 }
  0x10   : > { %p42_p0 = scmp.ge.s32.totalorder %s40_s24, 2  ;;  %p1773_p1 = scmp.ne.s32.totalorder %s1342_s20, %s1338_s19 }
  0x11   : > { %p89_p2 = scmp.eq.s32.totalorder %s1354_s23, 0  ;;  %p1029_p5 = scmp.lt.s32.totalorder %s1354_s23, 2 }
  0x12   : > { %s1834_s24 = smov (%p42_p0, %s40_s24), 0  ;;  %s1774_s27 = sand.u32 1, %s1354_s23  }
  0x13   : > { %1798 = sst [smem:[#allocation19_spill]] %s1834_s24  ;;  %p90_p4 = por %p89_p2, %p1773_p1 }
  0x14   : > { %s77_s26 = ssub.s32 %s1350_s22, %s1834_s24  ;;  %s1447_s28 = sand.u32 1, %s1342_s20  }
  0x15   : > { %p79_p6 = scmp.eq.s32.totalorder %s77_s26, 0  ;;  %s968_s29 = sshll.u32 %s1350_s22, 7 }
  0x16   : > { %s922_s6 = sshll.u32 %s1447_s28, 7  ;;  %s1800_s1 = sld [smem:[#allocation21_spill]] }
  0x17   : > { %s1451_s30 = scalar_select %p79_p6, %s1342_s20, %s81_s25  }
  0x18   : > { %p1461_p7 = pnand %p1029_p5, %p90_p4  ;;  %s247_s11 = scalar_lea.vmem [#allocation6], %s922_s6 }
  0x19   : > { %1799 = sst [smem:[#allocation20_spill]] %s1451_s30  ;;  %s257_s12 = sshll.u32 %s247_s11, 4  ;;  %s1465_s12 = int_to_ptr.vmem [resolvable:$true] %s257_s12 }
  0x1a   : > { %s1801_s10 = scalar_select %p1461_p7, 1, 0 }
  0x1b   : > { %s1469_s13 = scalar_lea.sflag [#allocation7], %s1774_s27  ;;  %p1475_p9 = pneg %p1461_p7 }
  0x1c   : > { %s1459_s9 = scalar_lea.hbm %s1800_s1, %s968_s29  ;;  %s1121_s25 = scalar_lea.hbm %s1800_s1, 4096 }
  0x1d   : > { %s1116_s14 = scalar_lea.hbm %s1459_s9, 2048  ;;  %p1122_p12 = scmp.lt.u32.totalorder %s1459_s9, %s1800_s1 }
  0x1e   : > { %p1117_p8 = scmp.ne.s32.totalorder %s1459_s9, %s1116_s14  ;;  %p1123_p13 = scmp.lt.u32.totalorder %s1121_s25, %s1116_s14 }
  0x1f   : > { %s1802_s15 = scalar_select %p1475_p9, 1, 0 }
  0x20   : > { %p1119_p10 = pnand %p1475_p9, %p1117_p8  ;;  %p1124_p0 = por %p1123_p13, %p1122_p12 }
  0x21   : > { %p1125_p2 = scmp.lt.u32.totalorder %s1116_s14, %s1459_s9 }
  0x22   : > { %p1120_p11 = pneg %p1119_p10 }
  0x23   : > { %p1126_p4 = por %p1125_p2, %p1124_p0 }
  0x25   : > { %p1127_p5 = pnand %p1126_p4, %p1120_p11 }
  0x27   : > { %1130 = shalt.err (!%p1127_p5)
}
  0x28   : > { %s1131_s7 = scalar_lea.vmem %s1465_s12, 2048  ;;  %s1356_s8 = smov [#allocation6]  }
  0x29   : > { %p1132_p6 = scmp.ne.s32.totalorder %s1465_s12, %s1131_s7  ;;  %s1136_s11 = sshll.u32 %s1356_s8, 4  ;;  %s1137_s11 = int_to_ptr.vmem [resolvable:$false] %s1136_s11 }
  0x2a   : > { %s1138_s16 = scalar_lea.vmem %s1137_s11, 4096  ;;  %p1139_p3 = scmp.lt.s32.totalorder %s1465_s12, %s1137_s11 }
  0x2b   : > { %p1134_p8 = pnand %p1132_p6, %p1475_p9  ;;  %p1140_p1 = scmp.lt.s32.totalorder %s1138_s16, %s1131_s7 }
  0x2d   : > { %p1135_p10 = pneg %p1134_p8  ;;  %p1141_p12 = por %p1140_p1, %p1139_p3 }
  0x2f   : > { %p1142_p13 = pnand %p1141_p12, %p1135_p10 }
  0x31   : > { %1145 = shalt.err (!%p1142_p13)
}
  0x32   : > { %s1777_s14 = smov 256   ;;  %s1780_s17 = smov 128  }
  0x33   : > { %s1781_s25 = smov 8   ;;  %s1507_s7 = scalar_lea.hbm %s1771_s4, %s968_s29 }
  0x34   : > { %1014 = dma.hbm_to_vmem [thread:$0]  (!%p1461_p7), %s1459_s9, 2048, %s1465_s12, %s1469_s13, %s1777_s14, %s1780_s17, %s1781_s25  }
  0x35   : > { %s925_s8 = sshll.u32 %s1447_s28, 1  ;;  %s969_s11 = sshll.u32 %s1350_s22, 5 }
  0x36   : > { %s1803_s2 = sld [smem:[#allocation22_spill]]  ;;  %s1804_s3 = sld [smem:[#allocation23_spill]] }
  0x37   : > { %s290_s9 = scalar_lea.vmem [#allocation9], %s925_s8  ;;  %s1805_s12 = sand.u32 1, %s1354_s23  }
  0x38   : > { %s298_s29 = sshll.u32 %s290_s9, 4  ;;  %s1525_s26 = scalar_lea.sflag [#allocation10], %s1805_s12  ;;  %s299_s29 = int_to_ptr.vmem [resolvable:$true] %s298_s29 }
  0x3c   : > { %s1514_s1 = scalar_lea.hbm %s1803_s2, %s969_s11  ;;  %s1519_s5 = scalar_lea.hbm %s1804_s3, %s969_s11 }
  0x3d   : > { %s1146_s6 = scalar_lea.hbm %s1519_s5, 32  ;;  %s1151_s30 = scalar_lea.hbm %s1804_s3, 64 }
  0x3e   : > { %p1147_p1 = scmp.ne.s32.totalorder %s1519_s5, %s1146_s6  ;;  %p1152_p0 = scmp.lt.u32.totalorder %s1519_s5, %s1804_s3 }
  0x3f   : > { %p1153_p2 = scmp.lt.u32.totalorder %s1151_s30, %s1146_s6  ;;  %p1155_p5 = scmp.lt.u32.totalorder %s1146_s6, %s1519_s5 }
  0x40   : > { %p1149_p3 = pnand %p1147_p1, %p1475_p9 }
  0x41   : > { %p1154_p4 = por %p1153_p2, %p1152_p0 }
  0x42   : > { %p1150_p11 = pneg %p1149_p3 }
  0x43   : > { %p1156_p6 = por %p1155_p5, %p1154_p4 }
  0x45   : > { %p1157_p8 = pnand %p1156_p6, %p1150_p11 }
  0x47   : > { %1160 = shalt.err (!%p1157_p8)
}
  0x48   : > { %s1161_s9 = scalar_lea.vmem %s299_s29, 32  ;;  %s1360_s12 = smov [#allocation9]  }
  0x49   : > { %p1162_p10 = scmp.ne.s32.totalorder %s299_s29, %s1161_s9  ;;  %s1166_s14 = sshll.u32 %s1360_s12, 4  ;;  %s1167_s14 = int_to_ptr.vmem [resolvable:$false] %s1166_s14 }
  0x4a   : > { %s1168_s27 = scalar_lea.vmem %s1167_s14, 64  ;;  %p1169_p1 = scmp.lt.s32.totalorder %s299_s29, %s1167_s14 }
  0x4b   : > { %p1164_p12 = pnand %p1162_p10, %p1475_p9  ;;  %p1170_p3 = scmp.lt.s32.totalorder %s1168_s27, %s1161_s9 }
  0x4d   : > { %p1165_p13 = pneg %p1164_p12  ;;  %p1171_p7 = por %p1170_p3, %p1169_p1 }
  0x4f   : > { %p1172_p0 = pnand %p1171_p7, %p1165_p13 }
  0x51   : > { %1175 = shalt.err (!%p1172_p0)
}
  0x52   : > { %p1806_p2 = scmp.ne.s32.totalorder %s1801_s10, 0  ;;  %s1546_s6 = sadd.s32 4294967295, %s1354_s23  }
  0x53   : > { %s918_s14 = sadd.s32 4294967294, %s1354_s23   ;;  %p94_p7 = scmp.ne.s32.totalorder %s1338_s19, %s1334_s18 }
  0x54   : > { %1020 = dma.hbm_to_vmem [thread:$0]  (!%p1806_p2), %s1519_s5, 32, %s299_s29, %s1525_s26  }
  0x55   : > { %p1784_p11 = scmp.eq.s32.totalorder %s1546_s6, 0  ;;  %p200_p4 = scmp.eq.s32.totalorder %s1546_s6, 1 }
  0x56   : > { %p206_p5 = scmp.eq.s32.totalorder %s918_s14, 1  ;;  %p919_p8 = scmp.ge.s32.totalorder %s1354_s23, 1 }
  0x57   : > { %p1555_p6 = por %p1784_p11, %p94_p7  ;;  %p1808_p10 = scmp.ne.s32.totalorder %s1342_s20, %s1338_s19 }
  0x58   : > { %p1567_p13 = por %p206_p5, %p94_p7  ;;  %p213_p1 = scmp.lt.s32.totalorder %s1354_s23, 3 }
  0x59   : > { %s1807_s24 = scalar_select %p1555_p6, 1, 0 }
  0x5a   : > { %p1563_p12 = por %p200_p4, %p1808_p10  ;;  %p1572_p3 = pnand %p919_p8, %p213_p1 }
  0x5b   : > { %s1810_s29 = scalar_select %p1567_p13, 1, 0 }
  0x5c   : > { %s1809_s5 = scalar_select %p1563_p12, 1, 0 }
  0x5d   : > { %s1811_s30 = scalar_select %p1572_p3, 1, 0 }
  0x5e   : > { %s1361_s11 = smov [#allocation3]   ;;  %p1007_p0 = pneg %p1572_p3 }
  0x5f   : > { %s229_s16 = sshll.u32 %s1361_s11, 4  ;;  %s271_s9 = scalar_lea.vmem [#allocation8], %s925_s8  ;;  %s1576_s16 = int_to_ptr.vmem [resolvable:$true] %s229_s16 }
  0x60   : > { %s279_s12 = sshll.u32 %s271_s9, 4  ;;  %s931_s27 = sshll.u32 %s1447_s28, 5  ;;  %s1582_s12 = int_to_ptr.vmem [resolvable:$true] %s279_s12 }
  0x61   : > { %p1587_p7 = pnand %p1007_p0, %p1784_p11  ;;  %s1176_s17 = scalar_lea.hbm %s1514_s1, 32 }
  0x62   : > { %p1177_p4 = scmp.ne.s32.totalorder %s1514_s1, %s1176_s17  ;;  %s1181_s3 = scalar_lea.hbm %s1803_s2, 64 }
  0x63   : > { %s1812_s14 = scalar_select %p1587_p7, 1, 0 }
  0x64   : > { %p1179_p5 = pnand %p1177_p4, %p1475_p9  ;;  %p1182_p10 = scmp.lt.u32.totalorder %s1514_s1, %s1803_s2 }
  0x65   : > { %p1183_p1 = scmp.lt.u32.totalorder %s1181_s3, %s1176_s17  ;;  %p1185_p12 = scmp.lt.u32.totalorder %s1176_s17, %s1514_s1 }
  0x66   : > { %p1180_p8 = pneg %p1179_p5 }
  0x67   : > { %p1184_p13 = por %p1183_p1, %p1182_p10 }
  0x69   : > { %p1186_p0 = por %p1185_p12, %p1184_p13 }
  0x6b   : > { %p1187_p11 = pnand %p1186_p0, %p1180_p8 }
  0x6d   : > { %1190 = shalt.err (!%p1187_p11)
}
  0x6e   : > { %s1191_s9 = scalar_lea.vmem %s1582_s12, 32  ;;  %s1362_s25 = smov [#allocation8]  }
  0x6f   : > { %p1192_p4 = scmp.ne.s32.totalorder %s1582_s12, %s1191_s9  ;;  %s1196_s11 = sshll.u32 %s1362_s25, 4  ;;  %s1197_s11 = int_to_ptr.vmem [resolvable:$false] %s1196_s11 }
  0x70   : > { %s1198_s22 = scalar_lea.vmem %s1197_s11, 64  ;;  %p1199_p3 = scmp.lt.s32.totalorder %s1582_s12, %s1197_s11 }
  0x71   : > { %p1194_p5 = pnand %p1192_p4, %p1475_p9  ;;  %p1200_p7 = scmp.lt.s32.totalorder %s1198_s22, %s1191_s9 }
  0x73   : > { %p1195_p6 = pneg %p1194_p5  ;;  %p1201_p10 = por %p1200_p7, %p1199_p3 }
  0x75   : > { %p1202_p1 = pnand %p1201_p10, %p1195_p6 }
  0x77   : > { %1205 = shalt.err (!%p1202_p1)
}
  0x78   : > { %1017 = dma.hbm_to_vmem [thread:$0]  (!%p1806_p2), %s1514_s1, 32, %s1582_s12, %s1469_s13  }
  0x79   : > { %s309_s3 = scalar_lea.vmem [#allocation11], %s931_s27  ;;  %s1206_s2 = scalar_lea.hbm %s1767_s0, 256 }
  0x7a   : > { %s319_s17 = sshll.u32 %s309_s3, 4  ;;  %p1207_p11 = scmp.ne.s32.totalorder %s1767_s0, %s1206_s2  ;;  %s1636_s17 = int_to_ptr.vmem [resolvable:$true] %s319_s17 }
  0x7b   : > { %p1813_p6 = scmp.ne.s32.totalorder %s1812_s14, 0  ;;  %p1213_p7 = scmp.lt.u32.totalorder %s1206_s2, %s1767_s0 }
  0x7d   : > { %p1208_p12 = pneg %p1813_p6 }
  0x7f   : > { %p1209_p13 = pnand %p1208_p12, %p1207_p11 }
  0x81   : > { %p1210_p3 = pneg %p1209_p13 }
  0x83   : > { %p1215_p8 = pnand %p1213_p7, %p1210_p3 }
  0x85   : > { %1218 = shalt.err (!%p1215_p8)
}
  0x86   : > { %s1219_s1 = scalar_lea.vmem %s1576_s16, 256  ;;  %p1227_p10 = scmp.lt.s32.totalorder %s1576_s16, %s1576_s16 }
  0x87   : > { %p1220_p0 = scmp.ne.s32.totalorder %s1576_s16, %s1219_s1  ;;  %p1228_p1 = scmp.lt.s32.totalorder %s1219_s1, %s1219_s1 }
  0x89   : > { %p1222_p4 = pnand %p1220_p0, %p1208_p12  ;;  %p1229_p2 = por %p1228_p1, %p1227_p10 }
  0x8b   : > { %p1223_p5 = pneg %p1222_p4 }
  0x8d   : > { %p1230_p9 = pnand %p1229_p2, %p1223_p5 }
  0x8f   : > { %1233 = shalt.err (!%p1230_p9)
}
  0x90   : > { %s1363_s28 = smov 64   ;;  %s1364_s2 = smov 4  }
  0x91   : > { %1010 = dma.hbm_to_vmem [thread:$0]  (!%p1813_p6), %s1767_s0, 256, %s1576_s16, [#allocation4], %s1363_s28, %s1363_s28, %s1364_s2  }
  0x92   : > { %s1234_s12 = scalar_lea.hbm %s1507_s7, 512  ;;  %p1814_p2 = scmp.ne.s32.totalorder %s1802_s15, 0 }
  0x93   : > { %p1235_p11 = scmp.ne.s32.totalorder %s1507_s7, %s1234_s12  ;;  %s1239_s8 = scalar_lea.hbm %s1771_s4, 1024 }
  0x94   : > { %p1240_p13 = scmp.lt.u32.totalorder %s1507_s7, %s1771_s4  ;;  %p1241_p3 = scmp.lt.u32.totalorder %s1239_s8, %s1234_s12 }
  0x95   : > { %p1237_p9 = pnand %p1235_p11, %p1814_p2  ;;  %p1243_p8 = scmp.lt.u32.totalorder %s1234_s12, %s1507_s7 }
  0x96   : > { %p1242_p7 = por %p1241_p3, %p1240_p13 }
  0x97   : > { %p1238_p12 = pneg %p1237_p9 }
  0x98   : > { %p1244_p0 = por %p1243_p8, %p1242_p7 }
  0x9a   : > { %p1245_p6 = pnand %p1244_p0, %p1238_p12 }
  0x9c   : > { %1248 = shalt.err (!%p1245_p6)
}
  0x9d   : > { %s1249_s16 = scalar_lea.vmem %s1636_s17, 512  ;;  %s1365_s14 = smov [#allocation11]  }
  0x9e   : > { %p1250_p4 = scmp.ne.s32.totalorder %s1636_s17, %s1249_s16  ;;  %s1254_s9 = sshll.u32 %s1365_s14, 4  ;;  %s1255_s9 = int_to_ptr.vmem [resolvable:$false] %s1254_s9 }
  0x9f   : > { %s1256_s22 = scalar_lea.vmem %s1255_s9, 1024  ;;  %p1257_p1 = scmp.lt.s32.totalorder %s1636_s17, %s1255_s9 }
  0xa0   : > { %p1252_p5 = pnand %p1250_p4, %p1814_p2  ;;  %p1258_p11 = scmp.lt.s32.totalorder %s1256_s22, %s1249_s16 }
  0xa2   : > { %p1253_p10 = pneg %p1252_p5  ;;  %p1259_p9 = por %p1258_p11, %p1257_p1 }
  0xa4   : > { %p1260_p13 = pnand %p1259_p9, %p1253_p10 }
  0xa6   : > { %1263 = shalt.err (!%p1260_p13)
}
  0xa7   : > { %p1815_p12 = scmp.ne.s32.totalorder %s1801_s10, 0  ;;  %s1816_s1 = smov 8  }
  0xa8   : > { %s1817_s28 = smov 128   ;;  %s1818_s2 = smov 256  }
  0xa9   : > { %1023 = dma.hbm_to_vmem [thread:$0]  (!%p1815_p12), %s1507_s7, 512, %s1636_s17, %s1525_s26, %s1818_s2, %s1817_s28, %s1816_s1  }
  0xaa   : > { %p1819_p2 = scmp.ne.s32.totalorder %s1811_s30, 0 }
  0xab   : > { %p1820_p3 = scmp.eq.s32.totalorder (!%p1819_p2), %s1546_s6, 0 }
  0xac   : > { %331 = sbr.rel (%p1819_p2) target bundleno = 463 (0x1cf), region = 40 }
  0xb3   : > { %1317 = dma.done.wait (%p1820_p3), [#allocation4], 256   ;;  %p1821_p7 = pmov %p1820_p3 }
  0xb4   : > { %s337_s10 = sand.u32 1, %s1546_s6   ;;  %s1671_s15 = sand.u32 1, %s1338_s19  }
  0xb5   : > { %1319 = vsyncadd (%p1821_p7), [#allocation4], 4294967040  ;;  %s936_s20 = sshll.u32 %s1671_s15, 7  ;;  %s338_s13 = scalar_lea.sflag [#allocation7], %s337_s10 }
  0xb6   : > { %s1674_s12 = scalar_lea.vmem [#allocation6], %s936_s20  ;;  %p1822_p8 = scmp.ne.s32.totalorder %s1807_s24, 0 }
  0xb8   : > { %1321 = dma.done.wait (%p1822_p8), %s338_s13, 2080  }
  0xb9   : > { %1323 = vsyncadd (%p1822_p8), %s338_s13, 4294965216  ;;  %s937_s7 = sshll.u32 %s1671_s15, 1  ;;  %s356_s30 = scalar_lea.sflag [#allocation10], %s337_s10 }
  0xba   : > { %s1681_s26 = scalar_lea.vmem [#allocation8], %s937_s7  ;;  %s1683_s17 = scalar_lea.vmem [#allocation9], %s937_s7 }
  0xbb   : > { %1325 = dma.done.wait (%p1822_p8), %s356_s30, 544  }
  0xbc   : > { %1327 = vsyncadd (%p1822_p8), %s356_s30, 4294966752  ;;  %v1366_v0 = vmov 0   ;;  %v1090_v1 = vld [vmem:[%s1674_s12 + $0x4] ss:$8 sps:$4 sm:$0xff]   ;;  %v1092_v2 = vld [vmem:[%s1674_s12] ss:$8 sps:$4 sm:$0xff]   ;;  %v634_v19 = vlaneseq }
  0xbd   : > { %584 = vmatprep.mubr.bf16.mxu0 %v1366_v0  ;;  %594 = vmatprep.mubr.bf16.mxu1 %v1366_v0  ;;  %v1093_v3 = vld [vmem:[%s1674_s12 + $0x14] ss:$8 sps:$4 sm:$0xff]   ;;  %v1095_v4 = vld [vmem:[%s1674_s12 + $0x10] ss:$8 sps:$4 sm:$0xff]   ;;  %v1096_v5 = vld [vmem:[%s1674_s12 + $0x24] ss:$8 sps:$4 sm:$0xff]  }
  0xbe   : > { %552 = vmatprep.subr.bf16.mxu0 %v1090_v1  ;;  %977 = vmatprep.subr.bf16.mxu1 %v1090_v1  ;;  %v1098_v6 = vld [vmem:[%s1674_s12 + $0x20] ss:$8 sps:$4 sm:$0xff]   ;;  %v1099_v7 = vld [vmem:[%s1674_s12 + $0x34] ss:$8 sps:$4 sm:$0xff]   ;;  %v1101_v8 = vld [vmem:[%s1674_s12 + $0x30] ss:$8 sps:$4 sm:$0xff]  }
  0xbf   : > { %553 = vmatpush1.bf16.msra.mxu0 %v1092_v2  ;;  %985 = vmatpush1.bf16.msra.mxu1 %v1092_v2  ;;  %v1102_v9 = vld [vmem:[%s1674_s12 + $0x44] ss:$8 sps:$4 sm:$0xff]   ;;  %v1104_v10 = vld [vmem:[%s1674_s12 + $0x40] ss:$8 sps:$4 sm:$0xff]   ;;  %v1105_v11 = vld [vmem:[%s1674_s12 + $0x54] ss:$8 sps:$4 sm:$0xff]  }
  0xc0   : > { %554 = vmatprep.subr.bf16.mxu0 %v1093_v3  ;;  %978 = vmatprep.subr.bf16.mxu1 %v1093_v3  ;;  %v1107_v12 = vld [vmem:[%s1674_s12 + $0x50] ss:$8 sps:$4 sm:$0xff]   ;;  %v1108_v13 = vld [vmem:[%s1674_s12 + $0x64] ss:$8 sps:$4 sm:$0xff]   ;;  %v1110_v14 = vld [vmem:[%s1674_s12 + $0x60] ss:$8 sps:$4 sm:$0xff]  }
  0xc1   : > { %v1111_v15 = vld [vmem:[%s1674_s12 + $0x74] ss:$8 sps:$4 sm:$0xff]   ;;  %v1113_v16 = vld [vmem:[%s1674_s12 + $0x70] ss:$8 sps:$4 sm:$0xff]   ;;  %v635_v20 = vshrl.u32 %v634_v19, 7  ;;  %s939_s6 = sshll.u32 %s1671_s15, 5 }
  0xc2   : > { %v1114_v17 = vld [vmem:[#allocation3] sm:$0xff]   ;;  %v1115_v18 = vld [vmem:[#allocation3 + $0x8] sm:$0xff]   ;;  %v632_v22 = vld [vmem:[%s1681_s26] sm:$0x3]  ;;  %s368_s24 = scalar_lea.vmem [#allocation11], %s939_s6  ;;  %s409_s27 = scalar_lea.vmem [#allocation12], %s939_s6 }
  0xc3   : > { %555 = vmatpush1.bf16.msra.mxu0 %v1095_v4  ;;  %986 = vmatpush1.bf16.msra.mxu1 %v1095_v4  ;;  %v636_v21 = vsub.s32 0, %v635_v20  ;;  %v640_v23 = vsub.s32 1, %v635_v20  ;;  %v652_v24 = vld [vmem:[%s1683_s17] sm:$0x3]  ;;  %v672_v26 = vld [vmem:[%s368_s24] sm:$0xff]  ;;  %v674_v27 = vld [vmem:[%s368_s24 + $0x10] sm:$0xff] }
  0xc4   : > { %556 = vmatprep.subr.bf16.mxu0 %v1096_v5  ;;  %979 = vmatprep.subr.bf16.mxu1 %v1096_v5  ;;  %v673_v29 = vld [vmem:[%s368_s24 + $0x8] sm:$0xff]  ;;  %v675_v30 = vld [vmem:[%s368_s24 + $0x18] sm:$0xff]  ;;  %v676_v34 = vunpack.c.l.bf16 %v672_v26  ;;  %v680_v36 = vunpack.c.l.bf16 %v674_v27  ;;  %v677_v37 = vunpack.c.h.bf16 %v672_v26  ;;  %v681_v38 = vunpack.c.h.bf16 %v674_v27  ;;  %s745_s3 = sshll.u32 %s409_s27, 4  ;;  %s976_s8 = sshll.u32 %s1346_s21, 7  ;;  %s1713_s3 = int_to_ptr.vmem [resolvable:$true] %s745_s3 }
  0xc5   : > { %v637_v25 = vrot.slane %v632_v22, %v636_v21  ;;  %v641_v28 = vrot.slane %v632_v22, %v640_v23  ;;  %v657_v31 = vrot.slane %v652_v24, %v636_v21  ;;  %v661_v32 = vrot.slane %v652_v24, %v640_v23  ;;  %s1823_s16 = sld [smem:[#allocation24_spill]]  ;;  %s729_s21 = scalar_lea.sflag [#allocation5], %s1671_s15 }
  0xc6   : > { %v678_v43 = vunpack.c.l.bf16 %v673_v29  ;;  %v682_v44 = vunpack.c.l.bf16 %v675_v30  ;;  %v679_v49 = vunpack.c.h.bf16 %v673_v29  ;;  %v683_v50 = vunpack.c.h.bf16 %v675_v30  ;;  %s1264_s9 = scalar_lea.vmem %s1713_s3, 512  ;;  %p1824_p6 = scmp.ne.s32.totalorder %s1809_s5, 0 }
  0xc7   : > { %557 = vmatpush1.bf16.msra.mxu0 %v1098_v6  ;;  %987 = vmatpush1.bf16.msra.mxu1 %v1098_v6  ;;  %p1265_p0 = scmp.ne.s32.totalorder %s1713_s3, %s1264_s9  ;;  %s1367_s22 = smov [#allocation12]  }
  0xc8   : > { %558 = vmatprep.subr.bf16.mxu0 %v1099_v7  ;;  %980 = vmatprep.subr.bf16.mxu1 %v1099_v7  ;;  %s1268_s1 = sshll.u32 %s1367_s22, 4  ;;  %s1269_s1 = int_to_ptr.vmem [resolvable:$false] %s1268_s1 }
  0xc9   : > { %p1266_p4 = pnand %p1265_p0, %p1824_p6  ;;  %s1270_s28 = scalar_lea.vmem %s1269_s1, 1024 }
  0xca   : > { %p1271_p10 = scmp.lt.s32.totalorder %s1713_s3, %s1269_s1  ;;  %p1272_p1 = scmp.lt.s32.totalorder %s1270_s28, %s1264_s9 }
  0xcb   : > { %559 = vmatpush1.bf16.msra.mxu0 %v1101_v8  ;;  %988 = vmatpush1.bf16.msra.mxu1 %v1101_v8  ;;  %s1718_s14 = scalar_lea.hbm %s1823_s16, %s976_s8  ;;  %p1267_p5 = pneg %p1266_p4 }
  0xcc   : > { %560 = vmatprep.subr.bf16.mxu0 %v1102_v9  ;;  %981 = vmatprep.subr.bf16.mxu1 %v1102_v9  ;;  %p1273_p11 = por %p1272_p1, %p1271_p10 }
  0xce   : > { %p1274_p9 = pnand %p1273_p11, %p1267_p5 }
  0xcf   : > { %561 = vmatpush1.bf16.msra.mxu0 %v1104_v10  ;;  %989 = vmatpush1.bf16.msra.mxu1 %v1104_v10 }
  0xd0   : > { %562 = vmatprep.subr.bf16.mxu0 %v1105_v11  ;;  %982 = vmatprep.subr.bf16.mxu1 %v1105_v11 }
  0xd3   : > { %563 = vmatpush1.bf16.msra.mxu0 %v1107_v12  ;;  %990 = vmatpush1.bf16.msra.mxu1 %v1107_v12 }
  0xd4   : > { %564 = vmatprep.subr.bf16.mxu0 %v1108_v13  ;;  %983 = vmatprep.subr.bf16.mxu1 %v1108_v13 }
  0xd7   : > { %565 = vmatpush1.bf16.msra.mxu0 %v1110_v14  ;;  %991 = vmatpush1.bf16.msra.mxu1 %v1110_v14 }
  0xd8   : > { %566 = vmatprep.subr.bf16.mxu0 %v1111_v15  ;;  %984 = vmatprep.subr.bf16.mxu1 %v1111_v15 }
  0xdb   : > { %567 = vmatpush1.bf16.msra.mxu0 %v1113_v16  ;;  %992 = vmatpush1.bf16.msra.mxu1 %v1113_v16 }
  0xde   : > { %585 = vmatmul.mubr.bf16.vlgmr.msra.gmra.mrb[0].mxu0 %v1114_v17  ;;  %595 = vmatmul.mubr.bf16.vlgmr.msra.gmra.mrb[0].mxu1 %v1115_v18 }
 0x1b1   : > { %v586_v33 = vpop.f32.mrb[0].mxu0  ;;  %v596_v35 = vpop.f32.mrb[0].mxu1 }
 0x1b2   : > { %v644_v39 = vmul.f32 %v637_v25, %v586_v33  ;;  %v648_v40 = vmul.f32 %v637_v25, %v596_v35  ;;  %v588_v41 = vpop.f32.mrb[1].mxu0  ;;  %v598_v42 = vpop.f32.mrb[1].mxu1 }
 0x1b3   : > { %v645_v45 = vmul.f32 %v641_v28, %v588_v41  ;;  %v649_v46 = vmul.f32 %v641_v28, %v598_v42  ;;  %v590_v47 = vpop.f32.mrb[2].mxu0  ;;  %v600_v48 = vpop.f32.mrb[2].mxu1 }
 0x1b4   : > { %v664_v51 = vadd.f32 %v657_v31, %v644_v39  ;;  %v668_v52 = vadd.f32 %v657_v31, %v648_v40  ;;  %v646_v53 = vmul.f32 %v637_v25, %v590_v47  ;;  %v650_v54 = vmul.f32 %v637_v25, %v600_v48  ;;  %v592_v55 = vpop.f32.mrb[3].mxu0  ;;  %v602_v56 = vpop.f32.mrb[3].mxu1 }
 0x1b5   : > { %v665_v57 = vadd.f32 %v661_v32, %v645_v45  ;;  %v669_v58 = vadd.f32 %v661_v32, %v649_v46  ;;  %v647_v59 = vmul.f32 %v641_v28, %v592_v55  ;;  %v651_v60 = vmul.f32 %v641_v28, %v602_v56 }
 0x1b6   : > { %v684_v61 = vadd.f32 %v676_v34, %v664_v51  ;;  %v688_v62 = vadd.f32 %v680_v36, %v668_v52  ;;  %v666_v63 = vadd.f32 %v657_v31, %v646_v53  ;;  %v670_v0 = vadd.f32 %v657_v31, %v650_v54 }
 0x1b7   : > { %v685_v1 = vadd.f32 %v677_v37, %v665_v57  ;;  %v689_v2 = vadd.f32 %v681_v38, %v669_v58  ;;  %v667_v3 = vadd.f32 %v661_v32, %v647_v59  ;;  %v671_v4 = vadd.f32 %v661_v32, %v651_v60 }
 0x1b8   : > { %v692_v5 = vmax.f32 %v684_v61, 0.0  ;;  %v696_v6 = vmax.f32 %v688_v62, 0.0  ;;  %v686_v7 = vadd.f32 %v678_v43, %v666_v63  ;;  %v690_v8 = vadd.f32 %v682_v44, %v670_v0 }
 0x1b9   : > { %v693_v9 = vmax.f32 %v685_v1, 0.0  ;;  %v697_v10 = vmax.f32 %v689_v2, 0.0  ;;  %v687_v11 = vadd.f32 %v679_v49, %v667_v3  ;;  %v691_v12 = vadd.f32 %v683_v50, %v671_v4 }
 0x1ba   : > { %v694_v13 = vmax.f32 %v686_v7, 0.0  ;;  %v698_v14 = vmax.f32 %v690_v8, 0.0 }
 0x1bb   : > { %v972_v15 = vpack.c.bf16 %v693_v9, %v692_v5  ;;  %v974_v16 = vpack.c.bf16 %v697_v10, %v696_v6  ;;  %v695_v17 = vmax.f32 %v687_v11, 0.0  ;;  %v699_v18 = vmax.f32 %v691_v12, 0.0 }
 0x1bd   : > { %724 = vst [vmem:[%s409_s27] sm:$0xff] %v972_v15  ;;  %726 = vst [vmem:[%s409_s27 + $0x10] sm:$0xff] %v974_v16  ;;  %v973_v19 = vpack.c.bf16 %v695_v17, %v694_v13  ;;  %v975_v20 = vpack.c.bf16 %v699_v18, %v698_v14 }
 0x1bf   : > { %725 = vst [vmem:[%s409_s27 + $0x8] sm:$0xff] %v973_v19  ;;  %727 = vst [vmem:[%s409_s27 + $0x18] sm:$0xff] %v975_v20 }
 0x1c0   : > { %1277 = shalt.err (!%p1274_p9)
}
 0x1c1   : > { %s1278_s2 = scalar_lea.hbm %s1718_s14, 512  ;;  %s1282_s13 = scalar_lea.hbm %s1823_s16, 1024 }
 0x1c2   : > { %p1279_p13 = scmp.ne.s32.totalorder %s1718_s14, %s1278_s2  ;;  %p1283_p3 = scmp.lt.u32.totalorder %s1718_s14, %s1823_s16 }
 0x1c3   : > { %p1284_p7 = scmp.lt.u32.totalorder %s1282_s13, %s1278_s2  ;;  %p1286_p0 = scmp.lt.u32.totalorder %s1278_s2, %s1718_s14 }
 0x1c4   : > { %p1280_p12 = pnand %p1279_p13, %p1824_p6 }
 0x1c5   : > { %p1285_p8 = por %p1284_p7, %p1283_p3 }
 0x1c6   : > { %p1281_p2 = pneg %p1280_p12 }
 0x1c7   : > { %p1287_p4 = por %p1286_p0, %p1285_p8 }
 0x1c9   : > { %p1288_p5 = pnand %p1287_p4, %p1281_p2 }
 0x1cb   : > { %1291 = shalt.err (!%p1288_p5)
}
 0x1cc   : > { %s1368_s26 = smov 128   ;;  %s1369_s30 = smov 256  }
 0x1cd   : > { %s1370_s17 = smov 8  }
 0x1ce   : > { %1005 = dma.vmem_to_hbm [thread:$0]  (%p1824_p6), %s1713_s3, 512, %s1718_s14, %s729_s21, %s1368_s26, %s1369_s30, %s1370_s17  }
 0x1cf PF: > { %s760_s6 = sand.u32 1, %s1334_s18   ;;  %p1825_p10 = scmp.ne.s32.totalorder %s1810_s29, 0 }
 0x1d0   : > { %p1826_p1 = scmp.ge.s32.totalorder %s1354_s23, 2  ;;  %s761_s24 = scalar_lea.sflag [#allocation5], %s760_s6 }
 0x1d2   : > { %p1025_p11 = pnand %p1826_p1, %p1825_p10 }
 0x1d4   : > { %1329 = dma.done.wait (!%p1025_p11), %s761_s24, 512  }
 0x1d5   : > { %1331 = vsyncadd (!%p1025_p11), %s761_s24, 4294966784  ;;  %s25_s23 = sadd.s32 1, %s1354_s23   ;;  %s1827_s27 = sld [smem:[#allocation17_spill]] }
 0x1d6   : > { %p22_p9 = scmp.ge.s32.totalorder %s25_s23, 4   ;;  %s1828_s20 = sld [smem:[#allocation20_spill]] }
 0x1d7   : > { %s1829_s21 = sld [smem:[#allocation18_spill]]  ;;  %s1830_s22 = sld [smem:[#allocation19_spill]] }
 0x1d8   : > { %s1831_s18 = smov %s1338_s19  ;;  %24 = sbr.rel (!%p22_p9) target bundleno = 14 (0xe), region = 134 }
 0x1db   : > { %s1832_s19 = smov %s1827_s27 }
 0x1df   :  { %766 = vsyncpa [#allocation4], 1 }
 0x1e0   :  { %768 = vsyncpa [#allocation4 + $0x1], 1 }
 0x1e1   :  { %769 = vsyncpa [#allocation7], 1 }
 0x1e2   :  { %771 = vsyncpa [#allocation7 + $0x1], 1 }
 0x1e3   :  { %772 = vsyncpa [#allocation10], 1 }
 0x1e4   :  { %774 = vsyncpa [#allocation10 + $0x1], 1 }
 0x1e5   :  { %775 = vsyncpa [#allocation5], 1 }
 0x1e6   :  { %777 = vsyncpa [#allocation5 + $0x1], 1 }

// kernel: _lambda_.36
= control target key start
LH: loop header
LB: loop body
LE: loop exit
PB: predicated region body
PF: predicated region fallthrough
CT: control target
= control target key end

     0   :  { %9 = vsyncpa [#allocation4], 0  ;;  %s952_s0 = inlined_call_operand.hbm [shape: bf16[32,512], index: 0, kind: input, shape index: {}]   ;;  %s953_s1 = inlined_call_operand.hbm [shape: bf16[512,128], index: 1, kind: input, shape index: {}]   ;;  %s954_s2 = inlined_call_operand.hbm [shape: f32[1,128], index: 2, kind: input, shape index: {}]   ;;  %s955_s3 = inlined_call_operand.hbm [shape: f32[1,128], index: 3, kind: input, shape index: {}]   ;;  %s956_s4 = inlined_call_operand.hbm [shape: bf16[32,128], index: 4, kind: output, shape index: {}]  }
   0x1   :  { %10 = vsyncpa [#allocation7], 0 }
   0x2   :  { %11 = vsyncpa [#allocation10], 0 }
   0x3   :  { %12 = vsyncpa [#allocation5], 0  ;;  %s852_s15 = smov [#allocation6]   ;;  %s734_s19 = scalar_lea.hbm %s953_s1, 4096 }
   0x4   :  { %s30_s16 = sshll.u32 %s852_s15, 4  ;;  %p735_p0 = scmp.ne.s32.totalorder %s953_s1, %s734_s19  ;;  %s31_s16 = int_to_ptr.vmem [resolvable:$true] %s30_s16 }
   0x5   :  { %p738_p1 = scmp.lt.u32.totalorder %s734_s19, %s953_s1 }
   0x7   :  { %p740_p2 = pnand %p738_p1, %p735_p0 }
   0x9   :  { %743 = shalt.err (!%p740_p2)
}
   0xa   :  { %s744_s24 = scalar_lea.vmem %s31_s16, 4096  ;;  %p749_p4 = scmp.lt.s32.totalorder %s31_s16, %s31_s16 }
   0xb   :  { %p745_p3 = scmp.ne.s32.totalorder %s31_s16, %s744_s24  ;;  %p750_p5 = scmp.lt.s32.totalorder %s744_s24, %s744_s24 }
   0xd   :  { %p751_p6 = por %p750_p5, %p749_p4 }
   0xf   :  { %p752_p7 = pnand %p751_p6, %p745_p3 }
  0x11   :  { %755 = shalt.err (!%p752_p7)
}
  0x12   :  { %s853_s25 = smov 64   ;;  %s854_s26 = smov 4  }
  0x13   :  { %36 = dma.hbm_to_vmem [thread:$0]  %s953_s1, 4096, %s31_s16, [#allocation7], %s853_s25, %s853_s25, %s854_s26  }
  0x14   :  { %s855_s29 = smov [#allocation3]   ;;  %s756_s7 = scalar_lea.hbm %s952_s0, 1024 }
  0x15   :  { %s18_s30 = sshll.u32 %s855_s29, 4  ;;  %p757_p8 = scmp.ne.s32.totalorder %s952_s0, %s756_s7  ;;  %s19_s30 = int_to_ptr.vmem [resolvable:$true] %s18_s30 }
  0x16   :  { %p760_p9 = scmp.lt.u32.totalorder %s756_s7, %s952_s0 }
  0x18   :  { %p762_p10 = pnand %p760_p9, %p757_p8 }
  0x1a   :  { %765 = shalt.err (!%p762_p10)
}
  0x1b   :  { %s766_s12 = scalar_lea.vmem %s19_s30, 1024  ;;  %p771_p12 = scmp.lt.s32.totalorder %s19_s30, %s19_s30 }
  0x1c   :  { %p767_p11 = scmp.ne.s32.totalorder %s19_s30, %s766_s12  ;;  %p772_p13 = scmp.lt.s32.totalorder %s766_s12, %s766_s12 }
  0x1e   :  { %p773_p0 = por %p772_p13, %p771_p12 }
  0x20   :  { %p774_p1 = pnand %p773_p0, %p767_p11 }
  0x22   :  { %777 = shalt.err (!%p774_p1)
}
  0x23   :  { %s856_s1 = smov 256   ;;  %s857_s13 = smov 16  }
  0x24   :  { %24 = dma.hbm_to_vmem [thread:$0]  %s952_s0, 1024, %s19_s30, [#allocation4], %s856_s1, %s856_s1, %s857_s13  }
  0x25   :  { %s858_s16 = smov [#allocation8]   ;;  %s859_s18 = smov [#allocation9]  }
  0x26   :  { %s43_s17 = sshll.u32 %s858_s16, 4  ;;  %s53_s19 = sshll.u32 %s859_s18, 4  ;;  %s44_s17 = int_to_ptr.vmem [resolvable:$true] %s43_s17  ;;  %s54_s19 = int_to_ptr.vmem [resolvable:$true] %s53_s19 }
  0x27   :  { %s778_s22 = scalar_lea.hbm %s954_s2, 16 }
  0x28   :  { %p779_p2 = scmp.ne.s32.totalorder %s954_s2, %s778_s22  ;;  %p782_p3 = scmp.lt.u32.totalorder %s778_s22, %s954_s2 }
  0x2a   :  { %p784_p4 = pnand %p782_p3, %p779_p2 }
  0x2c   :  { %787 = shalt.err (!%p784_p4)
}
  0x2d   :  { %s788_s0 = scalar_lea.vmem %s44_s17, 16  ;;  %s792_s29 = scalar_lea.vmem %s44_s17, 32 }
  0x2e   :  { %p789_p5 = scmp.ne.s32.totalorder %s44_s17, %s788_s0  ;;  %p793_p6 = scmp.lt.s32.totalorder %s44_s17, %s44_s17 }
  0x2f   :  { %p794_p7 = scmp.lt.s32.totalorder %s792_s29, %s788_s0 }
  0x31   :  { %p795_p8 = por %p794_p7, %p793_p6 }
  0x33   :  { %p796_p9 = pnand %p795_p8, %p789_p5 }
  0x35   :  { %799 = shalt.err (!%p796_p9)
}
  0x36   :  { %46 = dma.hbm_to_vmem [thread:$0]  %s954_s2, 16, %s44_s17, [#allocation7]  }
  0x37   :  { %s800_s8 = scalar_lea.hbm %s955_s3, 16 }
  0x38   :  { %p801_p10 = scmp.ne.s32.totalorder %s955_s3, %s800_s8  ;;  %p804_p11 = scmp.lt.u32.totalorder %s800_s8, %s955_s3 }
  0x3a   :  { %p806_p12 = pnand %p804_p11, %p801_p10 }
  0x3c   :  { %809 = shalt.err (!%p806_p12)
}
  0x3d   :  { %s810_s1 = scalar_lea.vmem %s54_s19, 16  ;;  %s814_s13 = scalar_lea.vmem %s54_s19, 32 }
  0x3e   :  { %p811_p13 = scmp.ne.s32.totalorder %s54_s19, %s810_s1  ;;  %p815_p0 = scmp.lt.s32.totalorder %s54_s19, %s54_s19 }
  0x3f   :  { %p816_p1 = scmp.lt.s32.totalorder %s814_s13, %s810_s1 }
  0x41   :  { %p817_p2 = por %p816_p1, %p815_p0 }
  0x43   :  { %p818_p3 = pnand %p817_p2, %p811_p13 }
  0x45   :  { %821 = shalt.err (!%p818_p3)
}
  0x46   :  { %56 = dma.hbm_to_vmem [thread:$0]  %s955_s3, 16, %s54_s19, [#allocation10]  }
  0x47   :  { %844 = dma.done.wait [#allocation4], 1024  }
  0x48   :  { %845 = vsyncadd [#allocation4], 4294966272 }
  0x49   :  { %846 = dma.done.wait [#allocation7], 4112  }
  0x4a   :  { %847 = vsyncadd [#allocation7], 4294963184 }
  0x4b   :  { %848 = dma.done.wait [#allocation10], 16  }
  0x4c   :  { %849 = vsyncadd [#allocation10], 4294967280  ;;  %v690_v0 = vld [vmem:[#allocation6 + $0x40] sm:$0xff]   ;;  %v694_v4 = vld [vmem:[#allocation6 + $0x48] sm:$0xff]   ;;  %s860_s3 = smov [#allocation11]  }
  0x4d   :  { %v691_v1 = vld [vmem:[#allocation6 + $0xc0] sm:$0xff]   ;;  %625 = vmatprep.subr.bf16.mxu0 %v690_v0  ;;  %v695_v5 = vld [vmem:[#allocation6 + $0xc8] sm:$0xff]   ;;  %v698_v8 = vld [vmem:[#allocation6 + $0x50] sm:$0xff]   ;;  %s550_s15 = sshll.u32 %s860_s3, 4  ;;  %s551_s15 = int_to_ptr.vmem [resolvable:$true] %s550_s15 }
  0x4e   :  { %v692_v2 = vld [vmem:[#allocation6] sm:$0xff]   ;;  %653 = vmatprep.subr.bf16.mxu1 %v691_v1  ;;  %v696_v6 = vld [vmem:[#allocation6 + $0x8] sm:$0xff]   ;;  %v699_v9 = vld [vmem:[#allocation6 + $0xd0] sm:$0xff]   ;;  %s822_s16 = scalar_lea.vmem %s551_s15, 256  ;;  %p827_p5 = scmp.lt.s32.totalorder %s551_s15, %s551_s15 }
  0x4f   :  { %v693_v3 = vld [vmem:[#allocation6 + $0x80] sm:$0xff]   ;;  %626 = vmatpush3.bf16.msra.mxu0 %v692_v2  ;;  %v697_v7 = vld [vmem:[#allocation6 + $0x88] sm:$0xff]   ;;  %v700_v10 = vld [vmem:[#allocation6 + $0x10] sm:$0xff]   ;;  %p823_p4 = scmp.ne.s32.totalorder %s551_s15, %s822_s16  ;;  %p828_p6 = scmp.lt.s32.totalorder %s822_s16, %s822_s16 }
  0x50   :  { %654 = vmatpush3.bf16.msra.mxu1 %v693_v3  ;;  %627 = vmatprep.subr.bf16.mxu0 %v694_v4  ;;  %v701_v11 = vld [vmem:[#allocation6 + $0x90] sm:$0xff]   ;;  %v702_v12 = vld [vmem:[#allocation6 + $0x58] sm:$0xff]   ;;  %v706_v16 = vld [vmem:[#allocation6 + $0x60] sm:$0xff]  }
  0x51   :  { %655 = vmatprep.subr.bf16.mxu1 %v695_v5  ;;  %v703_v13 = vld [vmem:[#allocation6 + $0xd8] sm:$0xff]   ;;  %v707_v17 = vld [vmem:[#allocation6 + $0xe0] sm:$0xff]   ;;  %v710_v20 = vld [vmem:[#allocation6 + $0x68] sm:$0xff]   ;;  %p829_p7 = por %p828_p6, %p827_p5 }
  0x52   :  { %v704_v14 = vld [vmem:[#allocation6 + $0x18] sm:$0xff]   ;;  %v708_v18 = vld [vmem:[#allocation6 + $0x20] sm:$0xff]   ;;  %v711_v21 = vld [vmem:[#allocation6 + $0xe8] sm:$0xff]  }
  0x53   :  { %628 = vmatpush3.bf16.msra.mxu0 %v696_v6  ;;  %v705_v15 = vld [vmem:[#allocation6 + $0x98] sm:$0xff]   ;;  %v709_v19 = vld [vmem:[#allocation6 + $0xa0] sm:$0xff]   ;;  %v712_v22 = vld [vmem:[#allocation6 + $0x28] sm:$0xff]   ;;  %p830_p8 = pnand %p829_p7, %p823_p4 }
  0x54   :  { %656 = vmatpush3.bf16.msra.mxu1 %v697_v7  ;;  %629 = vmatprep.subr.bf16.mxu0 %v698_v8  ;;  %v713_v23 = vld [vmem:[#allocation6 + $0xa8] sm:$0xff]   ;;  %v714_v24 = vld [vmem:[#allocation6 + $0x70] sm:$0xff]   ;;  %v718_v28 = vld [vmem:[#allocation6 + $0x78] sm:$0xff]  }
  0x55   :  { %657 = vmatprep.subr.bf16.mxu1 %v699_v9  ;;  %v715_v25 = vld [vmem:[#allocation6 + $0xf0] sm:$0xff]   ;;  %v719_v29 = vld [vmem:[#allocation6 + $0xf8] sm:$0xff]   ;;  %v604_v49 = vld [vmem:[#allocation8] ss:$0 sm:$0xff] }
  0x56   :  { %v716_v26 = vld [vmem:[#allocation6 + $0x30] sm:$0xff]   ;;  %v720_v30 = vld [vmem:[#allocation6 + $0x38] sm:$0xff]   ;;  %v605_v54 = vld [vmem:[#allocation9] ss:$0 sm:$0xff] }
  0x57   :  { %630 = vmatpush3.bf16.msra.mxu0 %v700_v10  ;;  %v717_v27 = vld [vmem:[#allocation6 + $0xb0] sm:$0xff]   ;;  %v721_v31 = vld [vmem:[#allocation6 + $0xb8] sm:$0xff]  }
  0x58   :  { %658 = vmatpush3.bf16.msra.mxu1 %v701_v11  ;;  %631 = vmatprep.subr.bf16.mxu0 %v702_v12  ;;  %v722_v32 = vld [vmem:[#allocation3] ss:$16 sps:$4 sm:$0xff]   ;;  %v724_v33 = vld [vmem:[#allocation3 + $0x4] ss:$16 sps:$4 sm:$0xff]   ;;  %v725_v34 = vld [vmem:[#allocation3 + $0x8] ss:$16 sps:$4 sm:$0xff]  }
  0x59   :  { %659 = vmatprep.subr.bf16.mxu1 %v703_v13  ;;  %v727_v35 = vld [vmem:[#allocation3 + $0xc] ss:$16 sps:$4 sm:$0xff]   ;;  %418 = vmatprep.mubr.bf16.mxu0 %v724_v33  ;;  %v728_v36 = vld [vmem:[#allocation3 + $0x24] ss:$16 sps:$4 sm:$0xff]   ;;  %v732_v38 = vld [vmem:[#allocation3 + $0x20] ss:$16 sps:$4 sm:$0xff]  }
  0x5a   :  { %467 = vmatprep.mubr.bf16.mxu1 %v727_v35  ;;  %v730_v37 = vld [vmem:[#allocation3 + $0x2c] ss:$16 sps:$4 sm:$0xff]   ;;  %v733_v39 = vld [vmem:[#allocation3 + $0x28] ss:$16 sps:$4 sm:$0xff]  }
  0x5b   :  { %632 = vmatpush3.bf16.msra.mxu0 %v704_v14 }
  0x5c   :  { %660 = vmatpush3.bf16.msra.mxu1 %v705_v15  ;;  %633 = vmatprep.subr.bf16.mxu0 %v706_v16 }
  0x5d   :  { %661 = vmatprep.subr.bf16.mxu1 %v707_v17 }
  0x5f   :  { %634 = vmatpush3.bf16.msra.mxu0 %v708_v18 }
  0x60   :  { %662 = vmatpush3.bf16.msra.mxu1 %v709_v19  ;;  %635 = vmatprep.subr.bf16.mxu0 %v710_v20 }
  0x61   :  { %663 = vmatprep.subr.bf16.mxu1 %v711_v21 }
  0x63   :  { %636 = vmatpush3.bf16.msra.mxu0 %v712_v22 }
  0x64   :  { %664 = vmatpush3.bf16.msra.mxu1 %v713_v23  ;;  %637 = vmatprep.subr.bf16.mxu0 %v714_v24 }
  0x65   :  { %665 = vmatprep.subr.bf16.mxu1 %v715_v25 }
  0x67   :  { %638 = vmatpush3.bf16.msra.mxu0 %v716_v26 }
  0x68   :  { %666 = vmatpush3.bf16.msra.mxu1 %v717_v27  ;;  %639 = vmatprep.subr.bf16.mxu0 %v718_v28 }
  0x69   :  { %667 = vmatprep.subr.bf16.mxu1 %v719_v29 }
  0x6b   :  { %640 = vmatpush3.bf16.msra.mxu0 %v720_v30 }
  0x6c   :  { %668 = vmatpush3.bf16.msra.mxu1 %v721_v31 }
  0x6e   :  { %419 = vmatmul.mubr.bf16.vlgmr.msra.gmra.mrb[0].mxu0 %v722_v32 }
  0x6f   :  { %468 = vmatmul.mubr.bf16.vlgmr.msra.gmra.mrb[0].mxu1 %v725_v34  ;;  %426 = vmatprep.mubr.bf16.mxu0 %v728_v36 }
  0x70   :  { %475 = vmatprep.mubr.bf16.mxu1 %v730_v37 }
  0x76   :  { %427 = vmatmul.mubr.bf16.gmra.mrb[4].mxu0 %v732_v38 }
  0x77   :  { %476 = vmatmul.mubr.bf16.gmra.mrb[4].mxu1 %v733_v39 }
 0x141   :  { %v641_v40 = vpop.f32.mrb[0].mxu0 }
 0x142   :  { %v669_v41 = vpop.f32.mrb[0].mxu1  ;;  %v642_v42 = vpop.f32.mrb[1].mxu0 }
 0x143   :  { %v643_v43 = vadd.f32 %v642_v42, %v641_v40  ;;  %v670_v44 = vpop.f32.mrb[1].mxu1  ;;  %v644_v45 = vpop.f32.mrb[2].mxu0 }
 0x144   :  { %v671_v46 = vadd.f32 %v670_v44, %v669_v41  ;;  %v672_v47 = vpop.f32.mrb[2].mxu1  ;;  %v645_v48 = vpop.f32.mrb[3].mxu0 }
 0x145   :  { %v646_v50 = vadd.f32 %v645_v48, %v644_v45  ;;  %v673_v51 = vpop.f32.mrb[3].mxu1 }
 0x146   :  { %v470_v52 = vadd.f32 %v671_v46, %v643_v43  ;;  %v674_v53 = vadd.f32 %v673_v51, %v672_v47 }
 0x148   :  { %v506_v55 = vmul.f32 %v604_v49, %v470_v52  ;;  %v473_v56 = vadd.f32 %v674_v53, %v646_v50 }
 0x149   :  { %v647_v57 = vpop.f32.mrb[4].mxu0 }
 0x14a   :  { %v517_v58 = vadd.f32 %v605_v54, %v506_v55  ;;  %v507_v59 = vmul.f32 %v604_v49, %v473_v56  ;;  %v675_v60 = vpop.f32.mrb[4].mxu1  ;;  %v648_v61 = vpop.f32.mrb[5].mxu0 }
 0x14b   :  { %v649_v62 = vadd.f32 %v648_v61, %v647_v57  ;;  %v676_v63 = vpop.f32.mrb[5].mxu1  ;;  %v650_v0 = vpop.f32.mrb[6].mxu0 }
 0x14c   :  { %v518_v1 = vadd.f32 %v605_v54, %v507_v59  ;;  %v677_v2 = vadd.f32 %v676_v63, %v675_v60  ;;  %v678_v3 = vpop.f32.mrb[6].mxu1  ;;  %v651_v4 = vpop.f32.mrb[7].mxu0  ;;  %v521_v7 = vmax.f32 %v517_v58, 0.0 }
 0x14d   :  { %v652_v5 = vadd.f32 %v651_v4, %v650_v0  ;;  %v679_v6 = vpop.f32.mrb[7].mxu1 }
 0x14e   :  { %v522_v8 = vmax.f32 %v518_v1, 0.0  ;;  %v478_v9 = vadd.f32 %v677_v2, %v649_v62  ;;  %v680_v10 = vadd.f32 %v679_v6, %v678_v3 }
 0x150   :  { %v508_v11 = vmul.f32 %v604_v49, %v478_v9  ;;  %v481_v12 = vadd.f32 %v680_v10, %v652_v5  ;;  %v617_v13 = vpack.c.bf16 %v522_v8, %v521_v7 }
 0x152   :  { %v519_v14 = vadd.f32 %v605_v54, %v508_v11  ;;  %v509_v15 = vmul.f32 %v604_v49, %v481_v12  ;;  %618 = vst [vmem:[#allocation11] sm:$0xff] %v617_v13  }
 0x154   :  { %v520_v16 = vadd.f32 %v605_v54, %v509_v15  ;;  %v523_v17 = vmax.f32 %v519_v14, 0.0 }
 0x156   :  { %v524_v18 = vmax.f32 %v520_v16, 0.0 }
 0x158   :  { %v622_v19 = vpack.c.bf16 %v524_v18, %v523_v17 }
 0x15a   :  { %624 = vst [vmem:[#allocation11 + $0x8] sm:$0xff] %v622_v19  }
 0x15b   :  { %833 = shalt.err (!%p830_p8)
}
 0x15c   :  { %s834_s19 = scalar_lea.hbm %s956_s4, 256 }
 0x15d   :  { %p835_p9 = scmp.ne.s32.totalorder %s956_s4, %s834_s19  ;;  %p838_p10 = scmp.lt.u32.totalorder %s834_s19, %s956_s4 }
 0x15f   :  { %p840_p11 = pnand %p838_p10, %p835_p9 }
 0x161   :  { %843 = shalt.err (!%p840_p11)
}
 0x162   :  { %556 = dma.vmem_to_hbm [thread:$0]  %s551_s15, 256, %s956_s4, [#allocation5], %s853_s25, %s853_s25, %s854_s26  }
 0x163   :  { %850 = dma.done.wait [#allocation5], 256  }
 0x164   :  { %851 = vsyncadd [#allocation5], 4294967040 }
 0x165   :  { %560 = vsyncpa [#allocation4], 1 }
 0x166   :  { %561 = vsyncpa [#allocation7], 1 }
 0x167   :  { %562 = vsyncpa [#allocation10], 1 }
 0x168   :  { %563 = vsyncpa [#allocation5], 1 }

// kernel: _lambda_.45
= control target key start
LH: loop header
LB: loop body
LE: loop exit
PB: predicated region body
PF: predicated region fallthrough
CT: control target
= control target key end

     0   :  { %9 = vsyncpa [#allocation4], 0  ;;  %s1172_s0 = inlined_call_operand.hbm [shape: bf16[32,512], index: 0, kind: input, shape index: {}]   ;;  %s1173_s1 = inlined_call_operand.hbm [shape: bf16[512,256], index: 1, kind: input, shape index: {}]   ;;  %s1174_s2 = inlined_call_operand.hbm [shape: f32[1,256], index: 2, kind: input, shape index: {}]   ;;  %s1175_s3 = inlined_call_operand.hbm [shape: f32[1,256], index: 3, kind: input, shape index: {}]   ;;  %s1176_s4 = inlined_call_operand.hbm [shape: bf16[32,256], index: 4, kind: output, shape index: {}]  }
   0x1   :  { %10 = vsyncpa [#allocation7], 0 }
   0x2   :  { %11 = vsyncpa [#allocation10], 0 }
   0x3   :  { %12 = vsyncpa [#allocation5], 0  ;;  %s1072_s15 = smov [#allocation6]   ;;  %s954_s19 = scalar_lea.hbm %s1173_s1, 8192 }
   0x4   :  { %s30_s16 = sshll.u32 %s1072_s15, 4  ;;  %p955_p0 = scmp.ne.s32.totalorder %s1173_s1, %s954_s19  ;;  %s31_s16 = int_to_ptr.vmem [resolvable:$true] %s30_s16 }
   0x5   :  { %p958_p1 = scmp.lt.u32.totalorder %s954_s19, %s1173_s1 }
   0x7   :  { %p960_p2 = pnand %p958_p1, %p955_p0 }
   0x9   :  { %963 = shalt.err (!%p960_p2)
}
   0xa   :  { %s964_s24 = scalar_lea.vmem %s31_s16, 8192  ;;  %p969_p4 = scmp.lt.s32.totalorder %s31_s16, %s31_s16 }
   0xb   :  { %p965_p3 = scmp.ne.s32.totalorder %s31_s16, %s964_s24  ;;  %p970_p5 = scmp.lt.s32.totalorder %s964_s24, %s964_s24 }
   0xd   :  { %p971_p6 = por %p970_p5, %p969_p4 }
   0xf   :  { %p972_p7 = pnand %p971_p6, %p965_p3 }
  0x11   :  { %975 = shalt.err (!%p972_p7)
}
  0x12   :  { %s1073_s25 = smov 128   ;;  %s1074_s26 = smov 8  }
  0x13   :  { %36 = dma.hbm_to_vmem [thread:$0]  %s1173_s1, 8192, %s31_s16, [#allocation7], %s1073_s25, %s1073_s25, %s1074_s26  }
  0x14   :  { %s1075_s29 = smov [#allocation3]   ;;  %s976_s7 = scalar_lea.hbm %s1172_s0, 1024 }
  0x15   :  { %s18_s30 = sshll.u32 %s1075_s29, 4  ;;  %p977_p8 = scmp.ne.s32.totalorder %s1172_s0, %s976_s7  ;;  %s19_s30 = int_to_ptr.vmem [resolvable:$true] %s18_s30 }
  0x16   :  { %p980_p9 = scmp.lt.u32.totalorder %s976_s7, %s1172_s0 }
  0x18   :  { %p982_p10 = pnand %p980_p9, %p977_p8 }
  0x1a   :  { %985 = shalt.err (!%p982_p10)
}
  0x1b   :  { %s986_s12 = scalar_lea.vmem %s19_s30, 1024  ;;  %p991_p12 = scmp.lt.s32.totalorder %s19_s30, %s19_s30 }
  0x1c   :  { %p987_p11 = scmp.ne.s32.totalorder %s19_s30, %s986_s12  ;;  %p992_p13 = scmp.lt.s32.totalorder %s986_s12, %s986_s12 }
  0x1e   :  { %p993_p0 = por %p992_p13, %p991_p12 }
  0x20   :  { %p994_p1 = pnand %p993_p0, %p987_p11 }
  0x22   :  { %997 = shalt.err (!%p994_p1)
}
  0x23   :  { %s1076_s1 = smov 256   ;;  %s1077_s13 = smov 16  }
  0x24   :  { %24 = dma.hbm_to_vmem [thread:$0]  %s1172_s0, 1024, %s19_s30, [#allocation4], %s1076_s1, %s1076_s1, %s1077_s13  }
  0x25   :  { %s1078_s16 = smov [#allocation8]   ;;  %s1079_s18 = smov [#allocation9]  }
  0x26   :  { %s43_s17 = sshll.u32 %s1078_s16, 4  ;;  %s53_s19 = sshll.u32 %s1079_s18, 4  ;;  %s44_s17 = int_to_ptr.vmem [resolvable:$true] %s43_s17  ;;  %s54_s19 = int_to_ptr.vmem [resolvable:$true] %s53_s19 }
  0x27   :  { %s998_s22 = scalar_lea.hbm %s1174_s2, 32 }
  0x28   :  { %p999_p2 = scmp.ne.s32.totalorder %s1174_s2, %s998_s22  ;;  %p1002_p3 = scmp.lt.u32.totalorder %s998_s22, %s1174_s2 }
  0x2a   :  { %p1004_p4 = pnand %p1002_p3, %p999_p2 }
  0x2c   :  { %1007 = shalt.err (!%p1004_p4)
}
  0x2d   :  { %s1008_s0 = scalar_lea.vmem %s44_s17, 32  ;;  %p1013_p6 = scmp.lt.s32.totalorder %s44_s17, %s44_s17 }
  0x2e   :  { %p1009_p5 = scmp.ne.s32.totalorder %s44_s17, %s1008_s0  ;;  %p1014_p7 = scmp.lt.s32.totalorder %s1008_s0, %s1008_s0 }
  0x30   :  { %p1015_p8 = por %p1014_p7, %p1013_p6 }
  0x32   :  { %p1016_p9 = pnand %p1015_p8, %p1009_p5 }
  0x34   :  { %1019 = shalt.err (!%p1016_p9)
}
  0x35   :  { %46 = dma.hbm_to_vmem [thread:$0]  %s1174_s2, 32, %s44_s17, [#allocation7]  }
  0x36   :  { %s1020_s7 = scalar_lea.hbm %s1175_s3, 32 }
  0x37   :  { %p1021_p10 = scmp.ne.s32.totalorder %s1175_s3, %s1020_s7  ;;  %p1024_p11 = scmp.lt.u32.totalorder %s1020_s7, %s1175_s3 }
  0x39   :  { %p1026_p12 = pnand %p1024_p11, %p1021_p10 }
  0x3b   :  { %1029 = shalt.err (!%p1026_p12)
}
  0x3c   :  { %s1030_s12 = scalar_lea.vmem %s54_s19, 32  ;;  %p1035_p0 = scmp.lt.s32.totalorder %s54_s19, %s54_s19 }
  0x3d   :  { %p1031_p13 = scmp.ne.s32.totalorder %s54_s19, %s1030_s12  ;;  %p1036_p1 = scmp.lt.s32.totalorder %s1030_s12, %s1030_s12 }
  0x3f   :  { %p1037_p2 = por %p1036_p1, %p1035_p0 }
  0x41   :  { %p1038_p3 = pnand %p1037_p2, %p1031_p13 }
  0x43   :  { %1041 = shalt.err (!%p1038_p3)
}
  0x44   :  { %56 = dma.hbm_to_vmem [thread:$0]  %s1175_s3, 32, %s54_s19, [#allocation10]  }
  0x45   :  { %1064 = dma.done.wait [#allocation4], 1024  }
  0x46   :  { %1065 = vsyncadd [#allocation4], 4294966272 }
  0x47   :  { %1066 = dma.done.wait [#allocation7], 8224  }
  0x48   :  { %1067 = vsyncadd [#allocation7], 4294959072 }
  0x49   :  { %1068 = dma.done.wait [#allocation10], 32  }
  0x4a   :  { %1069 = vsyncadd [#allocation10], 4294967264  ;;  %v846_v0 = vld [vmem:[#allocation6 + $0x4] ss:$8 sps:$4 sm:$0xff]   ;;  %v850_v2 = vld [vmem:[#allocation6] ss:$8 sps:$4 sm:$0xff]  }
  0x4b   :  { %v848_v1 = vld [vmem:[#allocation6 + $0x104] ss:$8 sps:$4 sm:$0xff]   ;;  %521 = vmatprep.subr.bf16.mxu1 %v846_v0  ;;  %v851_v3 = vld [vmem:[#allocation6 + $0x100] ss:$8 sps:$4 sm:$0xff]   ;;  %v852_v4 = vld [vmem:[#allocation6 + $0x14] ss:$8 sps:$4 sm:$0xff]  }
  0x4c   :  { %574 = vmatprep.subr.bf16.mxu0 %v848_v1  ;;  %522 = vmatpush1.bf16.msra.mxu1 %v850_v2  ;;  %v854_v5 = vld [vmem:[#allocation6 + $0x114] ss:$8 sps:$4 sm:$0xff]   ;;  %v856_v6 = vld [vmem:[#allocation6 + $0x10] ss:$8 sps:$4 sm:$0xff]   ;;  %v858_v8 = vld [vmem:[#allocation6 + $0x24] ss:$8 sps:$4 sm:$0xff]  }
  0x4d   :  { %575 = vmatpush1.bf16.msra.mxu0 %v851_v3  ;;  %523 = vmatprep.subr.bf16.mxu1 %v852_v4  ;;  %v857_v7 = vld [vmem:[#allocation6 + $0x110] ss:$8 sps:$4 sm:$0xff]   ;;  %v860_v9 = vld [vmem:[#allocation6 + $0x124] ss:$8 sps:$4 sm:$0xff]   ;;  %v862_v10 = vld [vmem:[#allocation6 + $0x20] ss:$8 sps:$4 sm:$0xff]  }
  0x4e   :  { %576 = vmatprep.subr.bf16.mxu0 %v854_v5  ;;  %v863_v11 = vld [vmem:[#allocation6 + $0x120] ss:$8 sps:$4 sm:$0xff]   ;;  %v864_v12 = vld [vmem:[#allocation6 + $0x34] ss:$8 sps:$4 sm:$0xff]   ;;  %v868_v14 = vld [vmem:[#allocation6 + $0x30] ss:$8 sps:$4 sm:$0xff]  }
  0x4f   :  { %v866_v13 = vld [vmem:[#allocation6 + $0x134] ss:$8 sps:$4 sm:$0xff]   ;;  %v869_v15 = vld [vmem:[#allocation6 + $0x130] ss:$8 sps:$4 sm:$0xff]   ;;  %v870_v16 = vld [vmem:[#allocation6 + $0x44] ss:$8 sps:$4 sm:$0xff]  }
  0x50   :  { %524 = vmatpush1.bf16.msra.mxu1 %v856_v6  ;;  %v872_v17 = vld [vmem:[#allocation6 + $0x144] ss:$8 sps:$4 sm:$0xff]   ;;  %v874_v18 = vld [vmem:[#allocation6 + $0x40] ss:$8 sps:$4 sm:$0xff]   ;;  %v876_v20 = vld [vmem:[#allocation6 + $0x54] ss:$8 sps:$4 sm:$0xff]  }
  0x51   :  { %577 = vmatpush1.bf16.msra.mxu0 %v857_v7  ;;  %525 = vmatprep.subr.bf16.mxu1 %v858_v8  ;;  %v875_v19 = vld [vmem:[#allocation6 + $0x140] ss:$8 sps:$4 sm:$0xff]   ;;  %v878_v21 = vld [vmem:[#allocation6 + $0x154] ss:$8 sps:$4 sm:$0xff]   ;;  %v880_v22 = vld [vmem:[#allocation6 + $0x50] ss:$8 sps:$4 sm:$0xff]   ;;  %v656_v8 = vlaneseq }
  0x52   :  { %578 = vmatprep.subr.bf16.mxu0 %v860_v9  ;;  %v881_v23 = vld [vmem:[#allocation6 + $0x150] ss:$8 sps:$4 sm:$0xff]   ;;  %v882_v24 = vld [vmem:[#allocation6 + $0x64] ss:$8 sps:$4 sm:$0xff]   ;;  %v886_v26 = vld [vmem:[#allocation6 + $0x60] ss:$8 sps:$4 sm:$0xff]  }
  0x53   :  { %v884_v25 = vld [vmem:[#allocation6 + $0x164] ss:$8 sps:$4 sm:$0xff]   ;;  %v887_v27 = vld [vmem:[#allocation6 + $0x160] ss:$8 sps:$4 sm:$0xff]   ;;  %v888_v28 = vld [vmem:[#allocation6 + $0x74] ss:$8 sps:$4 sm:$0xff]  }
  0x54   :  { %526 = vmatpush1.bf16.msra.mxu1 %v862_v10  ;;  %v890_v29 = vld [vmem:[#allocation6 + $0x174] ss:$8 sps:$4 sm:$0xff]   ;;  %v892_v30 = vld [vmem:[#allocation6 + $0x70] ss:$8 sps:$4 sm:$0xff]   ;;  %v894_v32 = vld [vmem:[#allocation6 + $0x84] ss:$8 sps:$4 sm:$0xff]  }
  0x55   :  { %579 = vmatpush1.bf16.msra.mxu0 %v863_v11  ;;  %527 = vmatprep.subr.bf16.mxu1 %v864_v12  ;;  %v893_v31 = vld [vmem:[#allocation6 + $0x170] ss:$8 sps:$4 sm:$0xff]   ;;  %v896_v33 = vld [vmem:[#allocation6 + $0x184] ss:$8 sps:$4 sm:$0xff]   ;;  %v898_v34 = vld [vmem:[#allocation6 + $0x80] ss:$8 sps:$4 sm:$0xff]  }
  0x56   :  { %580 = vmatprep.subr.bf16.mxu0 %v866_v13  ;;  %v899_v35 = vld [vmem:[#allocation6 + $0x180] ss:$8 sps:$4 sm:$0xff]   ;;  %v900_v36 = vld [vmem:[#allocation6 + $0x94] ss:$8 sps:$4 sm:$0xff]   ;;  %v904_v38 = vld [vmem:[#allocation6 + $0x90] ss:$8 sps:$4 sm:$0xff]  }
  0x57   :  { %v902_v37 = vld [vmem:[#allocation6 + $0x194] ss:$8 sps:$4 sm:$0xff]   ;;  %v905_v39 = vld [vmem:[#allocation6 + $0x190] ss:$8 sps:$4 sm:$0xff]   ;;  %v906_v40 = vld [vmem:[#allocation6 + $0xa4] ss:$8 sps:$4 sm:$0xff]  }
  0x58   :  { %528 = vmatpush1.bf16.msra.mxu1 %v868_v14  ;;  %v908_v41 = vld [vmem:[#allocation6 + $0x1a4] ss:$8 sps:$4 sm:$0xff]   ;;  %v910_v42 = vld [vmem:[#allocation6 + $0xa0] ss:$8 sps:$4 sm:$0xff]   ;;  %v912_v44 = vld [vmem:[#allocation6 + $0xb4] ss:$8 sps:$4 sm:$0xff]  }
  0x59   :  { %581 = vmatpush1.bf16.msra.mxu0 %v869_v15  ;;  %529 = vmatprep.subr.bf16.mxu1 %v870_v16  ;;  %v911_v43 = vld [vmem:[#allocation6 + $0x1a0] ss:$8 sps:$4 sm:$0xff]   ;;  %v914_v45 = vld [vmem:[#allocation6 + $0x1b4] ss:$8 sps:$4 sm:$0xff]   ;;  %v916_v46 = vld [vmem:[#allocation6 + $0xb0] ss:$8 sps:$4 sm:$0xff]  }
  0x5a   :  { %582 = vmatprep.subr.bf16.mxu0 %v872_v17  ;;  %v917_v47 = vld [vmem:[#allocation6 + $0x1b0] ss:$8 sps:$4 sm:$0xff]   ;;  %v918_v48 = vld [vmem:[#allocation6 + $0xc4] ss:$8 sps:$4 sm:$0xff]   ;;  %v922_v52 = vld [vmem:[#allocation6 + $0xc0] ss:$8 sps:$4 sm:$0xff]  }
  0x5b   :  { %v944_v49 = vld [vmem:[#allocation3 + $0x4] ss:$16 sps:$4 sm:$0xff]   ;;  %v947_v51 = vld [vmem:[#allocation3 + $0xc] ss:$16 sps:$4 sm:$0xff]   ;;  %v923_v53 = vld [vmem:[#allocation6 + $0x1c0] ss:$8 sps:$4 sm:$0xff]  }
  0x5c   :  { %530 = vmatpush1.bf16.msra.mxu1 %v874_v18  ;;  %v920_v50 = vld [vmem:[#allocation6 + $0x1c4] ss:$8 sps:$4 sm:$0xff]   ;;  %553 = vmatprep.mubr.bf16.mxu1 %v944_v49  ;;  %v924_v54 = vld [vmem:[#allocation6 + $0xd4] ss:$8 sps:$4 sm:$0xff]   ;;  %v928_v56 = vld [vmem:[#allocation6 + $0xd0] ss:$8 sps:$4 sm:$0xff]  }
  0x5d   :  { %583 = vmatpush1.bf16.msra.mxu0 %v875_v19  ;;  %531 = vmatprep.subr.bf16.mxu1 %v876_v20  ;;  %v926_v55 = vld [vmem:[#allocation6 + $0x1d4] ss:$8 sps:$4 sm:$0xff]   ;;  %v929_v57 = vld [vmem:[#allocation6 + $0x1d0] ss:$8 sps:$4 sm:$0xff]   ;;  %v930_v58 = vld [vmem:[#allocation6 + $0xe4] ss:$8 sps:$4 sm:$0xff]  }
  0x5e   :  { %584 = vmatprep.subr.bf16.mxu0 %v878_v21  ;;  %606 = vmatprep.mubr.bf16.mxu0 %v947_v51  ;;  %v932_v59 = vld [vmem:[#allocation6 + $0x1e4] ss:$8 sps:$4 sm:$0xff]   ;;  %v934_v60 = vld [vmem:[#allocation6 + $0xe0] ss:$8 sps:$4 sm:$0xff]   ;;  %v936_v62 = vld [vmem:[#allocation6 + $0xf4] ss:$8 sps:$4 sm:$0xff]  }
  0x5f   :  { %v935_v61 = vld [vmem:[#allocation6 + $0x1e0] ss:$8 sps:$4 sm:$0xff]   ;;  %v938_v63 = vld [vmem:[#allocation6 + $0x1f4] ss:$8 sps:$4 sm:$0xff]   ;;  %v940_v0 = vld [vmem:[#allocation6 + $0xf0] ss:$8 sps:$4 sm:$0xff]  }
  0x60   :  { %532 = vmatpush1.bf16.msra.mxu1 %v880_v22  ;;  %v941_v1 = vld [vmem:[#allocation6 + $0x1f0] ss:$8 sps:$4 sm:$0xff]   ;;  %v948_v4 = vld [vmem:[#allocation3 + $0x24] ss:$16 sps:$4 sm:$0xff]   ;;  %v950_v5 = vld [vmem:[#allocation3 + $0x2c] ss:$16 sps:$4 sm:$0xff]  }
  0x61   :  { %585 = vmatpush1.bf16.msra.mxu0 %v881_v23  ;;  %533 = vmatprep.subr.bf16.mxu1 %v882_v24  ;;  %v942_v2 = vld [vmem:[#allocation3] ss:$16 sps:$4 sm:$0xff]   ;;  %v945_v3 = vld [vmem:[#allocation3 + $0x8] ss:$16 sps:$4 sm:$0xff]   ;;  %v657_v9 = vshrl.u32 %v656_v8, 7  ;;  %s1080_s3 = smov [#allocation11]  }
  0x62   :  { %586 = vmatprep.subr.bf16.mxu0 %v884_v25  ;;  %v952_v6 = vld [vmem:[#allocation3 + $0x20] ss:$16 sps:$4 sm:$0xff]   ;;  %v953_v7 = vld [vmem:[#allocation3 + $0x28] ss:$16 sps:$4 sm:$0xff]   ;;  %s735_s13 = sshll.u32 %s1080_s3, 4  ;;  %s736_s13 = int_to_ptr.vmem [resolvable:$true] %s735_s13 }
  0x63   :  { %v658_v10 = vsub.s32 0, %v657_v9  ;;  %v654_v11 = vld [vmem:[#allocation8] sm:$0x3]  ;;  %v662_v12 = vsub.s32 1, %v657_v9  ;;  %v674_v13 = vld [vmem:[#allocation9] sm:$0x3]  ;;  %p1047_p5 = scmp.lt.s32.totalorder %s736_s13, %s736_s13 }
  0x64   :  { %534 = vmatpush1.bf16.msra.mxu1 %v886_v26  ;;  %s1042_s14 = scalar_lea.vmem %s736_s13, 512 }
  0x65   :  { %587 = vmatpush1.bf16.msra.mxu0 %v887_v27  ;;  %535 = vmatprep.subr.bf16.mxu1 %v888_v28  ;;  %v659_v14 = vrot.slane %v654_v11, %v658_v10  ;;  %v663_v17 = vrot.slane %v654_v11, %v662_v12  ;;  %v679_v19 = vrot.slane %v674_v13, %v658_v10  ;;  %p1043_p4 = scmp.ne.s32.totalorder %s736_s13, %s1042_s14  ;;  %p1048_p6 = scmp.lt.s32.totalorder %s1042_s14, %s1042_s14 }
  0x66   :  { %588 = vmatprep.subr.bf16.mxu0 %v890_v29  ;;  %v683_v23 = vrot.slane %v674_v13, %v662_v12 }
  0x67   :  { %p1049_p7 = por %p1048_p6, %p1047_p5 }
  0x68   :  { %536 = vmatpush1.bf16.msra.mxu1 %v892_v30 }
  0x69   :  { %589 = vmatpush1.bf16.msra.mxu0 %v893_v31  ;;  %537 = vmatprep.subr.bf16.mxu1 %v894_v32  ;;  %p1050_p8 = pnand %p1049_p7, %p1043_p4 }
  0x6a   :  { %590 = vmatprep.subr.bf16.mxu0 %v896_v33 }
  0x6c   :  { %538 = vmatpush1.bf16.msra.mxu1 %v898_v34 }
  0x6d   :  { %591 = vmatpush1.bf16.msra.mxu0 %v899_v35  ;;  %539 = vmatprep.subr.bf16.mxu1 %v900_v36 }
  0x6e   :  { %592 = vmatprep.subr.bf16.mxu0 %v902_v37 }
  0x70   :  { %540 = vmatpush1.bf16.msra.mxu1 %v904_v38 }
  0x71   :  { %593 = vmatpush1.bf16.msra.mxu0 %v905_v39  ;;  %541 = vmatprep.subr.bf16.mxu1 %v906_v40 }
  0x72   :  { %594 = vmatprep.subr.bf16.mxu0 %v908_v41 }
  0x74   :  { %542 = vmatpush1.bf16.msra.mxu1 %v910_v42 }
  0x75   :  { %595 = vmatpush1.bf16.msra.mxu0 %v911_v43  ;;  %543 = vmatprep.subr.bf16.mxu1 %v912_v44 }
  0x76   :  { %596 = vmatprep.subr.bf16.mxu0 %v914_v45 }
  0x78   :  { %544 = vmatpush1.bf16.msra.mxu1 %v916_v46 }
  0x79   :  { %597 = vmatpush1.bf16.msra.mxu0 %v917_v47  ;;  %545 = vmatprep.subr.bf16.mxu1 %v918_v48 }
  0x7a   :  { %598 = vmatprep.subr.bf16.mxu0 %v920_v50 }
  0x7c   :  { %546 = vmatpush1.bf16.msra.mxu1 %v922_v52 }
  0x7d   :  { %599 = vmatpush1.bf16.msra.mxu0 %v923_v53  ;;  %547 = vmatprep.subr.bf16.mxu1 %v924_v54 }
  0x7e   :  { %600 = vmatprep.subr.bf16.mxu0 %v926_v55 }
  0x80   :  { %548 = vmatpush1.bf16.msra.mxu1 %v928_v56 }
  0x81   :  { %601 = vmatpush1.bf16.msra.mxu0 %v929_v57  ;;  %549 = vmatprep.subr.bf16.mxu1 %v930_v58 }
  0x82   :  { %602 = vmatprep.subr.bf16.mxu0 %v932_v59 }
  0x84   :  { %550 = vmatpush1.bf16.msra.mxu1 %v934_v60 }
  0x85   :  { %603 = vmatpush1.bf16.msra.mxu0 %v935_v61  ;;  %551 = vmatprep.subr.bf16.mxu1 %v936_v62 }
  0x86   :  { %604 = vmatprep.subr.bf16.mxu0 %v938_v63 }
  0x88   :  { %552 = vmatpush1.bf16.msra.mxu1 %v940_v0 }
  0x89   :  { %605 = vmatpush1.bf16.msra.mxu0 %v941_v1 }
  0x8b   :  { %554 = vmatmul.mubr.bf16.vlgmr.msra.gmra.mrb[0].mxu1 %v942_v2 }
  0x8c   :  { %607 = vmatmul.mubr.bf16.vlgmr.msra.gmra.mrb[0].mxu0 %v945_v3  ;;  %563 = vmatprep.mubr.bf16.mxu1 %v948_v4 }
  0x8d   :  { %616 = vmatprep.mubr.bf16.mxu0 %v950_v5 }
  0x93   :  { %564 = vmatmul.mubr.bf16.gmra.mrb[4].mxu1 %v952_v6 }
  0x94   :  { %617 = vmatmul.mubr.bf16.gmra.mrb[4].mxu0 %v953_v7 }
 0x15e   :  { %v555_v15 = vpop.f32.mrb[0].mxu1 }
 0x15f   :  { %v608_v16 = vpop.f32.mrb[0].mxu0  ;;  %v557_v20 = vpop.f32.mrb[1].mxu1 }
 0x160   :  { %v609_v18 = vadd.f32 %v608_v16, %v555_v15  ;;  %v610_v21 = vpop.f32.mrb[1].mxu0  ;;  %v559_v24 = vpop.f32.mrb[2].mxu1 }
 0x161   :  { %v611_v22 = vadd.f32 %v610_v21, %v557_v20  ;;  %v612_v25 = vpop.f32.mrb[2].mxu0  ;;  %v561_v28 = vpop.f32.mrb[3].mxu1 }
 0x162   :  { %v666_v26 = vmul.f32 %v659_v14, %v609_v18  ;;  %v613_v27 = vadd.f32 %v612_v25, %v559_v24  ;;  %v614_v29 = vpop.f32.mrb[3].mxu0 }
 0x163   :  { %v667_v30 = vmul.f32 %v663_v17, %v611_v22  ;;  %v615_v31 = vadd.f32 %v614_v29, %v561_v28 }
 0x164   :  { %v686_v32 = vadd.f32 %v679_v19, %v666_v26  ;;  %v668_v33 = vmul.f32 %v659_v14, %v613_v27 }
 0x165   :  { %v687_v34 = vadd.f32 %v683_v23, %v667_v30  ;;  %v669_v35 = vmul.f32 %v663_v17, %v615_v31 }
 0x166   :  { %v694_v36 = vmax.f32 %v686_v32, 0.0  ;;  %v688_v37 = vadd.f32 %v679_v19, %v668_v33  ;;  %v565_v40 = vpop.f32.mrb[4].mxu1 }
 0x167   :  { %v695_v38 = vmax.f32 %v687_v34, 0.0  ;;  %v689_v39 = vadd.f32 %v683_v23, %v669_v35  ;;  %v618_v41 = vpop.f32.mrb[4].mxu0  ;;  %v567_v44 = vpop.f32.mrb[5].mxu1 }
 0x168   :  { %v696_v42 = vmax.f32 %v688_v37, 0.0  ;;  %v619_v43 = vadd.f32 %v618_v41, %v565_v40  ;;  %v620_v45 = vpop.f32.mrb[5].mxu0  ;;  %v569_v49 = vpop.f32.mrb[6].mxu1 }
 0x169   :  { %v825_v46 = vpack.c.bf16 %v695_v38, %v694_v36  ;;  %v697_v47 = vmax.f32 %v689_v39, 0.0  ;;  %v621_v48 = vadd.f32 %v620_v45, %v567_v44  ;;  %v622_v50 = vpop.f32.mrb[6].mxu0  ;;  %v571_v53 = vpop.f32.mrb[7].mxu1 }
 0x16a   :  { %v670_v51 = vmul.f32 %v659_v14, %v619_v43  ;;  %v623_v52 = vadd.f32 %v622_v50, %v569_v49  ;;  %v624_v54 = vpop.f32.mrb[7].mxu0 }
 0x16b   :  { %726 = vst [vmem:[#allocation11] sm:$0xff] %v825_v46  ;;  %v826_v55 = vpack.c.bf16 %v697_v47, %v696_v42  ;;  %v671_v56 = vmul.f32 %v663_v17, %v621_v48  ;;  %v625_v57 = vadd.f32 %v624_v54, %v571_v53 }
 0x16c   :  { %v690_v58 = vadd.f32 %v679_v19, %v670_v51  ;;  %v672_v59 = vmul.f32 %v659_v14, %v623_v52 }
 0x16d   :  { %727 = vst [vmem:[#allocation11 + $0x8] sm:$0xff] %v826_v55  ;;  %v691_v60 = vadd.f32 %v683_v23, %v671_v56  ;;  %v673_v61 = vmul.f32 %v663_v17, %v625_v57 }
 0x16e   :  { %v698_v62 = vmax.f32 %v690_v58, 0.0  ;;  %v692_v63 = vadd.f32 %v679_v19, %v672_v59 }
 0x16f   :  { %v699_v0 = vmax.f32 %v691_v60, 0.0  ;;  %v693_v1 = vadd.f32 %v683_v23, %v673_v61 }
 0x170   :  { %v700_v2 = vmax.f32 %v692_v63, 0.0 }
 0x171   :  { %v827_v3 = vpack.c.bf16 %v699_v0, %v698_v62  ;;  %v701_v4 = vmax.f32 %v693_v1, 0.0 }
 0x173   :  { %728 = vst [vmem:[#allocation11 + $0x10] sm:$0xff] %v827_v3  ;;  %v828_v5 = vpack.c.bf16 %v701_v4, %v700_v2 }
 0x175   :  { %729 = vst [vmem:[#allocation11 + $0x18] sm:$0xff] %v828_v5 }
 0x176   :  { %1053 = shalt.err (!%p1050_p8)
}
 0x177   :  { %s1054_s17 = scalar_lea.hbm %s1176_s4, 512 }
 0x178   :  { %p1055_p9 = scmp.ne.s32.totalorder %s1176_s4, %s1054_s17  ;;  %p1058_p10 = scmp.lt.u32.totalorder %s1054_s17, %s1176_s4 }
 0x17a   :  { %p1060_p11 = pnand %p1058_p10, %p1055_p9 }
 0x17c   :  { %1063 = shalt.err (!%p1060_p11)
}
 0x17d   :  { %741 = dma.vmem_to_hbm [thread:$0]  %s736_s13, 512, %s1176_s4, [#allocation5], %s1073_s25, %s1073_s25, %s1074_s26  }
 0x17e   :  { %1070 = dma.done.wait [#allocation5], 512  }
 0x17f   :  { %1071 = vsyncadd [#allocation5], 4294966784 }
 0x180   :  { %745 = vsyncpa [#allocation4], 1 }
 0x181   :  { %746 = vsyncpa [#allocation7], 1 }
 0x182   :  { %747 = vsyncpa [#allocation10], 1 }
 0x183   :  { %748 = vsyncpa [#allocation5], 1 }

// kernel: _lambda_.46
= control target key start
LH: loop header
LB: loop body
LE: loop exit
PB: predicated region body
PF: predicated region fallthrough
CT: control target
= control target key end

     0   :  { %9 = vsyncpa [#allocation4], 0  ;;  %s2215_s0 = inlined_call_operand.hbm [shape: bf16[8,2304], index: 0, kind: input, shape index: {}]   ;;  %s2216_s1 = inlined_call_operand.hbm [shape: bf16[2304,256], index: 1, kind: input, shape index: {}]   ;;  %s2217_s2 = inlined_call_operand.hbm [shape: f32[1,256], index: 2, kind: input, shape index: {}]   ;;  %s2218_s3 = inlined_call_operand.hbm [shape: f32[1,256], index: 3, kind: input, shape index: {}]   ;;  %s2219_s4 = inlined_call_operand.hbm [shape: bf16[8,256], index: 4, kind: output, shape index: {}]  }
   0x1   :  { %11 = vsyncpa [#allocation4 + $0x1], 0 }
   0x2   :  { %12 = vsyncpa [#allocation7], 0 }
   0x3   :  { %14 = vsyncpa [#allocation7 + $0x1], 0 }
   0x4   :  { %15 = vsyncpa [#allocation10], 0 }
   0x5   :  { %16 = vsyncpa [#allocation5], 0  ;;  %s1848_s15 = smov 0   ;;  %s1850_s16 = smov 0  }
   0x6   :  { %s1852_s17 = smov 0   ;;  %s1854_s18 = smov 0  }
   0x7   :  { %s1856_s19 = smov 0   ;;  %s1858_s20 = smov 0  }
   0x8 LB: > { %s1877_s21 = sadd.s32 4294967295, %s1813_s20   ;;  %p63_p0 = scmp.ne.s32.totalorder %s1797_s16, %s1793_s15  ;;  %s1813_s20 = sphi %s1858_s20, %s22_s20   ;;  %s1809_s19 = sphi %s1856_s19, %s2237_s19   ;;  %s1805_s18 = sphi %s1854_s18, %s2236_s18   ;;  %s1801_s17 = sphi %s1852_s17, %s2235_s17   ;;  %s1797_s16 = sphi %s1850_s16, %s2234_s16   ;;  %s1793_s15 = sphi %s1848_s15, %s2233_s15  }
   0x9   : > { %p2220_p1 = scmp.eq.s32.totalorder %s1877_s21, 0  ;;  %p1236_p2 = scmp.ge.s32.totalorder %s1813_s20, 1 }
   0xa   : > { %p182_p3 = scmp.lt.s32.totalorder %s1813_s20, 4  ;;  %s1815_s24 = smov [#allocation8]  }
   0xb   : > { %p1885_p4 = por %p2220_p1, %p63_p0  ;;  %s198_s25 = sshll.u32 %s1815_s24, 4  ;;  %s199_s25 = int_to_ptr.vmem [resolvable:$true] %s198_s25 }
   0xc   : > { %p1889_p5 = pnand %p1236_p2, %p182_p3  ;;  %s1816_s26 = smov [#allocation9]  }
   0xd   : > { %s2223_s22 = scalar_select %p1885_p4, 1, 0 }
   0xe   : > { %s2224_s23 = scalar_select %p1889_p5, 1, 0 }
   0xf   : > { %p1380_p6 = pneg %p1889_p5  ;;  %s212_s27 = sshll.u32 %s1816_s26, 4  ;;  %s1901_s27 = int_to_ptr.vmem [resolvable:$true] %s212_s27 }
  0x10   : > { %s1605_s5 = scalar_lea.hbm %s2217_s2, 32 }
  0x11   : > { %p1897_p7 = pnand %p1380_p6, %p2220_p1  ;;  %p1606_p8 = scmp.ne.s32.totalorder %s2217_s2, %s1605_s5 }
  0x12   : > { %p1612_p12 = scmp.lt.u32.totalorder %s1605_s5, %s2217_s2 }
  0x13   : > { %p1607_p9 = pneg %p1897_p7 }
  0x15   : > { %p1608_p10 = pnand %p1607_p9, %p1606_p8 }
  0x17   : > { %p1609_p11 = pneg %p1608_p10 }
  0x19   : > { %p1614_p13 = pnand %p1612_p12, %p1609_p11 }
  0x1b   : > { %1617 = shalt.err (!%p1614_p13)
}
  0x1c   : > { %s1618_s10 = scalar_lea.vmem %s199_s25, 32  ;;  %p1626_p6 = scmp.lt.s32.totalorder %s199_s25, %s199_s25 }
  0x1d   : > { %p1619_p0 = scmp.ne.s32.totalorder %s199_s25, %s1618_s10  ;;  %p1627_p1 = scmp.lt.s32.totalorder %s1618_s10, %s1618_s10 }
  0x1f   : > { %p1621_p2 = pnand %p1619_p0, %p1607_p9  ;;  %p1628_p4 = por %p1627_p1, %p1626_p6 }
  0x21   : > { %p1622_p3 = pneg %p1621_p2 }
  0x23   : > { %p1629_p5 = pnand %p1628_p4, %p1622_p3 }
  0x25   : > { %1632 = shalt.err (!%p1629_p5)
}
  0x26   : > { %1383 = dma.hbm_to_vmem [thread:$0]  (!%p1897_p7), %s2217_s2, 32, %s199_s25, [#allocation7]  }
  0x27   : > { %s1633_s15 = scalar_lea.hbm %s2218_s3, 32 }
  0x28   : > { %p1634_p8 = scmp.ne.s32.totalorder %s2218_s3, %s1633_s15  ;;  %p1640_p5 = scmp.lt.u32.totalorder %s1633_s15, %s2218_s3 }
  0x2a   : > { %p1636_p1 = pnand %p1634_p8, %p1607_p9 }
  0x2c   : > { %p1637_p4 = pneg %p1636_p1 }
  0x2e   : > { %p1642_p10 = pnand %p1640_p5, %p1637_p4 }
  0x30   : > { %1645 = shalt.err (!%p1642_p10)
}
  0x31   : > { %s1646_s25 = scalar_lea.vmem %s1901_s27, 32  ;;  %p1654_p0 = scmp.lt.s32.totalorder %s1901_s27, %s1901_s27 }
  0x32   : > { %p1647_p11 = scmp.ne.s32.totalorder %s1901_s27, %s1646_s25  ;;  %p1655_p2 = scmp.lt.s32.totalorder %s1646_s25, %s1646_s25 }
  0x34   : > { %p1649_p12 = pnand %p1647_p11, %p1607_p9  ;;  %p1656_p3 = por %p1655_p2, %p1654_p0 }
  0x36   : > { %p1650_p13 = pneg %p1649_p12 }
  0x38   : > { %p1657_p6 = pnand %p1656_p3, %p1650_p13 }
  0x3a   : > { %1660 = shalt.err (!%p1657_p6)
}
  0x3b   : > { %1386 = dma.hbm_to_vmem [thread:$0]  (!%p1897_p7), %s2218_s3, 32, %s1901_s27, [#allocation10]  }
  0x3c   : > { %s34_s7 = sadd.s32 1, %s1809_s19  ;;  %s50_s8 = sadd.s32 1, %s1801_s17 }
  0x3d   : > { %p35_p9 = scmp.ge.s32.totalorder %s34_s7, 3  ;;  %p57_p8 = scmp.ne.s32.totalorder %s1801_s17, %s1797_s16 }
  0x3e   : > { %p58_p1 = scmp.eq.s32.totalorder %s1813_s20, 0  ;;  %p1396_p4 = scmp.lt.s32.totalorder %s1813_s20, 3 }
  0x3f   : > { %s2239_s7 = smov (%p35_p9, %s34_s7), 0  ;;  %s1959_s28 = sand.u32 1, %s1801_s17  }
  0x40   : > { %p59_p5 = por %p58_p1, %p57_p8  ;;  %s46_s9 = ssub.s32 %s1809_s19, %s2239_s7 }
  0x41   : > { %p48_p10 = scmp.eq.s32.totalorder %s46_s9, 0  ;;  %s1360_s10 = smul.u32 24, %s1959_s28 }
  0x42   : > { %s1355_s11 = smul.u32 384, %s1809_s19  ;;  %p1965_p7 = pnand %p1396_p4, %p59_p5 }
  0x43   : > { %s1970_s12 = scalar_select %p48_p10, %s1801_s17, %s50_s8  }
  0x44   : > { %s1975_s15 = scalar_lea.hbm %s2215_s0, %s1355_s11  ;;  %s227_s24 = scalar_lea.vmem [#allocation3], %s1360_s10 }
  0x45   : > { %s237_s26 = sshll.u32 %s227_s24, 4  ;;  %s1361_s29 = smul.u32 768, %s1959_s28  ;;  %s1977_s26 = int_to_ptr.vmem [resolvable:$true] %s237_s26 }
  0x46   : > { %s224_s30 = scalar_lea.sflag [#allocation4], %s1959_s28  ;;  %s1661_s25 = scalar_lea.hbm %s1975_s15, 384 }
  0x47   : > { %p1662_p11 = scmp.ne.s32.totalorder %s1975_s15, %s1661_s25  ;;  %p1663_p12 = pneg %p1965_p7 }
  0x48   : > { %s1666_s8 = scalar_lea.hbm %s2215_s0, 1152  ;;  %p1667_p2 = scmp.lt.u32.totalorder %s1975_s15, %s2215_s0 }
  0x49   : > { %p1664_p13 = pnand %p1663_p12, %p1662_p11  ;;  %p1668_p3 = scmp.lt.u32.totalorder %s1666_s8, %s1661_s25 }
  0x4a   : > { %p1670_p9 = scmp.lt.u32.totalorder %s1661_s25, %s1975_s15 }
  0x4b   : > { %p1665_p0 = pneg %p1664_p13  ;;  %p1669_p6 = por %p1668_p3, %p1667_p2 }
  0x4d   : > { %p1671_p8 = por %p1670_p9, %p1669_p6 }
  0x4f   : > { %p1672_p1 = pnand %p1671_p8, %p1665_p0 }
  0x51   : > { %1675 = shalt.err (!%p1672_p1)
}
  0x52   : > { %s1676_s10 = scalar_lea.vmem %s1977_s26, 384  ;;  %s1817_s13 = smov [#allocation3]  }
  0x53   : > { %p1677_p4 = scmp.ne.s32.totalorder %s1977_s26, %s1676_s10  ;;  %s1681_s14 = sshll.u32 %s1817_s13, 4  ;;  %s1682_s14 = int_to_ptr.vmem [resolvable:$false] %s1681_s14 }
  0x54   : > { %s1683_s24 = scalar_lea.vmem %s1682_s14, 768  ;;  %p1684_p11 = scmp.lt.s32.totalorder %s1977_s26, %s1682_s14 }
  0x55   : > { %p1679_p5 = pnand %p1677_p4, %p1663_p12  ;;  %p1685_p13 = scmp.lt.s32.totalorder %s1683_s24, %s1676_s10 }
  0x57   : > { %p1680_p10 = pneg %p1679_p5  ;;  %p1686_p2 = por %p1685_p13, %p1684_p11 }
  0x59   : > { %p1687_p3 = pnand %p1686_p2, %p1680_p10 }
  0x5b   : > { %1690 = shalt.err (!%p1687_p3)
}
  0x5c   : > { %1390 = dma.hbm_to_vmem [thread:$0]  (!%p1965_p7), %s1975_s15, 384, %s1977_s26, %s224_s30  }
  0x5d   : > { %s1359_s25 = smul.u32 12288, %s1809_s19  ;;  %s248_s5 = scalar_lea.vmem [#allocation6], %s1361_s29 }
  0x5e   : > { %s258_s6 = sshll.u32 %s248_s5, 4  ;;  %s244_s8 = sand.u32 1, %s1813_s20   ;;  %s2010_s6 = int_to_ptr.vmem [resolvable:$true] %s258_s6 }
  0x5f   : > { %s2015_s10 = scalar_lea.hbm %s2216_s1, %s1359_s25  ;;  %s2017_s13 = scalar_lea.sflag [#allocation7], %s244_s8 }
  0x60   : > { %s1691_s14 = scalar_lea.hbm %s2015_s10, 12288  ;;  %s1696_s26 = scalar_lea.hbm %s2216_s1, 36864 }
  0x61   : > { %p1692_p0 = scmp.ne.s32.totalorder %s2015_s10, %s1691_s14  ;;  %p1697_p8 = scmp.lt.u32.totalorder %s2015_s10, %s2216_s1 }
  0x62   : > { %p1698_p1 = scmp.lt.u32.totalorder %s1696_s26, %s1691_s14  ;;  %p1700_p5 = scmp.lt.u32.totalorder %s1691_s14, %s2015_s10 }
  0x63   : > { %p1694_p6 = pnand %p1692_p0, %p1663_p12 }
  0x64   : > { %p1699_p4 = por %p1698_p1, %p1697_p8 }
  0x65   : > { %p1695_p9 = pneg %p1694_p6 }
  0x66   : > { %p1701_p10 = por %p1700_p5, %p1699_p4 }
  0x68   : > { %p1702_p11 = pnand %p1701_p10, %p1695_p9 }
  0x6a   : > { %1705 = shalt.err (!%p1702_p11)
}
  0x6b   : > { %s1706_s24 = scalar_lea.vmem %s2010_s6, 12288  ;;  %s1818_s25 = smov [#allocation6]  }
  0x6c   : > { %p1707_p13 = scmp.ne.s32.totalorder %s2010_s6, %s1706_s24  ;;  %s1711_s5 = sshll.u32 %s1818_s25, 4  ;;  %s1712_s5 = int_to_ptr.vmem [resolvable:$false] %s1711_s5 }
  0x6d   : > { %s1713_s8 = scalar_lea.vmem %s1712_s5, 24576  ;;  %p1714_p0 = scmp.lt.s32.totalorder %s2010_s6, %s1712_s5 }
  0x6e   : > { %p1709_p2 = pnand %p1707_p13, %p1663_p12  ;;  %p1715_p6 = scmp.lt.s32.totalorder %s1713_s8, %s1706_s24 }
  0x70   : > { %p1710_p3 = pneg %p1709_p2  ;;  %p1716_p8 = por %p1715_p6, %p1714_p0 }
  0x72   : > { %p1717_p1 = pnand %p1716_p8, %p1710_p3 }
  0x74   : > { %1720 = shalt.err (!%p1717_p1)
}
  0x75   : > { %s1819_s9 = smov 128   ;;  %s1820_s11 = smov 8  }
  0x76   : > { %1393 = dma.hbm_to_vmem [thread:$0]  (!%p1965_p7), %s2015_s10, 12288, %s2010_s6, %s2017_s13, %s1819_s9, %s1819_s9, %s1820_s11  }
  0x77   : > { %p2227_p12 = scmp.ne.s32.totalorder %s2224_s23, 0 }
  0x78   : > { %s272_s14 = sand.u32 (!%p2227_p12), 1, %s1797_s16   ;;  %p2228_p9 = scmp.ne.s32.totalorder (!%p2227_p12), %s2223_s22, 0 }
  0x79   : > { %270 = sbr.rel (%p2227_p12) target bundleno = 537 (0x219), region = 36  ;;  %s273_s15 = scalar_lea.sflag (!%p2227_p12), [#allocation4], %s272_s14 }
  0x7a   : > { %s1362_s28 = smul.u32 (!%p2227_p12), 24, %s272_s14 }
  0x7c   : > { %s2046_s26 = scalar_lea.vmem (!%p2227_p12), [#allocation3], %s1362_s28 }
  0x80   : > { %1772 = dma.done.wait (%p2228_p9), %s273_s15, 384  }
  0x81   : > { %1774 = vsyncadd (%p2228_p9), %s273_s15, 4294966912  ;;  %s281_s29 = sand.u32 1, %s1877_s21   ;;  %s1363_s27 = smul.u32 768, %s272_s14 }
  0x82   : > { %s282_s6 = scalar_lea.sflag [#allocation7], %s281_s29 }
  0x83   : > { %s2053_s10 = scalar_lea.vmem [#allocation6], %s1363_s27 }
  0x84   : > { %1776 = dma.done.wait (%p2228_p9), %s282_s6, 12288  }
  0x85   : > { %1778 = vsyncadd (%p2228_p9), %s282_s6, 4294955008  ;;  %p2229_p7 = scmp.eq.s32.totalorder %s1877_s21, 0 }
  0x87   : > { %1780 = dma.done.wait (%p2229_p7), [#allocation7], 32   ;;  %p2230_p4 = pmov %p2229_p7 }
  0x89   : > { %1782 = vsyncadd (%p2230_p4), [#allocation7], 4294967264  ;;  %p2231_p5 = pmov %p2230_p4 }
  0x8a   : > { %p2232_p10 = pmov %p2230_p4 }
  0x8b   : > { %1784 = dma.done.wait (%p2231_p5), [#allocation10], 32  }
  0x8c   : > { %1786 = vsyncadd (%p2232_p10), [#allocation10], 4294967264  ;;  %p1246_p11 = scmp.ne.s32.totalorder %s1805_s18, 0 }
  0x8d   : > { %v1821_v0 = vmov (!%p1246_p11), 0.0  }
  0x8e   : > { %327 = sbr.rel (%p1246_p11) target bundleno = 149 (0x95), region = 56  ;;  %328 = vst [vmem:[#allocation2] sm:$0xff] (!%p1246_p11), %v1821_v0  ;;  %329 = vst [vmem:[#allocation2 + $0x8] sm:$0xff] (!%p1246_p11), %v1821_v0 }
  0x95 PF: > { %v1455_v1 = vld [vmem:[%s2053_s10 + $0x4] ss:$8 sps:$4 sm:$0xff]   ;;  %v1459_v3 = vld [vmem:[%s2053_s10] ss:$8 sps:$4 sm:$0xff]   ;;  %v1461_v5 = vld [vmem:[%s2053_s10 + $0x14] ss:$8 sps:$4 sm:$0xff]  }
  0x96   : > { %v1457_v2 = vld [vmem:[%s2053_s10 + $0x104] ss:$8 sps:$4 sm:$0xff]   ;;  %932 = vmatprep.subr.bf16.mxu0 %v1455_v1  ;;  %v1460_v4 = vld [vmem:[%s2053_s10 + $0x100] ss:$8 sps:$4 sm:$0xff]   ;;  %v1463_v6 = vld [vmem:[%s2053_s10 + $0x114] ss:$8 sps:$4 sm:$0xff]  }
  0x97   : > { %973 = vmatprep.subr.bf16.mxu1 %v1457_v2  ;;  %933 = vmatpush1.bf16.msra.mxu0 %v1459_v3  ;;  %v1465_v7 = vld [vmem:[%s2053_s10 + $0x10] ss:$8 sps:$4 sm:$0xff]   ;;  %v1467_v9 = vld [vmem:[%s2053_s10 + $0x24] ss:$8 sps:$4 sm:$0xff]   ;;  %v1471_v11 = vld [vmem:[%s2053_s10 + $0x20] ss:$8 sps:$4 sm:$0xff]  }
  0x98   : > { %974 = vmatpush1.bf16.msra.mxu1 %v1460_v4  ;;  %934 = vmatprep.subr.bf16.mxu0 %v1461_v5  ;;  %v1466_v8 = vld [vmem:[%s2053_s10 + $0x110] ss:$8 sps:$4 sm:$0xff]   ;;  %v1469_v10 = vld [vmem:[%s2053_s10 + $0x124] ss:$8 sps:$4 sm:$0xff]   ;;  %v1472_v12 = vld [vmem:[%s2053_s10 + $0x120] ss:$8 sps:$4 sm:$0xff]  }
  0x99   : > { %975 = vmatprep.subr.bf16.mxu1 %v1463_v6  ;;  %v1473_v13 = vld [vmem:[%s2053_s10 + $0x34] ss:$8 sps:$4 sm:$0xff]   ;;  %v1477_v15 = vld [vmem:[%s2053_s10 + $0x30] ss:$8 sps:$4 sm:$0xff]   ;;  %v1479_v17 = vld [vmem:[%s2053_s10 + $0x44] ss:$8 sps:$4 sm:$0xff]  }
  0x9a   : > { %v1475_v14 = vld [vmem:[%s2053_s10 + $0x134] ss:$8 sps:$4 sm:$0xff]   ;;  %v1478_v16 = vld [vmem:[%s2053_s10 + $0x130] ss:$8 sps:$4 sm:$0xff]   ;;  %v1481_v18 = vld [vmem:[%s2053_s10 + $0x144] ss:$8 sps:$4 sm:$0xff]  }
  0x9b   : > { %935 = vmatpush1.bf16.msra.mxu0 %v1465_v7  ;;  %v1483_v19 = vld [vmem:[%s2053_s10 + $0x40] ss:$8 sps:$4 sm:$0xff]   ;;  %v1485_v21 = vld [vmem:[%s2053_s10 + $0x54] ss:$8 sps:$4 sm:$0xff]   ;;  %v1489_v23 = vld [vmem:[%s2053_s10 + $0x50] ss:$8 sps:$4 sm:$0xff]  }
  0x9c   : > { %976 = vmatpush1.bf16.msra.mxu1 %v1466_v8  ;;  %936 = vmatprep.subr.bf16.mxu0 %v1467_v9  ;;  %v1484_v20 = vld [vmem:[%s2053_s10 + $0x140] ss:$8 sps:$4 sm:$0xff]   ;;  %v1487_v22 = vld [vmem:[%s2053_s10 + $0x154] ss:$8 sps:$4 sm:$0xff]   ;;  %v1490_v24 = vld [vmem:[%s2053_s10 + $0x150] ss:$8 sps:$4 sm:$0xff]  }
  0x9d   : > { %977 = vmatprep.subr.bf16.mxu1 %v1469_v10  ;;  %v1491_v25 = vld [vmem:[%s2053_s10 + $0x64] ss:$8 sps:$4 sm:$0xff]   ;;  %v1495_v27 = vld [vmem:[%s2053_s10 + $0x60] ss:$8 sps:$4 sm:$0xff]   ;;  %v1497_v29 = vld [vmem:[%s2053_s10 + $0x74] ss:$8 sps:$4 sm:$0xff]  }
  0x9e   : > { %v1493_v26 = vld [vmem:[%s2053_s10 + $0x164] ss:$8 sps:$4 sm:$0xff]   ;;  %v1496_v28 = vld [vmem:[%s2053_s10 + $0x160] ss:$8 sps:$4 sm:$0xff]   ;;  %v1499_v30 = vld [vmem:[%s2053_s10 + $0x174] ss:$8 sps:$4 sm:$0xff]  }
  0x9f   : > { %937 = vmatpush1.bf16.msra.mxu0 %v1471_v11  ;;  %v1501_v31 = vld [vmem:[%s2053_s10 + $0x70] ss:$8 sps:$4 sm:$0xff]   ;;  %v1503_v33 = vld [vmem:[%s2053_s10 + $0x84] ss:$8 sps:$4 sm:$0xff]   ;;  %v1507_v35 = vld [vmem:[%s2053_s10 + $0x80] ss:$8 sps:$4 sm:$0xff]  }
  0xa0   : > { %978 = vmatpush1.bf16.msra.mxu1 %v1472_v12  ;;  %938 = vmatprep.subr.bf16.mxu0 %v1473_v13  ;;  %v1502_v32 = vld [vmem:[%s2053_s10 + $0x170] ss:$8 sps:$4 sm:$0xff]   ;;  %v1505_v34 = vld [vmem:[%s2053_s10 + $0x184] ss:$8 sps:$4 sm:$0xff]   ;;  %v1508_v36 = vld [vmem:[%s2053_s10 + $0x180] ss:$8 sps:$4 sm:$0xff]  }
  0xa1   : > { %979 = vmatprep.subr.bf16.mxu1 %v1475_v14  ;;  %v1509_v37 = vld [vmem:[%s2053_s10 + $0x94] ss:$8 sps:$4 sm:$0xff]   ;;  %v1513_v39 = vld [vmem:[%s2053_s10 + $0x90] ss:$8 sps:$4 sm:$0xff]   ;;  %v1515_v41 = vld [vmem:[%s2053_s10 + $0xa4] ss:$8 sps:$4 sm:$0xff]  }
  0xa2   : > { %v1511_v38 = vld [vmem:[%s2053_s10 + $0x194] ss:$8 sps:$4 sm:$0xff]   ;;  %v1514_v40 = vld [vmem:[%s2053_s10 + $0x190] ss:$8 sps:$4 sm:$0xff]   ;;  %v1517_v42 = vld [vmem:[%s2053_s10 + $0x1a4] ss:$8 sps:$4 sm:$0xff]  }
  0xa3   : > { %939 = vmatpush1.bf16.msra.mxu0 %v1477_v15  ;;  %v1519_v43 = vld [vmem:[%s2053_s10 + $0xa0] ss:$8 sps:$4 sm:$0xff]   ;;  %v1521_v45 = vld [vmem:[%s2053_s10 + $0xb4] ss:$8 sps:$4 sm:$0xff]   ;;  %v1525_v50 = vld [vmem:[%s2053_s10 + $0xb0] ss:$8 sps:$4 sm:$0xff]  }
  0xa4   : > { %980 = vmatpush1.bf16.msra.mxu1 %v1478_v16  ;;  %940 = vmatprep.subr.bf16.mxu0 %v1479_v17  ;;  %v1520_v44 = vld [vmem:[%s2053_s10 + $0x1a0] ss:$8 sps:$4 sm:$0xff]   ;;  %v1523_v46 = vld [vmem:[%s2053_s10 + $0x1b4] ss:$8 sps:$4 sm:$0xff]   ;;  %v1526_v51 = vld [vmem:[%s2053_s10 + $0x1b0] ss:$8 sps:$4 sm:$0xff]  }
  0xa5   : > { %981 = vmatprep.subr.bf16.mxu1 %v1481_v18  ;;  %v332_v47 = vld [vmem:[%s2046_s26] sm:$0xff]  ;;  %v333_v49 = vld [vmem:[%s2046_s26 + $0x8] sm:$0xff]  ;;  %v2137_v9 = vld [vmem:[%s2046_s26 + $0x10] sm:$0xff]  ;;  %p1349_p13 = scmp.ne.s32.totalorder %s1805_s18, 2 }
  0xa6   : > { %v1248_v48 = vcombine.high %v332_v47, %v332_v47  ;;  %v1250_v52 = vcombine.high %v333_v49, %v333_v49  ;;  %v1527_v53 = vld [vmem:[%s2053_s10 + $0xc4] ss:$8 sps:$4 sm:$0xff]   ;;  %v1531_v55 = vld [vmem:[%s2053_s10 + $0xc0] ss:$8 sps:$4 sm:$0xff]   ;;  %v1533_v57 = vld [vmem:[%s2053_s10 + $0xd4] ss:$8 sps:$4 sm:$0xff]   ;;  %v1247_v6 = vcombine.low %v332_v47, %v332_v47  ;;  %v1249_v7 = vcombine.low %v333_v49, %v333_v49 }
  0xa7   : > { %941 = vmatpush1.bf16.msra.mxu0 %v1483_v19  ;;  %v1529_v54 = vld [vmem:[%s2053_s10 + $0x1c4] ss:$8 sps:$4 sm:$0xff]   ;;  %v1532_v56 = vld [vmem:[%s2053_s10 + $0x1c0] ss:$8 sps:$4 sm:$0xff]   ;;  %v1535_v58 = vld [vmem:[%s2053_s10 + $0x1d4] ss:$8 sps:$4 sm:$0xff]   ;;  %v1252_v11 = vcombine.high %v2137_v9, %v2137_v9 }
  0xa8   : > { %982 = vmatpush1.bf16.msra.mxu1 %v1484_v20  ;;  %942 = vmatprep.subr.bf16.mxu0 %v1485_v21  ;;  %v1537_v59 = vld [vmem:[%s2053_s10 + $0xd0] ss:$8 sps:$4 sm:$0xff]   ;;  %v1539_v61 = vld [vmem:[%s2053_s10 + $0xe4] ss:$8 sps:$4 sm:$0xff]   ;;  %v1543_v63 = vld [vmem:[%s2053_s10 + $0xe0] ss:$8 sps:$4 sm:$0xff]  }
  0xa9   : > { %983 = vmatprep.subr.bf16.mxu1 %v1487_v22  ;;  %964 = vmatprep.mubr.bf16.mxu0 %v1248_v48  ;;  %v1538_v60 = vld [vmem:[%s2053_s10 + $0x1d0] ss:$8 sps:$4 sm:$0xff]   ;;  %v1541_v62 = vld [vmem:[%s2053_s10 + $0x1e4] ss:$8 sps:$4 sm:$0xff]   ;;  %v1544_v0 = vld [vmem:[%s2053_s10 + $0x1e0] ss:$8 sps:$4 sm:$0xff]  }
  0xaa   : > { %1005 = vmatprep.mubr.bf16.mxu1 %v1250_v52  ;;  %v1545_v1 = vld [vmem:[%s2053_s10 + $0xf4] ss:$8 sps:$4 sm:$0xff]   ;;  %v1549_v3 = vld [vmem:[%s2053_s10 + $0xf0] ss:$8 sps:$4 sm:$0xff]   ;;  %v1557_v5 = vld [vmem:[%s2053_s10 + $0x204] ss:$8 sps:$4 sm:$0xff]  }
  0xab   : > { %943 = vmatpush1.bf16.msra.mxu0 %v1489_v23  ;;  %v1547_v2 = vld [vmem:[%s2053_s10 + $0x1f4] ss:$8 sps:$4 sm:$0xff]   ;;  %v1550_v4 = vld [vmem:[%s2053_s10 + $0x1f0] ss:$8 sps:$4 sm:$0xff]   ;;  %v1555_v8 = vld [vmem:[%s2053_s10 + $0x200] ss:$8 sps:$4 sm:$0xff]  }
  0xac   : > { %984 = vmatpush1.bf16.msra.mxu1 %v1490_v24  ;;  %944 = vmatprep.subr.bf16.mxu0 %v1491_v25  ;;  %v1560_v10 = vld [vmem:[%s2053_s10 + $0x214] ss:$8 sps:$4 sm:$0xff]   ;;  %v1558_v12 = vld [vmem:[%s2053_s10 + $0x210] ss:$8 sps:$4 sm:$0xff]   ;;  %v1563_v13 = vld [vmem:[%s2053_s10 + $0x224] ss:$8 sps:$4 sm:$0xff]  }
  0xad   : > { %985 = vmatprep.subr.bf16.mxu1 %v1493_v26  ;;  %v1561_v14 = vld [vmem:[%s2053_s10 + $0x220] ss:$8 sps:$4 sm:$0xff]   ;;  %v1566_v15 = vld [vmem:[%s2053_s10 + $0x234] ss:$8 sps:$4 sm:$0xff]   ;;  %v1564_v16 = vld [vmem:[%s2053_s10 + $0x230] ss:$8 sps:$4 sm:$0xff]  }
  0xae   : > { %v1569_v17 = vld [vmem:[%s2053_s10 + $0x244] ss:$8 sps:$4 sm:$0xff]   ;;  %v1567_v18 = vld [vmem:[%s2053_s10 + $0x240] ss:$8 sps:$4 sm:$0xff]   ;;  %v1572_v19 = vld [vmem:[%s2053_s10 + $0x254] ss:$8 sps:$4 sm:$0xff]  }
  0xaf   : > { %945 = vmatpush1.bf16.msra.mxu0 %v1495_v27  ;;  %v1570_v20 = vld [vmem:[%s2053_s10 + $0x250] ss:$8 sps:$4 sm:$0xff]   ;;  %v1575_v21 = vld [vmem:[%s2053_s10 + $0x264] ss:$8 sps:$4 sm:$0xff]   ;;  %v1573_v22 = vld [vmem:[%s2053_s10 + $0x260] ss:$8 sps:$4 sm:$0xff]  }
  0xb0   : > { %986 = vmatpush1.bf16.msra.mxu1 %v1496_v28  ;;  %946 = vmatprep.subr.bf16.mxu0 %v1497_v29  ;;  %v1578_v23 = vld [vmem:[%s2053_s10 + $0x274] ss:$8 sps:$4 sm:$0xff]   ;;  %v1576_v24 = vld [vmem:[%s2053_s10 + $0x270] ss:$8 sps:$4 sm:$0xff]   ;;  %v1581_v25 = vld [vmem:[%s2053_s10 + $0x284] ss:$8 sps:$4 sm:$0xff]  }
  0xb1   : > { %987 = vmatprep.subr.bf16.mxu1 %v1499_v30  ;;  %v1579_v26 = vld [vmem:[%s2053_s10 + $0x280] ss:$8 sps:$4 sm:$0xff]   ;;  %v1584_v27 = vld [vmem:[%s2053_s10 + $0x294] ss:$8 sps:$4 sm:$0xff]   ;;  %v1582_v28 = vld [vmem:[%s2053_s10 + $0x290] ss:$8 sps:$4 sm:$0xff]  }
  0xb2   : > { %v1587_v29 = vld [vmem:[%s2053_s10 + $0x2a4] ss:$8 sps:$4 sm:$0xff]   ;;  %v1585_v30 = vld [vmem:[%s2053_s10 + $0x2a0] ss:$8 sps:$4 sm:$0xff]  }
  0xb3   : > { %947 = vmatpush1.bf16.msra.mxu0 %v1501_v31  ;;  %v1590_v31 = vld [vmem:[%s2053_s10 + $0x2b4] ss:$8 sps:$4 sm:$0xff]   ;;  %v330_v52 = vld [vmem:[#allocation2] sm:$0xff] }
  0xb4   : > { %988 = vmatpush1.bf16.msra.mxu1 %v1502_v32  ;;  %948 = vmatprep.subr.bf16.mxu0 %v1503_v33  ;;  %v1588_v32 = vld [vmem:[%s2053_s10 + $0x2b0] ss:$8 sps:$4 sm:$0xff]   ;;  %v1593_v33 = vld [vmem:[%s2053_s10 + $0x2c4] ss:$8 sps:$4 sm:$0xff]  }
  0xb5   : > { %989 = vmatprep.subr.bf16.mxu1 %v1505_v34  ;;  %v1591_v34 = vld [vmem:[%s2053_s10 + $0x2c0] ss:$8 sps:$4 sm:$0xff]  }
  0xb7   : > { %949 = vmatpush1.bf16.msra.mxu0 %v1507_v35  ;;  %v1596_v35 = vld [vmem:[%s2053_s10 + $0x2d4] ss:$8 sps:$4 sm:$0xff]  }
  0xb8   : > { %990 = vmatpush1.bf16.msra.mxu1 %v1508_v36  ;;  %950 = vmatprep.subr.bf16.mxu0 %v1509_v37  ;;  %v1594_v36 = vld [vmem:[%s2053_s10 + $0x2d0] ss:$8 sps:$4 sm:$0xff]   ;;  %v1599_v37 = vld [vmem:[%s2053_s10 + $0x2e4] ss:$8 sps:$4 sm:$0xff]  }
  0xb9   : > { %991 = vmatprep.subr.bf16.mxu1 %v1511_v38  ;;  %v1597_v38 = vld [vmem:[%s2053_s10 + $0x2e0] ss:$8 sps:$4 sm:$0xff]  }
  0xbb   : > { %951 = vmatpush1.bf16.msra.mxu0 %v1513_v39  ;;  %v1602_v39 = vld [vmem:[%s2053_s10 + $0x2f4] ss:$8 sps:$4 sm:$0xff]  }
  0xbc   : > { %992 = vmatpush1.bf16.msra.mxu1 %v1514_v40  ;;  %952 = vmatprep.subr.bf16.mxu0 %v1515_v41  ;;  %v1600_v40 = vld [vmem:[%s2053_s10 + $0x2f0] ss:$8 sps:$4 sm:$0xff]   ;;  %v1251_v41 = vcombine.low %v2137_v9, %v2137_v9 }
  0xbd   : > { %993 = vmatprep.subr.bf16.mxu1 %v1517_v42 }
  0xbf   : > { %953 = vmatpush1.bf16.msra.mxu0 %v1519_v43 }
  0xc0   : > { %994 = vmatpush1.bf16.msra.mxu1 %v1520_v44  ;;  %954 = vmatprep.subr.bf16.mxu0 %v1521_v45 }
  0xc1   : > { %995 = vmatprep.subr.bf16.mxu1 %v1523_v46 }
  0xc3   : > { %955 = vmatpush1.bf16.msra.mxu0 %v1525_v50 }
  0xc4   : > { %996 = vmatpush1.bf16.msra.mxu1 %v1526_v51  ;;  %956 = vmatprep.subr.bf16.mxu0 %v1527_v53 }
  0xc5   : > { %997 = vmatprep.subr.bf16.mxu1 %v1529_v54 }
  0xc7   : > { %957 = vmatpush1.bf16.msra.mxu0 %v1531_v55  ;;  %v331_v55 = vld [vmem:[#allocation2 + $0x8] sm:$0xff] }
  0xc8   : > { %998 = vmatpush1.bf16.msra.mxu1 %v1532_v56  ;;  %958 = vmatprep.subr.bf16.mxu0 %v1533_v57 }
  0xc9   : > { %999 = vmatprep.subr.bf16.mxu1 %v1535_v58 }
  0xcb   : > { %959 = vmatpush1.bf16.msra.mxu0 %v1537_v59 }
  0xcc   : > { %1000 = vmatpush1.bf16.msra.mxu1 %v1538_v60  ;;  %960 = vmatprep.subr.bf16.mxu0 %v1539_v61 }
  0xcd   : > { %1001 = vmatprep.subr.bf16.mxu1 %v1541_v62  ;;  %v1067_v62 = vlaneseq (!%p1349_p13) }
  0xcf   : > { %961 = vmatpush1.bf16.msra.mxu0 %v1543_v63  ;;  %v1068_v63 = vshrl.u32 (!%p1349_p13), %v1067_v62, 7 }
  0xd0   : > { %1002 = vmatpush1.bf16.msra.mxu1 %v1544_v0  ;;  %962 = vmatprep.subr.bf16.mxu0 %v1545_v1  ;;  %v1065_v0 = vld [vmem:[#allocation8] sm:$0x3] (!%p1349_p13)  ;;  %v1079_v1 = vld [vmem:[#allocation9] sm:$0x3] (!%p1349_p13) }
  0xd1   : > { %1003 = vmatprep.subr.bf16.mxu1 %v1547_v2  ;;  %v1069_v2 = vsub.s32 (!%p1349_p13), 0, %v1068_v63 }
  0xd3   : > { %963 = vmatpush1.bf16.msra.mxu0 %v1549_v3  ;;  %v1073_v3 = vsub.s32 (!%p1349_p13), 1, %v1068_v63 }
  0xd4   : > { %1004 = vmatpush1.bf16.msra.mxu1 %v1550_v4  ;;  %1014 = vmatprep.subr.bf16.mxu0 %v1557_v5 }
  0xd5   : > { %v1088_v9 = vrot.slane (!%p1349_p13), %v1079_v1, %v1073_v3 }
  0xd6   : > { %965 = vmatmul.mubr.bf16.vlgmr.msra.gmra.mrb[0].mxu0 %v1247_v6  ;;  %v1070_v6 = vrot.slane (!%p1349_p13), %v1065_v0, %v1069_v2 }
  0xd7   : > { %1006 = vmatmul.mubr.bf16.vlgmr.msra.gmra.mrb[0].mxu1 %v1249_v7  ;;  %1015 = vmatpush1.bf16.msra.mxu0 %v1555_v8  ;;  %v1074_v7 = vrot.slane (!%p1349_p13), %v1065_v0, %v1073_v3  ;;  %v1084_v8 = vrot.slane (!%p1349_p13), %v1079_v1, %v1069_v2 }
  0xd8   : > { %1046 = vmatprep.mubr.bf16.mxu0 %v1252_v11  ;;  %1016 = vmatprep.subr.bf16.mxu0 %v1560_v10 }
  0xdb   : > { %1017 = vmatpush1.bf16.msra.mxu0 %v1558_v12 }
  0xdc   : > { %1018 = vmatprep.subr.bf16.mxu0 %v1563_v13 }
  0xdf   : > { %1019 = vmatpush1.bf16.msra.mxu0 %v1561_v14 }
  0xe0   : > { %1020 = vmatprep.subr.bf16.mxu0 %v1566_v15 }
  0xe3   : > { %1021 = vmatpush1.bf16.msra.mxu0 %v1564_v16 }
  0xe4   : > { %1022 = vmatprep.subr.bf16.mxu0 %v1569_v17 }
  0xe7   : > { %1023 = vmatpush1.bf16.msra.mxu0 %v1567_v18 }
  0xe8   : > { %1024 = vmatprep.subr.bf16.mxu0 %v1572_v19 }
  0xeb   : > { %1025 = vmatpush1.bf16.msra.mxu0 %v1570_v20 }
  0xec   : > { %1026 = vmatprep.subr.bf16.mxu0 %v1575_v21 }
  0xef   : > { %1027 = vmatpush1.bf16.msra.mxu0 %v1573_v22 }
  0xf0   : > { %1028 = vmatprep.subr.bf16.mxu0 %v1578_v23 }
  0xf3   : > { %1029 = vmatpush1.bf16.msra.mxu0 %v1576_v24 }
  0xf4   : > { %1030 = vmatprep.subr.bf16.mxu0 %v1581_v25 }
  0xf7   : > { %1031 = vmatpush1.bf16.msra.mxu0 %v1579_v26 }
  0xf8   : > { %1032 = vmatprep.subr.bf16.mxu0 %v1584_v27 }
  0xfb   : > { %1033 = vmatpush1.bf16.msra.mxu0 %v1582_v28 }
  0xfc   : > { %1034 = vmatprep.subr.bf16.mxu0 %v1587_v29 }
  0xff   : > { %1035 = vmatpush1.bf16.msra.mxu0 %v1585_v30 }
 0x100   : > { %1036 = vmatprep.subr.bf16.mxu0 %v1590_v31 }
 0x103   : > { %1037 = vmatpush1.bf16.msra.mxu0 %v1588_v32 }
 0x104   : > { %1038 = vmatprep.subr.bf16.mxu0 %v1593_v33 }
 0x107   : > { %1039 = vmatpush1.bf16.msra.mxu0 %v1591_v34 }
 0x108   : > { %1040 = vmatprep.subr.bf16.mxu0 %v1596_v35 }
 0x10b   : > { %1041 = vmatpush1.bf16.msra.mxu0 %v1594_v36 }
 0x10c   : > { %1042 = vmatprep.subr.bf16.mxu0 %v1599_v37 }
 0x10f   : > { %1043 = vmatpush1.bf16.msra.mxu0 %v1597_v38 }
 0x110   : > { %1044 = vmatprep.subr.bf16.mxu0 %v1602_v39 }
 0x113   : > { %1045 = vmatpush1.bf16.msra.mxu0 %v1600_v40 }
 0x116   : > { %1047 = vmatmul.mubr.bf16.vlgmr.msra.gmra.mrb[4].mxu0 %v1251_v41 }
 0x1a9   : > { %v966_v42 = vpop.f32.mrb[0].mxu0 }
 0x1aa   : > { %v1007_v43 = vpop.f32.mrb[0].mxu1  ;;  %v968_v45 = vpop.f32.mrb[1].mxu0 }
 0x1ab   : > { %v1008_v44 = vadd.f32 %v1007_v43, %v966_v42  ;;  %v1009_v46 = vpop.f32.mrb[1].mxu1  ;;  %v970_v48 = vpop.f32.mrb[2].mxu0 }
 0x1ac   : > { %v1010_v47 = vadd.f32 %v1009_v46, %v968_v45  ;;  %v1011_v49 = vpop.f32.mrb[2].mxu1  ;;  %v971_v50 = vpop.f32.mrb[3].mxu0 }
 0x1ad   : > { %v1012_v51 = vpop.f32.mrb[3].mxu1 }
 0x1e9   : > { %v1048_v53 = vpop.f32.mrb[4].mxu0  ;;  %1062 = sbr.rel (%p1349_p13) target bundleno = 512 (0x200), region = 60 }
 0x1ea   : > { %v1049_v54 = vadd.f32 %v1048_v53, %v1008_v44  ;;  %v1050_v56 = vpop.f32.mrb[5].mxu0 }
 0x1eb   : > { %v1051_v57 = vadd.f32 %v1050_v56, %v1010_v47  ;;  %v1052_v58 = vpop.f32.mrb[6].mxu0 }
 0x1ec   : > { %v1055_v59 = vadd.f32 %v1049_v54, %v330_v52  ;;  %v1053_v60 = vpop.f32.mrb[7].mxu0 }
 0x1ed   : > { %v1056_v61 = vadd.f32 %v1051_v57, %v331_v55 }
 0x1ee   : > { %1057 = vst [vmem:[#allocation2] sm:$0xff] %v1055_v59 }
 0x1ef   : > { %1058 = vst [vmem:[#allocation2 + $0x8] sm:$0xff] %v1056_v61 }
 0x1f5   : > { %v1063_v4 = vld [vmem:[#allocation2] sm:$0xff] }
 0x1f6   : > { %v1064_v5 = vld [vmem:[#allocation2 + $0x8] sm:$0xff]  ;;  %v1077_v10 = vmul.f32 %v1070_v6, %v1063_v4 }
 0x1f7   : > { %v1078_v11 = vmul.f32 %v1074_v7, %v1064_v5 }
 0x1f8   : > { %v1091_v12 = vadd.f32 %v1084_v8, %v1077_v10 }
 0x1f9   : > { %v1092_v13 = vadd.f32 %v1088_v9, %v1078_v11 }
 0x1fa   : > { %v1093_v14 = vmax.f32 %v1091_v12, 0.0 }
 0x1fb   : > { %v1094_v15 = vmax.f32 %v1092_v13, 0.0 }
 0x1fd   : > { %v1358_v16 = vpack.c.bf16 %v1094_v15, %v1093_v14 }
 0x1ff   : > { %1103 = vst [vmem:[#allocation11] sm:$0xff] %v1358_v16 }
 0x200 PF: > { %p1399_p2 = scmp.eq.s32.totalorder %s1877_s21, 2  ;;  %s1822_s18 = smov [#allocation11]  }
 0x201   : > { %s1116_s22 = sshll.u32 %s1822_s18, 4  ;;  %s1117_s22 = int_to_ptr.vmem [resolvable:$true] %s1116_s22 }
 0x202   : > { %s1721_s23 = scalar_lea.vmem %s1117_s22, 128  ;;  %p1728_p8 = scmp.lt.s32.totalorder %s1117_s22, %s1117_s22 }
 0x203   : > { %p1722_p3 = scmp.ne.s32.totalorder %s1117_s22, %s1721_s23  ;;  %p1729_p1 = scmp.lt.s32.totalorder %s1721_s23, %s1721_s23 }
 0x205   : > { %p1723_p0 = pnand %p1722_p3, %p1399_p2  ;;  %p1730_p12 = por %p1729_p1, %p1728_p8 }
 0x207   : > { %p1724_p6 = pneg %p1723_p0 }
 0x209   : > { %p1731_p9 = pnand %p1730_p12, %p1724_p6 }
 0x20b   : > { %1734 = shalt.err (!%p1731_p9)
}
 0x20c   : > { %s1735_s24 = scalar_lea.hbm %s2219_s4, 128 }
 0x20d   : > { %p1736_p7 = scmp.ne.s32.totalorder %s2219_s4, %s1735_s24  ;;  %p1741_p10 = scmp.lt.u32.totalorder %s1735_s24, %s2219_s4 }
 0x20f   : > { %p1737_p4 = pnand %p1736_p7, %p1399_p2 }
 0x211   : > { %p1738_p5 = pneg %p1737_p4 }
 0x213   : > { %p1743_p11 = pnand %p1741_p10, %p1738_p5 }
 0x215   : > { %1746 = shalt.err (!%p1743_p11)
}
 0x216   : > { %1377 = dma.vmem_to_hbm [thread:$0]  (%p1399_p2), %s1117_s22, 128, %s2219_s4, [#allocation5]  }
 0x217   : > { %1788 = dma.done.wait (%p1399_p2), [#allocation5], 128  }
 0x218   : > { %1790 = vsyncadd (%p1399_p2), [#allocation5], 4294967168 }
 0x219 PF: > { %s22_s20 = sadd.s32 1, %s1813_s20   ;;  %s2233_s15 = smov %s1797_s16 }
 0x21a   : > { %p19_p13 = scmp.ge.s32.totalorder %s22_s20, 5   ;;  %s2234_s16 = smov %s1801_s17 }
 0x21b   : > { %s2235_s17 = smov %s1970_s12  ;;  %s2236_s18 = smov %s1809_s19 }
 0x21c   : > { %s2237_s19 = smov %s2239_s7  ;;  %21 = sbr.rel (!%p19_p13) target bundleno = 8 (0x8), region = 105 }
 0x223   :  { %1129 = vsyncpa [#allocation4], 1 }
 0x224   :  { %1131 = vsyncpa [#allocation4 + $0x1], 1 }
 0x225   :  { %1132 = vsyncpa [#allocation7], 1 }
 0x226   :  { %1134 = vsyncpa [#allocation7 + $0x1], 1 }
 0x227   :  { %1135 = vsyncpa [#allocation10], 1 }
 0x228   :  { %1136 = vsyncpa [#allocation5], 1 }
 0x229   :  { %1138 = vsyncpa [#allocation5 + $0x1], 1 }

// kernel: _lambda_.47
= control target key start
LH: loop header
LB: loop body
LE: loop exit
PB: predicated region body
PF: predicated region fallthrough
CT: control target
= control target key end

     0   :  { %s1933_s0 = inlined_call_operand.hbm [shape: bf16[8,512], index: 0, kind: input, shape index: {}]   ;;  %s1934_s1 = inlined_call_operand.hbm [shape: bf16[512,1024], index: 1, kind: input, shape index: {}]   ;;  %s1935_s2 = inlined_call_operand.hbm [shape: f32[1,1024], index: 2, kind: input, shape index: {}]   ;;  %s1936_s3 = inlined_call_operand.hbm [shape: f32[1,1024], index: 3, kind: input, shape index: {}]   ;;  %s1937_s4 = inlined_call_operand.hbm [shape: bf16[8,1024], index: 4, kind: output, shape index: {}]  }
   0x1   :  { %1952 = sst [smem:[#allocation19_spill]] %s1934_s1 }
   0x2   :  { %9 = vsyncpa [#allocation4], 0 }
   0x3   :  { %10 = vsyncpa [#allocation7], 0 }
   0x4   :  { %12 = vsyncpa [#allocation7 + $0x1], 0 }
   0x5   :  { %13 = vsyncpa [#allocation10], 0 }
   0x6   :  { %15 = vsyncpa [#allocation10 + $0x1], 0 }
   0x7   :  { %16 = vsyncpa [#allocation5], 0 }
   0x8   :  { %18 = vsyncpa [#allocation5 + $0x1], 0  ;;  %s1576_s15 = smov 0   ;;  %s1578_s16 = smov 0  }
   0x9   :  { %s1580_s17 = smov 0   ;;  %s1582_s18 = smov 0  }
   0xa   :  { %s1584_s19 = smov 0   ;;  %s1586_s20 = smov 0  }
   0xb LB: > { %1953 = sst [smem:[#allocation16_spill]] %s1529_s17  ;;  %s39_s21 = sadd.s32 1, %s1537_s19  ;;  %s1541_s20 = sphi %s1586_s20, %s24_s20   ;;  %s1537_s19 = sphi %s1584_s19, %s1983_s19   ;;  %s1533_s18 = sphi %s1582_s18, %s1982_s18   ;;  %s1529_s17 = sphi %s1580_s17, %s1978_s17   ;;  %s1525_s16 = sphi %s1578_s16, %s1981_s16   ;;  %s1521_s15 = sphi %s1576_s15, %s1980_s15  }
   0xc   : > { %s80_s22 = sadd.s32 1, %s1529_s17  ;;  %p41_p0 = scmp.ge.s32.totalorder %s39_s21, 4 }
   0xd   : > { %p1938_p1 = scmp.ne.s32.totalorder %s1529_s17, %s1525_s16  ;;  %p88_p2 = scmp.eq.s32.totalorder %s1541_s20, 0 }
   0xe   : > { %s1985_s21 = smov (%p41_p0, %s39_s21), 0  ;;  %p1178_p4 = scmp.lt.s32.totalorder %s1541_s20, 4 }
   0xf   : > { %1954 = sst [smem:[#allocation17_spill]] %s1985_s21  ;;  %p89_p3 = por %p88_p2, %p1938_p1 }
  0x10   : > { %s76_s23 = ssub.s32 %s1537_s19, %s1985_s21  ;;  %s213_s24 = sand.u32 1, %s1541_s20  }
  0x11   : > { %p78_p5 = scmp.eq.s32.totalorder %s76_s23, 0  ;;  %s1621_s25 = sand.u32 1, %s1529_s17  }
  0x12   : > { %s1140_s26 = sshll.u32 %s1537_s19, 7  ;;  %s1051_s28 = sshll.u32 %s1621_s25, 9 }
  0x13   : > { %s1625_s27 = scalar_select %p78_p5, %s1529_s17, %s80_s22  }
  0x14   : > { %s1956_s1 = sld [smem:[#allocation19_spill]]  ;;  %p1633_p6 = pnand %p1178_p4, %p89_p3 }
  0x15   : > { %1955 = sst [smem:[#allocation18_spill]] %s1625_s27  ;;  %s217_s7 = scalar_lea.vmem [#allocation6], %s1051_s28 }
  0x16   : > { %s1957_s6 = scalar_select %p1633_p6, 1, 0 }
  0x17   : > { %s227_s8 = sshll.u32 %s217_s7, 4  ;;  %s1639_s9 = scalar_lea.sflag [#allocation7], %s213_s24  ;;  %s1637_s8 = int_to_ptr.vmem [resolvable:$true] %s227_s8 }
  0x18   : > { %p1645_p8 = pneg %p1633_p6 }
  0x1a   : > { %s1631_s5 = scalar_lea.hbm %s1956_s1, %s1140_s26  ;;  %s1338_s14 = scalar_lea.hbm %s1956_s1, 32768 }
  0x1b   : > { %s1333_s10 = scalar_lea.hbm %s1631_s5, 8192  ;;  %p1339_p11 = scmp.lt.u32.totalorder %s1631_s5, %s1956_s1 }
  0x1c   : > { %p1334_p7 = scmp.ne.s32.totalorder %s1631_s5, %s1333_s10  ;;  %p1340_p12 = scmp.lt.u32.totalorder %s1338_s14, %s1333_s10 }
  0x1d   : > { %s1958_s11 = scalar_select %p1645_p8, 1, 0 }
  0x1e   : > { %p1336_p9 = pnand %p1645_p8, %p1334_p7  ;;  %p1341_p13 = por %p1340_p12, %p1339_p11 }
  0x1f   : > { %p1342_p0 = scmp.lt.u32.totalorder %s1333_s10, %s1631_s5 }
  0x20   : > { %p1337_p10 = pneg %p1336_p9 }
  0x21   : > { %p1343_p2 = por %p1342_p0, %p1341_p13 }
  0x23   : > { %p1344_p3 = pnand %p1343_p2, %p1337_p10 }
  0x25   : > { %1347 = shalt.err (!%p1344_p3)
}
  0x26   : > { %s1348_s24 = scalar_lea.vmem %s1637_s8, 8192  ;;  %s1543_s26 = smov [#allocation6]  }
  0x27   : > { %p1349_p4 = scmp.ne.s32.totalorder %s1637_s8, %s1348_s24  ;;  %s1353_s28 = sshll.u32 %s1543_s26, 4  ;;  %s1354_s28 = int_to_ptr.vmem [resolvable:$false] %s1353_s28 }
  0x28   : > { %s1355_s29 = scalar_lea.vmem %s1354_s28, 16384  ;;  %p1356_p9 = scmp.lt.s32.totalorder %s1637_s8, %s1354_s28 }
  0x29   : > { %p1351_p5 = pnand %p1349_p4, %p1645_p8  ;;  %p1357_p1 = scmp.lt.s32.totalorder %s1355_s29, %s1348_s24 }
  0x2b   : > { %p1352_p7 = pneg %p1351_p5  ;;  %p1358_p11 = por %p1357_p1, %p1356_p9 }
  0x2d   : > { %p1359_p12 = pnand %p1358_p11, %p1352_p7 }
  0x2f   : > { %1362 = shalt.err (!%p1359_p12)
}
  0x30   : > { %s1544_s30 = smov 512   ;;  %s1545_s7 = smov 128  }
  0x31   : > { %s1546_s10 = smov 8   ;;  %s1670_s12 = sadd.s32 4294967295, %s1541_s20  }
  0x32   : > { %1166 = dma.hbm_to_vmem [thread:$0]  (!%p1633_p6), %s1631_s5, 8192, %s1637_s8, %s1639_s9, %s1544_s30, %s1545_s7, %s1546_s10  }
  0x33   : > { %s1047_s13 = sadd.s32 4294967294, %s1541_s20   ;;  %p93_p1 = scmp.ne.s32.totalorder %s1525_s16, %s1521_s15 }
  0x34   : > { %p1941_p10 = scmp.eq.s32.totalorder %s1670_s12, 0  ;;  %p171_p13 = scmp.eq.s32.totalorder %s1670_s12, 3 }
  0x35   : > { %p177_p0 = scmp.eq.s32.totalorder %s1047_s13, 3  ;;  %p1048_p3 = scmp.ge.s32.totalorder %s1541_s20, 1 }
  0x36   : > { %p1679_p2 = por %p1941_p10, %p93_p1  ;;  %p1960_p4 = scmp.ne.s32.totalorder %s1529_s17, %s1525_s16 }
  0x37   : > { %p1691_p7 = por %p177_p0, %p93_p1  ;;  %p184_p9 = scmp.lt.s32.totalorder %s1541_s20, 5 }
  0x38   : > { %s1959_s14 = scalar_select %p1679_p2, 1, 0 }
  0x39   : > { %p1687_p5 = por %p171_p13, %p1960_p4  ;;  %s1944_s22 = sshll.u32 %s1621_s25, 1 }
  0x3a   : > { %s1962_s8 = scalar_select %p1691_p7, 1, 0 }
  0x3b   : > { %s1961_s5 = scalar_select %p1687_p5, 1, 0 }
  0x3c   : > { %p1697_p11 = pnand %p1048_p3, %p184_p9  ;;  %s1547_s24 = smov [#allocation3]  }
  0x3d   : > { %s202_s26 = sshll.u32 %s1547_s24, 4  ;;  %s1939_s28 = sshll.u32 %s1537_s19, 5  ;;  %s1701_s26 = int_to_ptr.vmem [resolvable:$true] %s202_s26 }
  0x3e   : > { %s1963_s23 = scalar_select %p1697_p11, 1, 0 }
  0x3f   : > { %p1159_p12 = pneg %p1697_p11  ;;  %s1711_s7 = scalar_lea.hbm %s1935_s2, %s1939_s28 }
  0x40   : > { %s241_s10 = scalar_lea.vmem [#allocation8], %s1944_s22  ;;  %s1363_s1 = scalar_lea.hbm %s1711_s7, 32 }
  0x41   : > { %s249_s13 = sshll.u32 %s241_s10, 4  ;;  %p1717_p1 = pnand %p1159_p12, %p1941_p10  ;;  %s250_s13 = int_to_ptr.vmem [resolvable:$true] %s249_s13 }
  0x42   : > { %p1364_p13 = scmp.ne.s32.totalorder %s1711_s7, %s1363_s1  ;;  %s1368_s28 = scalar_lea.hbm %s1935_s2, 128 }
  0x43   : > { %s1964_s24 = scalar_select %p1717_p1, 1, 0 }
  0x44   : > { %p1366_p0 = pnand %p1364_p13, %p1645_p8  ;;  %p1369_p4 = scmp.lt.u32.totalorder %s1711_s7, %s1935_s2 }
  0x45   : > { %p1370_p9 = scmp.lt.u32.totalorder %s1368_s28, %s1363_s1  ;;  %p1372_p12 = scmp.lt.u32.totalorder %s1363_s1, %s1711_s7 }
  0x46   : > { %p1367_p3 = pneg %p1366_p0 }
  0x47   : > { %p1371_p7 = por %p1370_p9, %p1369_p4 }
  0x49   : > { %p1373_p10 = por %p1372_p12, %p1371_p7 }
  0x4b   : > { %p1374_p5 = pnand %p1373_p10, %p1367_p3 }
  0x4d   : > { %1377 = shalt.err (!%p1374_p5)
}
  0x4e   : > { %s1378_s10 = scalar_lea.vmem %s250_s13, 32  ;;  %s1548_s22 = smov [#allocation8]  }
  0x4f   : > { %p1379_p2 = scmp.ne.s32.totalorder %s250_s13, %s1378_s10  ;;  %s1383_s17 = sshll.u32 %s1548_s22, 4  ;;  %s1384_s17 = int_to_ptr.vmem [resolvable:$false] %s1383_s17 }
  0x50   : > { %s1385_s29 = scalar_lea.vmem %s1384_s17, 64  ;;  %p1386_p11 = scmp.lt.s32.totalorder %s250_s13, %s1384_s17 }
  0x51   : > { %p1381_p13 = pnand %p1379_p2, %p1645_p8  ;;  %p1387_p1 = scmp.lt.s32.totalorder %s1385_s29, %s1378_s10 }
  0x53   : > { %p1382_p0 = pneg %p1381_p13  ;;  %p1388_p6 = por %p1387_p1, %p1386_p11 }
  0x55   : > { %p1389_p4 = pnand %p1388_p6, %p1382_p0 }
  0x57   : > { %1392 = shalt.err (!%p1389_p4)
}
  0x58   : > { %p1965_p9 = scmp.ne.s32.totalorder %s1957_s6, 0  ;;  %s1393_s27 = scalar_lea.hbm %s1933_s0, 256 }
  0x59   : > { %p1394_p10 = scmp.ne.s32.totalorder %s1933_s0, %s1393_s27  ;;  %p1966_p2 = scmp.ne.s32.totalorder %s1964_s24, 0 }
  0x5a   : > { %1169 = dma.hbm_to_vmem [thread:$0]  (!%p1965_p9), %s1711_s7, 32, %s250_s13, %s1639_s9  }
  0x5b   : > { %p1395_p5 = pneg %p1966_p2  ;;  %p1400_p6 = scmp.lt.u32.totalorder %s1393_s27, %s1933_s0 }
  0x5d   : > { %p1396_p7 = pnand %p1395_p5, %p1394_p10 }
  0x5f   : > { %p1397_p11 = pneg %p1396_p7 }
  0x61   : > { %p1402_p1 = pnand %p1400_p6, %p1397_p11 }
  0x63   : > { %1405 = shalt.err (!%p1402_p1)
}
  0x64   : > { %s1406_s9 = scalar_lea.vmem %s1701_s26, 256  ;;  %p1414_p0 = scmp.lt.s32.totalorder %s1701_s26, %s1701_s26 }
  0x65   : > { %p1407_p3 = scmp.ne.s32.totalorder %s1701_s26, %s1406_s9  ;;  %p1415_p4 = scmp.lt.s32.totalorder %s1406_s9, %s1406_s9 }
  0x67   : > { %p1409_p12 = pnand %p1407_p3, %p1395_p5  ;;  %p1416_p9 = por %p1415_p4, %p1414_p0 }
  0x69   : > { %p1410_p13 = pneg %p1409_p12 }
  0x6b   : > { %p1417_p8 = pnand %p1416_p9, %p1410_p13 }
  0x6d   : > { %1420 = shalt.err (!%p1417_p8)
}
  0x6e   : > { %1162 = dma.hbm_to_vmem [thread:$0]  (!%p1966_p2), %s1933_s0, 256, %s1701_s26, [#allocation4]  }
  0x6f   : > { %s1967_s10 = sshll.u32 %s1537_s19, 5  ;;  %s1968_s27 = sshll.u32 %s1621_s25, 1 }
  0x70   : > { %s1765_s21 = scalar_lea.hbm %s1936_s3, %s1967_s10  ;;  %s260_s24 = scalar_lea.vmem [#allocation9], %s1968_s27 }
  0x71   : > { %s268_s28 = sshll.u32 %s260_s24, 4  ;;  %s257_s30 = scalar_lea.sflag [#allocation10], %s1621_s25  ;;  %s269_s28 = int_to_ptr.vmem [resolvable:$true] %s268_s28 }
  0x72   : > { %s1421_s17 = scalar_lea.hbm %s1765_s21, 32  ;;  %p1969_p9 = scmp.ne.s32.totalorder %s1958_s11, 0 }
  0x73   : > { %p1422_p8 = scmp.ne.s32.totalorder %s1765_s21, %s1421_s17  ;;  %s1426_s9 = scalar_lea.hbm %s1936_s3, 128 }
  0x74   : > { %p1427_p5 = scmp.lt.u32.totalorder %s1765_s21, %s1936_s3  ;;  %p1428_p7 = scmp.lt.u32.totalorder %s1426_s9, %s1421_s17 }
  0x75   : > { %p1424_p10 = pnand %p1422_p8, %p1969_p9  ;;  %p1430_p6 = scmp.lt.u32.totalorder %s1421_s17, %s1765_s21 }
  0x76   : > { %p1429_p11 = por %p1428_p7, %p1427_p5 }
  0x77   : > { %p1425_p2 = pneg %p1424_p10 }
  0x78   : > { %p1431_p1 = por %p1430_p6, %p1429_p11 }
  0x7a   : > { %p1432_p3 = pnand %p1431_p1, %p1425_p2 }
  0x7c   : > { %1435 = shalt.err (!%p1432_p3)
}
  0x7d   : > { %s1436_s25 = scalar_lea.vmem %s269_s28, 32  ;;  %s1549_s10 = smov [#allocation9]  }
  0x7e   : > { %p1437_p12 = scmp.ne.s32.totalorder %s269_s28, %s1436_s25  ;;  %s1441_s29 = sshll.u32 %s1549_s10, 4  ;;  %s1442_s29 = int_to_ptr.vmem [resolvable:$false] %s1441_s29 }
  0x7f   : > { %s1443_s1 = scalar_lea.vmem %s1442_s29, 64  ;;  %p1444_p4 = scmp.lt.s32.totalorder %s269_s28, %s1442_s29 }
  0x80   : > { %p1439_p13 = pnand %p1437_p12, %p1969_p9  ;;  %p1445_p8 = scmp.lt.s32.totalorder %s1443_s1, %s1436_s25 }
  0x82   : > { %p1440_p0 = pneg %p1439_p13  ;;  %p1446_p10 = por %p1445_p8, %p1444_p4 }
  0x84   : > { %p1447_p5 = pnand %p1446_p10, %p1440_p0 }
  0x86   : > { %1450 = shalt.err (!%p1447_p5)
}
  0x87   : > { %p1970_p7 = scmp.ne.s32.totalorder %s1957_s6, 0  ;;  %p1971_p2 = scmp.ne.s32.totalorder %s1963_s23, 0 }
  0x88   : > { %p1972_p11 = scmp.eq.s32.totalorder (!%p1971_p2), %s1670_s12, 0 }
  0x89   : > { %1172 = dma.hbm_to_vmem [thread:$0]  (!%p1970_p7), %s1765_s21, 32, %s269_s28, %s257_s30  }
  0x8a   : > { %277 = sbr.rel (%p1971_p2) target bundleno = 455 (0x1c7), region = 36 }
  0x91   : > { %1504 = dma.done.wait (%p1972_p11), [#allocation4], 256   ;;  %p1973_p9 = pmov %p1972_p11 }
  0x92   : > { %s283_s11 = sand.u32 1, %s1670_s12   ;;  %s1795_s27 = sand.u32 1, %s1525_s16  }
  0x93   : > { %1506 = vsyncadd (%p1973_p9), [#allocation4], 4294967040  ;;  %s1062_s24 = sshll.u32 %s1795_s27, 9  ;;  %s284_s6 = scalar_lea.sflag [#allocation7], %s283_s11 }
  0x94   : > { %s1798_s17 = scalar_lea.vmem [#allocation6], %s1062_s24  ;;  %p1974_p6 = scmp.ne.s32.totalorder %s1959_s14, 0 }
  0x96   : > { %1508 = dma.done.wait (%p1974_p6), %s284_s6, 8224  }
  0x97   : > { %1510 = vsyncadd (%p1974_p6), %s284_s6, 4294959072  ;;  %s1063_s23 = sshll.u32 %s1795_s27, 1  ;;  %s302_s28 = scalar_lea.sflag [#allocation10], %s1795_s27 }
  0x98   : > { %s1805_s21 = scalar_lea.vmem [#allocation8], %s1063_s23  ;;  %s1808_s12 = scalar_lea.vmem [#allocation9], %s1063_s23 }
  0x99   : > { %1512 = dma.done.wait (%p1974_p6), %s302_s28, 32  }
  0x9a   : > { %1514 = vsyncadd (%p1974_p6), %s302_s28, 4294967264  ;;  %v1233_v0 = vld [vmem:[%s1798_s17 + $0x4] ss:$8 sps:$4 sm:$0xff]   ;;  %v1237_v2 = vld [vmem:[%s1798_s17] ss:$8 sps:$4 sm:$0xff]   ;;  %s1065_s14 = sshll.u32 %s1795_s27, 3 }
  0x9b   : > { %v1235_v1 = vld [vmem:[%s1798_s17 + $0x104] ss:$8 sps:$4 sm:$0xff]   ;;  %754 = vmatprep.subr.bf16.mxu1 %v1233_v0  ;;  %v1238_v3 = vld [vmem:[%s1798_s17 + $0x100] ss:$8 sps:$4 sm:$0xff]   ;;  %v1239_v4 = vld [vmem:[%s1798_s17 + $0x14] ss:$8 sps:$4 sm:$0xff]  }
  0x9c   : > { %795 = vmatprep.subr.bf16.mxu0 %v1235_v1  ;;  %755 = vmatpush1.bf16.msra.mxu1 %v1237_v2  ;;  %v1241_v5 = vld [vmem:[%s1798_s17 + $0x114] ss:$8 sps:$4 sm:$0xff]   ;;  %v1243_v6 = vld [vmem:[%s1798_s17 + $0x10] ss:$8 sps:$4 sm:$0xff]   ;;  %v1245_v8 = vld [vmem:[%s1798_s17 + $0x24] ss:$8 sps:$4 sm:$0xff]  }
  0x9d   : > { %796 = vmatpush1.bf16.msra.mxu0 %v1238_v3  ;;  %756 = vmatprep.subr.bf16.mxu1 %v1239_v4  ;;  %v1244_v7 = vld [vmem:[%s1798_s17 + $0x110] ss:$8 sps:$4 sm:$0xff]   ;;  %v1247_v9 = vld [vmem:[%s1798_s17 + $0x124] ss:$8 sps:$4 sm:$0xff]   ;;  %v1249_v10 = vld [vmem:[%s1798_s17 + $0x20] ss:$8 sps:$4 sm:$0xff]  }
  0x9e   : > { %797 = vmatprep.subr.bf16.mxu0 %v1241_v5  ;;  %v1250_v11 = vld [vmem:[%s1798_s17 + $0x120] ss:$8 sps:$4 sm:$0xff]   ;;  %v1251_v12 = vld [vmem:[%s1798_s17 + $0x34] ss:$8 sps:$4 sm:$0xff]   ;;  %v1255_v14 = vld [vmem:[%s1798_s17 + $0x30] ss:$8 sps:$4 sm:$0xff]  }
  0x9f   : > { %v1253_v13 = vld [vmem:[%s1798_s17 + $0x134] ss:$8 sps:$4 sm:$0xff]   ;;  %v1256_v15 = vld [vmem:[%s1798_s17 + $0x130] ss:$8 sps:$4 sm:$0xff]   ;;  %v1257_v16 = vld [vmem:[%s1798_s17 + $0x44] ss:$8 sps:$4 sm:$0xff]  }
  0xa0   : > { %757 = vmatpush1.bf16.msra.mxu1 %v1243_v6  ;;  %v1259_v17 = vld [vmem:[%s1798_s17 + $0x144] ss:$8 sps:$4 sm:$0xff]   ;;  %v1261_v18 = vld [vmem:[%s1798_s17 + $0x40] ss:$8 sps:$4 sm:$0xff]   ;;  %v1263_v20 = vld [vmem:[%s1798_s17 + $0x54] ss:$8 sps:$4 sm:$0xff]   ;;  %v847_v6 = vlaneseq }
  0xa1   : > { %798 = vmatpush1.bf16.msra.mxu0 %v1244_v7  ;;  %758 = vmatprep.subr.bf16.mxu1 %v1245_v8  ;;  %v1262_v19 = vld [vmem:[%s1798_s17 + $0x140] ss:$8 sps:$4 sm:$0xff]   ;;  %v1265_v21 = vld [vmem:[%s1798_s17 + $0x154] ss:$8 sps:$4 sm:$0xff]   ;;  %v1267_v22 = vld [vmem:[%s1798_s17 + $0x50] ss:$8 sps:$4 sm:$0xff]  }
  0xa2   : > { %799 = vmatprep.subr.bf16.mxu0 %v1247_v9  ;;  %v1268_v23 = vld [vmem:[%s1798_s17 + $0x150] ss:$8 sps:$4 sm:$0xff]   ;;  %v1269_v24 = vld [vmem:[%s1798_s17 + $0x64] ss:$8 sps:$4 sm:$0xff]   ;;  %v1273_v26 = vld [vmem:[%s1798_s17 + $0x60] ss:$8 sps:$4 sm:$0xff]  }
  0xa3   : > { %v1271_v25 = vld [vmem:[%s1798_s17 + $0x164] ss:$8 sps:$4 sm:$0xff]   ;;  %v1274_v27 = vld [vmem:[%s1798_s17 + $0x160] ss:$8 sps:$4 sm:$0xff]   ;;  %v1275_v28 = vld [vmem:[%s1798_s17 + $0x74] ss:$8 sps:$4 sm:$0xff]  }
  0xa4   : > { %759 = vmatpush1.bf16.msra.mxu1 %v1249_v10  ;;  %v1277_v29 = vld [vmem:[%s1798_s17 + $0x174] ss:$8 sps:$4 sm:$0xff]   ;;  %v1279_v30 = vld [vmem:[%s1798_s17 + $0x70] ss:$8 sps:$4 sm:$0xff]   ;;  %v1281_v32 = vld [vmem:[%s1798_s17 + $0x84] ss:$8 sps:$4 sm:$0xff]  }
  0xa5   : > { %800 = vmatpush1.bf16.msra.mxu0 %v1250_v11  ;;  %760 = vmatprep.subr.bf16.mxu1 %v1251_v12  ;;  %v1280_v31 = vld [vmem:[%s1798_s17 + $0x170] ss:$8 sps:$4 sm:$0xff]   ;;  %v1283_v33 = vld [vmem:[%s1798_s17 + $0x184] ss:$8 sps:$4 sm:$0xff]   ;;  %v1285_v34 = vld [vmem:[%s1798_s17 + $0x80] ss:$8 sps:$4 sm:$0xff]  }
  0xa6   : > { %801 = vmatprep.subr.bf16.mxu0 %v1253_v13  ;;  %v1286_v35 = vld [vmem:[%s1798_s17 + $0x180] ss:$8 sps:$4 sm:$0xff]   ;;  %v1287_v36 = vld [vmem:[%s1798_s17 + $0x94] ss:$8 sps:$4 sm:$0xff]   ;;  %v1291_v38 = vld [vmem:[%s1798_s17 + $0x90] ss:$8 sps:$4 sm:$0xff]  }
  0xa7   : > { %v1289_v37 = vld [vmem:[%s1798_s17 + $0x194] ss:$8 sps:$4 sm:$0xff]   ;;  %v1292_v39 = vld [vmem:[%s1798_s17 + $0x190] ss:$8 sps:$4 sm:$0xff]   ;;  %v1293_v40 = vld [vmem:[%s1798_s17 + $0xa4] ss:$8 sps:$4 sm:$0xff]  }
  0xa8   : > { %761 = vmatpush1.bf16.msra.mxu1 %v1255_v14  ;;  %v1295_v41 = vld [vmem:[%s1798_s17 + $0x1a4] ss:$8 sps:$4 sm:$0xff]   ;;  %v1297_v42 = vld [vmem:[%s1798_s17 + $0xa0] ss:$8 sps:$4 sm:$0xff]   ;;  %v1299_v44 = vld [vmem:[%s1798_s17 + $0xb4] ss:$8 sps:$4 sm:$0xff]  }
  0xa9   : > { %802 = vmatpush1.bf16.msra.mxu0 %v1256_v15  ;;  %762 = vmatprep.subr.bf16.mxu1 %v1257_v16  ;;  %v1298_v43 = vld [vmem:[%s1798_s17 + $0x1a0] ss:$8 sps:$4 sm:$0xff]   ;;  %v1301_v45 = vld [vmem:[%s1798_s17 + $0x1b4] ss:$8 sps:$4 sm:$0xff]   ;;  %v1303_v49 = vld [vmem:[%s1798_s17 + $0xb0] ss:$8 sps:$4 sm:$0xff]  }
  0xaa   : > { %803 = vmatprep.subr.bf16.mxu0 %v1259_v17  ;;  %v354_v46 = vld [vmem:[#allocation3] sm:$0xff]  ;;  %v355_v48 = vld [vmem:[#allocation3 + $0x8] sm:$0xff]  ;;  %v1305_v52 = vld [vmem:[%s1798_s17 + $0xc4] ss:$8 sps:$4 sm:$0xff]   ;;  %v848_v7 = vshrl.u32 %v847_v6, 7  ;;  %s1144_s30 = sshll.u32 %s1533_s18, 7 }
  0xab   : > { %v1067_v47 = vcombine.high %v354_v46, %v354_v46  ;;  %v1304_v50 = vld [vmem:[%s1798_s17 + $0x1b0] ss:$8 sps:$4 sm:$0xff]   ;;  %v1069_v51 = vcombine.high %v355_v48, %v355_v48  ;;  %v1307_v53 = vld [vmem:[%s1798_s17 + $0x1c4] ss:$8 sps:$4 sm:$0xff]   ;;  %v1309_v54 = vld [vmem:[%s1798_s17 + $0xc0] ss:$8 sps:$4 sm:$0xff]   ;;  %v1066_v4 = vcombine.low %v354_v46, %v354_v46  ;;  %v1068_v5 = vcombine.low %v355_v48, %v355_v48  ;;  %s1885_s13 = scalar_lea.hbm %s1937_s4, %s1144_s30 }
  0xac   : > { %763 = vmatpush1.bf16.msra.mxu1 %v1261_v18  ;;  %v1310_v55 = vld [vmem:[%s1798_s17 + $0x1c0] ss:$8 sps:$4 sm:$0xff]   ;;  %v1311_v56 = vld [vmem:[%s1798_s17 + $0xd4] ss:$8 sps:$4 sm:$0xff]   ;;  %v1315_v58 = vld [vmem:[%s1798_s17 + $0xd0] ss:$8 sps:$4 sm:$0xff]  }
  0xad   : > { %804 = vmatpush1.bf16.msra.mxu0 %v1262_v19  ;;  %764 = vmatprep.subr.bf16.mxu1 %v1263_v20  ;;  %v1313_v57 = vld [vmem:[%s1798_s17 + $0x1d4] ss:$8 sps:$4 sm:$0xff]   ;;  %v1316_v59 = vld [vmem:[%s1798_s17 + $0x1d0] ss:$8 sps:$4 sm:$0xff]   ;;  %v1317_v60 = vld [vmem:[%s1798_s17 + $0xe4] ss:$8 sps:$4 sm:$0xff]  }
  0xae   : > { %805 = vmatprep.subr.bf16.mxu0 %v1265_v21  ;;  %786 = vmatprep.mubr.bf16.mxu1 %v1067_v47  ;;  %v1319_v61 = vld [vmem:[%s1798_s17 + $0x1e4] ss:$8 sps:$4 sm:$0xff]   ;;  %v1321_v62 = vld [vmem:[%s1798_s17 + $0xe0] ss:$8 sps:$4 sm:$0xff]   ;;  %v1323_v0 = vld [vmem:[%s1798_s17 + $0xf4] ss:$8 sps:$4 sm:$0xff]  }
  0xaf   : > { %827 = vmatprep.mubr.bf16.mxu0 %v1069_v51  ;;  %v1322_v63 = vld [vmem:[%s1798_s17 + $0x1e0] ss:$8 sps:$4 sm:$0xff]   ;;  %v1325_v1 = vld [vmem:[%s1798_s17 + $0x1f4] ss:$8 sps:$4 sm:$0xff]   ;;  %v1327_v2 = vld [vmem:[%s1798_s17 + $0xf0] ss:$8 sps:$4 sm:$0xff]  }
  0xb0   : > { %765 = vmatpush1.bf16.msra.mxu1 %v1267_v22  ;;  %v1328_v3 = vld [vmem:[%s1798_s17 + $0x1f0] ss:$8 sps:$4 sm:$0xff]   ;;  %v849_v8 = vsub.s32 0, %v848_v7  ;;  %v845_v9 = vld [vmem:[%s1805_s21] sm:$0x3]  ;;  %v853_v10 = vsub.s32 1, %v848_v7 }
  0xb1   : > { %806 = vmatpush1.bf16.msra.mxu0 %v1268_v23  ;;  %766 = vmatprep.subr.bf16.mxu1 %v1269_v24  ;;  %v859_v11 = vld [vmem:[%s1808_s12] sm:$0x3]  ;;  %s339_s26 = scalar_lea.vmem [#allocation11], %s1065_s14  ;;  %s883_s25 = scalar_lea.sflag [#allocation5], %s1795_s27 }
  0xb2   : > { %807 = vmatprep.subr.bf16.mxu0 %v1271_v25  ;;  %v850_v12 = vrot.slane %v845_v9, %v849_v8  ;;  %v854_v15 = vrot.slane %v845_v9, %v853_v10  ;;  %v864_v17 = vrot.slane %v859_v11, %v849_v8  ;;  %v868_v21 = vrot.slane %v859_v11, %v853_v10  ;;  %s899_s22 = sshll.u32 %s339_s26, 4  ;;  %p1975_p3 = scmp.ne.s32.totalorder %s1961_s5, 0  ;;  %s1887_s22 = int_to_ptr.vmem [resolvable:$true] %s899_s22 }
  0xb3   : > { %s1451_s10 = scalar_lea.vmem %s1887_s22, 128  ;;  %s1550_s18 = smov [#allocation11]  }
  0xb4   : > { %767 = vmatpush1.bf16.msra.mxu1 %v1273_v26  ;;  %p1452_p1 = scmp.ne.s32.totalorder %s1887_s22, %s1451_s10  ;;  %s1455_s29 = sshll.u32 %s1550_s18, 4  ;;  %s1456_s29 = int_to_ptr.vmem [resolvable:$false] %s1455_s29 }
  0xb5   : > { %808 = vmatpush1.bf16.msra.mxu0 %v1274_v27  ;;  %768 = vmatprep.subr.bf16.mxu1 %v1275_v28  ;;  %s1457_s1 = scalar_lea.vmem %s1456_s29, 256  ;;  %p1458_p0 = scmp.lt.s32.totalorder %s1887_s22, %s1456_s29 }
  0xb6   : > { %809 = vmatprep.subr.bf16.mxu0 %v1277_v29  ;;  %p1453_p12 = pnand %p1452_p1, %p1975_p3  ;;  %p1459_p4 = scmp.lt.s32.totalorder %s1457_s1, %s1451_s10 }
  0xb8   : > { %769 = vmatpush1.bf16.msra.mxu1 %v1279_v30  ;;  %p1454_p13 = pneg %p1453_p12  ;;  %p1460_p8 = por %p1459_p4, %p1458_p0 }
  0xb9   : > { %810 = vmatpush1.bf16.msra.mxu0 %v1280_v31  ;;  %770 = vmatprep.subr.bf16.mxu1 %v1281_v32 }
  0xba   : > { %811 = vmatprep.subr.bf16.mxu0 %v1283_v33  ;;  %p1461_p10 = pnand %p1460_p8, %p1454_p13 }
  0xbc   : > { %771 = vmatpush1.bf16.msra.mxu1 %v1285_v34 }
  0xbd   : > { %812 = vmatpush1.bf16.msra.mxu0 %v1286_v35  ;;  %772 = vmatprep.subr.bf16.mxu1 %v1287_v36 }
  0xbe   : > { %813 = vmatprep.subr.bf16.mxu0 %v1289_v37 }
  0xc0   : > { %773 = vmatpush1.bf16.msra.mxu1 %v1291_v38 }
  0xc1   : > { %814 = vmatpush1.bf16.msra.mxu0 %v1292_v39  ;;  %774 = vmatprep.subr.bf16.mxu1 %v1293_v40 }
  0xc2   : > { %815 = vmatprep.subr.bf16.mxu0 %v1295_v41 }
  0xc4   : > { %775 = vmatpush1.bf16.msra.mxu1 %v1297_v42 }
  0xc5   : > { %816 = vmatpush1.bf16.msra.mxu0 %v1298_v43  ;;  %776 = vmatprep.subr.bf16.mxu1 %v1299_v44 }
  0xc6   : > { %817 = vmatprep.subr.bf16.mxu0 %v1301_v45 }
  0xc8   : > { %777 = vmatpush1.bf16.msra.mxu1 %v1303_v49 }
  0xc9   : > { %818 = vmatpush1.bf16.msra.mxu0 %v1304_v50  ;;  %778 = vmatprep.subr.bf16.mxu1 %v1305_v52 }
  0xca   : > { %819 = vmatprep.subr.bf16.mxu0 %v1307_v53 }
  0xcc   : > { %779 = vmatpush1.bf16.msra.mxu1 %v1309_v54 }
  0xcd   : > { %820 = vmatpush1.bf16.msra.mxu0 %v1310_v55  ;;  %780 = vmatprep.subr.bf16.mxu1 %v1311_v56 }
  0xce   : > { %821 = vmatprep.subr.bf16.mxu0 %v1313_v57 }
  0xd0   : > { %781 = vmatpush1.bf16.msra.mxu1 %v1315_v58 }
  0xd1   : > { %822 = vmatpush1.bf16.msra.mxu0 %v1316_v59  ;;  %782 = vmatprep.subr.bf16.mxu1 %v1317_v60 }
  0xd2   : > { %823 = vmatprep.subr.bf16.mxu0 %v1319_v61 }
  0xd4   : > { %783 = vmatpush1.bf16.msra.mxu1 %v1321_v62 }
  0xd5   : > { %824 = vmatpush1.bf16.msra.mxu0 %v1322_v63  ;;  %784 = vmatprep.subr.bf16.mxu1 %v1323_v0 }
  0xd6   : > { %825 = vmatprep.subr.bf16.mxu0 %v1325_v1 }
  0xd8   : > { %785 = vmatpush1.bf16.msra.mxu1 %v1327_v2 }
  0xd9   : > { %826 = vmatpush1.bf16.msra.mxu0 %v1328_v3 }
  0xdb   : > { %787 = vmatmul.mubr.bf16.vlgmr.msra.gmra.mrb[0].mxu1 %v1066_v4 }
  0xdc   : > { %828 = vmatmul.mubr.bf16.vlgmr.msra.gmra.mrb[0].mxu0 %v1068_v5 }
 0x1ae   : > { %v788_v13 = vpop.f32.mrb[0].mxu1 }
 0x1af   : > { %v829_v14 = vpop.f32.mrb[0].mxu0  ;;  %v790_v18 = vpop.f32.mrb[1].mxu1 }
 0x1b0   : > { %v830_v16 = vadd.f32 %v829_v14, %v788_v13  ;;  %v831_v19 = vpop.f32.mrb[1].mxu0  ;;  %v792_v22 = vpop.f32.mrb[2].mxu1 }
 0x1b1   : > { %v832_v20 = vadd.f32 %v831_v19, %v790_v18  ;;  %v833_v23 = vpop.f32.mrb[2].mxu0  ;;  %v793_v25 = vpop.f32.mrb[3].mxu1 }
 0x1b2   : > { %v857_v24 = vmul.f32 %v850_v12, %v830_v16  ;;  %v834_v26 = vpop.f32.mrb[3].mxu0 }
 0x1b3   : > { %v858_v27 = vmul.f32 %v854_v15, %v832_v20 }
 0x1b4   : > { %v871_v28 = vadd.f32 %v864_v17, %v857_v24 }
 0x1b5   : > { %v872_v29 = vadd.f32 %v868_v21, %v858_v27 }
 0x1b7   : > { %v1143_v30 = vpack.c.bf16 %v872_v29, %v871_v28 }
 0x1b9   : > { %881 = vst [vmem:[%s339_s26] sm:$0xff] %v1143_v30 }
 0x1ba   : > { %1464 = shalt.err (!%p1461_p10)
}
 0x1bb   : > { %s1465_s11 = scalar_lea.hbm %s1885_s13, 128  ;;  %s1469_s6 = scalar_lea.hbm %s1937_s4, 512 }
 0x1bc   : > { %p1466_p5 = scmp.ne.s32.totalorder %s1885_s13, %s1465_s11  ;;  %p1470_p11 = scmp.lt.u32.totalorder %s1885_s13, %s1937_s4 }
 0x1bd   : > { %p1471_p9 = scmp.lt.u32.totalorder %s1469_s6, %s1465_s11  ;;  %p1473_p1 = scmp.lt.u32.totalorder %s1465_s11, %s1885_s13 }
 0x1be   : > { %p1467_p7 = pnand %p1466_p5, %p1975_p3 }
 0x1bf   : > { %p1472_p6 = por %p1471_p9, %p1470_p11 }
 0x1c0   : > { %p1468_p2 = pneg %p1467_p7 }
 0x1c1   : > { %p1474_p12 = por %p1473_p1, %p1472_p6 }
 0x1c3   : > { %p1475_p13 = pnand %p1474_p12, %p1468_p2 }
 0x1c5   : > { %1478 = shalt.err (!%p1475_p13)
}
 0x1c6   : > { %1157 = dma.vmem_to_hbm [thread:$0]  (%p1975_p3), %s1887_s22, 128, %s1885_s13, %s883_s25  }
 0x1c7 PF: > { %p1180_p0 = scmp.ge.s32.totalorder %s1541_s20, 2  ;;  %s911_s21 = sand.u32 1, %s1521_s15  }
 0x1c8   : > { %p1976_p4 = scmp.ne.s32.totalorder %s1962_s8, 0  ;;  %s912_s28 = scalar_lea.sflag [#allocation5], %s911_s21 }
 0x1ca   : > { %p1174_p8 = pnand %p1180_p0, %p1976_p4 }
 0x1cc   : > { %1516 = dma.done.wait (!%p1174_p8), %s912_s28, 128  }
 0x1cd   : > { %1518 = vsyncadd (!%p1174_p8), %s912_s28, 4294967168  ;;  %s24_s20 = sadd.s32 1, %s1541_s20   ;;  %s1977_s12 = sld [smem:[#allocation16_spill]] }
 0x1ce   : > { %p21_p10 = scmp.ge.s32.totalorder %s24_s20, 6   ;;  %s1978_s17 = sld [smem:[#allocation18_spill]] }
 0x1cf   : > { %s1979_s5 = sld [smem:[#allocation17_spill]]  ;;  %s1980_s15 = smov %s1525_s16 }
 0x1d0   : > { %s1982_s18 = smov %s1537_s19  ;;  %23 = sbr.rel (!%p21_p10) target bundleno = 11 (0xb), region = 119 }
 0x1d3   : > { %s1981_s16 = smov %s1977_s12 }
 0x1d5   : > { %s1983_s19 = smov %s1979_s5 }
 0x1d7   :  { %917 = vsyncpa [#allocation4], 1 }
 0x1d8   :  { %919 = vsyncpa [#allocation4 + $0x1], 1 }
 0x1d9   :  { %920 = vsyncpa [#allocation7], 1 }
 0x1da   :  { %922 = vsyncpa [#allocation7 + $0x1], 1 }
 0x1db   :  { %923 = vsyncpa [#allocation10], 1 }
 0x1dc   :  { %925 = vsyncpa [#allocation10 + $0x1], 1 }
 0x1dd   :  { %926 = vsyncpa [#allocation5], 1 }
 0x1de   :  { %928 = vsyncpa [#allocation5 + $0x1], 1 }

// kernel: _lambda_.48
= control target key start
LH: loop header
LB: loop body
LE: loop exit
PB: predicated region body
PF: predicated region fallthrough
CT: control target
= control target key end

     0   :  { %s1749_s0 = inlined_call_operand.hbm [shape: bf16[8,256], index: 0, kind: input, shape index: {}]   ;;  %s1750_s1 = inlined_call_operand.hbm [shape: bf16[256,1024], index: 1, kind: input, shape index: {}]   ;;  %s1751_s2 = inlined_call_operand.hbm [shape: f32[1,1024], index: 2, kind: input, shape index: {}]   ;;  %s1752_s3 = inlined_call_operand.hbm [shape: f32[1,1024], index: 3, kind: input, shape index: {}]   ;;  %s1753_s4 = inlined_call_operand.hbm [shape: bf16[8,1024], index: 4, kind: input, shape index: {}]   ;;  %s1754_s5 = inlined_call_operand.hbm [shape: bf16[8,1024], index: 5, kind: output, shape index: {}]  }
   0x1   :  { %1770 = sst [smem:[#allocation21_spill]] %s1750_s1 }
   0x2   :  { %1771 = sst [smem:[#allocation22_spill]] %s1751_s2 }
   0x3   :  { %1772 = sst [smem:[#allocation23_spill]] %s1752_s3 }
   0x4   :  { %10 = vsyncpa [#allocation4], 0 }
   0x5   :  { %11 = vsyncpa [#allocation7], 0 }
   0x6   :  { %13 = vsyncpa [#allocation7 + $0x1], 0 }
   0x7   :  { %14 = vsyncpa [#allocation10], 0 }
   0x8   :  { %16 = vsyncpa [#allocation10 + $0x1], 0 }
   0x9   :  { %17 = vsyncpa [#allocation5], 0 }
   0xa   :  { %19 = vsyncpa [#allocation5 + $0x1], 0  ;;  %s1392_s18 = smov 0   ;;  %s1394_s19 = smov 0  }
   0xb   :  { %s1396_s20 = smov 0   ;;  %s1398_s21 = smov 0  }
   0xc   :  { %s1400_s22 = smov 0   ;;  %s1402_s23 = smov 0  }
   0xd LB: > { %1773 = sst [smem:[#allocation17_spill]] %s1339_s20  ;;  %s40_s24 = sadd.s32 1, %s1347_s22  ;;  %s1351_s23 = sphi %s1402_s23, %s25_s23   ;;  %s1347_s22 = sphi %s1400_s22, %s1806_s22   ;;  %s1343_s21 = sphi %s1398_s21, %s1805_s21   ;;  %s1339_s20 = sphi %s1396_s20, %s1804_s20   ;;  %s1335_s19 = sphi %s1394_s19, %s1808_s19   ;;  %s1331_s18 = sphi %s1392_s18, %s1807_s18  }
   0xe   : > { %1774 = sst [smem:[#allocation18_spill]] %s1347_s22  ;;  %s81_s25 = sadd.s32 1, %s1339_s20 }
   0xf   : > { %p42_p0 = scmp.ge.s32.totalorder %s40_s24, 4  ;;  %p1755_p1 = scmp.ne.s32.totalorder %s1339_s20, %s1335_s19 }
  0x10   : > { %p89_p2 = scmp.eq.s32.totalorder %s1351_s23, 0  ;;  %p1008_p4 = scmp.lt.s32.totalorder %s1351_s23, 4 }
  0x11   : > { %s1810_s24 = smov (%p42_p0, %s40_s24), 0  ;;  %s1757_s27 = sand.u32 1, %s1351_s23  }
  0x12   : > { %1775 = sst [smem:[#allocation19_spill]] %s1810_s24  ;;  %p90_p3 = por %p89_p2, %p1755_p1 }
  0x13   : > { %s77_s26 = ssub.s32 %s1347_s22, %s1810_s24  ;;  %s1437_s28 = sand.u32 1, %s1339_s20  }
  0x14   : > { %p79_p5 = scmp.eq.s32.totalorder %s77_s26, 0  ;;  %s1756_s29 = sshll.u32 %s1347_s22, 7 }
  0x15   : > { %s907_s6 = sshll.u32 %s1437_s28, 8  ;;  %s1777_s1 = sld [smem:[#allocation21_spill]] }
  0x16   : > { %s1441_s30 = scalar_select %p79_p5, %s1339_s20, %s81_s25  }
  0x17   : > { %p1451_p6 = pnand %p1008_p4, %p90_p3  ;;  %s246_s11 = scalar_lea.vmem [#allocation6], %s907_s6 }
  0x18   : > { %1776 = sst [smem:[#allocation20_spill]] %s1441_s30  ;;  %s256_s12 = sshll.u32 %s246_s11, 4  ;;  %s1455_s12 = int_to_ptr.vmem [resolvable:$true] %s256_s12 }
  0x19   : > { %s1778_s10 = scalar_select %p1451_p6, 1, 0 }
  0x1a   : > { %s1459_s13 = scalar_lea.sflag [#allocation7], %s1757_s27  ;;  %p1465_p8 = pneg %p1451_p6 }
  0x1b   : > { %s1449_s9 = scalar_lea.hbm %s1777_s1, %s1756_s29  ;;  %s1118_s25 = scalar_lea.hbm %s1777_s1, 16384 }
  0x1c   : > { %s1113_s14 = scalar_lea.hbm %s1449_s9, 4096  ;;  %p1119_p11 = scmp.lt.u32.totalorder %s1449_s9, %s1777_s1 }
  0x1d   : > { %p1114_p7 = scmp.ne.s32.totalorder %s1449_s9, %s1113_s14  ;;  %p1120_p12 = scmp.lt.u32.totalorder %s1118_s25, %s1113_s14 }
  0x1e   : > { %s1779_s15 = scalar_select %p1465_p8, 1, 0 }
  0x1f   : > { %p1116_p9 = pnand %p1465_p8, %p1114_p7  ;;  %p1121_p13 = por %p1120_p12, %p1119_p11 }
  0x20   : > { %p1122_p0 = scmp.lt.u32.totalorder %s1113_s14, %s1449_s9 }
  0x21   : > { %p1117_p10 = pneg %p1116_p9 }
  0x22   : > { %p1123_p2 = por %p1122_p0, %p1121_p13 }
  0x24   : > { %p1124_p3 = pnand %p1123_p2, %p1117_p10 }
  0x26   : > { %1127 = shalt.err (!%p1124_p3)
}
  0x27   : > { %s1128_s7 = scalar_lea.vmem %s1455_s12, 4096  ;;  %s1353_s8 = smov [#allocation6]  }
  0x28   : > { %p1129_p4 = scmp.ne.s32.totalorder %s1455_s12, %s1128_s7  ;;  %s1133_s11 = sshll.u32 %s1353_s8, 4  ;;  %s1134_s11 = int_to_ptr.vmem [resolvable:$false] %s1133_s11 }
  0x29   : > { %s1135_s16 = scalar_lea.vmem %s1134_s11, 8192  ;;  %p1136_p9 = scmp.lt.s32.totalorder %s1455_s12, %s1134_s11 }
  0x2a   : > { %p1131_p5 = pnand %p1129_p4, %p1465_p8  ;;  %p1137_p1 = scmp.lt.s32.totalorder %s1135_s16, %s1128_s7 }
  0x2c   : > { %p1132_p7 = pneg %p1131_p5  ;;  %p1138_p11 = por %p1137_p1, %p1136_p9 }
  0x2e   : > { %p1139_p12 = pnand %p1138_p11, %p1132_p7 }
  0x30   : > { %1142 = shalt.err (!%p1139_p12)
}
  0x31   : > { %s1354_s14 = smov 512   ;;  %s1355_s17 = smov 128  }
  0x32   : > { %s1356_s25 = smov 8   ;;  %s910_s26 = sshll.u32 %s1437_s28, 1 }
  0x33   : > { %993 = dma.hbm_to_vmem [thread:$0]  (!%p1451_p6), %s1449_s9, 4096, %s1455_s12, %s1459_s13, %s1354_s14, %s1355_s17, %s1356_s25  }
  0x34   : > { %s967_s6 = sshll.u32 %s1347_s22, 5  ;;  %s1780_s2 = sld [smem:[#allocation22_spill]] }
  0x35   : > { %s1781_s3 = sld [smem:[#allocation23_spill]]  ;;  %s289_s1 = scalar_lea.vmem [#allocation9], %s910_s26 }
  0x36   : > { %s297_s24 = sshll.u32 %s289_s1, 4  ;;  %s1782_s9 = sand.u32 1, %s1351_s23   ;;  %s298_s24 = int_to_ptr.vmem [resolvable:$true] %s297_s24 }
  0x37   : > { %s1505_s12 = scalar_lea.sflag [#allocation10], %s1782_s9 }
  0x3a   : > { %s1494_s11 = scalar_lea.hbm %s1780_s2, %s967_s6 }
  0x3b   : > { %s1499_s27 = scalar_lea.hbm %s1781_s3, %s967_s6  ;;  %s1148_s25 = scalar_lea.hbm %s1781_s3, 128 }
  0x3c   : > { %s1143_s14 = scalar_lea.hbm %s1499_s27, 32  ;;  %p1149_p0 = scmp.lt.u32.totalorder %s1499_s27, %s1781_s3 }
  0x3d   : > { %p1144_p1 = scmp.ne.s32.totalorder %s1499_s27, %s1143_s14  ;;  %p1150_p2 = scmp.lt.u32.totalorder %s1148_s25, %s1143_s14 }
  0x3e   : > { %p1152_p4 = scmp.lt.u32.totalorder %s1143_s14, %s1499_s27 }
  0x3f   : > { %p1146_p10 = pnand %p1144_p1, %p1465_p8  ;;  %p1151_p3 = por %p1150_p2, %p1149_p0 }
  0x41   : > { %p1147_p13 = pneg %p1146_p10  ;;  %p1153_p5 = por %p1152_p4, %p1151_p3 }
  0x43   : > { %p1154_p7 = pnand %p1153_p5, %p1147_p13 }
  0x45   : > { %1157 = shalt.err (!%p1154_p7)
}
  0x46   : > { %s1158_s1 = scalar_lea.vmem %s298_s24, 32  ;;  %s1357_s8 = smov [#allocation9]  }
  0x47   : > { %p1159_p9 = scmp.ne.s32.totalorder %s298_s24, %s1158_s1  ;;  %s1163_s16 = sshll.u32 %s1357_s8, 4  ;;  %s1164_s16 = int_to_ptr.vmem [resolvable:$false] %s1163_s16 }
  0x48   : > { %s1165_s9 = scalar_lea.vmem %s1164_s16, 64  ;;  %p1166_p1 = scmp.lt.s32.totalorder %s298_s24, %s1164_s16 }
  0x49   : > { %p1161_p11 = pnand %p1159_p9, %p1465_p8  ;;  %p1167_p10 = scmp.lt.s32.totalorder %s1165_s9, %s1158_s1 }
  0x4b   : > { %p1162_p12 = pneg %p1161_p11  ;;  %p1168_p6 = por %p1167_p10, %p1166_p1 }
  0x4d   : > { %p1169_p0 = pnand %p1168_p6, %p1162_p12 }
  0x4f   : > { %1172 = shalt.err (!%p1169_p0)
}
  0x50   : > { %p1783_p2 = scmp.ne.s32.totalorder %s1778_s10, 0  ;;  %s1526_s14 = sadd.s32 4294967295, %s1351_s23  }
  0x51   : > { %s903_s17 = sadd.s32 4294967294, %s1351_s23   ;;  %p94_p6 = scmp.ne.s32.totalorder %s1335_s19, %s1331_s18 }
  0x52   : > { %999 = dma.hbm_to_vmem [thread:$0]  (!%p1783_p2), %s1499_s27, 32, %s298_s24, %s1505_s12  }
  0x53   : > { %p1762_p13 = scmp.eq.s32.totalorder %s1526_s14, 0  ;;  %p200_p3 = scmp.eq.s32.totalorder %s1526_s14, 3 }
  0x54   : > { %p206_p4 = scmp.eq.s32.totalorder %s903_s17, 3  ;;  %p904_p5 = scmp.ge.s32.totalorder %s1351_s23, 1 }
  0x55   : > { %p1536_p7 = por %p1762_p13, %p94_p6  ;;  %p1785_p9 = scmp.ne.s32.totalorder %s1339_s20, %s1335_s19 }
  0x56   : > { %p1547_p12 = por %p206_p4, %p94_p6  ;;  %p213_p1 = scmp.lt.s32.totalorder %s1351_s23, 5 }
  0x57   : > { %s1784_s29 = scalar_select %p1536_p7, 1, 0 }
  0x58   : > { %p1543_p11 = por %p200_p3, %p1785_p9  ;;  %p1552_p10 = pnand %p904_p5, %p213_p1 }
  0x59   : > { %s1787_s27 = scalar_select %p1547_p12, 1, 0 }
  0x5a   : > { %s1786_s24 = scalar_select %p1543_p11, 1, 0 }
  0x5b   : > { %s1788_s25 = scalar_select %p1552_p10, 1, 0 }
  0x5c   : > { %s1358_s6 = smov [#allocation3]   ;;  %s270_s1 = scalar_lea.vmem [#allocation8], %s910_s26 }
  0x5d   : > { %s231_s7 = sshll.u32 %s1358_s6, 4  ;;  %s278_s8 = sshll.u32 %s270_s1, 4  ;;  %s1556_s7 = int_to_ptr.vmem [resolvable:$true] %s231_s7  ;;  %s279_s8 = int_to_ptr.vmem [resolvable:$true] %s278_s8 }
  0x5e   : > { %s1173_s16 = scalar_lea.hbm %s1494_s11, 32  ;;  %s1178_s3 = scalar_lea.hbm %s1780_s2, 128 }
  0x5f   : > { %p1174_p6 = scmp.ne.s32.totalorder %s1494_s11, %s1173_s16  ;;  %p1179_p5 = scmp.lt.u32.totalorder %s1494_s11, %s1780_s2 }
  0x60   : > { %p1180_p9 = scmp.lt.u32.totalorder %s1178_s3, %s1173_s16  ;;  %p1182_p13 = scmp.lt.u32.totalorder %s1173_s16, %s1494_s11 }
  0x61   : > { %p1176_p3 = pnand %p1174_p6, %p1465_p8 }
  0x62   : > { %p1181_p1 = por %p1180_p9, %p1179_p5 }
  0x63   : > { %p1177_p4 = pneg %p1176_p3 }
  0x64   : > { %p1183_p12 = por %p1182_p13, %p1181_p1 }
  0x66   : > { %p1184_p11 = pnand %p1183_p12, %p1177_p4 }
  0x68   : > { %1187 = shalt.err (!%p1184_p11)
}
  0x69   : > { %s1188_s26 = scalar_lea.vmem %s279_s8, 32  ;;  %s1359_s6 = smov [#allocation8]  }
  0x6a   : > { %p1189_p0 = scmp.ne.s32.totalorder %s279_s8, %s1188_s26  ;;  %s1193_s1 = sshll.u32 %s1359_s6, 4  ;;  %s1194_s1 = int_to_ptr.vmem [resolvable:$false] %s1193_s1 }
  0x6b   : > { %s1195_s9 = scalar_lea.vmem %s1194_s1, 64  ;;  %p1196_p7 = scmp.lt.s32.totalorder %s279_s8, %s1194_s1 }
  0x6c   : > { %p1191_p6 = pnand %p1189_p0, %p1465_p8  ;;  %p1197_p10 = scmp.lt.s32.totalorder %s1195_s9, %s1188_s26 }
  0x6e   : > { %p1192_p3 = pneg %p1191_p6  ;;  %p1198_p2 = por %p1197_p10, %p1196_p7 }
  0x70   : > { %p1199_p5 = pnand %p1198_p2, %p1192_p3 }
  0x72   : > { %1202 = shalt.err (!%p1199_p5)
}
  0x73   : > { %p1789_p9 = scmp.ne.s32.totalorder %s1778_s10, 0  ;;  %p1790_p13 = scmp.eq.s32.totalorder %s1526_s14, 0 }
  0x74   : > { %p1791_p11 = scmp.ne.s32.totalorder %s1788_s25, 0  ;;  %s916_s20 = sshll.u32 %s1437_s28, 3 }
  0x75   : > { %996 = dma.hbm_to_vmem [thread:$0]  (!%p1789_p9), %s1494_s11, 32, %s279_s8, %s1459_s13  }
  0x76   : > { %p1792_p12 = pneg %p1791_p11  ;;  %s1794_s30 = sshll.u32 %s1347_s22, 7 }
  0x77   : > { %s1595_s26 = scalar_lea.hbm %s1753_s4, %s1794_s30  ;;  %s308_s6 = scalar_lea.vmem [#allocation11], %s916_s20 }
  0x78   : > { %p1585_p0 = pnand %p1792_p12, %p1790_p13  ;;  %s318_s1 = sshll.u32 %s308_s6, 4  ;;  %s319_s1 = int_to_ptr.vmem [resolvable:$true] %s318_s1 }
  0x79   : > { %s1203_s13 = scalar_lea.hbm %s1749_s0, 128 }
  0x7a   : > { %p1204_p2 = scmp.ne.s32.totalorder %s1749_s0, %s1203_s13  ;;  %p1205_p7 = pneg %p1585_p0 }
  0x7b   : > { %p1210_p1 = scmp.lt.u32.totalorder %s1203_s13, %s1749_s0 }
  0x7c   : > { %p1206_p10 = pnand %p1205_p7, %p1204_p2 }
  0x7e   : > { %p1207_p4 = pneg %p1206_p10 }
  0x80   : > { %p1212_p6 = pnand %p1210_p1, %p1207_p4 }
  0x82   : > { %1215 = shalt.err (!%p1212_p6)
}
  0x83   : > { %s1216_s20 = scalar_lea.vmem %s1556_s7, 128  ;;  %p1224_p12 = scmp.lt.s32.totalorder %s1556_s7, %s1556_s7 }
  0x84   : > { %p1217_p3 = scmp.ne.s32.totalorder %s1556_s7, %s1216_s20  ;;  %p1225_p11 = scmp.lt.s32.totalorder %s1216_s20, %s1216_s20 }
  0x86   : > { %p1219_p5 = pnand %p1217_p3, %p1205_p7  ;;  %p1226_p9 = por %p1225_p11, %p1224_p12 }
  0x88   : > { %p1220_p13 = pneg %p1219_p5 }
  0x8a   : > { %p1227_p8 = pnand %p1226_p9, %p1220_p13 }
  0x8c   : > { %1230 = shalt.err (!%p1227_p8)
}
  0x8d   : > { %989 = dma.hbm_to_vmem [thread:$0]  (!%p1585_p0), %s1749_s0, 128, %s1556_s7, [#allocation4]  }
  0x8e   : > { %s1231_s30 = scalar_lea.hbm %s1595_s26, 128  ;;  %p1795_p7 = scmp.ne.s32.totalorder %s1779_s15, 0 }
  0x8f   : > { %p1232_p2 = scmp.ne.s32.totalorder %s1595_s26, %s1231_s30  ;;  %s1236_s3 = scalar_lea.hbm %s1753_s4, 512 }
  0x90   : > { %p1237_p8 = scmp.lt.u32.totalorder %s1595_s26, %s1753_s4  ;;  %p1238_p9 = scmp.lt.u32.totalorder %s1236_s3, %s1231_s30 }
  0x91   : > { %p1234_p10 = pnand %p1232_p2, %p1795_p7  ;;  %p1240_p1 = scmp.lt.u32.totalorder %s1231_s30, %s1595_s26 }
  0x92   : > { %p1239_p4 = por %p1238_p9, %p1237_p8 }
  0x93   : > { %p1235_p11 = pneg %p1234_p10 }
  0x94   : > { %p1241_p6 = por %p1240_p1, %p1239_p4 }
  0x96   : > { %p1242_p3 = pnand %p1241_p6, %p1235_p11 }
  0x98   : > { %1245 = shalt.err (!%p1242_p3)
}
  0x99   : > { %s1246_s7 = scalar_lea.vmem %s319_s1, 128  ;;  %s1360_s13 = smov [#allocation11]  }
  0x9a   : > { %p1247_p0 = scmp.ne.s32.totalorder %s319_s1, %s1246_s7  ;;  %s1251_s11 = sshll.u32 %s1360_s13, 4  ;;  %s1252_s11 = int_to_ptr.vmem [resolvable:$false] %s1251_s11 }
  0x9b   : > { %s1253_s8 = scalar_lea.vmem %s1252_s11, 256  ;;  %p1254_p12 = scmp.lt.s32.totalorder %s319_s1, %s1252_s11 }
  0x9c   : > { %p1249_p5 = pnand %p1247_p0, %p1795_p7  ;;  %p1255_p2 = scmp.lt.s32.totalorder %s1253_s8, %s1246_s7 }
  0x9e   : > { %p1250_p13 = pneg %p1249_p5  ;;  %p1256_p10 = por %p1255_p2, %p1254_p12 }
  0xa0   : > { %p1257_p8 = pnand %p1256_p10, %p1250_p13 }
  0xa2   : > { %1260 = shalt.err (!%p1257_p8)
}
  0xa3   : > { %p1796_p9 = scmp.ne.s32.totalorder %s1778_s10, 0  ;;  %p1797_p11 = scmp.ne.s32.totalorder %s1788_s25, 0 }
  0xa4   : > { %p1798_p7 = scmp.eq.s32.totalorder (!%p1797_p11), %s1526_s14, 0 }
  0xa5   : > { %1002 = dma.hbm_to_vmem [thread:$0]  (!%p1796_p9), %s1595_s26, 128, %s319_s1, %s1505_s12  }
  0xa6   : > { %327 = sbr.rel (%p1797_p11) target bundleno = 484 (0x1e4), region = 40 }
  0xad   : > { %1314 = dma.done.wait (%p1798_p7), [#allocation4], 128   ;;  %p1799_p4 = pmov %p1798_p7 }
  0xae   : > { %s333_s15 = sand.u32 1, %s1526_s14   ;;  %s1644_s28 = sand.u32 1, %s1335_s19  }
  0xaf   : > { %1316 = vsyncadd (%p1799_p4), [#allocation4], 4294967168  ;;  %s921_s10 = sshll.u32 %s1644_s28, 8  ;;  %s334_s20 = scalar_lea.sflag [#allocation7], %s333_s15 }
  0xb0   : > { %s1647_s2 = scalar_lea.vmem [#allocation6], %s921_s10  ;;  %p1800_p1 = scmp.ne.s32.totalorder %s1784_s29, 0 }
  0xb2   : > { %1318 = dma.done.wait (%p1800_p1), %s334_s20, 4128  }
  0xb3   : > { %1320 = vsyncadd (%p1800_p1), %s334_s20, 4294963168  ;;  %s922_s12 = sshll.u32 %s1644_s28, 1  ;;  %s352_s26 = scalar_lea.sflag [#allocation10], %s333_s15 }
  0xb4   : > { %s1654_s25 = scalar_lea.vmem [#allocation8], %s922_s12  ;;  %s1656_s1 = scalar_lea.vmem [#allocation9], %s922_s12 }
  0xb5   : > { %1322 = dma.done.wait (%p1800_p1), %s352_s26, 160  }
  0xb6   : > { %1324 = vsyncadd (%p1800_p1), %s352_s26, 4294967136  ;;  %v1063_v0 = vld [vmem:[%s1647_s2 + $0x4] ss:$8 sps:$4 sm:$0xff]   ;;  %v1065_v1 = vld [vmem:[%s1647_s2] ss:$8 sps:$4 sm:$0xff]   ;;  %v673_v35 = vlaneseq  ;;  %s924_s14 = sshll.u32 %s1644_s28, 3 }
  0xb7   : > { %621 = vmatprep.subr.bf16.mxu0 %v1063_v0  ;;  %v1066_v2 = vld [vmem:[%s1647_s2 + $0x14] ss:$8 sps:$4 sm:$0xff]   ;;  %v1068_v3 = vld [vmem:[%s1647_s2 + $0x10] ss:$8 sps:$4 sm:$0xff]   ;;  %v1069_v4 = vld [vmem:[%s1647_s2 + $0x24] ss:$8 sps:$4 sm:$0xff]  }
  0xb8   : > { %622 = vmatpush1.bf16.msra.mxu0 %v1065_v1  ;;  %v1071_v5 = vld [vmem:[%s1647_s2 + $0x20] ss:$8 sps:$4 sm:$0xff]   ;;  %v1072_v6 = vld [vmem:[%s1647_s2 + $0x34] ss:$8 sps:$4 sm:$0xff]   ;;  %v1074_v7 = vld [vmem:[%s1647_s2 + $0x30] ss:$8 sps:$4 sm:$0xff]  }
  0xb9   : > { %623 = vmatprep.subr.bf16.mxu0 %v1066_v2  ;;  %v1075_v8 = vld [vmem:[%s1647_s2 + $0x44] ss:$8 sps:$4 sm:$0xff]   ;;  %v1077_v9 = vld [vmem:[%s1647_s2 + $0x40] ss:$8 sps:$4 sm:$0xff]   ;;  %v1078_v10 = vld [vmem:[%s1647_s2 + $0x54] ss:$8 sps:$4 sm:$0xff]  }
  0xba   : > { %v1080_v11 = vld [vmem:[%s1647_s2 + $0x50] ss:$8 sps:$4 sm:$0xff]   ;;  %v1081_v12 = vld [vmem:[%s1647_s2 + $0x64] ss:$8 sps:$4 sm:$0xff]   ;;  %v1083_v15 = vld [vmem:[%s1647_s2 + $0x60] ss:$8 sps:$4 sm:$0xff]  }
  0xbb   : > { %v421_v13 = vld [vmem:[#allocation3] sm:$0xff]  ;;  %v1087_v18 = vld [vmem:[%s1647_s2 + $0x84] ss:$8 sps:$4 sm:$0xff]   ;;  %v1089_v19 = vld [vmem:[%s1647_s2 + $0x80] ss:$8 sps:$4 sm:$0xff]   ;;  %v674_v36 = vshrl.u32 %v673_v35, 7 }
  0xbc   : > { %624 = vmatpush1.bf16.msra.mxu0 %v1068_v3  ;;  %v927_v14 = vcombine.high %v421_v13, %v421_v13  ;;  %v1084_v16 = vld [vmem:[%s1647_s2 + $0x74] ss:$8 sps:$4 sm:$0xff]   ;;  %v1086_v17 = vld [vmem:[%s1647_s2 + $0x70] ss:$8 sps:$4 sm:$0xff]   ;;  %v1093_v22 = vld [vmem:[%s1647_s2 + $0xa4] ss:$8 sps:$4 sm:$0xff]   ;;  %v926_v34 = vcombine.low %v421_v13, %v421_v13 }
  0xbd   : > { %625 = vmatprep.subr.bf16.mxu0 %v1069_v4  ;;  %v1090_v20 = vld [vmem:[%s1647_s2 + $0x94] ss:$8 sps:$4 sm:$0xff]   ;;  %v1092_v21 = vld [vmem:[%s1647_s2 + $0x90] ss:$8 sps:$4 sm:$0xff]   ;;  %v1095_v23 = vld [vmem:[%s1647_s2 + $0xa0] ss:$8 sps:$4 sm:$0xff]  }
  0xbe   : > { %653 = vmatprep.mubr.bf16.mxu0 %v927_v14  ;;  %v1096_v24 = vld [vmem:[%s1647_s2 + $0xb4] ss:$8 sps:$4 sm:$0xff]   ;;  %v1098_v25 = vld [vmem:[%s1647_s2 + $0xb0] ss:$8 sps:$4 sm:$0xff]   ;;  %v1099_v26 = vld [vmem:[%s1647_s2 + $0xc4] ss:$8 sps:$4 sm:$0xff]  }
  0xbf   : > { %v1101_v27 = vld [vmem:[%s1647_s2 + $0xc0] ss:$8 sps:$4 sm:$0xff]   ;;  %v1102_v28 = vld [vmem:[%s1647_s2 + $0xd4] ss:$8 sps:$4 sm:$0xff]   ;;  %v1104_v29 = vld [vmem:[%s1647_s2 + $0xd0] ss:$8 sps:$4 sm:$0xff]  }
  0xc0   : > { %626 = vmatpush1.bf16.msra.mxu0 %v1071_v5  ;;  %v1105_v30 = vld [vmem:[%s1647_s2 + $0xe4] ss:$8 sps:$4 sm:$0xff]   ;;  %v1107_v31 = vld [vmem:[%s1647_s2 + $0xe0] ss:$8 sps:$4 sm:$0xff]   ;;  %v1108_v32 = vld [vmem:[%s1647_s2 + $0xf4] ss:$8 sps:$4 sm:$0xff]  }
  0xc1   : > { %627 = vmatprep.subr.bf16.mxu0 %v1072_v6  ;;  %v1110_v33 = vld [vmem:[%s1647_s2 + $0xf0] ss:$8 sps:$4 sm:$0xff]   ;;  %v675_v37 = vsub.s32 0, %v674_v36  ;;  %v671_v38 = vld [vmem:[%s1654_s25] sm:$0x3]  ;;  %v679_v39 = vsub.s32 1, %v674_v36 }
  0xc2   : > { %v685_v40 = vld [vmem:[%s1656_s1] sm:$0x3]  ;;  %s364_s29 = scalar_lea.vmem [#allocation11], %s924_s14  ;;  %s971_s22 = sshll.u32 %s1343_s21, 7 }
  0xc3   : > { %v676_v41 = vrot.slane %v671_v38, %v675_v37  ;;  %v699_v42 = vld [vmem:[%s364_s29] sm:$0xff]  ;;  %v680_v43 = vrot.slane %v671_v38, %v679_v39  ;;  %v690_v44 = vrot.slane %v685_v40, %v675_v37  ;;  %v694_v46 = vrot.slane %v685_v40, %v679_v39  ;;  %s405_s30 = scalar_lea.vmem [#allocation12], %s924_s14  ;;  %s1701_s6 = scalar_lea.hbm %s1754_s5, %s971_s22 }
  0xc4   : > { %628 = vmatpush1.bf16.msra.mxu0 %v1074_v7  ;;  %v700_v48 = vunpack.c.l.bf16 %v699_v42  ;;  %v701_v51 = vunpack.c.h.bf16 %v699_v42  ;;  %s732_s16 = sshll.u32 %s405_s30, 4  ;;  %s716_s9 = scalar_lea.sflag [#allocation5], %s1644_s28  ;;  %s1703_s16 = int_to_ptr.vmem [resolvable:$true] %s732_s16 }
  0xc5   : > { %629 = vmatprep.subr.bf16.mxu0 %v1075_v8  ;;  %s1261_s7 = scalar_lea.vmem %s1703_s16, 128  ;;  %p1801_p3 = scmp.ne.s32.totalorder %s1786_s24, 0 }
  0xc6   : > { %p1262_p6 = scmp.ne.s32.totalorder %s1703_s16, %s1261_s7  ;;  %s1361_s21 = smov [#allocation12]  }
  0xc7   : > { %s1265_s13 = sshll.u32 %s1361_s21, 4  ;;  %s1266_s13 = int_to_ptr.vmem [resolvable:$false] %s1265_s13 }
  0xc8   : > { %630 = vmatpush1.bf16.msra.mxu0 %v1077_v9  ;;  %p1263_p0 = pnand %p1262_p6, %p1801_p3  ;;  %s1267_s11 = scalar_lea.vmem %s1266_s13, 256 }
  0xc9   : > { %631 = vmatprep.subr.bf16.mxu0 %v1078_v10  ;;  %p1268_p13 = scmp.lt.s32.totalorder %s1703_s16, %s1266_s13  ;;  %p1269_p12 = scmp.lt.s32.totalorder %s1267_s11, %s1261_s7 }
  0xca   : > { %p1264_p5 = pneg %p1263_p0 }
  0xcb   : > { %p1270_p2 = por %p1269_p12, %p1268_p13 }
  0xcc   : > { %632 = vmatpush1.bf16.msra.mxu0 %v1080_v11 }
  0xcd   : > { %633 = vmatprep.subr.bf16.mxu0 %v1081_v12  ;;  %p1271_p10 = pnand %p1270_p2, %p1264_p5 }
  0xd0   : > { %634 = vmatpush1.bf16.msra.mxu0 %v1083_v15 }
  0xd1   : > { %635 = vmatprep.subr.bf16.mxu0 %v1084_v16 }
  0xd4   : > { %636 = vmatpush1.bf16.msra.mxu0 %v1086_v17 }
  0xd5   : > { %637 = vmatprep.subr.bf16.mxu0 %v1087_v18 }
  0xd8   : > { %638 = vmatpush1.bf16.msra.mxu0 %v1089_v19 }
  0xd9   : > { %639 = vmatprep.subr.bf16.mxu0 %v1090_v20 }
  0xdc   : > { %640 = vmatpush1.bf16.msra.mxu0 %v1092_v21 }
  0xdd   : > { %641 = vmatprep.subr.bf16.mxu0 %v1093_v22 }
  0xe0   : > { %642 = vmatpush1.bf16.msra.mxu0 %v1095_v23 }
  0xe1   : > { %643 = vmatprep.subr.bf16.mxu0 %v1096_v24 }
  0xe4   : > { %644 = vmatpush1.bf16.msra.mxu0 %v1098_v25 }
  0xe5   : > { %645 = vmatprep.subr.bf16.mxu0 %v1099_v26 }
  0xe8   : > { %646 = vmatpush1.bf16.msra.mxu0 %v1101_v27 }
  0xe9   : > { %647 = vmatprep.subr.bf16.mxu0 %v1102_v28 }
  0xec   : > { %648 = vmatpush1.bf16.msra.mxu0 %v1104_v29 }
  0xed   : > { %649 = vmatprep.subr.bf16.mxu0 %v1105_v30 }
  0xf0   : > { %650 = vmatpush1.bf16.msra.mxu0 %v1107_v31 }
  0xf1   : > { %651 = vmatprep.subr.bf16.mxu0 %v1108_v32 }
  0xf4   : > { %652 = vmatpush1.bf16.msra.mxu0 %v1110_v33 }
  0xf7   : > { %654 = vmatmul.mubr.bf16.vlgmr.msra.gmra.mrb[0].mxu0 %v926_v34 }
 0x1ca   : > { %v655_v45 = vpop.f32.mrb[0].mxu0 }
 0x1cb   : > { %v683_v47 = vmul.f32 %v676_v41, %v655_v45  ;;  %v657_v49 = vpop.f32.mrb[1].mxu0 }
 0x1cc   : > { %v684_v50 = vmul.f32 %v680_v43, %v657_v49  ;;  %v659_v52 = vpop.f32.mrb[2].mxu0 }
 0x1cd   : > { %v697_v53 = vadd.f32 %v690_v44, %v683_v47  ;;  %v660_v54 = vpop.f32.mrb[3].mxu0 }
 0x1ce   : > { %v698_v55 = vadd.f32 %v694_v46, %v684_v50 }
 0x1cf   : > { %v702_v56 = vadd.f32 %v700_v48, %v697_v53 }
 0x1d0   : > { %v703_v57 = vadd.f32 %v701_v51, %v698_v55 }
 0x1d1   : > { %v704_v58 = vmax.f32 %v702_v56, 0.0 }
 0x1d2   : > { %v705_v59 = vmax.f32 %v703_v57, 0.0 }
 0x1d4   : > { %v970_v60 = vpack.c.bf16 %v705_v59, %v704_v58 }
 0x1d6   : > { %714 = vst [vmem:[%s405_s30] sm:$0xff] %v970_v60 }
 0x1d7   : > { %1274 = shalt.err (!%p1271_p10)
}
 0x1d8   : > { %s1275_s8 = scalar_lea.hbm %s1701_s6, 128  ;;  %s1279_s10 = scalar_lea.hbm %s1754_s5, 512 }
 0x1d9   : > { %p1276_p8 = scmp.ne.s32.totalorder %s1701_s6, %s1275_s8  ;;  %p1280_p7 = scmp.lt.u32.totalorder %s1701_s6, %s1754_s5 }
 0x1da   : > { %p1281_p4 = scmp.lt.u32.totalorder %s1279_s10, %s1275_s8  ;;  %p1283_p6 = scmp.lt.u32.totalorder %s1275_s8, %s1701_s6 }
 0x1db   : > { %p1277_p9 = pnand %p1276_p8, %p1801_p3 }
 0x1dc   : > { %p1282_p1 = por %p1281_p4, %p1280_p7 }
 0x1dd   : > { %p1278_p11 = pneg %p1277_p9 }
 0x1de   : > { %p1284_p0 = por %p1283_p6, %p1282_p1 }
 0x1e0   : > { %p1285_p5 = pnand %p1284_p0, %p1278_p11 }
 0x1e2   : > { %1288 = shalt.err (!%p1285_p5)
}
 0x1e3   : > { %984 = dma.vmem_to_hbm [thread:$0]  (%p1801_p3), %s1703_s16, 128, %s1701_s6, %s716_s9  }
 0x1e4 PF: > { %p1010_p13 = scmp.ge.s32.totalorder %s1351_s23, 2  ;;  %s744_s12 = sand.u32 1, %s1331_s18  }
 0x1e5   : > { %p1802_p12 = scmp.ne.s32.totalorder %s1787_s27, 0  ;;  %s745_s25 = scalar_lea.sflag [#allocation5], %s744_s12 }
 0x1e7   : > { %p1004_p2 = pnand %p1010_p13, %p1802_p12 }
 0x1e9   : > { %1326 = dma.done.wait (!%p1004_p2), %s745_s25, 128  }
 0x1ea   : > { %1328 = vsyncadd (!%p1004_p2), %s745_s25, 4294967168  ;;  %s25_s23 = sadd.s32 1, %s1351_s23   ;;  %s1803_s26 = sld [smem:[#allocation17_spill]] }
 0x1eb   : > { %p22_p10 = scmp.ge.s32.totalorder %s25_s23, 6   ;;  %s1804_s20 = sld [smem:[#allocation20_spill]] }
 0x1ec   : > { %s1805_s21 = sld [smem:[#allocation18_spill]]  ;;  %s1806_s22 = sld [smem:[#allocation19_spill]] }
 0x1ed   : > { %s1807_s18 = smov %s1335_s19  ;;  %24 = sbr.rel (!%p22_p10) target bundleno = 13 (0xd), region = 134 }
 0x1f0   : > { %s1808_s19 = smov %s1803_s26 }
 0x1f4   :  { %750 = vsyncpa [#allocation4], 1 }
 0x1f5   :  { %752 = vsyncpa [#allocation4 + $0x1], 1 }
 0x1f6   :  { %753 = vsyncpa [#allocation7], 1 }
 0x1f7   :  { %755 = vsyncpa [#allocation7 + $0x1], 1 }
 0x1f8   :  { %756 = vsyncpa [#allocation10], 1 }
 0x1f9   :  { %758 = vsyncpa [#allocation10 + $0x1], 1 }
 0x1fa   :  { %759 = vsyncpa [#allocation5], 1 }
 0x1fb   :  { %761 = vsyncpa [#allocation5 + $0x1], 1 }

// kernel: _lambda_.49
= control target key start
LH: loop header
LB: loop body
LE: loop exit
PB: predicated region body
PF: predicated region fallthrough
CT: control target
= control target key end

     0   :  { %9 = vsyncpa [#allocation4], 0  ;;  %s1681_s0 = inlined_call_operand.hbm [shape: bf16[8,1024], index: 0, kind: input, shape index: {}]   ;;  %s1682_s1 = inlined_call_operand.hbm [shape: bf16[1024,256], index: 1, kind: input, shape index: {}]   ;;  %s1683_s2 = inlined_call_operand.hbm [shape: f32[1,256], index: 2, kind: input, shape index: {}]   ;;  %s1684_s3 = inlined_call_operand.hbm [shape: f32[1,256], index: 3, kind: input, shape index: {}]   ;;  %s1685_s4 = inlined_call_operand.hbm [shape: bf16[8,256], index: 4, kind: output, shape index: {}]  }
   0x1   :  { %10 = vsyncpa [#allocation7], 0 }
   0x2   :  { %11 = vsyncpa [#allocation10], 0 }
   0x3   :  { %12 = vsyncpa [#allocation5], 0  ;;  %s1577_s15 = smov [#allocation6]   ;;  %s1459_s19 = scalar_lea.hbm %s1682_s1, 16384 }
   0x4   :  { %s28_s16 = sshll.u32 %s1577_s15, 4  ;;  %p1460_p0 = scmp.ne.s32.totalorder %s1682_s1, %s1459_s19  ;;  %s29_s16 = int_to_ptr.vmem [resolvable:$true] %s28_s16 }
   0x5   :  { %p1463_p1 = scmp.lt.u32.totalorder %s1459_s19, %s1682_s1 }
   0x7   :  { %p1465_p2 = pnand %p1463_p1, %p1460_p0 }
   0x9   :  { %1468 = shalt.err (!%p1465_p2)
}
   0xa   :  { %s1469_s24 = scalar_lea.vmem %s29_s16, 16384  ;;  %p1474_p4 = scmp.lt.s32.totalorder %s29_s16, %s29_s16 }
   0xb   :  { %p1470_p3 = scmp.ne.s32.totalorder %s29_s16, %s1469_s24  ;;  %p1475_p5 = scmp.lt.s32.totalorder %s1469_s24, %s1469_s24 }
   0xd   :  { %p1476_p6 = por %p1475_p5, %p1474_p4 }
   0xf   :  { %p1477_p7 = pnand %p1476_p6, %p1470_p3 }
  0x11   :  { %1480 = shalt.err (!%p1477_p7)
}
  0x12   :  { %s1578_s25 = smov 128   ;;  %s1579_s26 = smov 8  }
  0x13   :  { %34 = dma.hbm_to_vmem [thread:$0]  %s1682_s1, 16384, %s29_s16, [#allocation7], %s1578_s25, %s1578_s25, %s1579_s26  }
  0x14   :  { %s1580_s29 = smov [#allocation3]   ;;  %s1581_s5 = smov [#allocation8]  }
  0x15   :  { %s19_s30 = sshll.u32 %s1580_s29, 4  ;;  %s41_s6 = sshll.u32 %s1581_s5, 4  ;;  %s20_s30 = int_to_ptr.vmem [resolvable:$true] %s19_s30  ;;  %s42_s6 = int_to_ptr.vmem [resolvable:$true] %s41_s6 }
  0x16   :  { %s1481_s9 = scalar_lea.hbm %s1681_s0, 512 }
  0x17   :  { %p1482_p8 = scmp.ne.s32.totalorder %s1681_s0, %s1481_s9  ;;  %p1485_p9 = scmp.lt.u32.totalorder %s1481_s9, %s1681_s0 }
  0x19   :  { %p1487_p10 = pnand %p1485_p9, %p1482_p8 }
  0x1b   :  { %1490 = shalt.err (!%p1487_p10)
}
  0x1c   :  { %s1491_s1 = scalar_lea.vmem %s20_s30, 512  ;;  %p1496_p12 = scmp.lt.s32.totalorder %s20_s30, %s20_s30 }
  0x1d   :  { %p1492_p11 = scmp.ne.s32.totalorder %s20_s30, %s1491_s1  ;;  %p1497_p13 = scmp.lt.s32.totalorder %s1491_s1, %s1491_s1 }
  0x1f   :  { %p1498_p0 = por %p1497_p13, %p1496_p12 }
  0x21   :  { %p1499_p1 = pnand %p1498_p0, %p1492_p11 }
  0x23   :  { %1502 = shalt.err (!%p1499_p1)
}
  0x24   :  { %22 = dma.hbm_to_vmem [thread:$0]  %s1681_s0, 512, %s20_s30, [#allocation4]  }
  0x25   :  { %s1503_s18 = scalar_lea.hbm %s1683_s2, 32 }
  0x26   :  { %p1504_p2 = scmp.ne.s32.totalorder %s1683_s2, %s1503_s18  ;;  %p1507_p3 = scmp.lt.u32.totalorder %s1503_s18, %s1683_s2 }
  0x28   :  { %p1509_p4 = pnand %p1507_p3, %p1504_p2 }
  0x2a   :  { %1512 = shalt.err (!%p1509_p4)
}
  0x2b   :  { %s1513_s23 = scalar_lea.vmem %s42_s6, 32  ;;  %p1518_p6 = scmp.lt.s32.totalorder %s42_s6, %s42_s6 }
  0x2c   :  { %p1514_p5 = scmp.ne.s32.totalorder %s42_s6, %s1513_s23  ;;  %p1519_p7 = scmp.lt.s32.totalorder %s1513_s23, %s1513_s23 }
  0x2e   :  { %p1520_p8 = por %p1519_p7, %p1518_p6 }
  0x30   :  { %p1521_p9 = pnand %p1520_p8, %p1514_p5 }
  0x32   :  { %1524 = shalt.err (!%p1521_p9)
}
  0x33   :  { %44 = dma.hbm_to_vmem [thread:$0]  %s1683_s2, 32, %s42_s6, [#allocation7]  }
  0x34   :  { %s1582_s25 = smov [#allocation9]   ;;  %s1525_s29 = scalar_lea.hbm %s1684_s3, 32 }
  0x35   :  { %s51_s26 = sshll.u32 %s1582_s25, 4  ;;  %p1526_p10 = scmp.ne.s32.totalorder %s1684_s3, %s1525_s29  ;;  %s52_s26 = int_to_ptr.vmem [resolvable:$true] %s51_s26 }
  0x36   :  { %p1529_p11 = scmp.lt.u32.totalorder %s1525_s29, %s1684_s3 }
  0x38   :  { %p1531_p12 = pnand %p1529_p11, %p1526_p10 }
  0x3a   :  { %1534 = shalt.err (!%p1531_p12)
}
  0x3b   :  { %s1535_s9 = scalar_lea.vmem %s52_s26, 32  ;;  %p1540_p0 = scmp.lt.s32.totalorder %s52_s26, %s52_s26 }
  0x3c   :  { %p1536_p13 = scmp.ne.s32.totalorder %s52_s26, %s1535_s9  ;;  %p1541_p1 = scmp.lt.s32.totalorder %s1535_s9, %s1535_s9 }
  0x3e   :  { %p1542_p2 = por %p1541_p1, %p1540_p0 }
  0x40   :  { %p1543_p3 = pnand %p1542_p2, %p1536_p13 }
  0x42   :  { %1546 = shalt.err (!%p1543_p3)
}
  0x43   :  { %54 = dma.hbm_to_vmem [thread:$0]  %s1684_s3, 32, %s52_s26, [#allocation10]  }
  0x44   :  { %1569 = dma.done.wait [#allocation4], 512  }
  0x45   :  { %1570 = vsyncadd [#allocation4], 4294966784 }
  0x46   :  { %1571 = dma.done.wait [#allocation7], 16416  }
  0x47   :  { %1572 = vsyncadd [#allocation7], 4294950880 }
  0x48   :  { %1573 = dma.done.wait [#allocation10], 32  }
  0x49   :  { %1574 = vsyncadd [#allocation10], 4294967264  ;;  %v1259_v0 = vld [vmem:[#allocation6 + $0x4] ss:$8 sps:$4 sm:$0xff]   ;;  %v1263_v2 = vld [vmem:[#allocation6] ss:$8 sps:$4 sm:$0xff]  }
  0x4a   :  { %v1261_v1 = vld [vmem:[#allocation6 + $0x204] ss:$8 sps:$4 sm:$0xff]   ;;  %875 = vmatprep.subr.bf16.mxu1 %v1259_v0  ;;  %v1264_v3 = vld [vmem:[#allocation6 + $0x200] ss:$8 sps:$4 sm:$0xff]   ;;  %v1265_v4 = vld [vmem:[#allocation6 + $0x14] ss:$8 sps:$4 sm:$0xff]  }
  0x4b   :  { %957 = vmatprep.subr.bf16.mxu0 %v1261_v1  ;;  %876 = vmatpush1.bf16.msra.mxu1 %v1263_v2  ;;  %v1267_v5 = vld [vmem:[#allocation6 + $0x214] ss:$8 sps:$4 sm:$0xff]   ;;  %v1269_v6 = vld [vmem:[#allocation6 + $0x10] ss:$8 sps:$4 sm:$0xff]   ;;  %v1271_v8 = vld [vmem:[#allocation6 + $0x24] ss:$8 sps:$4 sm:$0xff]  }
  0x4c   :  { %958 = vmatpush1.bf16.msra.mxu0 %v1264_v3  ;;  %877 = vmatprep.subr.bf16.mxu1 %v1265_v4  ;;  %v1270_v7 = vld [vmem:[#allocation6 + $0x210] ss:$8 sps:$4 sm:$0xff]   ;;  %v1273_v9 = vld [vmem:[#allocation6 + $0x224] ss:$8 sps:$4 sm:$0xff]   ;;  %v1275_v10 = vld [vmem:[#allocation6 + $0x20] ss:$8 sps:$4 sm:$0xff]  }
  0x4d   :  { %959 = vmatprep.subr.bf16.mxu0 %v1267_v5  ;;  %v1276_v11 = vld [vmem:[#allocation6 + $0x220] ss:$8 sps:$4 sm:$0xff]   ;;  %v1277_v12 = vld [vmem:[#allocation6 + $0x34] ss:$8 sps:$4 sm:$0xff]   ;;  %v1281_v14 = vld [vmem:[#allocation6 + $0x30] ss:$8 sps:$4 sm:$0xff]  }
  0x4e   :  { %v1279_v13 = vld [vmem:[#allocation6 + $0x234] ss:$8 sps:$4 sm:$0xff]   ;;  %v1282_v15 = vld [vmem:[#allocation6 + $0x230] ss:$8 sps:$4 sm:$0xff]   ;;  %v1283_v16 = vld [vmem:[#allocation6 + $0x44] ss:$8 sps:$4 sm:$0xff]  }
  0x4f   :  { %878 = vmatpush1.bf16.msra.mxu1 %v1269_v6  ;;  %v1285_v17 = vld [vmem:[#allocation6 + $0x244] ss:$8 sps:$4 sm:$0xff]   ;;  %v1287_v18 = vld [vmem:[#allocation6 + $0x40] ss:$8 sps:$4 sm:$0xff]   ;;  %v1289_v20 = vld [vmem:[#allocation6 + $0x54] ss:$8 sps:$4 sm:$0xff]  }
  0x50   :  { %960 = vmatpush1.bf16.msra.mxu0 %v1270_v7  ;;  %879 = vmatprep.subr.bf16.mxu1 %v1271_v8  ;;  %v1288_v19 = vld [vmem:[#allocation6 + $0x240] ss:$8 sps:$4 sm:$0xff]   ;;  %v1291_v21 = vld [vmem:[#allocation6 + $0x254] ss:$8 sps:$4 sm:$0xff]   ;;  %v1293_v22 = vld [vmem:[#allocation6 + $0x50] ss:$8 sps:$4 sm:$0xff]  }
  0x51   :  { %961 = vmatprep.subr.bf16.mxu0 %v1273_v9  ;;  %v1294_v23 = vld [vmem:[#allocation6 + $0x250] ss:$8 sps:$4 sm:$0xff]   ;;  %v1295_v24 = vld [vmem:[#allocation6 + $0x64] ss:$8 sps:$4 sm:$0xff]   ;;  %v1299_v26 = vld [vmem:[#allocation6 + $0x60] ss:$8 sps:$4 sm:$0xff]  }
  0x52   :  { %v1297_v25 = vld [vmem:[#allocation6 + $0x264] ss:$8 sps:$4 sm:$0xff]   ;;  %v1300_v27 = vld [vmem:[#allocation6 + $0x260] ss:$8 sps:$4 sm:$0xff]   ;;  %v1301_v28 = vld [vmem:[#allocation6 + $0x74] ss:$8 sps:$4 sm:$0xff]  }
  0x53   :  { %880 = vmatpush1.bf16.msra.mxu1 %v1275_v10  ;;  %v1303_v29 = vld [vmem:[#allocation6 + $0x274] ss:$8 sps:$4 sm:$0xff]   ;;  %v1305_v30 = vld [vmem:[#allocation6 + $0x70] ss:$8 sps:$4 sm:$0xff]   ;;  %v1307_v32 = vld [vmem:[#allocation6 + $0x84] ss:$8 sps:$4 sm:$0xff]  }
  0x54   :  { %962 = vmatpush1.bf16.msra.mxu0 %v1276_v11  ;;  %881 = vmatprep.subr.bf16.mxu1 %v1277_v12  ;;  %v1306_v31 = vld [vmem:[#allocation6 + $0x270] ss:$8 sps:$4 sm:$0xff]   ;;  %v1309_v33 = vld [vmem:[#allocation6 + $0x284] ss:$8 sps:$4 sm:$0xff]   ;;  %v1311_v34 = vld [vmem:[#allocation6 + $0x80] ss:$8 sps:$4 sm:$0xff]  }
  0x55   :  { %963 = vmatprep.subr.bf16.mxu0 %v1279_v13  ;;  %v1312_v35 = vld [vmem:[#allocation6 + $0x280] ss:$8 sps:$4 sm:$0xff]   ;;  %v1313_v36 = vld [vmem:[#allocation6 + $0x94] ss:$8 sps:$4 sm:$0xff]   ;;  %v1317_v38 = vld [vmem:[#allocation6 + $0x90] ss:$8 sps:$4 sm:$0xff]  }
  0x56   :  { %v1315_v37 = vld [vmem:[#allocation6 + $0x294] ss:$8 sps:$4 sm:$0xff]   ;;  %v1318_v39 = vld [vmem:[#allocation6 + $0x290] ss:$8 sps:$4 sm:$0xff]   ;;  %v1319_v40 = vld [vmem:[#allocation6 + $0xa4] ss:$8 sps:$4 sm:$0xff]  }
  0x57   :  { %882 = vmatpush1.bf16.msra.mxu1 %v1281_v14  ;;  %v1321_v41 = vld [vmem:[#allocation6 + $0x2a4] ss:$8 sps:$4 sm:$0xff]   ;;  %v1323_v42 = vld [vmem:[#allocation6 + $0xa0] ss:$8 sps:$4 sm:$0xff]   ;;  %v1325_v44 = vld [vmem:[#allocation6 + $0xb4] ss:$8 sps:$4 sm:$0xff]  }
  0x58   :  { %964 = vmatpush1.bf16.msra.mxu0 %v1282_v15  ;;  %883 = vmatprep.subr.bf16.mxu1 %v1283_v16  ;;  %v1324_v43 = vld [vmem:[#allocation6 + $0x2a0] ss:$8 sps:$4 sm:$0xff]   ;;  %v1327_v45 = vld [vmem:[#allocation6 + $0x2b4] ss:$8 sps:$4 sm:$0xff]   ;;  %v1329_v47 = vld [vmem:[#allocation6 + $0xb0] ss:$8 sps:$4 sm:$0xff]  }
  0x59   :  { %965 = vmatprep.subr.bf16.mxu0 %v1285_v17  ;;  %v75_v46 = vld [vmem:[#allocation3] sm:$0xff]  ;;  %v1330_v49 = vld [vmem:[#allocation6 + $0x2b0] ss:$8 sps:$4 sm:$0xff]   ;;  %v1337_v56 = vld [vmem:[#allocation6 + $0xd4] ss:$8 sps:$4 sm:$0xff]   ;;  %s1583_s3 = smov [#allocation11]  }
  0x5a   :  { %v1105_v48 = vcombine.high %v75_v46, %v75_v46  ;;  %v77_v50 = vld [vmem:[#allocation3 + $0x10] sm:$0xff]  ;;  %v1331_v51 = vld [vmem:[#allocation6 + $0xc4] ss:$8 sps:$4 sm:$0xff]   ;;  %v1335_v54 = vld [vmem:[#allocation6 + $0xc0] ss:$8 sps:$4 sm:$0xff]   ;;  %v1104_v6 = vcombine.low %v75_v46, %v75_v46  ;;  %s1093_s10 = sshll.u32 %s1583_s3, 4  ;;  %s1094_s10 = int_to_ptr.vmem [resolvable:$true] %s1093_s10 }
  0x5b   :  { %884 = vmatpush1.bf16.msra.mxu1 %v1287_v18  ;;  %v1333_v52 = vld [vmem:[#allocation6 + $0x2c4] ss:$8 sps:$4 sm:$0xff]   ;;  %v1109_v53 = vcombine.high %v77_v50, %v77_v50  ;;  %v1336_v55 = vld [vmem:[#allocation6 + $0x2c0] ss:$8 sps:$4 sm:$0xff]   ;;  %v1339_v57 = vld [vmem:[#allocation6 + $0x2d4] ss:$8 sps:$4 sm:$0xff]   ;;  %v1108_v7 = vcombine.low %v77_v50, %v77_v50  ;;  %p1552_p5 = scmp.lt.s32.totalorder %s1094_s10, %s1094_s10 }
  0x5c   :  { %966 = vmatpush1.bf16.msra.mxu0 %v1288_v19  ;;  %885 = vmatprep.subr.bf16.mxu1 %v1289_v20  ;;  %v1341_v58 = vld [vmem:[#allocation6 + $0xd0] ss:$8 sps:$4 sm:$0xff]   ;;  %v1343_v60 = vld [vmem:[#allocation6 + $0xe4] ss:$8 sps:$4 sm:$0xff]   ;;  %v1347_v62 = vld [vmem:[#allocation6 + $0xe0] ss:$8 sps:$4 sm:$0xff]  }
  0x5d   :  { %967 = vmatprep.subr.bf16.mxu0 %v1291_v21  ;;  %907 = vmatprep.mubr.bf16.mxu1 %v1105_v48  ;;  %v1342_v59 = vld [vmem:[#allocation6 + $0x2d0] ss:$8 sps:$4 sm:$0xff]   ;;  %v1345_v61 = vld [vmem:[#allocation6 + $0x2e4] ss:$8 sps:$4 sm:$0xff]   ;;  %v1348_v63 = vld [vmem:[#allocation6 + $0x2e0] ss:$8 sps:$4 sm:$0xff]  }
  0x5e   :  { %989 = vmatprep.mubr.bf16.mxu0 %v1109_v53  ;;  %v1349_v0 = vld [vmem:[#allocation6 + $0xf4] ss:$8 sps:$4 sm:$0xff]   ;;  %v1353_v2 = vld [vmem:[#allocation6 + $0xf0] ss:$8 sps:$4 sm:$0xff]   ;;  %v1359_v4 = vld [vmem:[#allocation6 + $0x104] ss:$8 sps:$4 sm:$0xff]  }
  0x5f   :  { %886 = vmatpush1.bf16.msra.mxu1 %v1293_v22  ;;  %v1351_v1 = vld [vmem:[#allocation6 + $0x2f4] ss:$8 sps:$4 sm:$0xff]   ;;  %v1354_v3 = vld [vmem:[#allocation6 + $0x2f0] ss:$8 sps:$4 sm:$0xff]   ;;  %v1364_v5 = vld [vmem:[#allocation6 + $0x304] ss:$8 sps:$4 sm:$0xff]  }
  0x60   :  { %968 = vmatpush1.bf16.msra.mxu0 %v1294_v23  ;;  %887 = vmatprep.subr.bf16.mxu1 %v1295_v24  ;;  %v1357_v8 = vld [vmem:[#allocation6 + $0x100] ss:$8 sps:$4 sm:$0xff]   ;;  %v1367_v10 = vld [vmem:[#allocation6 + $0x114] ss:$8 sps:$4 sm:$0xff]   ;;  %v1365_v12 = vld [vmem:[#allocation6 + $0x110] ss:$8 sps:$4 sm:$0xff]  }
  0x61   :  { %969 = vmatprep.subr.bf16.mxu0 %v1297_v25  ;;  %v1362_v9 = vld [vmem:[#allocation6 + $0x300] ss:$8 sps:$4 sm:$0xff]   ;;  %v1370_v11 = vld [vmem:[#allocation6 + $0x314] ss:$8 sps:$4 sm:$0xff]   ;;  %v1368_v13 = vld [vmem:[#allocation6 + $0x310] ss:$8 sps:$4 sm:$0xff]  }
  0x62   :  { %v1373_v14 = vld [vmem:[#allocation6 + $0x124] ss:$8 sps:$4 sm:$0xff]   ;;  %v1371_v16 = vld [vmem:[#allocation6 + $0x120] ss:$8 sps:$4 sm:$0xff]   ;;  %v1379_v18 = vld [vmem:[#allocation6 + $0x134] ss:$8 sps:$4 sm:$0xff]  }
  0x63   :  { %888 = vmatpush1.bf16.msra.mxu1 %v1299_v26  ;;  %v1376_v15 = vld [vmem:[#allocation6 + $0x324] ss:$8 sps:$4 sm:$0xff]   ;;  %v1374_v17 = vld [vmem:[#allocation6 + $0x320] ss:$8 sps:$4 sm:$0xff]   ;;  %v1382_v19 = vld [vmem:[#allocation6 + $0x334] ss:$8 sps:$4 sm:$0xff]  }
  0x64   :  { %970 = vmatpush1.bf16.msra.mxu0 %v1300_v27  ;;  %889 = vmatprep.subr.bf16.mxu1 %v1301_v28  ;;  %v1377_v20 = vld [vmem:[#allocation6 + $0x130] ss:$8 sps:$4 sm:$0xff]   ;;  %v1385_v22 = vld [vmem:[#allocation6 + $0x144] ss:$8 sps:$4 sm:$0xff]   ;;  %v1383_v24 = vld [vmem:[#allocation6 + $0x140] ss:$8 sps:$4 sm:$0xff]  }
  0x65   :  { %971 = vmatprep.subr.bf16.mxu0 %v1303_v29  ;;  %v1380_v21 = vld [vmem:[#allocation6 + $0x330] ss:$8 sps:$4 sm:$0xff]   ;;  %v1388_v23 = vld [vmem:[#allocation6 + $0x344] ss:$8 sps:$4 sm:$0xff]   ;;  %v1386_v25 = vld [vmem:[#allocation6 + $0x340] ss:$8 sps:$4 sm:$0xff]  }
  0x66   :  { %v1391_v26 = vld [vmem:[#allocation6 + $0x154] ss:$8 sps:$4 sm:$0xff]   ;;  %v1389_v28 = vld [vmem:[#allocation6 + $0x150] ss:$8 sps:$4 sm:$0xff]   ;;  %v1421_v50 = vld [vmem:[#allocation6 + $0x1a4] ss:$8 sps:$4 sm:$0xff]  }
  0x67   :  { %890 = vmatpush1.bf16.msra.mxu1 %v1305_v30  ;;  %v1394_v27 = vld [vmem:[#allocation6 + $0x354] ss:$8 sps:$4 sm:$0xff]   ;;  %v1392_v29 = vld [vmem:[#allocation6 + $0x350] ss:$8 sps:$4 sm:$0xff]   ;;  %v1397_v30 = vld [vmem:[#allocation6 + $0x164] ss:$8 sps:$4 sm:$0xff]  }
  0x68   :  { %972 = vmatpush1.bf16.msra.mxu0 %v1306_v31  ;;  %891 = vmatprep.subr.bf16.mxu1 %v1307_v32  ;;  %v1400_v31 = vld [vmem:[#allocation6 + $0x364] ss:$8 sps:$4 sm:$0xff]   ;;  %v1415_v46 = vld [vmem:[#allocation6 + $0x194] ss:$8 sps:$4 sm:$0xff]   ;;  %v1413_v48 = vld [vmem:[#allocation6 + $0x190] ss:$8 sps:$4 sm:$0xff]  }
  0x69   :  { %973 = vmatprep.subr.bf16.mxu0 %v1309_v33  ;;  %v1657_v32 = vld [vmem:[#allocation3 + $0x8] sm:$0xff]  ;;  %v1659_v33 = vld [vmem:[#allocation3 + $0x18] sm:$0xff]  ;;  %s1547_s11 = scalar_lea.vmem %s1094_s10, 128 }
  0x6a   :  { %v1422_v53 = vld [vmem:[#allocation6 + $0x3a0] ss:$8 sps:$4 sm:$0xff]   ;;  %p1548_p4 = scmp.ne.s32.totalorder %s1094_s10, %s1547_s11  ;;  %p1553_p6 = scmp.lt.s32.totalorder %s1547_s11, %s1547_s11 }
  0x6b   :  { %892 = vmatpush1.bf16.msra.mxu1 %v1311_v34  ;;  %v1107_v34 = vcombine.high %v1657_v32, %v1657_v32 }
  0x6c   :  { %974 = vmatpush1.bf16.msra.mxu0 %v1312_v35  ;;  %893 = vmatprep.subr.bf16.mxu1 %v1313_v36  ;;  %v1111_v35 = vcombine.high %v1659_v33, %v1659_v33  ;;  %v1395_v36 = vld [vmem:[#allocation6 + $0x160] ss:$8 sps:$4 sm:$0xff]   ;;  %p1554_p7 = por %p1553_p6, %p1552_p5 }
  0x6d   :  { %975 = vmatprep.subr.bf16.mxu0 %v1315_v37  ;;  %v1398_v37 = vld [vmem:[#allocation6 + $0x360] ss:$8 sps:$4 sm:$0xff]  }
  0x6e   :  { %p1555_p8 = pnand %p1554_p7, %p1548_p4 }
  0x6f   :  { %894 = vmatpush1.bf16.msra.mxu1 %v1317_v38  ;;  %v1403_v38 = vld [vmem:[#allocation6 + $0x174] ss:$8 sps:$4 sm:$0xff]  }
  0x70   :  { %976 = vmatpush1.bf16.msra.mxu0 %v1318_v39  ;;  %895 = vmatprep.subr.bf16.mxu1 %v1319_v40  ;;  %v1406_v39 = vld [vmem:[#allocation6 + $0x374] ss:$8 sps:$4 sm:$0xff]   ;;  %v1401_v40 = vld [vmem:[#allocation6 + $0x170] ss:$8 sps:$4 sm:$0xff]  }
  0x71   :  { %977 = vmatprep.subr.bf16.mxu0 %v1321_v41  ;;  %v1404_v41 = vld [vmem:[#allocation6 + $0x370] ss:$8 sps:$4 sm:$0xff]  }
  0x73   :  { %896 = vmatpush1.bf16.msra.mxu1 %v1323_v42  ;;  %v1409_v42 = vld [vmem:[#allocation6 + $0x184] ss:$8 sps:$4 sm:$0xff]  }
  0x74   :  { %978 = vmatpush1.bf16.msra.mxu0 %v1324_v43  ;;  %897 = vmatprep.subr.bf16.mxu1 %v1325_v44  ;;  %v1412_v43 = vld [vmem:[#allocation6 + $0x384] ss:$8 sps:$4 sm:$0xff]   ;;  %v1407_v44 = vld [vmem:[#allocation6 + $0x180] ss:$8 sps:$4 sm:$0xff]  }
  0x75   :  { %979 = vmatprep.subr.bf16.mxu0 %v1327_v45  ;;  %v1410_v45 = vld [vmem:[#allocation6 + $0x380] ss:$8 sps:$4 sm:$0xff]  }
  0x77   :  { %898 = vmatpush1.bf16.msra.mxu1 %v1329_v47  ;;  %v1418_v47 = vld [vmem:[#allocation6 + $0x394] ss:$8 sps:$4 sm:$0xff]  }
  0x78   :  { %980 = vmatpush1.bf16.msra.mxu0 %v1330_v49  ;;  %899 = vmatprep.subr.bf16.mxu1 %v1331_v51  ;;  %v1416_v49 = vld [vmem:[#allocation6 + $0x390] ss:$8 sps:$4 sm:$0xff]   ;;  %v1424_v51 = vld [vmem:[#allocation6 + $0x3a4] ss:$8 sps:$4 sm:$0xff]  }
  0x79   :  { %981 = vmatprep.subr.bf16.mxu0 %v1333_v52  ;;  %v1419_v52 = vld [vmem:[#allocation6 + $0x1a0] ss:$8 sps:$4 sm:$0xff]  }
  0x7b   :  { %900 = vmatpush1.bf16.msra.mxu1 %v1335_v54  ;;  %v1427_v54 = vld [vmem:[#allocation6 + $0x1b4] ss:$8 sps:$4 sm:$0xff]  }
  0x7c   :  { %982 = vmatpush1.bf16.msra.mxu0 %v1336_v55  ;;  %901 = vmatprep.subr.bf16.mxu1 %v1337_v56  ;;  %v1430_v55 = vld [vmem:[#allocation6 + $0x3b4] ss:$8 sps:$4 sm:$0xff]   ;;  %v1425_v56 = vld [vmem:[#allocation6 + $0x1b0] ss:$8 sps:$4 sm:$0xff]  }
  0x7d   :  { %983 = vmatprep.subr.bf16.mxu0 %v1339_v57  ;;  %v1428_v57 = vld [vmem:[#allocation6 + $0x3b0] ss:$8 sps:$4 sm:$0xff]  }
  0x7f   :  { %902 = vmatpush1.bf16.msra.mxu1 %v1341_v58  ;;  %v1433_v58 = vld [vmem:[#allocation6 + $0x1c4] ss:$8 sps:$4 sm:$0xff]  }
  0x80   :  { %984 = vmatpush1.bf16.msra.mxu0 %v1342_v59  ;;  %903 = vmatprep.subr.bf16.mxu1 %v1343_v60  ;;  %v1436_v59 = vld [vmem:[#allocation6 + $0x3c4] ss:$8 sps:$4 sm:$0xff]   ;;  %v1431_v60 = vld [vmem:[#allocation6 + $0x1c0] ss:$8 sps:$4 sm:$0xff]  }
  0x81   :  { %985 = vmatprep.subr.bf16.mxu0 %v1345_v61  ;;  %v1434_v61 = vld [vmem:[#allocation6 + $0x3c0] ss:$8 sps:$4 sm:$0xff]  }
  0x83   :  { %904 = vmatpush1.bf16.msra.mxu1 %v1347_v62  ;;  %v1439_v62 = vld [vmem:[#allocation6 + $0x1d4] ss:$8 sps:$4 sm:$0xff]  }
  0x84   :  { %986 = vmatpush1.bf16.msra.mxu0 %v1348_v63  ;;  %905 = vmatprep.subr.bf16.mxu1 %v1349_v0  ;;  %v1442_v63 = vld [vmem:[#allocation6 + $0x3d4] ss:$8 sps:$4 sm:$0xff]   ;;  %v1437_v0 = vld [vmem:[#allocation6 + $0x1d0] ss:$8 sps:$4 sm:$0xff]  }
  0x85   :  { %987 = vmatprep.subr.bf16.mxu0 %v1351_v1  ;;  %v1440_v1 = vld [vmem:[#allocation6 + $0x3d0] ss:$8 sps:$4 sm:$0xff]  }
  0x87   :  { %906 = vmatpush1.bf16.msra.mxu1 %v1353_v2  ;;  %v1445_v2 = vld [vmem:[#allocation6 + $0x1e4] ss:$8 sps:$4 sm:$0xff]  }
  0x88   :  { %988 = vmatpush1.bf16.msra.mxu0 %v1354_v3  ;;  %916 = vmatprep.subr.bf16.mxu1 %v1359_v4  ;;  %v1448_v3 = vld [vmem:[#allocation6 + $0x3e4] ss:$8 sps:$4 sm:$0xff]   ;;  %v1443_v4 = vld [vmem:[#allocation6 + $0x1e0] ss:$8 sps:$4 sm:$0xff]  }
  0x89   :  { %998 = vmatprep.subr.bf16.mxu0 %v1364_v5  ;;  %v1446_v5 = vld [vmem:[#allocation6 + $0x3e0] ss:$8 sps:$4 sm:$0xff]  }
  0x8a   :  { %908 = vmatmul.mubr.bf16.vlgmr.msra.gmra.mrb[0].mxu1 %v1104_v6  ;;  %v1451_v6 = vld [vmem:[#allocation6 + $0x1f4] ss:$8 sps:$4 sm:$0xff]  }
  0x8b   :  { %990 = vmatmul.mubr.bf16.vlgmr.msra.gmra.mrb[0].mxu0 %v1108_v7  ;;  %917 = vmatpush1.bf16.msra.mxu1 %v1357_v8  ;;  %v1454_v7 = vld [vmem:[#allocation6 + $0x3f4] ss:$8 sps:$4 sm:$0xff]   ;;  %v1449_v8 = vld [vmem:[#allocation6 + $0x1f0] ss:$8 sps:$4 sm:$0xff]  }
  0x8c   :  { %999 = vmatpush1.bf16.msra.mxu0 %v1362_v9  ;;  %918 = vmatprep.subr.bf16.mxu1 %v1367_v10  ;;  %v1452_v9 = vld [vmem:[#allocation6 + $0x3f0] ss:$8 sps:$4 sm:$0xff]   ;;  %v1106_v10 = vcombine.low %v1657_v32, %v1657_v32 }
  0x8d   :  { %1000 = vmatprep.subr.bf16.mxu0 %v1370_v11  ;;  %948 = vmatprep.mubr.bf16.mxu1 %v1107_v34  ;;  %v1110_v11 = vcombine.low %v1659_v33, %v1659_v33 }
  0x8e   :  { %1030 = vmatprep.mubr.bf16.mxu0 %v1111_v35 }
  0x8f   :  { %919 = vmatpush1.bf16.msra.mxu1 %v1365_v12  ;;  %v1050_v12 = vlaneseq }
  0x90   :  { %1001 = vmatpush1.bf16.msra.mxu0 %v1368_v13  ;;  %920 = vmatprep.subr.bf16.mxu1 %v1373_v14 }
  0x91   :  { %1002 = vmatprep.subr.bf16.mxu0 %v1376_v15  ;;  %v1051_v13 = vshrl.u32 %v1050_v12, 7  ;;  %v1048_v15 = vld [vmem:[#allocation8] sm:$0x3] }
  0x93   :  { %921 = vmatpush1.bf16.msra.mxu1 %v1371_v16  ;;  %v1052_v14 = vsub.s32 0, %v1051_v13  ;;  %v1056_v16 = vsub.s32 1, %v1051_v13 }
  0x94   :  { %1003 = vmatpush1.bf16.msra.mxu0 %v1374_v17  ;;  %922 = vmatprep.subr.bf16.mxu1 %v1379_v18  ;;  %v1062_v17 = vld [vmem:[#allocation9] sm:$0x3] }
  0x95   :  { %1004 = vmatprep.subr.bf16.mxu0 %v1382_v19  ;;  %v1053_v18 = vrot.slane %v1048_v15, %v1052_v14 }
  0x97   :  { %923 = vmatpush1.bf16.msra.mxu1 %v1377_v20 }
  0x98   :  { %1005 = vmatpush1.bf16.msra.mxu0 %v1380_v21  ;;  %924 = vmatprep.subr.bf16.mxu1 %v1385_v22  ;;  %v1057_v21 = vrot.slane %v1048_v15, %v1056_v16 }
  0x99   :  { %1006 = vmatprep.subr.bf16.mxu0 %v1388_v23  ;;  %v1067_v23 = vrot.slane %v1062_v17, %v1052_v14 }
  0x9b   :  { %925 = vmatpush1.bf16.msra.mxu1 %v1383_v24 }
  0x9c   :  { %1007 = vmatpush1.bf16.msra.mxu0 %v1386_v25  ;;  %926 = vmatprep.subr.bf16.mxu1 %v1391_v26 }
  0x9d   :  { %1008 = vmatprep.subr.bf16.mxu0 %v1394_v27  ;;  %v1071_v27 = vrot.slane %v1062_v17, %v1056_v16 }
  0x9f   :  { %927 = vmatpush1.bf16.msra.mxu1 %v1389_v28 }
  0xa0   :  { %1009 = vmatpush1.bf16.msra.mxu0 %v1392_v29  ;;  %928 = vmatprep.subr.bf16.mxu1 %v1397_v30 }
  0xa1   :  { %1010 = vmatprep.subr.bf16.mxu0 %v1400_v31 }
  0xa3   :  { %929 = vmatpush1.bf16.msra.mxu1 %v1395_v36 }
  0xa4   :  { %1011 = vmatpush1.bf16.msra.mxu0 %v1398_v37  ;;  %930 = vmatprep.subr.bf16.mxu1 %v1403_v38 }
  0xa5   :  { %1012 = vmatprep.subr.bf16.mxu0 %v1406_v39 }
  0xa7   :  { %931 = vmatpush1.bf16.msra.mxu1 %v1401_v40 }
  0xa8   :  { %1013 = vmatpush1.bf16.msra.mxu0 %v1404_v41  ;;  %932 = vmatprep.subr.bf16.mxu1 %v1409_v42 }
  0xa9   :  { %1014 = vmatprep.subr.bf16.mxu0 %v1412_v43 }
  0xab   :  { %933 = vmatpush1.bf16.msra.mxu1 %v1407_v44 }
  0xac   :  { %1015 = vmatpush1.bf16.msra.mxu0 %v1410_v45  ;;  %934 = vmatprep.subr.bf16.mxu1 %v1415_v46 }
  0xad   :  { %1016 = vmatprep.subr.bf16.mxu0 %v1418_v47 }
  0xaf   :  { %935 = vmatpush1.bf16.msra.mxu1 %v1413_v48 }
  0xb0   :  { %1017 = vmatpush1.bf16.msra.mxu0 %v1416_v49  ;;  %936 = vmatprep.subr.bf16.mxu1 %v1421_v50 }
  0xb1   :  { %1018 = vmatprep.subr.bf16.mxu0 %v1424_v51 }
  0xb3   :  { %937 = vmatpush1.bf16.msra.mxu1 %v1419_v52 }
  0xb4   :  { %1019 = vmatpush1.bf16.msra.mxu0 %v1422_v53  ;;  %938 = vmatprep.subr.bf16.mxu1 %v1427_v54 }
  0xb5   :  { %1020 = vmatprep.subr.bf16.mxu0 %v1430_v55 }
  0xb7   :  { %939 = vmatpush1.bf16.msra.mxu1 %v1425_v56 }
  0xb8   :  { %1021 = vmatpush1.bf16.msra.mxu0 %v1428_v57  ;;  %940 = vmatprep.subr.bf16.mxu1 %v1433_v58 }
  0xb9   :  { %1022 = vmatprep.subr.bf16.mxu0 %v1436_v59 }
  0xbb   :  { %941 = vmatpush1.bf16.msra.mxu1 %v1431_v60 }
  0xbc   :  { %1023 = vmatpush1.bf16.msra.mxu0 %v1434_v61  ;;  %942 = vmatprep.subr.bf16.mxu1 %v1439_v62 }
  0xbd   :  { %1024 = vmatprep.subr.bf16.mxu0 %v1442_v63 }
  0xbf   :  { %943 = vmatpush1.bf16.msra.mxu1 %v1437_v0 }
  0xc0   :  { %1025 = vmatpush1.bf16.msra.mxu0 %v1440_v1  ;;  %944 = vmatprep.subr.bf16.mxu1 %v1445_v2 }
  0xc1   :  { %1026 = vmatprep.subr.bf16.mxu0 %v1448_v3 }
  0xc3   :  { %945 = vmatpush1.bf16.msra.mxu1 %v1443_v4 }
  0xc4   :  { %1027 = vmatpush1.bf16.msra.mxu0 %v1446_v5  ;;  %946 = vmatprep.subr.bf16.mxu1 %v1451_v6 }
  0xc5   :  { %1028 = vmatprep.subr.bf16.mxu0 %v1454_v7 }
  0xc7   :  { %947 = vmatpush1.bf16.msra.mxu1 %v1449_v8 }
  0xc8   :  { %1029 = vmatpush1.bf16.msra.mxu0 %v1452_v9 }
  0xca   :  { %949 = vmatmul.mubr.bf16.vlgmr.msra.gmra.mrb[0].mxu1 %v1106_v10 }
  0xcb   :  { %1031 = vmatmul.mubr.bf16.vlgmr.msra.gmra.mrb[0].mxu0 %v1110_v11 }
 0x19d   :  { %v950_v19 = vpop.f32.mrb[0].mxu1 }
 0x19e   :  { %v1032_v20 = vpop.f32.mrb[0].mxu0  ;;  %v952_v24 = vpop.f32.mrb[1].mxu1 }
 0x19f   :  { %v1242_v22 = vadd.f32 %v1032_v20, %v950_v19  ;;  %v1034_v25 = vpop.f32.mrb[1].mxu0  ;;  %v954_v28 = vpop.f32.mrb[2].mxu1 }
 0x1a0   :  { %v1243_v26 = vadd.f32 %v1034_v25, %v952_v24  ;;  %v1036_v29 = vpop.f32.mrb[2].mxu0  ;;  %v955_v31 = vpop.f32.mrb[3].mxu1 }
 0x1a1   :  { %v1060_v30 = vmul.f32 %v1242_v22, %v1053_v18  ;;  %v1037_v32 = vpop.f32.mrb[3].mxu0 }
 0x1a2   :  { %v1061_v33 = vmul.f32 %v1243_v26, %v1057_v21 }
 0x1a3   :  { %v1074_v34 = vadd.f32 %v1067_v23, %v1060_v30 }
 0x1a4   :  { %v1075_v35 = vadd.f32 %v1071_v27, %v1061_v33 }
 0x1a5   :  { %v1076_v36 = vmax.f32 %v1074_v34, 0.0 }
 0x1a6   :  { %v1077_v37 = vmax.f32 %v1075_v35, 0.0 }
 0x1a8   :  { %v1241_v38 = vpack.c.bf16 %v1077_v37, %v1076_v36 }
 0x1aa   :  { %1086 = vst [vmem:[#allocation11] sm:$0xff] %v1241_v38 }
 0x1ab   :  { %1558 = shalt.err (!%p1555_p8)
}
 0x1ac   :  { %s1559_s1 = scalar_lea.hbm %s1685_s4, 128 }
 0x1ad   :  { %p1560_p9 = scmp.ne.s32.totalorder %s1685_s4, %s1559_s1  ;;  %p1563_p10 = scmp.lt.u32.totalorder %s1559_s1, %s1685_s4 }
 0x1af   :  { %p1565_p11 = pnand %p1563_p10, %p1560_p9 }
 0x1b1   :  { %1568 = shalt.err (!%p1565_p11)
}
 0x1b2   :  { %1096 = dma.vmem_to_hbm [thread:$0]  %s1094_s10, 128, %s1685_s4, [#allocation5]  }
 0x1b3   :  { %1575 = dma.done.wait [#allocation5], 128  }
 0x1b4   :  { %1576 = vsyncadd [#allocation5], 4294967168 }
 0x1b5   :  { %1100 = vsyncpa [#allocation4], 1 }
 0x1b6   :  { %1101 = vsyncpa [#allocation7], 1 }
 0x1b7   :  { %1102 = vsyncpa [#allocation10], 1 }
 0x1b8   :  { %1103 = vsyncpa [#allocation5], 1 }

</bundles_post_ra>
